<compile_context>
chip_gen: v5e
topology: v5e:2x2
jax: 0.10.0
libtpu: 0.0.40
codegen_flags: <defaults>
</compile_context>

<pallas_src>
import numpy as np
import jax
import jax.numpy as jnp
from jax.experimental import pallas as pl
from jax.experimental.pallas import tpu as pltpu


# ----------------------------------------------------------------------------
# Fused kernel
# ----------------------------------------------------------------------------
def _shift_up(v, k):
    """out[r] = v[r + k], zero-filled at the bottom (static k)."""
    if k == 0:
        return v
    zeros = jnp.zeros((k,) + v.shape[1:], v.dtype)
    return jnp.concatenate([v[k:], zeros], axis=0)


def _shift_down(v, k):
    """out[r] = v[r - k], zero-filled at the top (static k)."""
    if k == 0:
        return v
    zeros = jnp.zeros((k,) + v.shape[1:], v.dtype)
    return jnp.concatenate([zeros, v[:-k]], axis=0)


def _cnn_kernel(x_ref, wb1_ref, b1t_ref, wb2_ref, b2t_ref, fcw_ref, fcb_ref,
                o_ref):
    # x_ref:   (nb*32, 28)    32-row block per sample; image at offsets 1..28,
    #                         zeros at 0 and 29..31 (= conv1 y-padding).
    # wb1_ref: (3, 28, 448)   conv1 band weights, col = x*16 + c       (f32)
    # wb2_ref: (3, 432, 448)  conv2 band weights, row = 32*xo + ci,
    #                         col = x2*32 + co                         (bf16)
    # fcw_ref: (7, 416, 128)  FC weights per pooled output row yq      (bf16)
    # o_ref:   (nb, 128)      logits padded to 128 lanes (cols 0..9 valid)
    f32 = jnp.float32
    bf16 = jnp.bfloat16
    m = x_ref.shape[0]          # nb * 32
    nb = m // 32

    # ---- conv1 (1->16, 3x3, pad=1): banded matmul over the width dim -------
    # h1[n*32+y, x*16+c] = sum_ky sum_j xin[n*32+y+ky, j] * wb1[ky, j, x*16+c]
    xin = x_ref[...]                                              # (m, 28)
    h1 = jnp.dot(xin, wb1_ref[0], preferred_element_type=f32)
    h1 = h1 + jnp.dot(_shift_up(xin, 1), wb1_ref[1], preferred_element_type=f32)
    h1 = h1 + jnp.dot(_shift_up(xin, 2), wb1_ref[2], preferred_element_type=f32)
    h1 = jnp.maximum(h1 + b1t_ref[...], 0.0)                      # (m, 448)

    # ---- 2x2 max-pool #1 (kept sparse: valid at even rows / even x) --------
    hx = jnp.maximum(h1[:, 0:432], h1[:, 16:448])                  # x pairs
    hp = jnp.maximum(hx, _shift_up(hx, 1))                         # y pairs
    row = jax.lax.broadcasted_iota(jnp.int32, (m, 1), 0) & 31
    hp = jnp.where(row < 28, hp, 0.0).astype(bf16)                 # zero y-pad

    # ---- conv2 (16->32, 3x3, pad=1): banded bf16 matmul ---------------------
    # Valid output rows are the even in-block offsets 0..26 (y2 = offset / 2).
    h2 = jnp.dot(_shift_down(hp, 2), wb2_ref[0], preferred_element_type=f32)
    h2 = h2 + jnp.dot(hp, wb2_ref[1], preferred_element_type=f32)
    h2 = h2 + jnp.dot(_shift_up(hp, 2), wb2_ref[2], preferred_element_type=f32)
    h2 = jnp.maximum(h2 + b2t_ref[...], 0.0)                       # (m, 448)

    # ---- 2x2 max-pool #2: x here, y fused into the FC loop below -----------
    g = jnp.maximum(h2[:, 0:416], h2[:, 32:448])                   # (m, 416)
    g3 = g.reshape(nb, 32, 416)                                    # aligned split

    # ---- linear(1568 -> 10): 7 accumulating matmuls (one per pooled row) ---
    # fcw_ref[yq] already folds the pool-2 column selection, the PyTorch
    # (C,H,W) flatten permutation and the 10 -> 128 lane padding.
    acc = jnp.zeros((nb, 128), f32)
    for yq in range(7):
        gy = jnp.maximum(g3[:, 4 * yq, :], g3[:, 4 * yq + 2, :]).astype(bf16)
        acc = acc + jnp.dot(gy, fcw_ref[yq], preferred_element_type=f32)
    o_ref[...] = acc + fcb_ref[...]


def cnn_pallas(x_rows, packed, nb, npad):
    grid = (npad // nb,)
    return pl.pallas_call(
        _cnn_kernel,
        out_shape=jax.ShapeDtypeStruct((npad, 128), jnp.float32),
        grid_spec=pltpu.PrefetchScalarGridSpec(
            num_scalar_prefetch=0,
            grid=grid,
            in_specs=[
                pl.BlockSpec((nb * 32, 28), lambda i: (i, 0)),      # input rows
                pl.BlockSpec((3, 28, 448), lambda i: (0, 0, 0)),    # conv1 band
                pl.BlockSpec((1, 448), lambda i: (0, 0)),           # b1 tiled
                pl.BlockSpec((3, 432, 448), lambda i: (0, 0, 0)),   # conv2 band
                pl.BlockSpec((1, 448), lambda i: (0, 0)),           # b2 tiled
                pl.BlockSpec((7, 416, 128), lambda i: (0, 0, 0)),   # fc weights
                pl.BlockSpec((1, 128), lambda i: (0, 0)),           # fc bias
            ],
            out_specs=pl.BlockSpec((nb, 128), lambda i: (i, 0)),
        ),
        compiler_params=pltpu.CompilerParams(
            dimension_semantics=("parallel",),
            vmem_limit_bytes=64 * 1024 * 1024,
        ),
    )(x_rows, packed["wb1"], packed["b1t"], packed["wb2"], packed["b2t"],
      packed["fcw"], packed["fcb"])


# ----------------------------------------------------------------------------
# Forward pass + parameter packing (PyTorch layouts -> band layouts, once).
# ----------------------------------------------------------------------------
def pack_params(p):
    """Pack PyTorch-layout params into the banded layouts the kernel expects."""
    w1 = np.asarray(p["w1"], np.float32)    # (16, 1, 3, 3)  OIHW
    b1 = np.asarray(p["b1"], np.float32)    # (16,)
    w2 = np.asarray(p["w2"], np.float32)    # (32, 16, 3, 3)
    b2 = np.asarray(p["b2"], np.float32)    # (32,)
    fw = np.asarray(p["fc_w"], np.float32)  # (10, 1568)
    fb = np.asarray(p["fc_b"], np.float32)  # (10,)

    # conv1 band: wb1[ky, j, x*16+c] = w1[c, 0, ky, j-x+1]  (x-padding folded in)
    wb1 = np.zeros((3, 28, 448), np.float32)
    for ky in range(3):
        for x in range(28):
            for kx in range(3):
                j = x + kx - 1
                if 0 <= j < 28:
                    wb1[ky, j, x * 16:(x + 1) * 16] = w1[:, 0, ky, kx]
    b1t = np.tile(b1, 28).reshape(1, 448)

    # conv2 band: wb2[ky, 32*xo+ci, x2*32+co] = w2[co, ci, ky, xo-x2+1]
    # (rows 32*xo+16..32*xo+31 stay zero -> they mask the sparse pool-1 layout)
    wb2 = np.zeros((3, 432, 448), np.float32)
    for ky in range(3):
        for x2 in range(14):
            for kx in range(3):
                xo = x2 + kx - 1
                if 0 <= xo < 14:
                    wb2[ky, 32 * xo:32 * xo + 16, x2 * 32:(x2 + 1) * 32] = \
                        w2[:, :, ky, kx].T
    b2t = np.tile(b2, 14).reshape(1, 448)

    # FC: fcw[yq, 64*xq+co, k] = fc_w[k, co*49 + yq*7 + xq]  ((C,H,W) flatten
    # order folded in; rows 64*xq+32..63 and cols 10..127 stay zero).
    fcw = np.zeros((7, 416, 128), np.float32)
    for yq in range(7):
        for xq in range(7):
            for co in range(32):
                fcw[yq, 64 * xq + co, :10] = fw[:, co * 49 + yq * 7 + xq]
    fcb = np.zeros((1, 128), np.float32)
    fcb[0, :10] = fb

    return {
        "wb1": jnp.asarray(wb1, jnp.float32),
        "b1t": jnp.asarray(b1t, jnp.float32),
        "wb2": jnp.asarray(wb2, jnp.bfloat16),
        "b2t": jnp.asarray(b2t, jnp.float32),
        "fcw": jnp.asarray(fcw, jnp.bfloat16),
        "fcb": jnp.asarray(fcb, jnp.float32),
    }


def cnn_forward(x_nchw, packed, nb=32):
    # Mirrors CNN.forward: from_numpy(...).to(float32) -> conv1 -> conv2
    # -> view(N, -1) -> linear.
    x = jnp.asarray(x_nchw, jnp.float32).reshape(-1, 28, 28)
    n = x.shape[0]
    nb = min(nb, n)
    npad = -(-n // nb) * nb
    if npad != n:                                   # pad batch instead of nb=1
        x = jnp.pad(x, ((0, npad - n), (0, 0), (0, 0)))
    # 32-row block per sample: row 0 and rows 29..31 carry the conv1 y-padding.
    x_rows = jnp.pad(x, ((0, 0), (1, 3), (0, 0))).reshape(npad * 32, 28)
    out = cnn_pallas(x_rows, packed, nb, npad)
    return out[:n, :10]


def init_params(key):
    """Deterministic params in the PyTorch layouts."""
    k1, k2, k3, k4, k5, k6 = jax.random.split(key, 6)
    return {
        "w1": jax.random.normal(k1, (16, 1, 3, 3), jnp.float32) * 0.1,
        "b1": jax.random.normal(k2, (16,), jnp.float32) * 0.1,
        "w2": jax.random.normal(k3, (32, 16, 3, 3), jnp.float32) * 0.05,
        "b2": jax.random.normal(k4, (32,), jnp.float32) * 0.05,
        "fc_w": jax.random.normal(k5, (10, 32 * 7 * 7), jnp.float32) * 0.02,
        "fc_b": jax.random.normal(k6, (10,), jnp.float32) * 0.02,
    }


def reference_forward(x_nchw, p):
    """Pure-JAX reference with PyTorch semantics (NCHW, (C,H,W) flatten)."""
    x = jnp.asarray(x_nchw, jnp.float32)

    def block(h, w, b):
        y = jax.lax.conv_general_dilated(
            h, w, window_strides=(1, 1), padding=((1, 1), (1, 1)),
            dimension_numbers=("NCHW", "OIHW", "NCHW"),
            precision=jax.lax.Precision.HIGHEST)
        y = jnp.maximum(y + b[None, :, None, None], 0.0)
        y = jnp.maximum(y[:, :, 0::2, :], y[:, :, 1::2, :])   # pool H
        y = jnp.maximum(y[:, :, :, 0::2], y[:, :, :, 1::2])   # pool W
        return y

    h = block(x, p["w1"], p["b1"])
    h = block(h, p["w2"], p["b2"])
    flat = h.reshape(h.shape[0], -1)
    return jnp.dot(flat, p["fc_w"].T, precision=jax.lax.Precision.HIGHEST) + p["fc_b"]


if __name__ == "__main__":
    key = jax.random.PRNGKey(0)
    kx, kp = jax.random.split(key)
    # Input matches the PyTorch module: MNIST-shaped NCHW batch.
    x = jax.random.normal(kx, (2, 1, 28, 28), jnp.float32)
    torch_params = init_params(kp)
    packed = pack_params(torch_params)

    out = jax.jit(cnn_forward)(x, packed)
    out = jax.block_until_ready(out)
    assert out.shape == (2, 10) and out.dtype == jnp.float32

    # Sanity check against a pure-JAX reference of the PyTorch model.
    ref = reference_forward(x, torch_params)
    err = float(jnp.max(jnp.abs(out - ref)))
    scale = float(jnp.max(jnp.abs(ref))) + 1.0
    assert err <= 5e-2 * scale, f"mismatch: max|diff|={err}, scale={scale}"

    print("KERNEL_OK")
</pallas_src>

<mosaic_0001>
module attributes {stable_mosaic.version = 11 : i64} {
  func.func @_cnn_kernel(%arg0: i32, %arg1: memref<64x28xf32, #tpu.memory_space<vmem>>, %arg2: memref<3x28x448xf32, #tpu.memory_space<vmem>>, %arg3: memref<1x448xf32, #tpu.memory_space<vmem>>, %arg4: memref<3x432x448xbf16, #tpu.memory_space<vmem>>, %arg5: memref<1x448xf32, #tpu.memory_space<vmem>>, %arg6: memref<7x416x128xbf16, #tpu.memory_space<vmem>>, %arg7: memref<1x128xf32, #tpu.memory_space<vmem>>, %arg8: memref<2x128xf32, #tpu.memory_space<vmem>>) attributes {dimension_semantics = [#tpu.dimension_semantics<parallel>], iteration_bounds = array<i64: 1>, scalar_prefetch = 0 : i64, scratch_operands = 0 : i64, tpu.core_type = #tpu.core_type<tc>, window_params = [{transform_indices = @transform_0, window_bounds = array<i64: 64, 28>}, {pipeline_mode = #tpu.pipeline_mode<synchronous>, transform_indices = @transform_1, window_bounds = array<i64: 3, 28, 448>}, {pipeline_mode = #tpu.pipeline_mode<synchronous>, transform_indices = @transform_2, window_bounds = array<i64: 1, 448>}, {pipeline_mode = #tpu.pipeline_mode<synchronous>, transform_indices = @transform_3, window_bounds = array<i64: 3, 432, 448>}, {pipeline_mode = #tpu.pipeline_mode<synchronous>, transform_indices = @transform_4, window_bounds = array<i64: 1, 448>}, {pipeline_mode = #tpu.pipeline_mode<synchronous>, transform_indices = @transform_5, window_bounds = array<i64: 7, 416, 128>}, {pipeline_mode = #tpu.pipeline_mode<synchronous>, transform_indices = @transform_6, window_bounds = array<i64: 1, 128>}, {transform_indices = @transform_7, window_bounds = array<i64: 2, 128>}]} {
    %c0 = arith.constant 0 : index
    %c0_0 = arith.constant 0 : index
    %0 = vector.load %arg1[%c0, %c0_0] : memref<64x28xf32, #tpu.memory_space<vmem>>, vector<64x28xf32>
    %c0_1 = arith.constant 0 : index
    %c0_2 = arith.constant 0 : index
    %c0_3 = arith.constant 0 : index
    %1 = vector.load %arg2[%c0_1, %c0_2, %c0_3] : memref<3x28x448xf32, #tpu.memory_space<vmem>>, vector<1x28x448xf32>
    %2 = vector.shape_cast %1 : vector<1x28x448xf32> to vector<28x448xf32>
    %cst = arith.constant dense<0.000000e+00> : vector<64x448xf32>
    %3 = tpu.matmul %0, %2, %cst {dimension_numbers = #tpu.dot_dimension_numbers<[1], [0], [0], [1], [0, 0, 1, 1], [], []>} : vector<64x28xf32>, vector<28x448xf32>, vector<64x448xf32> -> vector<64x448xf32>
    %cst_4 = arith.constant 0.000000e+00 : f32
    %4 = vector.broadcast %cst_4 : f32 to vector<1x28xf32>
    %5 = vector.extract_strided_slice %0 {offsets = [1, 0], sizes = [63, 28], strides = [1, 1]} : vector<64x28xf32> to vector<63x28xf32>
    %6 = tpu.concatenate %5, %4 in 0 : vector<63x28xf32>, vector<1x28xf32> -> vector<64x28xf32>
    %c1 = arith.constant 1 : index
    %c0_5 = arith.constant 0 : index
    %c0_6 = arith.constant 0 : index
    %7 = vector.load %arg2[%c1, %c0_5, %c0_6] : memref<3x28x448xf32, #tpu.memory_space<vmem>>, vector<1x28x448xf32>
    %8 = vector.shape_cast %7 : vector<1x28x448xf32> to vector<28x448xf32>
    %cst_7 = arith.constant dense<0.000000e+00> : vector<64x448xf32>
    %9 = tpu.matmul %6, %8, %cst_7 {dimension_numbers = #tpu.dot_dimension_numbers<[1], [0], [0], [1], [0, 0, 1, 1], [], []>} : vector<64x28xf32>, vector<28x448xf32>, vector<64x448xf32> -> vector<64x448xf32>
    %10 = arith.addf %3, %9 : vector<64x448xf32>
    %cst_8 = arith.constant 0.000000e+00 : f32
    %11 = vector.broadcast %cst_8 : f32 to vector<2x28xf32>
    %12 = vector.extract_strided_slice %0 {offsets = [2, 0], sizes = [62, 28], strides = [1, 1]} : vector<64x28xf32> to vector<62x28xf32>
    %13 = tpu.concatenate %12, %11 in 0 : vector<62x28xf32>, vector<2x28xf32> -> vector<64x28xf32>
    %c2 = arith.constant 2 : index
    %c0_9 = arith.constant 0 : index
    %c0_10 = arith.constant 0 : index
    %14 = vector.load %arg2[%c2, %c0_9, %c0_10] : memref<3x28x448xf32, #tpu.memory_space<vmem>>, vector<1x28x448xf32>
    %15 = vector.shape_cast %14 : vector<1x28x448xf32> to vector<28x448xf32>
    %cst_11 = arith.constant dense<0.000000e+00> : vector<64x448xf32>
    %16 = tpu.matmul %13, %15, %cst_11 {dimension_numbers = #tpu.dot_dimension_numbers<[1], [0], [0], [1], [0, 0, 1, 1], [], []>} : vector<64x28xf32>, vector<28x448xf32>, vector<64x448xf32> -> vector<64x448xf32>
    %17 = arith.addf %10, %16 : vector<64x448xf32>
    %c0_12 = arith.constant 0 : index
    %c0_13 = arith.constant 0 : index
    %18 = vector.load %arg3[%c0_12, %c0_13] : memref<1x448xf32, #tpu.memory_space<vmem>>, vector<1x448xf32>
    %19 = vector.broadcast %18 : vector<1x448xf32> to vector<64x448xf32>
    %20 = arith.addf %17, %19 : vector<64x448xf32>
    %cst_14 = arith.constant 0.000000e+00 : f32
    %21 = vector.broadcast %cst_14 : f32 to vector<64x448xf32>
    %22 = arith.maximumf %20, %21 : vector<64x448xf32>
    %23 = vector.extract_strided_slice %22 {offsets = [0, 0], sizes = [64, 432], strides = [1, 1]} : vector<64x448xf32> to vector<64x432xf32>
    %24 = vector.extract_strided_slice %22 {offsets = [0, 16], sizes = [64, 432], strides = [1, 1]} : vector<64x448xf32> to vector<64x432xf32>
    %25 = arith.maximumf %23, %24 : vector<64x432xf32>
    %cst_15 = arith.constant 0.000000e+00 : f32
    %26 = vector.broadcast %cst_15 : f32 to vector<1x432xf32>
    %27 = vector.extract_strided_slice %25 {offsets = [1, 0], sizes = [63, 432], strides = [1, 1]} : vector<64x432xf32> to vector<63x432xf32>
    %28 = tpu.concatenate %27, %26 in 0 : vector<63x432xf32>, vector<1x432xf32> -> vector<64x432xf32>
    %29 = arith.maximumf %25, %28 : vector<64x432xf32>
    %30 = tpu.iota {dimensions = array<i32: 0>} : vector<64x1xi32>
    %c31_i32 = arith.constant 31 : i32
    %31 = vector.broadcast %c31_i32 : i32 to vector<64x1xi32>
    %32 = arith.andi %30, %31 : vector<64x1xi32>
    %c28_i32 = arith.constant 28 : i32
    %33 = vector.broadcast %c28_i32 : i32 to vector<64x1xi32>
    %34 = arith.cmpi slt, %32, %33 : vector<64x1xi32>
    %cst_16 = arith.constant 0.000000e+00 : f32
    %35 = vector.shape_cast %34 : vector<64x1xi1> to vector<64x1xi1>
    %36 = vector.broadcast %35 : vector<64x1xi1> to vector<64x432xi1>
    %37 = vector.broadcast %cst_16 : f32 to vector<64x432xf32>
    %38 = arith.select %36, %29, %37 : vector<64x432xi1>, vector<64x432xf32>
    %39 = arith.truncf %38 : vector<64x432xf32> to vector<64x432xbf16>
    %cst_17 = arith.constant 0.000000e+00 : bf16
    %40 = vector.broadcast %cst_17 : bf16 to vector<2x432xbf16>
    %41 = vector.extract_strided_slice %39 {offsets = [0, 0], sizes = [62, 432], strides = [1, 1]} : vector<64x432xbf16> to vector<62x432xbf16>
    %42 = tpu.concatenate %40, %41 in 0 : vector<2x432xbf16>, vector<62x432xbf16> -> vector<64x432xbf16>
    %c0_18 = arith.constant 0 : index
    %c0_19 = arith.constant 0 : index
    %c0_20 = arith.constant 0 : index
    %43 = vector.load %arg4[%c0_18, %c0_19, %c0_20] : memref<3x432x448xbf16, #tpu.memory_space<vmem>>, vector<1x432x448xbf16>
    %44 = vector.shape_cast %43 : vector<1x432x448xbf16> to vector<432x448xbf16>
    %cst_21 = arith.constant dense<0.000000e+00> : vector<64x448xf32>
    %45 = tpu.matmul %42, %44, %cst_21 {dimension_numbers = #tpu.dot_dimension_numbers<[1], [0], [0], [1], [0, 0, 1, 1], [], []>} : vector<64x432xbf16>, vector<432x448xbf16>, vector<64x448xf32> -> vector<64x448xf32>
    %c1_22 = arith.constant 1 : index
    %c0_23 = arith.constant 0 : index
    %c0_24 = arith.constant 0 : index
    %46 = vector.load %arg4[%c1_22, %c0_23, %c0_24] : memref<3x432x448xbf16, #tpu.memory_space<vmem>>, vector<1x432x448xbf16>
    %47 = vector.shape_cast %46 : vector<1x432x448xbf16> to vector<432x448xbf16>
    %cst_25 = arith.constant dense<0.000000e+00> : vector<64x448xf32>
    %48 = tpu.matmul %39, %47, %cst_25 {dimension_numbers = #tpu.dot_dimension_numbers<[1], [0], [0], [1], [0, 0, 1, 1], [], []>} : vector<64x432xbf16>, vector<432x448xbf16>, vector<64x448xf32> -> vector<64x448xf32>
    %49 = arith.addf %45, %48 : vector<64x448xf32>
    %cst_26 = arith.constant 0.000000e+00 : bf16
    %50 = vector.broadcast %cst_26 : bf16 to vector<2x432xbf16>
    %51 = vector.extract_strided_slice %39 {offsets = [2, 0], sizes = [62, 432], strides = [1, 1]} : vector<64x432xbf16> to vector<62x432xbf16>
    %52 = tpu.concatenate %51, %50 in 0 : vector<62x432xbf16>, vector<2x432xbf16> -> vector<64x432xbf16>
    %c2_27 = arith.constant 2 : index
    %c0_28 = arith.constant 0 : index
    %c0_29 = arith.constant 0 : index
    %53 = vector.load %arg4[%c2_27, %c0_28, %c0_29] : memref<3x432x448xbf16, #tpu.memory_space<vmem>>, vector<1x432x448xbf16>
    %54 = vector.shape_cast %53 : vector<1x432x448xbf16> to vector<432x448xbf16>
    %cst_30 = arith.constant dense<0.000000e+00> : vector<64x448xf32>
    %55 = tpu.matmul %52, %54, %cst_30 {dimension_numbers = #tpu.dot_dimension_numbers<[1], [0], [0], [1], [0, 0, 1, 1], [], []>} : vector<64x432xbf16>, vector<432x448xbf16>, vector<64x448xf32> -> vector<64x448xf32>
    %56 = arith.addf %49, %55 : vector<64x448xf32>
    %c0_31 = arith.constant 0 : index
    %c0_32 = arith.constant 0 : index
    %57 = vector.load %arg5[%c0_31, %c0_32] : memref<1x448xf32, #tpu.memory_space<vmem>>, vector<1x448xf32>
    %58 = vector.broadcast %57 : vector<1x448xf32> to vector<64x448xf32>
    %59 = arith.addf %56, %58 : vector<64x448xf32>
    %cst_33 = arith.constant 0.000000e+00 : f32
    %60 = vector.broadcast %cst_33 : f32 to vector<64x448xf32>
    %61 = arith.maximumf %59, %60 : vector<64x448xf32>
    %62 = vector.extract_strided_slice %61 {offsets = [0, 0], sizes = [64, 416], strides = [1, 1]} : vector<64x448xf32> to vector<64x416xf32>
    %63 = vector.extract_strided_slice %61 {offsets = [0, 32], sizes = [64, 416], strides = [1, 1]} : vector<64x448xf32> to vector<64x416xf32>
    %64 = arith.maximumf %62, %63 : vector<64x416xf32>
    %65 = vector.shape_cast %64 : vector<64x416xf32> to vector<2x32x416xf32>
    %cst_34 = arith.constant 0.000000e+00 : f32
    %66 = vector.broadcast %cst_34 : f32 to vector<2x128xf32>
    %67 = vector.extract_strided_slice %65 {offsets = [0, 0, 0], sizes = [2, 1, 416], strides = [1, 1, 1]} : vector<2x32x416xf32> to vector<2x1x416xf32>
    %68 = vector.shape_cast %67 : vector<2x1x416xf32> to vector<2x416xf32>
    %69 = vector.extract_strided_slice %65 {offsets = [0, 2, 0], sizes = [2, 1, 416], strides = [1, 1, 1]} : vector<2x32x416xf32> to vector<2x1x416xf32>
    %70 = vector.shape_cast %69 : vector<2x1x416xf32> to vector<2x416xf32>
    %71 = arith.maximumf %68, %70 : vector<2x416xf32>
    %72 = arith.truncf %71 : vector<2x416xf32> to vector<2x416xbf16>
    %c0_35 = arith.constant 0 : index
    %c0_36 = arith.constant 0 : index
    %c0_37 = arith.constant 0 : index
    %73 = vector.load %arg6[%c0_35, %c0_36, %c0_37] : memref<7x416x128xbf16, #tpu.memory_space<vmem>>, vector<1x416x128xbf16>
    %74 = vector.shape_cast %73 : vector<1x416x128xbf16> to vector<416x128xbf16>
    %cst_38 = arith.constant dense<0.000000e+00> : vector<2x128xf32>
    %75 = tpu.matmul %72, %74, %cst_38 {dimension_numbers = #tpu.dot_dimension_numbers<[1], [0], [0], [1], [0, 0, 1, 1], [], []>} : vector<2x416xbf16>, vector<416x128xbf16>, vector<2x128xf32> -> vector<2x128xf32>
    %76 = arith.addf %66, %75 : vector<2x128xf32>
    %77 = vector.extract_strided_slice %65 {offsets = [0, 4, 0], sizes = [2, 1, 416], strides = [1, 1, 1]} : vector<2x32x416xf32> to vector<2x1x416xf32>
    %78 = vector.shape_cast %77 : vector<2x1x416xf32> to vector<2x416xf32>
    %79 = vector.extract_strided_slice %65 {offsets = [0, 6, 0], sizes = [2, 1, 416], strides = [1, 1, 1]} : vector<2x32x416xf32> to vector<2x1x416xf32>
    %80 = vector.shape_cast %79 : vector<2x1x416xf32> to vector<2x416xf32>
    %81 = arith.maximumf %78, %80 : vector<2x416xf32>
    %82 = arith.truncf %81 : vector<2x416xf32> to vector<2x416xbf16>
    %c1_39 = arith.constant 1 : index
    %c0_40 = arith.constant 0 : index
    %c0_41 = arith.constant 0 : index
    %83 = vector.load %arg6[%c1_39, %c0_40, %c0_41] : memref<7x416x128xbf16, #tpu.memory_space<vmem>>, vector<1x416x128xbf16>
    %84 = vector.shape_cast %83 : vector<1x416x128xbf16> to vector<416x128xbf16>
    %cst_42 = arith.constant dense<0.000000e+00> : vector<2x128xf32>
    %85 = tpu.matmul %82, %84, %cst_42 {dimension_numbers = #tpu.dot_dimension_numbers<[1], [0], [0], [1], [0, 0, 1, 1], [], []>} : vector<2x416xbf16>, vector<416x128xbf16>, vector<2x128xf32> -> vector<2x128xf32>
    %86 = arith.addf %76, %85 : vector<2x128xf32>
    %87 = vector.extract_strided_slice %65 {offsets = [0, 8, 0], sizes = [2, 1, 416], strides = [1, 1, 1]} : vector<2x32x416xf32> to vector<2x1x416xf32>
    %88 = vector.shape_cast %87 : vector<2x1x416xf32> to vector<2x416xf32>
    %89 = vector.extract_strided_slice %65 {offsets = [0, 10, 0], sizes = [2, 1, 416], strides = [1, 1, 1]} : vector<2x32x416xf32> to vector<2x1x416xf32>
    %90 = vector.shape_cast %89 : vector<2x1x416xf32> to vector<2x416xf32>
    %91 = arith.maximumf %88, %90 : vector<2x416xf32>
    %92 = arith.truncf %91 : vector<2x416xf32> to vector<2x416xbf16>
    %c2_43 = arith.constant 2 : index
    %c0_44 = arith.constant 0 : index
    %c0_45 = arith.constant 0 : index
    %93 = vector.load %arg6[%c2_43, %c0_44, %c0_45] : memref<7x416x128xbf16, #tpu.memory_space<vmem>>, vector<1x416x128xbf16>
    %94 = vector.shape_cast %93 : vector<1x416x128xbf16> to vector<416x128xbf16>
    %cst_46 = arith.constant dense<0.000000e+00> : vector<2x128xf32>
    %95 = tpu.matmul %92, %94, %cst_46 {dimension_numbers = #tpu.dot_dimension_numbers<[1], [0], [0], [1], [0, 0, 1, 1], [], []>} : vector<2x416xbf16>, vector<416x128xbf16>, vector<2x128xf32> -> vector<2x128xf32>
    %96 = arith.addf %86, %95 : vector<2x128xf32>
    %97 = vector.extract_strided_slice %65 {offsets = [0, 12, 0], sizes = [2, 1, 416], strides = [1, 1, 1]} : vector<2x32x416xf32> to vector<2x1x416xf32>
    %98 = vector.shape_cast %97 : vector<2x1x416xf32> to vector<2x416xf32>
    %99 = vector.extract_strided_slice %65 {offsets = [0, 14, 0], sizes = [2, 1, 416], strides = [1, 1, 1]} : vector<2x32x416xf32> to vector<2x1x416xf32>
    %100 = vector.shape_cast %99 : vector<2x1x416xf32> to vector<2x416xf32>
    %101 = arith.maximumf %98, %100 : vector<2x416xf32>
    %102 = arith.truncf %101 : vector<2x416xf32> to vector<2x416xbf16>
    %c3 = arith.constant 3 : index
    %c0_47 = arith.constant 0 : index
    %c0_48 = arith.constant 0 : index
    %103 = vector.load %arg6[%c3, %c0_47, %c0_48] : memref<7x416x128xbf16, #tpu.memory_space<vmem>>, vector<1x416x128xbf16>
    %104 = vector.shape_cast %103 : vector<1x416x128xbf16> to vector<416x128xbf16>
    %cst_49 = arith.constant dense<0.000000e+00> : vector<2x128xf32>
    %105 = tpu.matmul %102, %104, %cst_49 {dimension_numbers = #tpu.dot_dimension_numbers<[1], [0], [0], [1], [0, 0, 1, 1], [], []>} : vector<2x416xbf16>, vector<416x128xbf16>, vector<2x128xf32> -> vector<2x128xf32>
    %106 = arith.addf %96, %105 : vector<2x128xf32>
    %107 = vector.extract_strided_slice %65 {offsets = [0, 16, 0], sizes = [2, 1, 416], strides = [1, 1, 1]} : vector<2x32x416xf32> to vector<2x1x416xf32>
    %108 = vector.shape_cast %107 : vector<2x1x416xf32> to vector<2x416xf32>
    %109 = vector.extract_strided_slice %65 {offsets = [0, 18, 0], sizes = [2, 1, 416], strides = [1, 1, 1]} : vector<2x32x416xf32> to vector<2x1x416xf32>
    %110 = vector.shape_cast %109 : vector<2x1x416xf32> to vector<2x416xf32>
    %111 = arith.maximumf %108, %110 : vector<2x416xf32>
    %112 = arith.truncf %111 : vector<2x416xf32> to vector<2x416xbf16>
    %c4 = arith.constant 4 : index
    %c0_50 = arith.constant 0 : index
    %c0_51 = arith.constant 0 : index
    %113 = vector.load %arg6[%c4, %c0_50, %c0_51] : memref<7x416x128xbf16, #tpu.memory_space<vmem>>, vector<1x416x128xbf16>
    %114 = vector.shape_cast %113 : vector<1x416x128xbf16> to vector<416x128xbf16>
    %cst_52 = arith.constant dense<0.000000e+00> : vector<2x128xf32>
    %115 = tpu.matmul %112, %114, %cst_52 {dimension_numbers = #tpu.dot_dimension_numbers<[1], [0], [0], [1], [0, 0, 1, 1], [], []>} : vector<2x416xbf16>, vector<416x128xbf16>, vector<2x128xf32> -> vector<2x128xf32>
    %116 = arith.addf %106, %115 : vector<2x128xf32>
    %117 = vector.extract_strided_slice %65 {offsets = [0, 20, 0], sizes = [2, 1, 416], strides = [1, 1, 1]} : vector<2x32x416xf32> to vector<2x1x416xf32>
    %118 = vector.shape_cast %117 : vector<2x1x416xf32> to vector<2x416xf32>
    %119 = vector.extract_strided_slice %65 {offsets = [0, 22, 0], sizes = [2, 1, 416], strides = [1, 1, 1]} : vector<2x32x416xf32> to vector<2x1x416xf32>
    %120 = vector.shape_cast %119 : vector<2x1x416xf32> to vector<2x416xf32>
    %121 = arith.maximumf %118, %120 : vector<2x416xf32>
    %122 = arith.truncf %121 : vector<2x416xf32> to vector<2x416xbf16>
    %c5 = arith.constant 5 : index
    %c0_53 = arith.constant 0 : index
    %c0_54 = arith.constant 0 : index
    %123 = vector.load %arg6[%c5, %c0_53, %c0_54] : memref<7x416x128xbf16, #tpu.memory_space<vmem>>, vector<1x416x128xbf16>
    %124 = vector.shape_cast %123 : vector<1x416x128xbf16> to vector<416x128xbf16>
    %cst_55 = arith.constant dense<0.000000e+00> : vector<2x128xf32>
    %125 = tpu.matmul %122, %124, %cst_55 {dimension_numbers = #tpu.dot_dimension_numbers<[1], [0], [0], [1], [0, 0, 1, 1], [], []>} : vector<2x416xbf16>, vector<416x128xbf16>, vector<2x128xf32> -> vector<2x128xf32>
    %126 = arith.addf %116, %125 : vector<2x128xf32>
    %127 = vector.extract_strided_slice %65 {offsets = [0, 24, 0], sizes = [2, 1, 416], strides = [1, 1, 1]} : vector<2x32x416xf32> to vector<2x1x416xf32>
    %128 = vector.shape_cast %127 : vector<2x1x416xf32> to vector<2x416xf32>
    %129 = vector.extract_strided_slice %65 {offsets = [0, 26, 0], sizes = [2, 1, 416], strides = [1, 1, 1]} : vector<2x32x416xf32> to vector<2x1x416xf32>
    %130 = vector.shape_cast %129 : vector<2x1x416xf32> to vector<2x416xf32>
    %131 = arith.maximumf %128, %130 : vector<2x416xf32>
    %132 = arith.truncf %131 : vector<2x416xf32> to vector<2x416xbf16>
    %c6 = arith.constant 6 : index
    %c0_56 = arith.constant 0 : index
    %c0_57 = arith.constant 0 : index
    %133 = vector.load %arg6[%c6, %c0_56, %c0_57] : memref<7x416x128xbf16, #tpu.memory_space<vmem>>, vector<1x416x128xbf16>
    %134 = vector.shape_cast %133 : vector<1x416x128xbf16> to vector<416x128xbf16>
    %cst_58 = arith.constant dense<0.000000e+00> : vector<2x128xf32>
    %135 = tpu.matmul %132, %134, %cst_58 {dimension_numbers = #tpu.dot_dimension_numbers<[1], [0], [0], [1], [0, 0, 1, 1], [], []>} : vector<2x416xbf16>, vector<416x128xbf16>, vector<2x128xf32> -> vector<2x128xf32>
    %136 = arith.addf %126, %135 : vector<2x128xf32>
    %c0_59 = arith.constant 0 : index
    %c0_60 = arith.constant 0 : index
    %137 = vector.load %arg7[%c0_59, %c0_60] : memref<1x128xf32, #tpu.memory_space<vmem>>, vector<1x128xf32>
    %138 = vector.broadcast %137 : vector<1x128xf32> to vector<2x128xf32>
    %139 = arith.addf %136, %138 : vector<2x128xf32>
    %c0_61 = arith.constant 0 : index
    %c0_62 = arith.constant 0 : index
    %140 = vector.load %arg8[%c0_61, %c0_62] : memref<2x128xf32, #tpu.memory_space<vmem>>, vector<2x128xf32>
    tpu.vector_store %arg8[%c0_61, %c0_62], %139 {strides = array<i32>} : memref<2x128xf32, #tpu.memory_space<vmem>>, vector<2x128xf32>,
    return
  }
  func.func @transform_0(%arg0: i32) -> (i32, i32) {
    %c0_i32 = arith.constant 0 : i32
    %c0_i32_0 = arith.constant 0 : i32
    return %arg0, %c0_i32 : i32, i32
  }
  func.func @transform_1(%arg0: i32) -> (i32, i32, i32) {
    %c0_i32 = arith.constant 0 : i32
    %c0_i32_0 = arith.constant 0 : i32
    %c0_i32_1 = arith.constant 0 : i32
    %c0_i32_2 = arith.constant 0 : i32
    return %c0_i32, %c0_i32_0, %c0_i32_1 : i32, i32, i32
  }
  func.func @transform_2(%arg0: i32) -> (i32, i32) {
    %c0_i32 = arith.constant 0 : i32
    %c0_i32_0 = arith.constant 0 : i32
    %c0_i32_1 = arith.constant 0 : i32
    return %c0_i32, %c0_i32_0 : i32, i32
  }
  func.func @transform_3(%arg0: i32) -> (i32, i32, i32) {
    %c0_i32 = arith.constant 0 : i32
    %c0_i32_0 = arith.constant 0 : i32
    %c0_i32_1 = arith.constant 0 : i32
    %c0_i32_2 = arith.constant 0 : i32
    return %c0_i32, %c0_i32_0, %c0_i32_1 : i32, i32, i32
  }
  func.func @transform_4(%arg0: i32) -> (i32, i32) {
    %c0_i32 = arith.constant 0 : i32
    %c0_i32_0 = arith.constant 0 : i32
    %c0_i32_1 = arith.constant 0 : i32
    return %c0_i32, %c0_i32_0 : i32, i32
  }
  func.func @transform_5(%arg0: i32) -> (i32, i32, i32) {
    %c0_i32 = arith.constant 0 : i32
    %c0_i32_0 = arith.constant 0 : i32
    %c0_i32_1 = arith.constant 0 : i32
    %c0_i32_2 = arith.constant 0 : i32
    return %c0_i32, %c0_i32_0, %c0_i32_1 : i32, i32, i32
  }
  func.func @transform_6(%arg0: i32) -> (i32, i32) {
    %c0_i32 = arith.constant 0 : i32
    %c0_i32_0 = arith.constant 0 : i32
    %c0_i32_1 = arith.constant 0 : i32
    return %c0_i32, %c0_i32_0 : i32, i32
  }
  func.func @transform_7(%arg0: i32) -> (i32, i32) {
    %c0_i32 = arith.constant 0 : i32
    %c0_i32_0 = arith.constant 0 : i32
    return %arg0, %c0_i32 : i32, i32
  }
}

</mosaic_0001>

<bundles_post_ra>
// kernel: cnn_forward.1
= control target key start
LH: loop header
LB: loop body
LE: loop exit
PB: predicated region body
PF: predicated region fallthrough
CT: control target
= control target key end

     0   :  { %12 = vsyncpa [#allocation3], 0  ;;  %s12734_s0 = inlined_call_operand.vmem [shape: f32[64,28], index: 0, kind: input, shape index: {}]   ;;  %s12735_s1 = inlined_call_operand.hbm [shape: f32[3,28,448], index: 1, kind: input, shape index: {}]   ;;  %s12736_s2 = inlined_call_operand.hbm [shape: f32[1,448], index: 2, kind: input, shape index: {}]   ;;  %s12737_s3 = inlined_call_operand.hbm [shape: bf16[3,432,448], index: 3, kind: input, shape index: {}]   ;;  %s12738_s4 = inlined_call_operand.hbm [shape: f32[1,448], index: 4, kind: input, shape index: {}]   ;;  %s12739_s5 = inlined_call_operand.hbm [shape: bf16[7,416,128], index: 5, kind: input, shape index: {}]   ;;  %s12740_s6 = inlined_call_operand.hbm [shape: f32[1,128], index: 6, kind: input, shape index: {}]   ;;  %s12741_s7 = inlined_call_operand.hbm [shape: f32[2,128], index: 7, kind: output, shape index: {}]  }
   0x1   :  { %13 = vsyncpa [#allocation6], 0 }
   0x2   :  { %14 = vsyncpa [#allocation9], 0 }
   0x3   :  { %15 = vsyncpa [#allocation12], 0  ;;  %s37_s26 = sshll.u32 %s12736_s2, 4  ;;  %s38_s26 = int_to_ptr.hbm [resolvable:$true] %s37_s26 }
   0x4   :  { %16 = vsyncpa [#allocation4], 0  ;;  %s10490_s27 = smov [#allocation5]   ;;  %s61_s8 = sshll.u32 %s12738_s4, 4  ;;  %s62_s8 = int_to_ptr.hbm [resolvable:$true] %s61_s8 }
   0x5   :  { %s39_s28 = sshll.u32 %s10490_s27, 4  ;;  %s10491_s9 = smov [#allocation8]   ;;  %s40_s28 = int_to_ptr.vmem [resolvable:$true] %s39_s28 }
   0x6   :  { %42 = dma.hbm_to_vmem [thread:$0]  %s38_s26, 64, %s40_s28, [#allocation6]  }
   0x7   :  { %s63_s10 = sshll.u32 %s10491_s9, 4  ;;  %s23_s13 = sshll.u32 %s12735_s1, 4  ;;  %s64_s10 = int_to_ptr.vmem [resolvable:$true] %s63_s10  ;;  %s24_s13 = int_to_ptr.hbm [resolvable:$true] %s23_s13 }
   0x8   :  { %66 = dma.hbm_to_vmem [thread:$0]  %s62_s8, 64, %s64_s10, [#allocation9]  }
   0x9   :  { %s10492_s2 = smov [#allocation2]   ;;  %s47_s17 = sshll.u32 %s12737_s3, 4  ;;  %s48_s17 = int_to_ptr.hbm [resolvable:$true] %s47_s17 }
   0xa   :  { %s25_s14 = sshll.u32 %s10492_s2, 4  ;;  %s10493_s18 = smov 512   ;;  %s26_s14 = int_to_ptr.vmem [resolvable:$true] %s25_s14 }
   0xb   :  { %s10494_s4 = smov 32   ;;  %s10495_s19 = smov [#allocation7]  }
   0xc   :  { %31 = dma.hbm_to_vmem [thread:$0]  %s24_s13, 6144, %s26_s14, [#allocation3], %s10493_s18, %s10493_s18, %s10494_s4  }
   0xd   :  { %s49_s20 = sshll.u32 %s10495_s19, 4  ;;  %s10496_s21 = smov 256   ;;  %s50_s20 = int_to_ptr.vmem [resolvable:$true] %s49_s20 }
   0xe   :  { %s10497_s22 = smov 16   ;;  %s71_s24 = sshll.u32 %s12739_s5, 4  ;;  %s72_s24 = int_to_ptr.hbm [resolvable:$true] %s71_s24 }
   0xf   :  { %55 = dma.hbm_to_vmem [thread:$0]  %s48_s17, 41472, %s50_s20, [#allocation6], %s10496_s21, %s10496_s21, %s10497_s22  }
  0x10   :  { %s10498_s25 = smov [#allocation10]   ;;  %s85_s28 = sshll.u32 %s12740_s6, 4  ;;  %s86_s28 = int_to_ptr.hbm [resolvable:$true] %s85_s28 }
  0x11   :  { %s73_s26 = sshll.u32 %s10498_s25, 4  ;;  %s10499_s29 = smov 64   ;;  %s74_s26 = int_to_ptr.vmem [resolvable:$true] %s73_s26 }
  0x12   :  { %s10500_s30 = smov 4   ;;  %s10501_s8 = smov [#allocation11]  }
  0x13   :  { %79 = dma.hbm_to_vmem [thread:$0]  %s72_s24, 23296, %s74_s26, [#allocation9], %s10499_s29, %s10499_s29, %s10500_s30  }
  0x14   :  { %s87_s9 = sshll.u32 %s10501_s8, 4  ;;  %s88_s9 = int_to_ptr.vmem [resolvable:$true] %s87_s9 }
  0x15   :  { %90 = dma.hbm_to_vmem [thread:$0]  %s86_s28, 16, %s88_s9, [#allocation12]  }
  0x16   :  { %10480 = dma.done.wait [#allocation3], 6144  }
  0x17   :  { %10481 = vsyncadd [#allocation3], 4294961152 }
  0x18   :  { %10482 = dma.done.wait [#allocation6], 41536  }
  0x19   :  { %10483 = vsyncadd [#allocation6], 4294925760 }
  0x1a   :  { %10484 = dma.done.wait [#allocation9], 23360  }
  0x1b   :  { %10485 = vsyncadd [#allocation9], 4294943936 }
  0x1c   :  { %10486 = dma.done.wait [#allocation12], 16  }
  0x1d   :  { %10487 = vsyncadd [#allocation12], 4294967280  ;;  %vm201_vm0 = vcmask 1043456   ;;  %v179_v0 = vld [vmem:[#allocation2 + $0xe0] sm:$0xf]  ;;  %v176_v3 = vld [vmem:[#allocation2 + $0xc8] sm:$0xff] }
  0x1e   :  { %v180_v1 = vld [vmem:[#allocation2 + $0xe8] sm:$0xf]  ;;  %v175_v2 = vld [vmem:[#allocation2 + $0xc0] sm:$0xff]  ;;  %7399 = vmatpush.msk.msra.mxu0 %vm201_vm0, %v179_v0  ;;  %10128 = vmatpush.msk.msra.mxu2 %vm201_vm0, %v179_v0  ;;  %vm148_vm1 = vcmask 1046528   ;;  %v10581_v9 = vld [vmem:[%s12734_s0 + $0x38] sm:$0xff]  ;;  %vm183_vm2 = vcmask 228352  }
  0x1f   :  { %7408 = vmatpush.msk.msra.mxu1 %vm201_vm0, %v180_v1  ;;  %10132 = vmatpush.msk.msra.mxu3 %vm201_vm0, %v180_v1  ;;  %v171_v4 = vld [vmem:[#allocation2 + $0xa0] sm:$0xff]  ;;  %v172_v6 = vld [vmem:[#allocation2 + $0xa8] sm:$0xff]  ;;  %v162_v12 = vrot.slane %v10581_v9, 1  ;;  %v181_v16 = vld [vmem:[#allocation2 + $0xf0] sm:$0xf]  ;;  %vm570_vm3 = vcmask 1045504  }
  0x20   :  { %v10570_v5 = vld [vmem:[%s12734_s0] sm:$0xff]  ;;  %227 = vmatpush.msra.mxu0 %v175_v2  ;;  %10129 = vmatpush.msra.mxu2 %v175_v2  ;;  %v10575_v7 = vld [vmem:[%s12734_s0 + $0x8] sm:$0xff]  ;;  %v182_v17 = vld [vmem:[#allocation2 + $0xf8] sm:$0xf]  ;;  %vm1000_vm4 = vcmask 916480   ;;  %vm2222_vm5 = vcmask 392192  }
  0x21   :  { %v149_v8 = vrot.slane %v10570_v5, 1  ;;  %268 = vmatpush.msra.mxu1 %v176_v3  ;;  %10133 = vmatpush.msra.mxu3 %v176_v3  ;;  %v167_v10 = vld [vmem:[#allocation2 + $0x80] sm:$0xff]  ;;  %v150_v11 = vrot.slane %v10575_v7, 1  ;;  %v168_v13 = vld [vmem:[#allocation2 + $0x88] sm:$0xff]  ;;  %v10589_v15 = vsel %vm148_vm1, %v162_v12, 0.0  ;;  %v10594_v18 = vld [vmem:[%s12734_s0 + $0x10] sm:$0xff] }
  0x22   :  { %228 = vmatpush.msra.mxu0 %v171_v4  ;;  %10130 = vmatpush.msra.mxu2 %v171_v4  ;;  %v177_v19 = vld [vmem:[#allocation2 + $0xd0] sm:$0xff]  ;;  %v178_v20 = vld [vmem:[#allocation2 + $0xd8] sm:$0xff]  ;;  %v152_v21 = vrot.slane %v10594_v18, 1  ;;  %v10622_v32 = vld [vmem:[%s12734_s0 + $0x20] sm:$0xff]  ;;  %vm1402_vm8 = vcmask 1040384   ;;  %s10503_s22 = smov 96  }
  0x23   :  { %269 = vmatpush.msra.mxu1 %v172_v6  ;;  %10134 = vmatpush.msra.mxu3 %v172_v6  ;;  %v151_v14 = vsel %vm148_vm1, %v149_v8, %v150_v11  ;;  %v173_v22 = vld [vmem:[#allocation2 + $0xb0] sm:$0xff]  ;;  %v174_v23 = vld [vmem:[#allocation2 + $0xb8] sm:$0xff]  ;;  %v156_v33 = vrot.slane %v10622_v32, 1  ;;  %v136_v34 = vld [vmem:[#allocation2 + $0x60] sm:$0xf]  ;;  %vm5089_vm10 = vcmask 785408  }
  0x24   :  { %229 = vmatpush.msra.mxu0 %v167_v10  ;;  %10131 = vmatpush.msra.mxu2 %v167_v10  ;;  %v169_v24 = vld [vmem:[#allocation2 + $0x90] sm:$0xff]  ;;  %v170_v25 = vld [vmem:[#allocation2 + $0x98] sm:$0xff]  ;;  %v153_v26 = vsel %vm148_vm1, %v150_v11, %v152_v21  ;;  %v137_v35 = vld [vmem:[#allocation2 + $0x68] sm:$0xf]  ;;  %v571_v11 = vrot.slane %v10570_v5, 2  ;;  %vm5341_vm11 = vcmask 1041409  }
  0x25   :  { %270 = vmatpush.msra.mxu1 %v168_v13  ;;  %10135 = vmatpush.msra.mxu3 %v168_v13  ;;  %v10609_v27 = vld [vmem:[%s12734_s0 + $0x18] sm:$0xff]  ;;  %v138_v28 = vld [vmem:[#allocation2 + $0x70] sm:$0xf]  ;;  %v132_v36 = vld [vmem:[#allocation2 + $0x40] sm:$0xff]  ;;  %vm5515_vm12 = vcmask 261120   ;;  %s10504_s1 = smov [#allocation13]  }
  0x26   :  { %7400 = vmatmul.msk.f32.vlgmr.msra.gmra.mxu0 %vm183_vm2, %v151_v14  ;;  %7407 = vmatmul.msk.f32.vlgmr.msra.gmra.mxu2 %vm183_vm2, %v10589_v15  ;;  %v139_v29 = vld [vmem:[#allocation2 + $0x78] sm:$0xf]  ;;  %v154_v30 = vrot.slane %v10609_v27, 1  ;;  %v133_v37 = vld [vmem:[#allocation2 + $0x48] sm:$0xff]  ;;  %v134_v38 = vld [vmem:[#allocation2 + $0x50] sm:$0xff]  ;;  %s7384_s23 = sshll.u32 %s10504_s1, 4  ;;  %s7385_s23 = int_to_ptr.vmem [resolvable:$true] %s7384_s23 }
  0x27   :  { %7409 = vmatmul.msk.f32.vlgmr.msra.gmra.mxu1 %vm183_vm2, %v151_v14  ;;  %7416 = vmatmul.msk.f32.vlgmr.msra.gmra.mxu3 %vm183_vm2, %v10589_v15  ;;  %v135_v39 = vld [vmem:[#allocation2 + $0x58] sm:$0xff]  ;;  %v128_v40 = vld [vmem:[#allocation2 + $0x20] sm:$0xff]  ;;  %v129_v41 = vld [vmem:[#allocation2 + $0x28] sm:$0xff]  ;;  %s7386_s26 = sshll.u32 %s12741_s7, 4  ;;  %s7387_s26 = int_to_ptr.hbm [resolvable:$true] %s7386_s26 }
  0x28   :  { %7417 = vmatpush.msk.msrb.mxu2 %vm201_vm0, %v181_v16  ;;  %7426 = vmatpush.msk.msrb.mxu3 %vm201_vm0, %v182_v17  ;;  %v155_v31 = vsel %vm148_vm1, %v152_v21, %v154_v30  ;;  %v157_v42 = vsel %vm148_vm1, %v154_v30, %v156_v33  ;;  %v10635_v43 = vld [vmem:[%s12734_s0 + $0x28] sm:$0xff]  ;;  %v124_v44 = vld [vmem:[#allocation2] sm:$0xff]  ;;  %v10646_v48 = vld [vmem:[%s12734_s0 + $0x30] sm:$0xff]  ;;  %v576_v16 = vrot.slane %v10609_v27, 2  ;;  %s10502_s0 = smov 112  }
  0x29   :  { %7435 = vmatpush.msk.msrb.mxu0 %vm201_vm0, %v136_v34  ;;  %7444 = vmatpush.msk.msrb.mxu1 %vm201_vm0, %v137_v35  ;;  %v125_v45 = vld [vmem:[#allocation2 + $0x8] sm:$0xff]  ;;  %v158_v46 = vrot.slane %v10635_v43, 1  ;;  %v160_v49 = vrot.slane %v10646_v48, 1  ;;  %v130_v50 = vld [vmem:[#allocation2 + $0x30] sm:$0xff]  ;;  %v131_v51 = vld [vmem:[#allocation2 + $0x38] sm:$0xff]  ;;  %v582_v34 = vrot.slane %v10646_v48, 2 }
  0x2a   :  { %309 = vmatpush.msrb.mxu2 %v177_v19  ;;  %350 = vmatpush.msrb.mxu3 %v178_v20  ;;  %v126_v52 = vld [vmem:[#allocation2 + $0x10] sm:$0xff]  ;;  %v127_v53 = vld [vmem:[#allocation2 + $0x18] sm:$0xff]  ;;  %v601_v58 = vld [vmem:[#allocation2 + $0x160] sm:$0xf] }
  0x2b   :  { %419 = vmatpush.msrb.mxu0 %v132_v36  ;;  %460 = vmatpush.msrb.mxu1 %v133_v37  ;;  %v159_v47 = vsel %vm148_vm1, %v156_v33, %v158_v46  ;;  %v161_v54 = vsel %vm148_vm1, %v158_v46, %v160_v49  ;;  %v163_v55 = vsel %vm148_vm1, %v160_v49, %v162_v12  ;;  %v603_v56 = vld [vmem:[#allocation2 + $0x170] sm:$0xf]  ;;  %v604_v57 = vld [vmem:[#allocation2 + $0x178] sm:$0xf]  ;;  %v602_v59 = vld [vmem:[#allocation2 + $0x168] sm:$0xf] }
  0x2c   :  { %310 = vmatpush.msrb.mxu2 %v173_v22  ;;  %351 = vmatpush.msrb.mxu3 %v174_v23  ;;  %v597_v60 = vld [vmem:[#allocation2 + $0x140] sm:$0xff]  ;;  %v598_v61 = vld [vmem:[#allocation2 + $0x148] sm:$0xff]  ;;  %v599_v62 = vld [vmem:[#allocation2 + $0x150] sm:$0xff]  ;;  %v572_v12 = vrot.slane %v10575_v7, 2  ;;  %v578_v22 = vrot.slane %v10622_v32, 2 }
  0x2d   :  { %420 = vmatpush.msrb.mxu0 %v128_v40  ;;  %461 = vmatpush.msrb.mxu1 %v129_v41  ;;  %v600_v63 = vld [vmem:[#allocation2 + $0x158] sm:$0xff]  ;;  %v593_v0 = vld [vmem:[#allocation2 + $0x120] sm:$0xff]  ;;  %v594_v1 = vld [vmem:[#allocation2 + $0x128] sm:$0xff]  ;;  %v584_v40 = vrot.slane %v10581_v9, 2 }
  0x2e   :  { %311 = vmatpush.msrb.mxu2 %v169_v24  ;;  %352 = vmatpush.msrb.mxu3 %v170_v25  ;;  %v589_v2 = vld [vmem:[#allocation2 + $0x100] sm:$0xff]  ;;  %v590_v3 = vld [vmem:[#allocation2 + $0x108] sm:$0xff]  ;;  %v595_v4 = vld [vmem:[#allocation2 + $0x130] sm:$0xff]  ;;  %v573_v13 = vsel %vm570_vm3, %v571_v11, %v572_v12 }
  0x2f   :  { %7401 = vmatmul.msk.f32.gmra.mxu0 %vm183_vm2, %v153_v26  ;;  %7410 = vmatmul.msk.f32.gmra.mxu1 %vm183_vm2, %v153_v26  ;;  %v596_v6 = vld [vmem:[#allocation2 + $0x138] sm:$0xff]  ;;  %v591_v8 = vld [vmem:[#allocation2 + $0x110] sm:$0xff]  ;;  %v587_v49 = vsel %vm570_vm3, %v584_v40, 0.0  ;;  %vm11651_vm9 = vmneg %vm1402_vm8 }
  0x30   :  { %7418 = vmatmul.msk.f32.vlgmr.msrb.gmra.mxu2 %vm183_vm2, %v151_v14  ;;  %7427 = vmatmul.msk.f32.vlgmr.msrb.gmra.mxu3 %vm183_vm2, %v151_v14  ;;  %v592_v10 = vld [vmem:[#allocation2 + $0x118] sm:$0xff]  ;;  %v574_v14 = vrot.slane %v10594_v18, 2 }
  0x31   :  { %7453 = vmatpush.msk.msra.mxu2 %vm201_vm0, %v138_v28  ;;  %7462 = vmatpush.msk.msra.mxu3 %vm201_vm0, %v139_v29  ;;  %v580_v28 = vrot.slane %v10635_v43, 2 }
  0x32   :  { %421 = vmatpush.msrb.mxu0 %v124_v44  ;;  %462 = vmatpush.msrb.mxu1 %v125_v45  ;;  %v577_v21 = vsel %vm570_vm3, %v574_v14, %v576_v16  ;;  %v585_v45 = vsel %vm570_vm3, %v582_v34, %v584_v40 }
  0x33   :  { %501 = vmatpush.msra.mxu2 %v134_v38  ;;  %542 = vmatpush.msra.mxu3 %v135_v39  ;;  %v581_v33 = vsel %vm570_vm3, %v578_v22, %v580_v28  ;;  %v583_v39 = vsel %vm570_vm3, %v580_v28, %v582_v34 }
  0x34   :  { %7471 = vmatpush.msk.msra.mxu0 %vm201_vm0, %v601_v58  ;;  %7480 = vmatpush.msk.msra.mxu1 %vm201_vm0, %v602_v59 }
  0x35   :  { %502 = vmatpush.msra.mxu2 %v130_v50  ;;  %543 = vmatpush.msra.mxu3 %v131_v51 }
  0x36   :  { %647 = vmatpush.msra.mxu0 %v597_v60  ;;  %688 = vmatpush.msra.mxu1 %v598_v61 }
  0x37   :  { %7402 = vmatmul.msk.f32.gmra.mxu0 %vm183_vm2, %v155_v31  ;;  %7411 = vmatmul.msk.f32.gmra.mxu1 %vm183_vm2, %v155_v31 }
  0x38   :  { %7419 = vmatmul.msk.f32.gmra.mxu2 %vm183_vm2, %v153_v26  ;;  %7428 = vmatmul.msk.f32.gmra.mxu3 %vm183_vm2, %v153_v26 }
  0x39   :  { %503 = vmatpush.msra.mxu2 %v126_v52  ;;  %544 = vmatpush.msra.mxu3 %v127_v53 }
  0x3a   :  { %648 = vmatpush.msra.mxu0 %v593_v0  ;;  %689 = vmatpush.msra.mxu1 %v594_v1 }
  0x3b   :  { %7489 = vmatpush.msk.msrb.mxu2 %vm201_vm0, %v603_v56  ;;  %7498 = vmatpush.msk.msrb.mxu3 %vm201_vm0, %v604_v57 }
  0x3c   :  { %649 = vmatpush.msra.mxu0 %v589_v2  ;;  %690 = vmatpush.msra.mxu1 %v590_v3 }
  0x3d   :  { %729 = vmatpush.msrb.mxu2 %v599_v62  ;;  %770 = vmatpush.msrb.mxu3 %v600_v63 }
  0x3f   :  { %7403 = vmatmul.msk.f32.gmra.mxu0 %vm183_vm2, %v157_v42  ;;  %7412 = vmatmul.msk.f32.gmra.mxu1 %vm183_vm2, %v157_v42 }
  0x40   :  { %7420 = vmatmul.msk.f32.gmra.mxu2 %vm183_vm2, %v155_v31  ;;  %7429 = vmatmul.msk.f32.gmra.mxu3 %vm183_vm2, %v155_v31 }
  0x41   :  { %730 = vmatpush.msrb.mxu2 %v595_v4  ;;  %771 = vmatpush.msrb.mxu3 %v596_v6 }
  0x43   :  { %731 = vmatpush.msrb.mxu2 %v591_v8  ;;  %772 = vmatpush.msrb.mxu3 %v592_v10 }
  0x47   :  { %7404 = vmatmul.msk.f32.gmra.mxu0 %vm183_vm2, %v159_v47  ;;  %7413 = vmatmul.msk.f32.gmra.mxu1 %vm183_vm2, %v159_v47 }
  0x48   :  { %7421 = vmatmul.msk.f32.gmra.mxu2 %vm183_vm2, %v157_v42  ;;  %7430 = vmatmul.msk.f32.gmra.mxu3 %vm183_vm2, %v157_v42 }
  0x4f   :  { %7405 = vmatmul.msk.f32.gmra.mxu0 %vm183_vm2, %v161_v54  ;;  %7414 = vmatmul.msk.f32.gmra.mxu1 %vm183_vm2, %v161_v54 }
  0x50   :  { %7422 = vmatmul.msk.f32.gmra.mxu2 %vm183_vm2, %v159_v47  ;;  %7431 = vmatmul.msk.f32.gmra.mxu3 %vm183_vm2, %v159_v47 }
  0x57   :  { %7406 = vmatmul.msk.f32.gmra.mxu0 %vm183_vm2, %v163_v55  ;;  %7415 = vmatmul.msk.f32.gmra.mxu1 %vm183_vm2, %v163_v55 }
  0x58   :  { %7423 = vmatmul.msk.f32.gmra.mxu2 %vm183_vm2, %v161_v54  ;;  %7432 = vmatmul.msk.f32.gmra.mxu3 %vm183_vm2, %v161_v54 }
  0x5f   :  { %7436 = vmatmul.msk.f32.vlgmr.msrb.gmra.mxu0 %vm183_vm2, %v10570_v5  ;;  %7445 = vmatmul.msk.f32.vlgmr.msrb.gmra.mxu1 %vm183_vm2, %v10570_v5 }
  0x60   :  { %7424 = vmatmul.msk.f32.gmra.mxu2 %vm183_vm2, %v163_v55  ;;  %7433 = vmatmul.msk.f32.gmra.mxu3 %vm183_vm2, %v163_v55 }
  0x67   :  { %7437 = vmatmul.msk.f32.gmra.mxu0 %vm183_vm2, %v10575_v7  ;;  %7446 = vmatmul.msk.f32.gmra.mxu1 %vm183_vm2, %v10575_v7 }
  0x68   :  { %7425 = vmatmul.msk.f32.gmra.mxu2 %vm183_vm2, %v10589_v15  ;;  %7434 = vmatmul.msk.f32.gmra.mxu3 %vm183_vm2, %v10589_v15 }
  0x6f   :  { %7438 = vmatmul.msk.f32.gmra.mxu0 %vm183_vm2, %v10594_v18  ;;  %7447 = vmatmul.msk.f32.gmra.mxu1 %vm183_vm2, %v10594_v18 }
  0x70   :  { %7454 = vmatmul.msk.f32.vlgmr.msra.gmra.mxu2 %vm183_vm2, %v10570_v5  ;;  %7463 = vmatmul.msk.f32.vlgmr.msra.gmra.mxu3 %vm183_vm2, %v10570_v5 }
  0x77   :  { %7439 = vmatmul.msk.f32.gmra.mxu0 %vm183_vm2, %v10609_v27  ;;  %7448 = vmatmul.msk.f32.gmra.mxu1 %vm183_vm2, %v10609_v27 }
  0x78   :  { %7455 = vmatmul.msk.f32.gmra.mxu2 %vm183_vm2, %v10575_v7  ;;  %7464 = vmatmul.msk.f32.gmra.mxu3 %vm183_vm2, %v10575_v7  ;;  %v575_v7 = vsel %vm570_vm3, %v572_v12, %v574_v14 }
  0x7f   :  { %7440 = vmatmul.msk.f32.gmra.mxu0 %vm183_vm2, %v10622_v32  ;;  %7449 = vmatmul.msk.f32.gmra.mxu1 %vm183_vm2, %v10622_v32 }
  0x80   :  { %7456 = vmatmul.msk.f32.gmra.mxu2 %vm183_vm2, %v10594_v18  ;;  %7465 = vmatmul.msk.f32.gmra.mxu3 %vm183_vm2, %v10594_v18 }
  0x87   :  { %7441 = vmatmul.msk.f32.gmra.mxu0 %vm183_vm2, %v10635_v43  ;;  %7450 = vmatmul.msk.f32.gmra.mxu1 %vm183_vm2, %v10635_v43 }
  0x88   :  { %7457 = vmatmul.msk.f32.gmra.mxu2 %vm183_vm2, %v10609_v27  ;;  %7466 = vmatmul.msk.f32.gmra.mxu3 %vm183_vm2, %v10609_v27  ;;  %v579_v27 = vsel %vm570_vm3, %v576_v16, %v578_v22 }
  0x8f   :  { %7442 = vmatmul.msk.f32.gmra.mxu0 %vm183_vm2, %v10646_v48  ;;  %7451 = vmatmul.msk.f32.gmra.mxu1 %vm183_vm2, %v10646_v48 }
  0x90   :  { %7458 = vmatmul.msk.f32.gmra.mxu2 %vm183_vm2, %v10622_v32  ;;  %7467 = vmatmul.msk.f32.gmra.mxu3 %vm183_vm2, %v10622_v32 }
  0x97   :  { %7443 = vmatmul.msk.f32.gmra.mxu0 %vm183_vm2, %v10581_v9  ;;  %7452 = vmatmul.msk.f32.gmra.mxu1 %vm183_vm2, %v10581_v9 }
  0x98   :  { %7459 = vmatmul.msk.f32.gmra.mxu2 %vm183_vm2, %v10635_v43  ;;  %7468 = vmatmul.msk.f32.gmra.mxu3 %vm183_vm2, %v10635_v43 }
  0x9f   :  { %7472 = vmatmul.msk.f32.vlgmr.msra.gmra.mxu0 %vm183_vm2, %v573_v13  ;;  %7481 = vmatmul.msk.f32.vlgmr.msra.gmra.mxu1 %vm183_vm2, %v573_v13 }
  0xa0   :  { %7460 = vmatmul.msk.f32.gmra.mxu2 %vm183_vm2, %v10646_v48  ;;  %7469 = vmatmul.msk.f32.gmra.mxu3 %vm183_vm2, %v10646_v48 }
  0xa3   :  { %v10741_v15 = vpop.f32.mrf.mxu0 }
  0xa4   :  { %v10743_v5 = vpop.f32.mrf.mxu1 }
  0xa7   :  { %7473 = vmatmul.msk.f32.gmra.mxu0 %vm183_vm2, %v575_v7  ;;  %7482 = vmatmul.msk.f32.gmra.mxu1 %vm183_vm2, %v575_v7 }
  0xa8   :  { %7461 = vmatmul.msk.f32.gmra.mxu2 %vm183_vm2, %v10581_v9  ;;  %7470 = vmatmul.msk.f32.gmra.mxu3 %vm183_vm2, %v10581_v9 }
  0xa9   :  { %v10753_v17 = vpop.f32.mrf.mxu2 }
  0xaa   :  { %12802 = vst [vmem:[#allocation19_spill] sm:$0xff] %v10753_v17  ;;  %v10755_v18 = vpop.f32.mrf.mxu3 }
  0xab   :  { %12803 = vst [vmem:[#allocation20_spill] sm:$0xff] %v10755_v18 }
  0xac   :  { %v10757_v19 = vpop.f32.mrf.mxu0  ;;  %v10759_v20 = vpop.f32.mrf.mxu1 }
  0xaf   :  { %7474 = vmatmul.msk.f32.gmra.mxu0 %vm183_vm2, %v577_v21  ;;  %7483 = vmatmul.msk.f32.gmra.mxu1 %vm183_vm2, %v577_v21 }
  0xb0   :  { %7490 = vmatmul.msk.f32.vlgmr.msrb.gmra.mxu2 %vm183_vm2, %v573_v13  ;;  %7499 = vmatmul.msk.f32.vlgmr.msrb.gmra.mxu3 %vm183_vm2, %v573_v13 }
  0xb3   :  { %v10767_v23 = vpop.f32.mrf.mxu2  ;;  %v10769_v24 = vpop.f32.mrf.mxu3 }
  0xb4   :  { %v10771_v25 = vpop.f32.mrf.mxu0  ;;  %v10773_v26 = vpop.f32.mrf.mxu1 }
  0xb7   :  { %7475 = vmatmul.msk.f32.gmra.mxu0 %vm183_vm2, %v579_v27  ;;  %7484 = vmatmul.msk.f32.gmra.mxu1 %vm183_vm2, %v579_v27 }
  0xb8   :  { %7491 = vmatmul.msk.f32.gmra.mxu2 %vm183_vm2, %v575_v7  ;;  %7500 = vmatmul.msk.f32.gmra.mxu3 %vm183_vm2, %v575_v7 }
  0xbb   :  { %v10781_v29 = vpop.f32.mrf.mxu2  ;;  %v10783_v30 = vpop.f32.mrf.mxu3 }
  0xbc   :  { %v10785_v31 = vpop.f32.mrf.mxu0  ;;  %v10787_v32 = vpop.f32.mrf.mxu1 }
  0xbf   :  { %7476 = vmatmul.msk.f32.gmra.mxu0 %vm183_vm2, %v581_v33  ;;  %7485 = vmatmul.msk.f32.gmra.mxu1 %vm183_vm2, %v581_v33 }
  0xc0   :  { %7492 = vmatmul.msk.f32.gmra.mxu2 %vm183_vm2, %v577_v21  ;;  %7501 = vmatmul.msk.f32.gmra.mxu3 %vm183_vm2, %v577_v21 }
  0xc3   :  { %v10795_v35 = vpop.f32.mrf.mxu2  ;;  %v10797_v36 = vpop.f32.mrf.mxu3 }
  0xc4   :  { %v10799_v37 = vpop.f32.mrf.mxu0  ;;  %v10801_v38 = vpop.f32.mrf.mxu1 }
  0xc7   :  { %7477 = vmatmul.msk.f32.gmra.mxu0 %vm183_vm2, %v583_v39  ;;  %7486 = vmatmul.msk.f32.gmra.mxu1 %vm183_vm2, %v583_v39 }
  0xc8   :  { %7493 = vmatmul.msk.f32.gmra.mxu2 %vm183_vm2, %v579_v27  ;;  %7502 = vmatmul.msk.f32.gmra.mxu3 %vm183_vm2, %v579_v27 }
  0xcb   :  { %v10809_v41 = vpop.f32.mrf.mxu2  ;;  %v10811_v42 = vpop.f32.mrf.mxu3 }
  0xcc   :  { %v10813_v43 = vpop.f32.mrf.mxu0  ;;  %v10815_v44 = vpop.f32.mrf.mxu1 }
  0xcf   :  { %7478 = vmatmul.msk.f32.gmra.mxu0 %vm183_vm2, %v585_v45  ;;  %7487 = vmatmul.msk.f32.gmra.mxu1 %vm183_vm2, %v585_v45 }
  0xd0   :  { %7494 = vmatmul.msk.f32.gmra.mxu2 %vm183_vm2, %v581_v33  ;;  %7503 = vmatmul.msk.f32.gmra.mxu3 %vm183_vm2, %v581_v33 }
  0xd3   :  { %v10822_v46 = vpop.f32.mrf.mxu2  ;;  %v10824_v9 = vpop.f32.mrf.mxu3 }
  0xd4   :  { %v10826_v47 = vpop.f32.mrf.mxu0  ;;  %v10828_v48 = vpop.f32.mrf.mxu1 }
  0xd7   :  { %7479 = vmatmul.msk.f32.gmra.mxu0 %vm183_vm2, %v587_v49  ;;  %7488 = vmatmul.msk.f32.gmra.mxu1 %vm183_vm2, %v587_v49 }
  0xd8   :  { %7495 = vmatmul.msk.f32.gmra.mxu2 %vm183_vm2, %v583_v39  ;;  %7504 = vmatmul.msk.f32.gmra.mxu3 %vm183_vm2, %v583_v39 }
  0xdb   :  { %v10835_v50 = vpop.f32.mrf.mxu2  ;;  %v10837_v51 = vpop.f32.mrf.mxu3 }
  0xdc   :  { %12804 = vst [vmem:[#allocation21_spill] sm:$0xff] %v10837_v51  ;;  %v10839_v52 = vpop.f32.mrf.mxu0  ;;  %v10841_v53 = vpop.f32.mrf.mxu1 }
  0xe0   :  { %7496 = vmatmul.msk.f32.gmra.mxu2 %vm183_vm2, %v585_v45  ;;  %7505 = vmatmul.msk.f32.gmra.mxu3 %vm183_vm2, %v585_v45  ;;  %v830_v45 = vld [vmem:[#allocation5] sm:$0xf] }
  0xe3   :  { %v10845_v54 = vpop.f32.mrf.mxu2  ;;  %v10847_v55 = vpop.f32.mrf.mxu3 }
  0xe4   :  { %12805 = vst [vmem:[#allocation22_spill] sm:$0xff] %v10845_v54  ;;  %v426_v56 = vpop.f32.mrf.mxu0  ;;  %v467_v57 = vpop.f32.mrf.mxu1 }
  0xe5   :  { %12806 = vst [vmem:[#allocation23_spill] sm:$0xff] %v10847_v55 }
  0xe8   :  { %7497 = vmatmul.msk.f32.gmra.mxu2 %vm183_vm2, %v587_v49  ;;  %7506 = vmatmul.msk.f32.gmra.mxu3 %vm183_vm2, %v587_v49  ;;  %v427_v49 = vadd.f32 %v426_v56, %v10757_v19 }
  0xeb   :  { %v10851_v58 = vpop.f32.mrf.mxu2  ;;  %v10853_v59 = vpop.f32.mrf.mxu3 }
  0xec   :  { %12807 = vst [vmem:[#allocation24_spill] sm:$0xff] %v10851_v58  ;;  %v429_v60 = vpop.f32.mrf.mxu0  ;;  %v470_v61 = vpop.f32.mrf.mxu1 }
  0xed   :  { %12808 = vst [vmem:[#allocation25_spill] sm:$0xff] %v10853_v59  ;;  %v468_v59 = vadd.f32 %v467_v57, %v10759_v20  ;;  %v430_v56 = vadd.f32 %v429_v60, %v10771_v25  ;;  %v471_v57 = vadd.f32 %v470_v61, %v10773_v26 }
  0xf3   :  { %v505_v62 = vpop.f32.mrf.mxu2  ;;  %v546_v63 = vpop.f32.mrf.mxu3 }
  0xf4   :  { %v432_v0 = vpop.f32.mrf.mxu0  ;;  %v473_v1 = vpop.f32.mrf.mxu1 }
  0xfb   :  { %v10855_v2 = vpop.f32.mrf.mxu2  ;;  %v10857_v3 = vpop.f32.mrf.mxu3 }
  0xfc   :  { %v10859_v4 = vpop.f32.mrf.mxu0  ;;  %v10861_v6 = vpop.f32.mrf.mxu1 }
 0x103   :  { %v10863_v8 = vpop.f32.mrf.mxu2  ;;  %v10865_v10 = vpop.f32.mrf.mxu3 }
 0x104   :  { %v10867_v11 = vpop.f32.mrf.mxu0  ;;  %v10869_v12 = vpop.f32.mrf.mxu1 }
 0x10b   :  { %v10871_v13 = vpop.f32.mrf.mxu2  ;;  %v10873_v14 = vpop.f32.mrf.mxu3 }
 0x10c   :  { %v10875_v7 = vpop.f32.mrf.mxu0  ;;  %v10877_v16 = vpop.f32.mrf.mxu1 }
 0x113   :  { %v10879_v21 = vpop.f32.mrf.mxu2  ;;  %v10881_v22 = vpop.f32.mrf.mxu3 }
 0x114   :  { %v10883_v27 = vpop.f32.mrf.mxu0  ;;  %v10885_v28 = vpop.f32.mrf.mxu1 }
 0x115   :  { %12809 = vst [vmem:[#allocation26_spill] sm:$0xff] %v10883_v27  ;;  %v10903_v27 = vperm.slane %v830_v45, 1 }
 0x116   :  { %12810 = vst [vmem:[#allocation27_spill] sm:$0xff] %v10885_v28  ;;  %v10901_v28 = vperm.slane %v830_v45, 0 }
 0x11b   :  { %v10887_v33 = vpop.f32.mrf.mxu2  ;;  %v10889_v34 = vpop.f32.mrf.mxu3 }
 0x11c   :  { %12811 = vst [vmem:[#allocation28_spill] sm:$0xff] %v10887_v33  ;;  %v10891_v39 = vpop.f32.mrf.mxu0  ;;  %v10893_v40 = vpop.f32.mrf.mxu1 }
 0x11d   :  { %12812 = vst [vmem:[#allocation29_spill] sm:$0xff] %v10889_v34 }
 0x123   :  { %v10897_v58 = vpop.f32.mrf.mxu2  ;;  %v10899_v55 = vpop.f32.mrf.mxu3 }
 0x124   :  { %12813 = vst [vmem:[#allocation30_spill] sm:$0xff] %v10897_v58  ;;  %v654_v54 = vpop.f32.mrf.mxu0  ;;  %v695_v18 = vpop.f32.mrf.mxu1 }
 0x125   :  { %12814 = vst [vmem:[#allocation31_spill] sm:$0xff] %v10899_v55  ;;  %v802_v17 = vadd.f32 %v654_v54, %v427_v49  ;;  %v803_v34 = vadd.f32 %v695_v18, %v468_v59  ;;  %v506_v49 = vadd.f32 %v505_v62, %v10767_v23 }
 0x127   :  { %v10906_v51 = vadd.f32 %v10901_v28, %v802_v17  ;;  %v10909_v33 = vadd.f32 %v10903_v27, %v803_v34 }
 0x129   :  { %12815 = vst [vmem:[#allocation32_spill] sm:$0xff] %v10906_v51  ;;  %v12742_v19 = vmax.f32 %v10906_v51, 0.0  ;;  %v12743_v20 = vmax.f32 %v10909_v33, 0.0 }
 0x12b   :  { %v10915_v55 = vpop.f32.mrf.mxu2  ;;  %v10917_v58 = vpop.f32.mrf.mxu3  ;;  %v10171_v17 = vpack.i.bf16 %v12743_v20, %v12742_v19  ;;  %v547_v19 = vadd.f32 %v546_v63, %v10769_v24  ;;  %v10934_v20 = vperm.slane %v830_v45, 2 }
 0x12c   :  { %v657_v18 = vpop.f32.mrf.mxu0  ;;  %v698_v54 = vpop.f32.mrf.mxu1 }
 0x12d   :  { %v806_v59 = vadd.f32 %v657_v18, %v430_v56  ;;  %v807_v34 = vadd.f32 %v698_v54, %v471_v57  ;;  %10172 = vrot.lane.b32.xlu2 %v10171_v17, %s10502_s0  ;;  %v10936_v56 = vperm.slane %v830_v45, 3  ;;  %v433_v57 = vadd.f32 %v432_v0, %v10785_v31 }
 0x12e   :  { %v474_v17 = vadd.f32 %v473_v1, %v10787_v32 }
 0x12f   :  { %v10925_v25 = vadd.f32 %v10901_v28, %v806_v59  ;;  %v10928_v26 = vadd.f32 %v10903_v27, %v807_v34 }
 0x131   :  { %v880_v60 = vmax.f32 %v10925_v25, 0.0  ;;  %v881_v61 = vmax.f32 %v10928_v26, 0.0 }
 0x133   :  { %v733_v18 = vpop.f32.mrf.mxu2  ;;  %v774_v54 = vpop.f32.mrf.mxu3  ;;  %v10176_v59 = vpack.i.bf16 %v881_v61, %v880_v60 }
 0x134   :  { %v800_v34 = vadd.f32 %v733_v18, %v506_v49  ;;  %v801_v51 = vadd.f32 %v774_v54, %v547_v19  ;;  %v660_v23 = vpop.f32.mrf.mxu0  ;;  %v701_v62 = vpop.f32.mrf.mxu1 }
 0x135   :  { %v810_v24 = vadd.f32 %v660_v23, %v433_v57  ;;  %v811_v63 = vadd.f32 %v701_v62, %v474_v17  ;;  %10177 = vrot.lane.b32.xlu2 %v10176_v59, %s10502_s0  ;;  %v509_v17 = vadd.f32 %v10855_v2, %v10781_v29 }
 0x136   :  { %v10946_v45 = vadd.f32 %v10934_v20, %v800_v34  ;;  %v10949_v31 = vadd.f32 %v10936_v56, %v801_v51  ;;  %v550_v51 = vadd.f32 %v10857_v3, %v10783_v30 }
 0x137   :  { %v10952_v32 = vadd.f32 %v10901_v28, %v810_v24  ;;  %v10955_v0 = vadd.f32 %v10903_v27, %v811_v63 }
 0x138   :  { %v874_v1 = vmax.f32 %v10946_v45, 0.0  ;;  %v875_v19 = vmax.f32 %v10949_v31, 0.0 }
 0x139   :  { %v12746_v49 = vmax.f32 %v10952_v32, 0.0  ;;  %v12745_v57 = vmax.f32 %v10955_v0, 0.0 }
 0x13a   :  { %v10151_v18 = vpack.i.bf16 %v875_v19, %v874_v1 }
 0x13b   :  { %v736_v54 = vpop.f32.mrf.mxu2  ;;  %v777_v59 = vpop.f32.mrf.mxu3  ;;  %v10191_v34 = vpack.i.bf16 %v12745_v57, %v12746_v49 }
 0x13c   :  { %v804_v23 = vadd.f32 %v736_v54, %v509_v17  ;;  %v805_v62 = vadd.f32 %v777_v59, %v550_v51  ;;  %10152 = vrot.lane.b32.xlu0 %v10151_v18, %s10502_s0  ;;  %v663_v29 = vpop.f32.mrf.mxu0  ;;  %v704_v2 = vpop.f32.mrf.mxu1  ;;  %v512_v17 = vadd.f32 %v10863_v8, %v10795_v35  ;;  %v553_v51 = vadd.f32 %v10865_v10, %v10797_v36 }
 0x13d   :  { %10192 = vrot.lane.b32.xlu2 %v10191_v34, %s10502_s0  ;;  %v424_v54 = vadd.f32 %v10839_v52, %v10741_v15  ;;  %v465_v59 = vadd.f32 %v10841_v53, %v10743_v5 }
 0x13e   :  { %v10976_v30 = vadd.f32 %v10934_v20, %v804_v23  ;;  %v10979_v3 = vadd.f32 %v10936_v56, %v805_v62 }
 0x13f   :  { %v798_v36 = vadd.f32 %v10891_v39, %v424_v54  ;;  %v799_v10 = vadd.f32 %v10893_v40, %v465_v59  ;;  %v515_v39 = vadd.f32 %v10871_v13, %v10809_v41  ;;  %v556_v40 = vadd.f32 %v10873_v14, %v10811_v42 }
 0x140   :  { %v878_v24 = vmax.f32 %v10976_v30, 0.0  ;;  %v879_v63 = vmax.f32 %v10979_v3, 0.0  ;;  %v477_v41 = vadd.f32 %v10861_v6, %v10801_v38  ;;  %v7509_v3 = vld [vmem:[#allocation7 + $0x360] sm:$0xf] }
 0x141   :  { %v11007_v53 = vadd.f32 %v10901_v28, %v798_v36  ;;  %v7637_v30 = vld [vmem:[#allocation7 + $0x460] sm:$0xf] }
 0x142   :  { %v10156_v18 = vpack.i.bf16 %v879_v63, %v878_v24  ;;  %v815_v36 = vadd.f32 %v704_v2, %v477_v41  ;;  %v559_v2 = vadd.f32 %v10881_v22, %v10824_v9  ;;  %v480_v9 = vadd.f32 %v10869_v12, %v10815_v44 }
 0x143   :  { %v739_v34 = vpop.f32.mrf.mxu2  ;;  %v780_v23 = vpop.f32.mrf.mxu3 }
 0x144   :  { %v808_v62 = vadd.f32 %v739_v34, %v512_v17  ;;  %v809_v57 = vadd.f32 %v780_v23, %v553_v51  ;;  %10157 = vrot.lane.b32.xlu0 %v10156_v18, %s10502_s0  ;;  %v666_v35 = vpop.f32.mrf.mxu0  ;;  %v707_v8 = vpop.f32.mrf.mxu1  ;;  %v11010_v17 = vadd.f32 %v10903_v27, %v799_v10  ;;  %v442_v51 = vadd.f32 %v10875_v7, %v10826_v47 }
 0x145   :  { %v483_v18 = vadd.f32 %v10877_v16, %v10828_v48  ;;  %v436_v34 = vadd.f32 %v10859_v4, %v10799_v37  ;;  %v819_v41 = vadd.f32 %v707_v8, %v480_v9  ;;  %v12816_v8 = vld [vmem:[#allocation28_spill] sm:$0xff] }
 0x146   :  { %v10999_v49 = vadd.f32 %v10934_v20, %v808_v62  ;;  %v11002_v15 = vadd.f32 %v10936_v56, %v809_v57  ;;  %v872_v62 = vmax.f32 %v11007_v53, 0.0  ;;  %v873_v47 = vmax.f32 %v11010_v17, 0.0 }
 0x147   :  { %v814_v16 = vadd.f32 %v663_v29, %v436_v34  ;;  %v518_v29 = vadd.f32 %v10879_v21, %v10822_v46  ;;  %v439_v46 = vadd.f32 %v10867_v11, %v10813_v43 }
 0x148   :  { %v882_v5 = vmax.f32 %v10999_v49, 0.0  ;;  %v883_v52 = vmax.f32 %v11002_v15, 0.0 }
 0x149   :  { %v818_v34 = vadd.f32 %v666_v35, %v439_v46  ;;  %v11083_v35 = vadd.f32 %v10903_v27, %v819_v41  ;;  %v12820_v46 = vld [vmem:[#allocation26_spill] sm:$0xff] }
 0x14a   :  { %v10161_v57 = vpack.i.bf16 %v883_v52, %v882_v5 }
 0x14b   :  { %v742_v54 = vpop.f32.mrf.mxu2  ;;  %v783_v59 = vpop.f32.mrf.mxu3  ;;  %v11080_v12 = vadd.f32 %v10901_v28, %v818_v34 }
 0x14c   :  { %v812_v42 = vadd.f32 %v742_v54, %v515_v39  ;;  %v813_v13 = vadd.f32 %v783_v59, %v556_v40  ;;  %10162 = vrot.lane.b32.xlu1 %v10161_v57, %s10502_s0  ;;  %v669_v14 = vpop.f32.mrf.mxu0  ;;  %v710_v23 = vpop.f32.mrf.mxu1  ;;  %v11050_v40 = vadd.f32 %v10901_v28, %v814_v16  ;;  %v11053_v57 = vadd.f32 %v10903_v27, %v815_v36 }
 0x14d   :  { %v822_v7 = vadd.f32 %v669_v14, %v442_v51  ;;  %v823_v48 = vadd.f32 %v710_v23, %v483_v18  ;;  %v10166_v18 = vpack.i.bf16 %v873_v47, %v872_v62  ;;  %v521_v23 = vadd.f32 %v12816_v8, %v10835_v50 }
 0x14e   :  { %v11032_v10 = vadd.f32 %v10934_v20, %v812_v42  ;;  %v11035_v37 = vadd.f32 %v10936_v56, %v813_v13  ;;  %v12761_v42 = vmax.f32 %v11050_v40, 0.0  ;;  %v12748_v13 = vmax.f32 %v11053_v57, 0.0 }
 0x14f   :  { %v11038_v38 = vadd.f32 %v10901_v28, %v822_v7  ;;  %v11041_v4 = vadd.f32 %v10903_v27, %v823_v48  ;;  %v12817_v7 = vld [vmem:[#allocation21_spill] sm:$0xff]  ;;  %v12750_v8 = vmax.f32 %v11080_v12, 0.0 }
 0x150   :  { %v12763_v6 = vmax.f32 %v11032_v10, 0.0  ;;  %v887_v39 = vmax.f32 %v11035_v37, 0.0  ;;  %v12818_v48 = vld [vmem:[#allocation29_spill] sm:$0xff] }
 0x151   :  { %v562_v16 = vadd.f32 %v12818_v48, %v12817_v7  ;;  %v12749_v7 = vmax.f32 %v11083_v35, 0.0 }
 0x152   :  { %v10181_v51 = vpack.i.bf16 %v887_v39, %v12763_v6 }
 0x153   :  { %v745_v21 = vpop.f32.mrf.mxu2  ;;  %v786_v22 = vpop.f32.mrf.mxu3 }
 0x154   :  { %v816_v54 = vadd.f32 %v745_v21, %v518_v29  ;;  %v817_v59 = vadd.f32 %v786_v22, %v559_v2  ;;  %10182 = vrot.lane.b32.xlu0 %v10181_v51, %s10502_s0  ;;  %10167 = vrot.lane.b32.xlu1 %v10166_v18, %s10502_s0  ;;  %v672_v36 = vpop.f32.mrf.mxu0  ;;  %v713_v29 = vpop.f32.mrf.mxu1  ;;  %v10196_v2 = vpack.i.bf16 %v12748_v13, %v12761_v42  ;;  %v12819_v18 = vld [vmem:[#allocation19_spill] sm:$0xff]  ;;  %v12821_v22 = vld [vmem:[#allocation20_spill] sm:$0xff] }
 0x155   :  { %v445_v9 = vadd.f32 %v12820_v46, %v12819_v18 }
 0x156   :  { %v11072_v14 = vadd.f32 %v10934_v20, %v816_v54  ;;  %v11075_v43 = vadd.f32 %v10936_v56, %v817_v59  ;;  %v12822_v54 = vld [vmem:[#allocation27_spill] sm:$0xff] }
 0x157   :  { %v486_v59 = vadd.f32 %v12822_v54, %v12821_v22  ;;  %v826_v48 = vadd.f32 %v672_v36, %v445_v9 }
 0x158   :  { %v12747_v44 = vmax.f32 %v11072_v14, 0.0  ;;  %v12762_v11 = vmax.f32 %v11075_v43, 0.0 }
 0x159   :  { %v11118_v54 = vadd.f32 %v10901_v28, %v826_v48 }
 0x15a   :  { %v10186_v51 = vpack.i.bf16 %v12762_v11, %v12747_v44  ;;  %v827_v44 = vadd.f32 %v713_v29, %v486_v59  ;;  %v10211_v29 = vpack.i.bf16 %v12749_v7, %v12750_v8 }
 0x15b   :  { %v748_v21 = vpop.f32.mrf.mxu2  ;;  %v789_v50 = vpop.f32.mrf.mxu3 }
 0x15c   :  { %v820_v34 = vadd.f32 %v748_v21, %v521_v23  ;;  %v821_v41 = vadd.f32 %v789_v50, %v562_v16  ;;  %10197 = vrot.lane.b32.xlu0 %v10196_v2, %s10502_s0  ;;  %10187 = vrot.lane.b32.xlu1 %v10186_v51, %s10502_s0  ;;  %v12823_v16 = vld [vmem:[#allocation22_spill] sm:$0xff]  ;;  %v12825_v51 = vld [vmem:[#allocation23_spill] sm:$0xff]  ;;  %v11121_v36 = vadd.f32 %v10903_v27, %v827_v44  ;;  %v12752_v27 = vmax.f32 %v11118_v54, 0.0 }
 0x15d   :  { %v12824_v2 = vld [vmem:[#allocation30_spill] sm:$0xff]  ;;  %v12826_v50 = vld [vmem:[#allocation31_spill] sm:$0xff] }
 0x15e   :  { %v11106_v13 = vadd.f32 %v10934_v20, %v820_v34  ;;  %v11109_v18 = vadd.f32 %v10936_v56, %v821_v41  ;;  %v524_v21 = vadd.f32 %v12824_v2, %v12823_v16  ;;  %v565_v22 = vadd.f32 %v12826_v50, %v12825_v51 }
 0x15f   :  { %v12751_v28 = vmax.f32 %v11121_v36, 0.0  ;;  %v12753_v2 = vmax.f32 %v11038_v38, 0.0  ;;  %v12754_v51 = vmax.f32 %v11041_v4, 0.0 }
 0x160   :  { %v12755_v46 = vmax.f32 %v11106_v13, 0.0  ;;  %v12757_v23 = vmax.f32 %v11109_v18, 0.0 }
 0x162   :  { %v10201_v9 = vpack.i.bf16 %v12757_v23, %v12755_v46  ;;  %v7845_v23 = vld [vmem:[#allocation7 + $0x600] sm:$0xf] }
 0x163   :  { %v751_v59 = vpop.f32.mrf.mxu2  ;;  %v792_v34 = vpop.f32.mrf.mxu3 }
 0x164   :  { %v824_v41 = vadd.f32 %v751_v59, %v524_v21  ;;  %v825_v16 = vadd.f32 %v792_v34, %v565_v22  ;;  %10212 = vrot.lane.b32.xlu0 %v10211_v29, %s10502_s0  ;;  %10202 = vrot.lane.b32.xlu1 %v10201_v9, %s10502_s0  ;;  %v12827_v22 = vld [vmem:[#allocation24_spill] sm:$0xff]  ;;  %v12828_v9 = vld [vmem:[#allocation25_spill] sm:$0xff]  ;;  %v10226_v34 = vpack.i.bf16 %v12751_v28, %v12752_v27 }
 0x165   :  { %v527_v29 = vadd.f32 %v10915_v55, %v12827_v22  ;;  %v568_v59 = vadd.f32 %v10917_v58, %v12828_v9  ;;  %v10216_v55 = vpack.i.bf16 %v12754_v51, %v12753_v2  ;;  %v9760_v2 = vld [vmem:[#allocation7 + $0x44c] sm:$0xf0]  ;;  %v7749_v51 = vld [vmem:[#allocation7 + $0x540] sm:$0xf] }
 0x166   :  { %v11136_v44 = vadd.f32 %v10934_v20, %v824_v41  ;;  %v11139_v48 = vadd.f32 %v10936_v56, %v825_v16 }
 0x168   :  { %v12756_v21 = vmax.f32 %v11136_v44, 0.0  ;;  %v12760_v50 = vmax.f32 %v11139_v48, 0.0 }
 0x16a   :  { %v10206_v41 = vpack.i.bf16 %v12760_v50, %v12756_v21  ;;  %v9792_v21 = vld [vmem:[#allocation7 + $0x54c] sm:$0xf0]  ;;  %v7829_v50 = vld [vmem:[#allocation7 + $0x5e0] sm:$0xf] }
 0x16b   :  { %v754_v16 = vpop.f32.mrf.mxu2  ;;  %v795_v7 = vpop.f32.mrf.mxu3 }
 0x16c   :  { %v828_v22 = vadd.f32 %v754_v16, %v527_v29  ;;  %v829_v8 = vadd.f32 %v795_v7, %v568_v59  ;;  %10227 = vrot.lane.b32.xlu0 %v10226_v34, %s10502_s0  ;;  %10207 = vrot.lane.b32.xlu2 %v10206_v41, %s10502_s0  ;;  %v7877_v29 = vld [vmem:[#allocation7 + $0x640] sm:$0xf]  ;;  %v9824_v59 = vld [vmem:[#allocation7 + $0x64c] sm:$0xf0] }
 0x16d   :  { %10217 = vrot.lane.b32.xlu1 %v10216_v55, %s10502_s0  ;;  %v7878_v34 = vor.u32 %v9824_v59, %v7877_v29  ;;  %v9820_v41 = vld [vmem:[#allocation7 + $0x62c] sm:$0xf0]  ;;  %v7621_v55 = vld [vmem:[#allocation7 + $0x440] sm:$0xf] }
 0x16e   :  { %v11165_v58 = vadd.f32 %v10934_v20, %v828_v22  ;;  %v11168_v9 = vadd.f32 %v10936_v56, %v829_v8  ;;  %v7861_v20 = vld [vmem:[#allocation7 + $0x620] sm:$0xf]  ;;  %v9836_v8 = vld [vmem:[#allocation7 + $0x6ac] sm:$0xf0]  ;;  %v7622_v46 = vor.u32 %v9760_v2, %v7621_v55 }
 0x16f   :  { %2293 = vmatpush.bf16.msra.mxu2 %v7878_v34  ;;  %v7862_v16 = vor.u32 %v9820_v41, %v7861_v20  ;;  %v7925_v56 = vld [vmem:[#allocation7 + $0x6a0] sm:$0xf]  ;;  %v9756_v59 = vld [vmem:[#allocation7 + $0x42c] sm:$0xf0] }
 0x170   :  { %v12758_v28 = vmax.f32 %v11165_v58, 0.0  ;;  %v12759_v27 = vmax.f32 %v11168_v9, 0.0  ;;  %v7926_v22 = vor.u32 %v9836_v8, %v7925_v56  ;;  %2235 = vmatpush.bf16.msrb.mxu0 %v7622_v46  ;;  %v7605_v29 = vld [vmem:[#allocation7 + $0x420] sm:$0xf]  ;;  %v9788_v41 = vld [vmem:[#allocation7 + $0x52c] sm:$0xf0] }
 0x171   :  { %v7733_v34 = vld [vmem:[#allocation7 + $0x520] sm:$0xf]  ;;  %v7606_v20 = vor.u32 %v9756_v59, %v7605_v29  ;;  %v9812_v56 = vld [vmem:[#allocation7 + $0x5ec] sm:$0xf0] }
 0x172   :  { %v10221_v7 = vpack.i.bf16 %v12759_v27, %v12758_v28  ;;  %v9816_v28 = vld [vmem:[#allocation7 + $0x60c] sm:$0xf0]  ;;  %2327 = vmatpush.bf16.msra.mxu3 %v7926_v22  ;;  %v7734_v8 = vor.u32 %v9788_v41, %v7733_v34  ;;  %v7830_v42 = vor.u32 %v9812_v56, %v7829_v50  ;;  %v7589_v2 = vld [vmem:[#allocation7 + $0x400] sm:$0xf] }
 0x173   :  { %2294 = vmatpush.bf16.msra.mxu2 %v7862_v16  ;;  %v7846_v27 = vor.u32 %v9816_v28, %v7845_v23  ;;  %v9752_v16 = vld [vmem:[#allocation7 + $0x40c] sm:$0xf0]  ;;  %v7717_v55 = vld [vmem:[#allocation7 + $0x500] sm:$0xf] }
 0x174   :  { %10222 = vrot.lane.b32.xlu2 %v10221_v7, %s10502_s0  ;;  %v7750_v7 = vor.u32 %v9792_v21, %v7749_v51  ;;  %2236 = vmatpush.bf16.msrb.mxu0 %v7606_v20  ;;  %v7590_v51 = vor.u32 %v9752_v16, %v7589_v2  ;;  %v9784_v23 = vld [vmem:[#allocation7 + $0x50c] sm:$0xf0]  ;;  %v7813_v46 = vld [vmem:[#allocation7 + $0x5c0] sm:$0xf] }
 0x175   :  { %v9808_v28 = vld [vmem:[#allocation7 + $0x5cc] sm:$0xf0]  ;;  %v7573_v22 = vld [vmem:[#allocation7 + $0x3e0] sm:$0xf] }
 0x176   :  { %2264 = vmatpush.bf16.msrb.mxu1 %v7750_v7  ;;  %v7814_v21 = vor.u32 %v9808_v28, %v7813_v46  ;;  %v9748_v7 = vld [vmem:[#allocation7 + $0x3ec] sm:$0xf0]  ;;  %v7701_v29 = vld [vmem:[#allocation7 + $0x4e0] sm:$0xf] }
 0x177   :  { %2295 = vmatpush.bf16.msra.mxu2 %v7846_v27  ;;  %v7718_v27 = vor.u32 %v9784_v23, %v7717_v55  ;;  %v7574_v59 = vor.u32 %v9748_v7, %v7573_v22  ;;  %v9780_v50 = vld [vmem:[#allocation7 + $0x4ec] sm:$0xf0]  ;;  %v7797_v34 = vld [vmem:[#allocation7 + $0x5a0] sm:$0xf] }
 0x178   :  { %2237 = vmatpush.bf16.msrb.mxu0 %v7590_v51  ;;  %v9804_v20 = vld [vmem:[#allocation7 + $0x5ac] sm:$0xf0]  ;;  %v7909_v56 = vld [vmem:[#allocation7 + $0x680] sm:$0xf] }
 0x179   :  { %v7798_v41 = vor.u32 %v9804_v20, %v7797_v34  ;;  %v7557_v16 = vld [vmem:[#allocation7 + $0x3c0] sm:$0xf]  ;;  %v9744_v55 = vld [vmem:[#allocation7 + $0x3cc] sm:$0xf0] }
 0x17a   :  { %2265 = vmatpush.bf16.msrb.mxu1 %v7734_v8  ;;  %v9832_v8 = vld [vmem:[#allocation7 + $0x68c] sm:$0xf0]  ;;  %v7685_v51 = vld [vmem:[#allocation7 + $0x4c0] sm:$0xf]  ;;  %v7558_v23 = vor.u32 %v9744_v55, %v7557_v16 }
 0x17b   :  { %2296 = vmatpush.bf16.msra.mxu2 %v7830_v42  ;;  %v7702_v42 = vor.u32 %v9780_v50, %v7701_v29  ;;  %v7910_v2 = vor.u32 %v9832_v8, %v7909_v56  ;;  %v9776_v46 = vld [vmem:[#allocation7 + $0x4cc] sm:$0xf0]  ;;  %v7781_v28 = vld [vmem:[#allocation7 + $0x580] sm:$0xf] }
 0x17c   :  { %2238 = vmatpush.bf16.msrb.mxu0 %v7574_v59  ;;  %v7541_v29 = vld [vmem:[#allocation7 + $0x3a0] sm:$0xf]  ;;  %v9740_v59 = vld [vmem:[#allocation7 + $0x3ac] sm:$0xf0] }
 0x17d   :  { %2328 = vmatpush.bf16.msra.mxu3 %v7910_v2  ;;  %v7669_v50 = vld [vmem:[#allocation7 + $0x4a0] sm:$0xf]  ;;  %v7542_v20 = vor.u32 %v9740_v59, %v7541_v29  ;;  %v9796_v56 = vld [vmem:[#allocation7 + $0x56c] sm:$0xf0] }
 0x17e   :  { %2266 = vmatpush.bf16.msrb.mxu1 %v7718_v27  ;;  %v9800_v27 = vld [vmem:[#allocation7 + $0x58c] sm:$0xf0]  ;;  %v7893_v16 = vld [vmem:[#allocation7 + $0x660] sm:$0xf] }
 0x17f   :  { %2297 = vmatpush.bf16.msra.mxu2 %v7814_v21  ;;  %v7686_v21 = vor.u32 %v9776_v46, %v7685_v51  ;;  %v7782_v22 = vor.u32 %v9800_v27, %v7781_v28  ;;  %v9828_v55 = vld [vmem:[#allocation7 + $0x66c] sm:$0xf0] }
 0x180   :  { %2239 = vmatpush.bf16.msrb.mxu0 %v7558_v23  ;;  %v7894_v23 = vor.u32 %v9828_v55, %v7893_v16  ;;  %v9768_v16 = vld [vmem:[#allocation7 + $0x48c] sm:$0xf0] }
 0x182   :  { %2267 = vmatpush.bf16.msrb.mxu1 %v7702_v42  ;;  %v9772_v42 = vld [vmem:[#allocation7 + $0x4ac] sm:$0xf0]  ;;  %2329 = vmatpush.bf16.msra.mxu3 %v7894_v23 }
 0x183   :  { %2298 = vmatpush.bf16.msra.mxu2 %v7798_v41  ;;  %v7765_v41 = vld [vmem:[#allocation7 + $0x560] sm:$0xf]  ;;  %v7670_v8 = vor.u32 %v9772_v42, %v7669_v50 }
 0x184   :  { %v7766_v2 = vor.u32 %v9796_v56, %v7765_v41  ;;  %2240 = vmatpush.bf16.msrb.mxu0 %v7542_v20  ;;  %v7525_v42 = vld [vmem:[#allocation7 + $0x380] sm:$0xf]  ;;  %v9736_v41 = vld [vmem:[#allocation7 + $0x38c] sm:$0xf0] }
 0x185   :  { %v7526_v23 = vor.u32 %v9736_v41, %v7525_v42 }
 0x186   :  { %2268 = vmatpush.bf16.msrb.mxu1 %v7686_v21 }
 0x187   :  { %2299 = vmatpush.bf16.msra.mxu2 %v7782_v22  ;;  %v11179_v34 = vpop.permute.xlu2 %10172 }
 0x188   :  { %2241 = vmatpush.bf16.msrb.mxu0 %v7526_v23 }
 0x18a   :  { %2269 = vmatpush.bf16.msrb.mxu1 %v7670_v8 }
 0x18b   :  { %2300 = vmatpush.bf16.msra.mxu2 %v7766_v2  ;;  %v7653_v2 = vld [vmem:[#allocation7 + $0x480] sm:$0xf] }
 0x18c   :  { %v7654_v31 = vor.u32 %v9768_v16, %v7653_v2  ;;  %v10175_v2 = vunpack.i.h.bf16 %v11179_v34 }
 0x18e   :  { %2270 = vmatpush.bf16.msrb.mxu1 %v7654_v31 }
 0x18f   :  { %v10178_v56 = vpop.permute.xlu2 %10177 }
 0x190   :  { %v10180_v45 = vunpack.i.h.bf16 %v10178_v56 }
 0x1ae   :  { %v11177_v7 = vpop.permute.xlu0 %10152 }
 0x1af   :  { %v10155_v51 = vunpack.i.h.bf16 %v11177_v7  ;;  %v10154_v46 = vunpack.i.l.bf16 %v11177_v7 }
 0x1b1   :  { %v1003_v28 = vsel %vm1000_vm4, %v10154_v46, %v10155_v51  ;;  %v1060_v29 = vmax.f32 %v875_v19, %v10155_v51 }
 0x1b2   :  { %v1059_v59 = vmax.f32 %v874_v1, %v1003_v28  ;;  %v10179_v1 = vunpack.i.l.bf16 %v10178_v56  ;;  %v10174_v56 = vunpack.i.l.bf16 %v11179_v34 }
 0x1b3   :  { %v1130_v19 = vrot.slane %v1060_v29, 1 }
 0x1b4   :  { %v1127_v28 = vrot.slane %v1059_v59, 1  ;;  %v1007_v16 = vsel %vm1000_vm4, %v10179_v1, %v10180_v45 }
 0x1b6   :  { %v10158_v27 = vpop.permute.xlu0 %10157 }
 0x1b7   :  { %v10160_v21 = vunpack.i.h.bf16 %v10158_v27  ;;  %v10159_v22 = vunpack.i.l.bf16 %v10158_v27 }
 0x1b9   :  { %v1064_v50 = vmax.f32 %v879_v63, %v10160_v21  ;;  %v1006_v20 = vsel %vm1000_vm4, %v10159_v22, %v10160_v21  ;;  %v9732_v63 = vld [vmem:[#allocation7 + $0x36c] sm:$0xf0]  ;;  %v1005_v34 = vsel %vm1000_vm4, %v10175_v2, %v10159_v22 }
 0x1ba   :  { %v1063_v8 = vmax.f32 %v878_v24, %v1006_v20  ;;  %v7510_v11 = vor.u32 %v9732_v63, %v7509_v3  ;;  %v9764_v24 = vld [vmem:[#allocation7 + $0x46c] sm:$0xf0] }
 0x1bb   :  { %v1131_v55 = vrot.slane %v1064_v50, 1  ;;  %v7638_v41 = vor.u32 %v9764_v24, %v7637_v30 }
 0x1bc   :  { %v1128_v51 = vrot.slane %v1063_v8, 1  ;;  %2242 = vmatpush.bf16.msrb.mxu0 %v7510_v11 }
 0x1bd   :  { %v1132_v27 = vsel %vm148_vm1, %v1130_v19, %v1131_v55  ;;  %2271 = vmatpush.bf16.msrb.mxu1 %v7638_v41  ;;  %v10193_v41 = vpop.permute.xlu2 %10192 }
 0x1be   :  { %v10163_v21 = vpop.permute.xlu1 %10162  ;;  %v1129_v20 = vsel %vm148_vm1, %v1127_v28, %v1128_v51  ;;  %v1220_v3 = vmax.f32 %v1060_v29, %v1132_v27  ;;  %v12830_v27 = vld [vmem:[#allocation32_spill] sm:$0xff] }
 0x1bf   :  { %v10165_v6 = vunpack.i.h.bf16 %v10163_v21  ;;  %v10164_v42 = vunpack.i.l.bf16 %v10163_v21  ;;  %v1219_v19 = vmax.f32 %v1059_v59, %v1129_v20  ;;  %v12831_v21 = vmax.f32 %v12830_v27, 0.0 }
 0x1c1   :  { %v11202_v23 = vmax.f32 %v883_v52, %v10165_v6  ;;  %v1009_v31 = vsel %vm1000_vm4, %v10164_v42, %v10165_v6  ;;  %v1008_v28 = vsel %vm1000_vm4, %v10180_v45, %v10164_v42  ;;  %v1004_v52 = vsel %vm1000_vm4, %v10174_v56, %v10175_v2 }
 0x1c2   :  { %v11208_v63 = vmax.f32 %v882_v5, %v1009_v31  ;;  %v11216_v6 = vmax.f32 %v880_v60, %v1007_v16  ;;  %v11220_v11 = vmax.f32 %v881_v61, %v1008_v28  ;;  %v12829_v5 = vmax.f32 %v10909_v33, 0.0 }
 0x1c3   :  { %v1139_v1 = vrot.slane %v11202_v23, 1  ;;  %v1323_v29 = vpack.c.bf16 %v1220_v3, %v1219_v19  ;;  %v1061_v26 = vmax.f32 %v12831_v21, %v1004_v52  ;;  %v10195_v28 = vunpack.i.h.bf16 %v10193_v41 }
 0x1c4   :  { %v1137_v15 = vrot.slane %v11208_v63, 1  ;;  %v1062_v22 = vmax.f32 %v12829_v5, %v1005_v34  ;;  %v1135_v30 = vrot.slane %v11220_v11, 1  ;;  %v1249_v34 = vlaneseq }
 0x1c5   :  { %v1140_v49 = vsel %vm148_vm1, %v1131_v55, %v1139_v1  ;;  %v1133_v55 = vrot.slane %v11216_v6, 1  ;;  %v1356_v33 = vunpack.c.l.b16 %v1323_v29  ;;  %v1357_v42 = vunpack.c.h.b16 %v1323_v29 }
 0x1c6   :  { %v1138_v59 = vsel %vm148_vm1, %v1128_v51, %v1137_v15  ;;  %v1224_v45 = vmax.f32 %v1064_v50, %v1140_v49  ;;  %v10168_v60 = vpop.permute.xlu1 %10167  ;;  %v10183_v61 = vpop.permute.xlu0 %10182  ;;  %v1125_v20 = vrot.slane %v1062_v22, 1  ;;  %v1122_v50 = vrot.slane %v1061_v26, 1 }
 0x1c7   :  { %v1223_v25 = vmax.f32 %v1063_v8, %v1138_v59  ;;  %v10170_v16 = vunpack.i.h.bf16 %v10168_v60  ;;  %v10169_v51 = vunpack.i.l.bf16 %v10168_v60  ;;  %v10185_v52 = vunpack.i.h.bf16 %v10183_v61 }
 0x1c8   :  { %v1136_v8 = vsel %vm148_vm1, %v1125_v20, %v1135_v30  ;;  %v1134_v3 = vsel %vm148_vm1, %v1122_v50, %v1133_v55  ;;  %v10184_v49 = vunpack.i.l.bf16 %v10183_v61 }
 0x1c9   :  { %v1325_v24 = vpack.c.bf16 %v1224_v45, %v1223_v25  ;;  %v1002_v5 = vsel %vm1000_vm4, %v10170_v16, %v10154_v46  ;;  %v1001_v29 = vsel %vm1000_vm4, %v10169_v51, %v10170_v16  ;;  %v10194_v45 = vunpack.i.l.bf16 %v10193_v41 }
 0x1ca   :  { %v1222_v25 = vmax.f32 %v1062_v22, %v1136_v8  ;;  %v1058_v60 = vmax.f32 %v873_v47, %v1002_v5  ;;  %v1057_v27 = vmax.f32 %v872_v62, %v1001_v29  ;;  %v1221_v21 = vmax.f32 %v1061_v26, %v1134_v3 }
 0x1cb   :  { %v1360_v2 = vunpack.c.l.b16 %v1325_v24  ;;  %v1361_v56 = vunpack.c.h.b16 %v1325_v24  ;;  %v1010_v22 = vsel %vm1000_vm4, %v10194_v45, %v10195_v28  ;;  %v1072_v26 = vmax.f32 %v887_v39, %v10185_v52 }
 0x1cc   :  { %v1124_v7 = vrot.slane %v1058_v60, 1  ;;  %v1121_v61 = vrot.slane %v1057_v27, 1  ;;  %v1324_v41 = vpack.c.bf16 %v1222_v25, %v1221_v21  ;;  %v12833_v16 = vmax.f32 %v11032_v10, 0.0  ;;  %v11281_v21 = vpop.permute.xlu2 %10207 }
 0x1cd   :  { %v11237_v31 = vpack.c.b16 %v1360_v2, %v1356_v33  ;;  %v11239_v19 = vpack.c.b16 %v1361_v56, %v1357_v42  ;;  %v1012_v33 = vsel %vm1000_vm4, %v10184_v49, %v10185_v52  ;;  %v11256_v42 = vshrl.u32 %v1249_v34, 7 }
 0x1ce   :  { %v10188_v59 = vpop.permute.xlu1 %10187  ;;  %v10198_v46 = vpop.permute.xlu0 %10197  ;;  %v1126_v17 = vsel %vm148_vm1, %v1124_v7, %v1125_v20  ;;  %v1123_v53 = vsel %vm148_vm1, %v1121_v61, %v1122_v50  ;;  %v1071_v51 = vmax.f32 %v12833_v16, %v1012_v33  ;;  %v12834_v8 = vmax.f32 %v11075_v43, 0.0 }
 0x1cf   :  { %12832 = vst [vmem:[#allocation28_spill] sm:$0xff] %v11239_v19  ;;  %2301 = vmatmul.bf16.vlgmr.msra.gmra.mxu2 %v11237_v31  ;;  %7939 = vmatmul.msk.bf16.vlgmr.msra.gmra.mxu3 %vm2222_vm5, %v11239_v19  ;;  %v10190_v24 = vunpack.i.h.bf16 %v10188_v59  ;;  %v1218_v62 = vmax.f32 %v1058_v60, %v1126_v17  ;;  %v1217_v47 = vmax.f32 %v1057_v27, %v1123_v53  ;;  %v10200_v2 = vunpack.i.h.bf16 %v10198_v46 }
 0x1d0   :  { %v10199_v56 = vunpack.i.l.bf16 %v10198_v46  ;;  %v10189_v34 = vunpack.i.l.bf16 %v10188_v59  ;;  %v12835_v5 = vmax.f32 %v10952_v32, 0.0  ;;  %v1011_v50 = vsel %vm1000_vm4, %v10195_v28, %v10184_v49 }
 0x1d1   :  { %v11267_v3 = vmax.f32 %v12834_v8, %v10190_v24  ;;  %v1322_v29 = vpack.c.bf16 %v1218_v62, %v1217_v47  ;;  %v1253_v45 = vadd.s32 24, %v11256_v42  ;;  %v1358_v25 = vunpack.c.l.b16 %v1324_v41 }
 0x1d2   :  { %v11271_v20 = vmax.f32 %v12835_v5, %v1010_v22  ;;  %v1359_v39 = vunpack.c.h.b16 %v1324_v41  ;;  %v1013_v43 = vsel %vm1000_vm4, %v10199_v56, %v10200_v2  ;;  %v1147_v60 = vrot.slane %v1072_v26, 1 }
 0x1d3   :  { %v1155_v37 = vrot.slane %v11267_v3, 1  ;;  %v1354_v10 = vunpack.c.l.b16 %v1322_v29  ;;  %v1355_v52 = vunpack.c.h.b16 %v1322_v29  ;;  %v12836_v59 = vmax.f32 %v10955_v0, 0.0 }
 0x1d4   :  { %v1145_v32 = vrot.slane %v1071_v51, 1  ;;  %v1014_v28 = vsel %vm1000_vm4, %v10200_v2, %v10189_v34  ;;  %v1141_v7 = vrot.slane %v11271_v20, 1  ;;  %v1261_v33 = vand.u32 31, %v1253_v45 }
 0x1d5   :  { %v11279_v27 = vmax.f32 %v12836_v59, %v1011_v50  ;;  %v11287_v61 = vpack.c.b16 %v1358_v25, %v1354_v10  ;;  %v11289_v46 = vpack.c.b16 %v1359_v39, %v1355_v52  ;;  %v12839_v22 = vmax.f32 %v11050_v40, 0.0 }
 0x1d6   :  { %v11284_v49 = vpop.permute.xlu1 %10202  ;;  %v1156_v0 = vsel %vm148_vm1, %v1147_v60, %v1155_v37  ;;  %v10210_v17 = vunpack.i.h.bf16 %v11281_v21  ;;  %v10209_v53 = vunpack.i.l.bf16 %v11281_v21  ;;  %v1015_v62 = vsel %vm1000_vm4, %v10189_v34, %v10190_v24 }
 0x1d7   :  { %12837 = vst [vmem:[#allocation21_spill] sm:$0xff] %v11287_v61  ;;  %v11293_v41 = vmax.f32 %v12839_v22, %v1013_v43  ;;  %v12840_v47 = vmax.f32 %v11053_v57, 0.0  ;;  %2243 = vmatmul.bf16.vlgmr.msrb.gmra.mxu0 %v11287_v61  ;;  %2272 = vmatmul.bf16.vlgmr.msrb.gmra.mxu1 %v11289_v46  ;;  %v1148_v40 = vsel %vm148_vm1, %v1139_v1, %v1147_v60  ;;  %v1143_v56 = vrot.slane %v11279_v27, 1  ;;  %v10213_v60 = vpop.permute.xlu0 %10212  ;;  %v11362_v22 = vpop.permute.xlu2 %10222 }
 0x1d8   :  { %12838 = vst [vmem:[#allocation29_spill] sm:$0xff] %v11289_v46  ;;  %v1146_v16 = vsel %vm148_vm1, %v1137_v15, %v1145_v32  ;;  %v12841_v24 = vmax.f32 %v11072_v14, 0.0  ;;  %v1142_v57 = vsel %vm148_vm1, %v1133_v55, %v1141_v7  ;;  %vm11321_vm6 = vcmp.lt.s32.totalorder %v1261_v33, 28 }
 0x1d9   :  { %v11303_v2 = vmax.f32 %v12840_v47, %v1014_v28  ;;  %v1232_v5 = vmax.f32 %v1072_v26, %v1156_v0  ;;  %v1149_v1 = vrot.slane %v11293_v41, 1  ;;  %v10205_v15 = vunpack.i.h.bf16 %v11284_v49 }
 0x1da   :  { %v11316_v8 = vmax.f32 %v12841_v24, %v1015_v62  ;;  %v1228_v14 = vmax.f32 %v11202_v23, %v1148_v40  ;;  %v1227_v45 = vmax.f32 %v11208_v63, %v1146_v16  ;;  %v1144_v55 = vsel %vm148_vm1, %v1135_v30, %v1143_v56 }
 0x1db   :  { %v1151_v50 = vrot.slane %v11303_v2, 1  ;;  %v1021_v25 = vsel %vm1000_vm4, %v10209_v53, %v10210_v17  ;;  %v10204_v39 = vunpack.i.l.bf16 %v11284_v49  ;;  %v1225_v10 = vmax.f32 %v11216_v6, %v1142_v57 }
 0x1dc   :  { %v1153_v29 = vrot.slane %v11316_v8, 1  ;;  %v12844_v52 = vmax.f32 %v11139_v48, 0.0  ;;  %v1305_v23 = vsel %vm11321_vm6, %v1232_v5, 0.0  ;;  %v1150_v30 = vsel %vm148_vm1, %v1141_v7, %v1149_v1 }
 0x1dd   :  { %v1152_v59 = vsel %vm148_vm1, %v1143_v56, %v1151_v50  ;;  %v1018_v48 = vsel %vm1000_vm4, %v10204_v39, %v10205_v15  ;;  %v1226_v28 = vmax.f32 %v11220_v11, %v1144_v55  ;;  %v1327_v49 = vpack.c.bf16 %v1228_v14, %v1227_v45 }
 0x1de   :  { %v1154_v26 = vsel %vm148_vm1, %v1145_v32, %v1153_v29  ;;  %v11340_v43 = vmax.f32 %v12844_v52, %v10210_v17  ;;  %v12845_v32 = vmax.f32 %v11109_v18, 0.0  ;;  %v10215_v17 = vunpack.i.h.bf16 %v10213_v60 }
 0x1df   :  { %v1231_v63 = vmax.f32 %v1071_v51, %v1154_v26  ;;  %v10218_v21 = vpop.permute.xlu1 %10217  ;;  %v12846_v51 = vmax.f32 %v11136_v44, 0.0  ;;  %v10214_v18 = vunpack.i.l.bf16 %v10213_v60  ;;  %v12847_v62 = vmax.f32 %v11106_v13, 0.0 }
 0x1e0   :  { %v11352_v6 = vmax.f32 %v12845_v32, %v10205_v15  ;;  %v1229_v40 = vmax.f32 %v11271_v20, %v1150_v30  ;;  %v11370_v11 = vadd.s32 56, %v11256_v42  ;;  %v1230_v44 = vmax.f32 %v11279_v27, %v1152_v59 }
 0x1e1   :  { %v11358_v33 = vmax.f32 %v12846_v51, %v1021_v25  ;;  %v1304_v7 = vsel %vm11321_vm6, %v1231_v63, 0.0  ;;  %v11366_v47 = vmax.f32 %v12847_v62, %v1018_v48  ;;  %v10220_v56 = vunpack.i.h.bf16 %v10218_v21 }
 0x1e2   :  { %v1329_v0 = vpack.c.bf16 %v1305_v23, %v1304_v7  ;;  %v1171_v16 = vrot.slane %v11340_v43, 1  ;;  %v1163_v57 = vrot.slane %v11352_v6, 1  ;;  %v11376_v15 = vpack.c.bf16 %v1226_v28, %v1225_v10 }
 0x1e3   :  { %v1161_v5 = vrot.slane %v11366_v47, 1  ;;  %v1169_v13 = vrot.slane %v11358_v33, 1  ;;  %v10225_v14 = vunpack.i.h.bf16 %v11362_v22  ;;  %v10224_v20 = vunpack.i.l.bf16 %v11362_v22  ;;  %v7847_v22 = vld [vmem:[#allocation7 + $0x610] sm:$0xf0] }
 0x1e4   :  { %v1368_v24 = vunpack.c.l.b16 %v1329_v0  ;;  %v1364_v42 = vunpack.c.l.b16 %v1327_v49  ;;  %v1365_v45 = vunpack.c.h.b16 %v1327_v49  ;;  %v1369_v55 = vunpack.c.h.b16 %v1329_v0 }
 0x1e5   :  { %v1016_v27 = vsel %vm1000_vm4, %v10214_v18, %v10215_v17  ;;  %v1302_v25 = vsel %vm11321_vm6, %v1229_v40, 0.0  ;;  %v1303_v26 = vsel %vm11321_vm6, %v1230_v44, 0.0  ;;  %v1017_v10 = vsel %vm1000_vm4, %v10215_v17, %v10204_v39  ;;  %v10228_v17 = vpop.permute.xlu0 %10227  ;;  %v9822_v44 = vld [vmem:[#allocation7 + $0x644] sm:$0xf] }
 0x1e6   :  { %v1020_v52 = vsel %vm1000_vm4, %v10220_v56, %v10209_v53  ;;  %v1162_v23 = vsel %vm148_vm1, %v1153_v29, %v1161_v5  ;;  %v1164_v63 = vsel %vm148_vm1, %v1155_v37, %v1163_v57  ;;  %v10219_v60 = vunpack.i.l.bf16 %v10218_v21 }
 0x1e7   :  { %v11392_v30 = vpack.c.b16 %v1368_v24, %v1364_v42  ;;  %v12848_v59 = vmax.f32 %v11168_v9, 0.0  ;;  %v12849_v34 = vmax.f32 %v11080_v12, 0.0  ;;  %v1172_v53 = vsel %vm148_vm1, %v1163_v57, %v1171_v16 }
 0x1e8   :  { %v1170_v29 = vsel %vm148_vm1, %v1161_v5, %v1169_v13  ;;  %v1024_v37 = vsel %vm1000_vm4, %v10224_v20, %v10225_v14  ;;  %v12850_v9 = vmax.f32 %v11041_v4, 0.0  ;;  %v1019_v12 = vsel %vm1000_vm4, %v10219_v60, %v10220_v56  ;;  %v7927_v5 = vld [vmem:[#allocation7 + $0x6b0] sm:$0xf0] }
 0x1e9   :  { %v11396_v32 = vmax.f32 %v12848_v59, %v10225_v14  ;;  %v11400_v48 = vmax.f32 %v12849_v34, %v1016_v27  ;;  %2306 = vmatmul.bf16.gmra.mxu2 %v11392_v30  ;;  %v11417_v21 = vpack.c.b16 %v1369_v55, %v1365_v45  ;;  %v1328_v28 = vpack.c.bf16 %v1303_v26, %v1302_v25  ;;  %v9758_v55 = vld [vmem:[#allocation7 + $0x444] sm:$0xf]  ;;  %v7751_v60 = vld [vmem:[#allocation7 + $0x550] sm:$0xf0] }
 0x1ea   :  { %v11413_v39 = vmax.f32 %v12850_v9, %v1020_v52  ;;  %v12851_v49 = vmax.f32 %v11083_v35, 0.0  ;;  %v1235_v7 = vmax.f32 %v11316_v8, %v1162_v23  ;;  %v1236_v0 = vmax.f32 %v11267_v3, %v1164_v63  ;;  %v7879_v35 = vld [vmem:[#allocation7 + $0x650] sm:$0xf0]  ;;  %v9818_v59 = vld [vmem:[#allocation7 + $0x624] sm:$0xf] }
 0x1eb   :  { %v1362_v4 = vunpack.c.l.b16 %v11376_v15  ;;  %v1265_v18 = vand.u32 31, %v11370_v11  ;;  %v1240_v62 = vmax.f32 %v11352_v6, %v1172_v53  ;;  %v1239_v40 = vmax.f32 %v11366_v47, %v1170_v29  ;;  %7940 = vmatmul.msk.bf16.gmra.mxu3 %vm2222_vm5, %v11417_v21  ;;  %v9834_v6 = vld [vmem:[#allocation7 + $0x6a4] sm:$0xf]  ;;  %v7863_v34 = vld [vmem:[#allocation7 + $0x630] sm:$0xf0] }
 0x1ec   :  { %v11421_v51 = vmax.f32 %v12851_v49, %v1017_v10  ;;  %v1363_v56 = vunpack.c.h.b16 %v11376_v15  ;;  %v12852_v8 = vmax.f32 %v11165_v58, 0.0  ;;  %v1157_v3 = vrot.slane %v11400_v48, 1  ;;  %v7623_v15 = vld [vmem:[#allocation7 + $0x450] sm:$0xf0] }
 0x1ed   :  { %v12853_v57 = vmax.f32 %v11038_v38, 0.0  ;;  %v1179_v47 = vrot.slane %v11396_v32, 1  ;;  %v10230_v14 = vunpack.i.h.bf16 %v10228_v17  ;;  %v10229_v42 = vunpack.i.l.bf16 %v10228_v17  ;;  %v9790_v38 = vld [vmem:[#allocation7 + $0x544] sm:$0xf]  ;;  %v7607_v49 = vld [vmem:[#allocation7 + $0x430] sm:$0xf0] }
 0x1ee   :  { %v11434_v24 = vmax.f32 %v12852_v8, %v1024_v37  ;;  %v1167_v45 = vrot.slane %v11413_v39, 1  ;;  %v1159_v58 = vrot.slane %v11421_v51, 1  ;;  %v11444_v27 = vpack.c.bf16 %v1236_v0, %v1235_v7  ;;  %v7735_v8 = vld [vmem:[#allocation7 + $0x530] sm:$0xf0] }
 0x1ef   :  { %v11439_v11 = vmax.f32 %v12853_v57, %v1019_v12  ;;  %v1366_v26 = vunpack.c.l.b16 %v1328_v28  ;;  %v11447_v10 = vpack.c.bf16 %v1240_v62, %v1239_v40  ;;  %v1367_v52 = vunpack.c.h.b16 %v1328_v28  ;;  %v9754_v12 = vld [vmem:[#allocation7 + $0x424] sm:$0xf] }
 0x1f0   :  { %v7882_v23 = vor.u32 %v9822_v44, %v7879_v35  ;;  %v7930_v63 = vor.u32 %v9834_v6, %v7927_v5  ;;  %v1177_v53 = vrot.slane %v11434_v24, 1  ;;  %v11453_v29 = vsel %vm148_vm1, %v1149_v1, %v1157_v3  ;;  %v9814_v44 = vld [vmem:[#allocation7 + $0x604] sm:$0xf] }
 0x1f1   :  { %v1165_v25 = vrot.slane %v11439_v11, 1  ;;  %v11455_v37 = vpack.c.b16 %v1366_v26, %v1362_v4  ;;  %v7626_v9 = vor.u32 %v9758_v55, %v7623_v15  ;;  %vm11457_vm7 = vcmp.lt.s32.totalorder %v1265_v18, 28  ;;  %v9786_v35 = vld [vmem:[#allocation7 + $0x524] sm:$0xf] }
 0x1f2   :  { %v11464_v28 = vsel %vm148_vm1, %v1179_v47, 0.0  ;;  %v1022_v0 = vsel %vm1000_vm4, %v10229_v42, %v10230_v14  ;;  %v1168_v17 = vsel %vm148_vm1, %v1159_v58, %v1167_v45  ;;  %2409 = vmatpush.bf16.msrb.mxu2 %v7882_v23  ;;  %2443 = vmatpush.bf16.msrb.mxu3 %v7930_v63  ;;  %v1023_v4 = vsel %vm1000_vm4, %v10230_v14, %v10224_v20  ;;  %v9830_v5 = vld [vmem:[#allocation7 + $0x684] sm:$0xf]  ;;  %v7911_v14 = vld [vmem:[#allocation7 + $0x690] sm:$0xf0] }
 0x1f3   :  { %v1166_v1 = vsel %vm148_vm1, %v1157_v3, %v1165_v25  ;;  %2248 = vmatmul.bf16.gmra.mxu0 %v11455_v37  ;;  %v11477_v18 = vpack.c.b16 %v1367_v52, %v1363_v56  ;;  %v7754_v62 = vor.u32 %v9790_v38, %v7751_v60  ;;  %v7866_v40 = vor.u32 %v9818_v59, %v7863_v34  ;;  %v9782_v59 = vld [vmem:[#allocation7 + $0x504] sm:$0xf]  ;;  %v7719_v34 = vld [vmem:[#allocation7 + $0x510] sm:$0xf0] }
 0x1f4   :  { %v1160_v3 = vsel %vm148_vm1, %v1151_v50, %v1159_v58  ;;  %v1372_v57 = vunpack.c.l.b16 %v11444_v27  ;;  %v1376_v6 = vunpack.c.l.b16 %v11447_v10  ;;  %2351 = vmatpush.bf16.msra.mxu0 %v7626_v9  ;;  %v7610_v20 = vor.u32 %v9754_v12, %v7607_v49  ;;  %v9750_v50 = vld [vmem:[#allocation7 + $0x404] sm:$0xf]  ;;  %v7591_v58 = vld [vmem:[#allocation7 + $0x410] sm:$0xf0] }
 0x1f5   :  { %v1215_v56 = vsel %vm148_vm1, %v1177_v53, 0.0  ;;  %v1233_v42 = vmax.f32 %v11293_v41, %v11453_v29  ;;  %v1237_v55 = vmax.f32 %v11400_v48, %v1166_v1  ;;  %v1238_v15 = vmax.f32 %v11421_v51, %v1168_v17  ;;  %2277 = vmatmul.bf16.gmra.mxu1 %v11477_v18  ;;  %v7831_v9 = vld [vmem:[#allocation7 + $0x5f0] sm:$0xf0]  ;;  %v9746_v49 = vld [vmem:[#allocation7 + $0x3e4] sm:$0xf] }
 0x1f6   :  { %v1373_v26 = vunpack.c.h.b16 %v11444_v27  ;;  %v1377_v38 = vunpack.c.h.b16 %v11447_v10  ;;  %v12856_v52 = vmax.f32 %v11118_v54, 0.0  ;;  %2380 = vmatpush.bf16.msra.mxu1 %v7754_v62  ;;  %2410 = vmatpush.bf16.msrb.mxu2 %v7866_v40  ;;  %v7738_v63 = vor.u32 %v9786_v35, %v7735_v8  ;;  %v9810_v54 = vld [vmem:[#allocation7 + $0x5e4] sm:$0xf]  ;;  %v7575_v1 = vld [vmem:[#allocation7 + $0x3f0] sm:$0xf0] }
 0x1f7   :  { %v1234_v41 = vmax.f32 %v11303_v2, %v1160_v3  ;;  %v12857_v48 = vmax.f32 %v11121_v36, 0.0  ;;  %v7850_v60 = vor.u32 %v9814_v44, %v7847_v22  ;;  %v7914_v29 = vor.u32 %v9830_v5, %v7911_v14  ;;  %v9826_v17 = vld [vmem:[#allocation7 + $0x664] sm:$0xf] }
 0x1f8   :  { %v11494_v23 = vmax.f32 %v12856_v52, %v1022_v0  ;;  %v1248_v27 = vmax.f32 %v11396_v32, %v11464_v28  ;;  %v11503_v10 = vpack.c.b16 %v1376_v6, %v1372_v57  ;;  %2352 = vmatpush.bf16.msra.mxu0 %v7610_v20  ;;  %v7594_v12 = vor.u32 %v9750_v50, %v7591_v58  ;;  %v9806_v3 = vld [vmem:[#allocation7 + $0x5c4] sm:$0xf]  ;;  %v7815_v57 = vld [vmem:[#allocation7 + $0x5d0] sm:$0xf0] }
 0x1f9   :  { %v11499_v51 = vmax.f32 %v12857_v48, %v1023_v4  ;;  %v1178_v36 = vsel %vm148_vm1, %v1169_v13, %v1177_v53  ;;  %v1180_v2 = vsel %vm148_vm1, %v1171_v16, %v1179_v47  ;;  %v1247_v0 = vmax.f32 %v11434_v24, %v1215_v56  ;;  %2444 = vmatpush.bf16.msrb.mxu3 %v7914_v29  ;;  %v7895_v4 = vld [vmem:[#allocation7 + $0x670] sm:$0xf0]  ;;  %v9778_v24 = vld [vmem:[#allocation7 + $0x4e4] sm:$0xf] }
 0x1fa   :  { %v1332_v28 = vpack.c.bf16 %v1238_v15, %v1237_v55  ;;  %v11514_v62 = vpack.c.b16 %v1377_v38, %v1373_v26  ;;  %v1173_v40 = vrot.slane %v11494_v23, 1  ;;  %2311 = vmatmul.bf16.gmra.mxu2 %v11503_v10  ;;  %2381 = vmatpush.bf16.msra.mxu1 %v7738_v63  ;;  %v7722_v13 = vor.u32 %v9782_v59, %v7719_v34  ;;  %v7703_v47 = vld [vmem:[#allocation7 + $0x4f0] sm:$0xf0]  ;;  %v9742_v14 = vld [vmem:[#allocation7 + $0x3c4] sm:$0xf] }
 0x1fb   :  { %v7898_v32 = vor.u32 %v9826_v17, %v7895_v4  ;;  %v1330_v53 = vpack.c.bf16 %v1234_v41, %v1233_v42  ;;  %v1175_v44 = vrot.slane %v11499_v51, 1  ;;  %2411 = vmatpush.bf16.msrb.mxu2 %v7850_v60  ;;  %v7834_v16 = vor.u32 %v9810_v54, %v7831_v9  ;;  %v7559_v56 = vld [vmem:[#allocation7 + $0x3d0] sm:$0xf0]  ;;  %v9774_v58 = vld [vmem:[#allocation7 + $0x4c4] sm:$0xf] }
 0x1fc   :  { %v1243_v35 = vmax.f32 %v11358_v33, %v1178_v36  ;;  %v1244_v8 = vmax.f32 %v11340_v43, %v1180_v2  ;;  %7941 = vmatmul.msk.bf16.gmra.mxu3 %vm2222_vm5, %v11514_v62  ;;  %2353 = vmatpush.bf16.msra.mxu0 %v7594_v12  ;;  %v7578_v6 = vor.u32 %v9746_v49, %v7575_v1  ;;  %v1321_v22 = vsel %vm11457_vm7, %v1248_v27, 0.0  ;;  %v7687_v26 = vld [vmem:[#allocation7 + $0x4d0] sm:$0xf0]  ;;  %v9802_v63 = vld [vmem:[#allocation7 + $0x5a4] sm:$0xf] }
 0x1fd   :  { %v1320_v20 = vsel %vm11457_vm7, %v1247_v0, 0.0  ;;  %v1374_v5 = vunpack.c.l.b16 %v1332_v28  ;;  %2445 = vmatpush.bf16.msrb.mxu3 %v7898_v32  ;;  %v1213_v33 = vsel %vm148_vm1, %v1173_v40, 0.0  ;;  %v7706_v43 = vor.u32 %v9778_v24, %v7703_v47  ;;  %v7799_v41 = vld [vmem:[#allocation7 + $0x5b0] sm:$0xf0]  ;;  %v9738_v29 = vld [vmem:[#allocation7 + $0x3a4] sm:$0xf] }
 0x1fe   :  { %2382 = vmatpush.bf16.msra.mxu1 %v7722_v13  ;;  %v1370_v42 = vunpack.c.l.b16 %v1330_v53  ;;  %v1214_v55 = vsel %vm148_vm1, %v1175_v44, 0.0  ;;  %v1375_v15 = vunpack.c.h.b16 %v1332_v28  ;;  %v7818_v50 = vor.u32 %v9806_v3, %v7815_v57  ;;  %v7543_v27 = vld [vmem:[#allocation7 + $0x3b0] sm:$0xf0]  ;;  %v9770_v2 = vld [vmem:[#allocation7 + $0x4a4] sm:$0xf] }
 0x1ff   :  { %2412 = vmatpush.bf16.msrb.mxu2 %v7834_v16  ;;  %v1335_v38 = vpack.c.bf16 %v1244_v8, %v1243_v35  ;;  %v1337_v52 = vpack.c.bf16 %v1321_v22, %v1320_v20  ;;  %v7562_v48 = vor.u32 %v9742_v14, %v7559_v56  ;;  %v1371_v60 = vunpack.c.h.b16 %v1330_v53  ;;  %v7671_v0 = vld [vmem:[#allocation7 + $0x4b0] sm:$0xf0]  ;;  %v9798_v1 = vld [vmem:[#allocation7 + $0x584] sm:$0xf] }
 0x200   :  { %2354 = vmatpush.bf16.msra.mxu0 %v7578_v6  ;;  %v1245_v59 = vmax.f32 %v11494_v23, %v1213_v33  ;;  %v11530_v34 = vpack.c.b16 %v1374_v5, %v1370_v42  ;;  %v1246_v54 = vmax.f32 %v11499_v51, %v1214_v55  ;;  %v1176_v9 = vsel %vm148_vm1, %v1167_v45, %v1175_v44  ;;  %v7783_v17 = vld [vmem:[#allocation7 + $0x590] sm:$0xf0]  ;;  %v9766_v35 = vld [vmem:[#allocation7 + $0x484] sm:$0xf] }
 0x201   :  { %v1174_v12 = vsel %vm148_vm1, %v1165_v25, %v1173_v40  ;;  %v7690_v49 = vor.u32 %v9774_v58, %v7687_v26  ;;  %v11540_v36 = vpack.c.b16 %v1375_v15, %v1371_v60  ;;  %v7802_v23 = vor.u32 %v9802_v63, %v7799_v41  ;;  %v9734_v40 = vld [vmem:[#allocation7 + $0x384] sm:$0xf]  ;;  %v7527_v32 = vld [vmem:[#allocation7 + $0x390] sm:$0xf0]  ;;  %v7885_v63 = vld [vmem:[#allocation7 + $0x648] sm:$0xf] }
 0x202   :  { %12858 = vst [vmem:[#allocation19_spill] sm:$0xff] %v11530_v34  ;;  %2383 = vmatpush.bf16.msra.mxu1 %v7706_v43  ;;  %v1380_v28 = vunpack.c.l.b16 %v1335_v38  ;;  %v1384_v51 = vunpack.c.l.b16 %v1337_v52  ;;  %v7546_v45 = vor.u32 %v9738_v29, %v7543_v27  ;;  %v1381_v4 = vunpack.c.h.b16 %v1335_v38  ;;  %v7655_v8 = vld [vmem:[#allocation7 + $0x490] sm:$0xf0]  ;;  %v9730_v20 = vld [vmem:[#allocation7 + $0x364] sm:$0xf] }
 0x203   :  { %2253 = vmatmul.bf16.gmra.mxu0 %v11530_v34  ;;  %12859 = vst [vmem:[#allocation26_spill] sm:$0xff] %v11540_v36  ;;  %2413 = vmatpush.bf16.msrb.mxu2 %v7818_v50  ;;  %v1242_v13 = vmax.f32 %v11413_v39, %v1176_v9  ;;  %v1241_v25 = vmax.f32 %v11439_v11, %v1174_v12  ;;  %v1385_v53 = vunpack.c.h.b16 %v1337_v52  ;;  %v1318_v44 = vsel %vm11457_vm7, %v1245_v59, 0.0  ;;  %v9794_v11 = vld [vmem:[#allocation7 + $0x564] sm:$0xf]  ;;  %v7767_v3 = vld [vmem:[#allocation7 + $0x570] sm:$0xf0] }
 0x204   :  { %2355 = vmatpush.bf16.msra.mxu0 %v7562_v48  ;;  %v1319_v16 = vsel %vm11457_vm7, %v1246_v54, 0.0  ;;  %v7674_v24 = vor.u32 %v9770_v2, %v7671_v0  ;;  %v7786_v47 = vor.u32 %v9798_v1, %v7783_v17  ;;  %v11549_v39 = vpack.c.b16 %v1384_v51, %v1380_v28  ;;  %v7511_v5 = vld [vmem:[#allocation7 + $0x370] sm:$0xf0]  ;;  %v9762_v33 = vld [vmem:[#allocation7 + $0x464] sm:$0xf] }
 0x205   :  { %2282 = vmatmul.bf16.gmra.mxu1 %v11540_v36  ;;  %v7530_v57 = vor.u32 %v9734_v40, %v7527_v32  ;;  %v1336_v6 = vpack.c.bf16 %v1319_v16, %v1318_v44  ;;  %v1334_v22 = vpack.c.bf16 %v1242_v13, %v1241_v25  ;;  %v11551_v14 = vpack.c.b16 %v1385_v53, %v1381_v4  ;;  %v7639_v43 = vld [vmem:[#allocation7 + $0x470] sm:$0xf0]  ;;  %v9825_v41 = vld [vmem:[#allocation7 + $0x654] sm:$0xf0]  ;;  %v7933_v60 = vld [vmem:[#allocation7 + $0x6a8] sm:$0xf] }
 0x206   :  { %2384 = vmatpush.bf16.msra.mxu1 %v7690_v49  ;;  %12860 = vst [vmem:[#allocation20_spill] sm:$0xff] %v11549_v39  ;;  %v7658_v7 = vor.u32 %v9766_v35, %v7655_v8  ;;  %v7770_v56 = vor.u32 %v9794_v11, %v7767_v3  ;;  %v7514_v42 = vor.u32 %v9730_v20, %v7511_v5  ;;  %v9837_v59 = vld [vmem:[#allocation7 + $0x6b4] sm:$0xf0]  ;;  %v7629_v29 = vld [vmem:[#allocation7 + $0x448] sm:$0xf] }
 0x207   :  { %2414 = vmatpush.bf16.msrb.mxu2 %v7802_v23  ;;  %12861 = vst [vmem:[#allocation27_spill] sm:$0xff] %v11551_v14  ;;  %v1382_v55 = vunpack.c.l.b16 %v1336_v6  ;;  %v1378_v15 = vunpack.c.l.b16 %v1334_v22  ;;  %v7642_v50 = vor.u32 %v9762_v33, %v7639_v43  ;;  %v1383_v58 = vunpack.c.h.b16 %v1336_v6  ;;  %v9761_v54 = vld [vmem:[#allocation7 + $0x454] sm:$0xf0]  ;;  %v7757_v9 = vld [vmem:[#allocation7 + $0x548] sm:$0xf] }
 0x208   :  { %2356 = vmatpush.bf16.msra.mxu0 %v7546_v45  ;;  %v1379_v26 = vunpack.c.h.b16 %v1334_v22  ;;  %v7886_v48 = vor.u32 %v9825_v41, %v7885_v63  ;;  %v7934_v27 = vor.u32 %v9837_v59, %v7933_v60  ;;  %v9793_v12 = vld [vmem:[#allocation7 + $0x554] sm:$0xf0]  ;;  %v7630_v49 = vor.u32 %v9761_v54, %v7629_v29  ;;  %v7869_v2 = vld [vmem:[#allocation7 + $0x628] sm:$0xf] }
 0x209   :  { %v11556_v38 = vpack.c.b16 %v1382_v55, %v1378_v15  ;;  %v7758_v23 = vor.u32 %v9793_v12, %v7757_v9  ;;  %v9821_v0 = vld [vmem:[#allocation7 + $0x634] sm:$0xf0]  ;;  %v7853_v51 = vld [vmem:[#allocation7 + $0x608] sm:$0xf] }
 0x20a   :  { %2316 = vmatmul.bf16.gmra.mxu2 %v11549_v39  ;;  %2385 = vmatpush.bf16.msra.mxu1 %v7674_v24  ;;  %v11558_v52 = vpack.c.b16 %v1383_v58, %v1379_v26  ;;  %v7870_v28 = vor.u32 %v9821_v0, %v7869_v2  ;;  %v9817_v1 = vld [vmem:[#allocation7 + $0x614] sm:$0xf0]  ;;  %v7613_v17 = vld [vmem:[#allocation7 + $0x428] sm:$0xf] }
 0x20b   :  { %2415 = vmatpush.bf16.msrb.mxu2 %v7786_v47  ;;  %12862 = vst [vmem:[#allocation22_spill] sm:$0xff] %v11556_v38  ;;  %2559 = vmatpush.bf16.msra.mxu3 %v7934_v27  ;;  %v7854_v45 = vor.u32 %v9817_v1, %v7853_v51  ;;  %v9757_v4 = vld [vmem:[#allocation7 + $0x434] sm:$0xf0]  ;;  %v7741_v13 = vld [vmem:[#allocation7 + $0x528] sm:$0xf] }
 0x20c   :  { %7942 = vmatmul.msk.bf16.gmra.mxu3 %vm2222_vm5, %v11551_v14  ;;  %2357 = vmatpush.bf16.msra.mxu0 %v7530_v57  ;;  %12863 = vst [vmem:[#allocation30_spill] sm:$0xff] %v11558_v52  ;;  %v9789_v25 = vld [vmem:[#allocation7 + $0x534] sm:$0xf0]  ;;  %v7614_v40 = vor.u32 %v9757_v4, %v7613_v17  ;;  %v7837_v53 = vld [vmem:[#allocation7 + $0x5e8] sm:$0xf] }
 0x20d   :  { %v7742_v32 = vor.u32 %v9789_v25, %v7741_v13  ;;  %v9813_v44 = vld [vmem:[#allocation7 + $0x5f4] sm:$0xf0]  ;;  %v7597_v24 = vld [vmem:[#allocation7 + $0x408] sm:$0xf] }
 0x20e   :  { %2386 = vmatpush.bf16.msra.mxu1 %v7658_v7  ;;  %v7838_v16 = vor.u32 %v9813_v44, %v7837_v53  ;;  %v9753_v47 = vld [vmem:[#allocation7 + $0x414] sm:$0xf0]  ;;  %v7725_v35 = vld [vmem:[#allocation7 + $0x508] sm:$0xf] }
 0x20f   :  { %2416 = vmatpush.bf16.msrb.mxu2 %v7770_v56  ;;  %v7598_v8 = vor.u32 %v9753_v47, %v7597_v24  ;;  %v9785_v11 = vld [vmem:[#allocation7 + $0x514] sm:$0xf0]  ;;  %v7821_v3 = vld [vmem:[#allocation7 + $0x5c8] sm:$0xf] }
 0x210   :  { %2358 = vmatpush.bf16.msra.mxu0 %v7514_v42  ;;  %v9809_v57 = vld [vmem:[#allocation7 + $0x5d4] sm:$0xf0]  ;;  %v7726_v6 = vor.u32 %v9785_v11, %v7725_v35  ;;  %v7581_v20 = vld [vmem:[#allocation7 + $0x3e8] sm:$0xf] }
 0x211   :  { %v7822_v22 = vor.u32 %v9809_v57, %v7821_v3  ;;  %v9749_v5 = vld [vmem:[#allocation7 + $0x3f4] sm:$0xf0]  ;;  %v7709_v7 = vld [vmem:[#allocation7 + $0x4e8] sm:$0xf] }
 0x212   :  { %2387 = vmatpush.bf16.msra.mxu1 %v7642_v50  ;;  %v9781_v56 = vld [vmem:[#allocation7 + $0x4f4] sm:$0xf0]  ;;  %v7805_v33 = vld [vmem:[#allocation7 + $0x5a8] sm:$0xf]  ;;  %v7582_v42 = vor.u32 %v9749_v5, %v7581_v20 }
 0x213   :  { %2258 = vmatmul.bf16.gmra.mxu0 %v11556_v38  ;;  %2525 = vmatpush.bf16.msra.mxu2 %v7886_v48  ;;  %v9805_v43 = vld [vmem:[#allocation7 + $0x5b4] sm:$0xf0]  ;;  %v7710_v55 = vor.u32 %v9781_v56, %v7709_v7  ;;  %v7917_v15 = vld [vmem:[#allocation7 + $0x688] sm:$0xf]  ;;  %v9823_v56 = vld [vmem:[#allocation7 + $0x64c] sm:$0xf] }
 0x214   :  { %2467 = vmatpush.bf16.msrb.mxu0 %v7630_v49  ;;  %v9833_v50 = vld [vmem:[#allocation7 + $0x694] sm:$0xf0]  ;;  %v7806_v58 = vor.u32 %v9805_v43, %v7805_v33  ;;  %v7565_v63 = vld [vmem:[#allocation7 + $0x3c8] sm:$0xf]  ;;  %v7887_v33 = vld [vmem:[#allocation7 + $0x658] sm:$0xf0] }
 0x215   :  { %2287 = vmatmul.bf16.gmra.mxu1 %v11558_v52  ;;  %v7918_v26 = vor.u32 %v9833_v50, %v7917_v15  ;;  %v9745_v41 = vld [vmem:[#allocation7 + $0x3d4] sm:$0xf0]  ;;  %v7693_v48 = vld [vmem:[#allocation7 + $0x4c8] sm:$0xf]  ;;  %v9835_v43 = vld [vmem:[#allocation7 + $0x6ac] sm:$0xf] }
 0x216   :  { %2496 = vmatpush.bf16.msrb.mxu1 %v7758_v23  ;;  %v7566_v60 = vor.u32 %v9745_v41, %v7565_v63  ;;  %v9777_v59 = vld [vmem:[#allocation7 + $0x4d4] sm:$0xf0]  ;;  %v7789_v29 = vld [vmem:[#allocation7 + $0x588] sm:$0xf]  ;;  %v9759_v15 = vld [vmem:[#allocation7 + $0x44c] sm:$0xf] }
 0x217   :  { %2526 = vmatpush.bf16.msra.mxu2 %v7870_v28  ;;  %2560 = vmatpush.bf16.msra.mxu3 %v7918_v26  ;;  %v9801_v27 = vld [vmem:[#allocation7 + $0x594] sm:$0xf0]  ;;  %v7694_v54 = vor.u32 %v9777_v59, %v7693_v48  ;;  %v7549_v12 = vld [vmem:[#allocation7 + $0x3a8] sm:$0xf]  ;;  %v7631_v50 = vld [vmem:[#allocation7 + $0x458] sm:$0xf0] }
 0x218   :  { %2468 = vmatpush.bf16.msrb.mxu0 %v7614_v40  ;;  %v7790_v9 = vor.u32 %v9801_v27, %v7789_v29  ;;  %v9741_v49 = vld [vmem:[#allocation7 + $0x3b4] sm:$0xf0]  ;;  %v7677_v23 = vld [vmem:[#allocation7 + $0x4a8] sm:$0xf]  ;;  %v7634_v26 = vor.u32 %v9759_v15, %v7631_v50  ;;  %v9791_v63 = vld [vmem:[#allocation7 + $0x54c] sm:$0xf] }
 0x219   :  { %v7550_v2 = vor.u32 %v9741_v49, %v7549_v12  ;;  %v9773_v0 = vld [vmem:[#allocation7 + $0x4b4] sm:$0xf0]  ;;  %v7773_v28 = vld [vmem:[#allocation7 + $0x568] sm:$0xf]  ;;  %v7759_v41 = vld [vmem:[#allocation7 + $0x558] sm:$0xf0] }
 0x21a   :  { %2417 = vmatmul.bf16.vlgmr.msrb.gmra.mxu2 %v11237_v31  ;;  %2497 = vmatpush.bf16.msrb.mxu1 %v7742_v32  ;;  %v9797_v51 = vld [vmem:[#allocation7 + $0x574] sm:$0xf0]  ;;  %v7678_v1 = vor.u32 %v9773_v0, %v7677_v23  ;;  %v7533_v13 = vld [vmem:[#allocation7 + $0x388] sm:$0xf]  ;;  %v7762_v48 = vor.u32 %v9791_v63, %v7759_v41  ;;  %v7871_v12 = vld [vmem:[#allocation7 + $0x638] sm:$0xf0] }
 0x21b   :  { %2527 = vmatpush.bf16.msra.mxu2 %v7854_v45  ;;  %v7774_v17 = vor.u32 %v9797_v51, %v7773_v28  ;;  %v7901_v45 = vld [vmem:[#allocation7 + $0x668] sm:$0xf]  ;;  %v9829_v4 = vld [vmem:[#allocation7 + $0x674] sm:$0xf0]  ;;  %v9815_v49 = vld [vmem:[#allocation7 + $0x60c] sm:$0xf] }
 0x21c   :  { %7943 = vmatmul.msk.bf16.vlgmr.msrb.gmra.mxu3 %vm2222_vm5, %v11239_v19  ;;  %2469 = vmatpush.bf16.msrb.mxu0 %v7598_v8  ;;  %v7902_v25 = vor.u32 %v9829_v4, %v7901_v45  ;;  %v9737_v40 = vld [vmem:[#allocation7 + $0x394] sm:$0xf0]  ;;  %v7661_v32 = vld [vmem:[#allocation7 + $0x488] sm:$0xf]  ;;  %v7855_v0 = vld [vmem:[#allocation7 + $0x618] sm:$0xf0] }
 0x21d   :  { %v9769_v53 = vld [vmem:[#allocation7 + $0x494] sm:$0xf0]  ;;  %v7534_v44 = vor.u32 %v9737_v40, %v7533_v13  ;;  %v7517_v24 = vld [vmem:[#allocation7 + $0x368] sm:$0xf]  ;;  %v9755_v28 = vld [vmem:[#allocation7 + $0x42c] sm:$0xf]  ;;  %v7858_v4 = vor.u32 %v9815_v49, %v7855_v0 }
 0x21e   :  { %2498 = vmatpush.bf16.msrb.mxu1 %v7726_v6  ;;  %v9733_v47 = vld [vmem:[#allocation7 + $0x374] sm:$0xf0]  ;;  %2561 = vmatpush.bf16.msra.mxu3 %v7902_v25  ;;  %v7645_v35 = vld [vmem:[#allocation7 + $0x468] sm:$0xf]  ;;  %v7615_v51 = vld [vmem:[#allocation7 + $0x438] sm:$0xf0] }
 0x21f   :  { %2528 = vmatpush.bf16.msra.mxu2 %v7838_v16  ;;  %v7662_v16 = vor.u32 %v9769_v53, %v7661_v32  ;;  %v9765_v8 = vld [vmem:[#allocation7 + $0x474] sm:$0xf0]  ;;  %v7518_v11 = vor.u32 %v9733_v47, %v7517_v24  ;;  %v7743_v45 = vld [vmem:[#allocation7 + $0x538] sm:$0xf0]  ;;  %v9811_v32 = vld [vmem:[#allocation7 + $0x5ec] sm:$0xf] }
 0x220   :  { %2470 = vmatpush.bf16.msrb.mxu0 %v7582_v42  ;;  %v7646_v3 = vor.u32 %v9765_v8, %v7645_v35  ;;  %v7890_v42 = vor.u32 %v9823_v56, %v7887_v33  ;;  %v7839_v53 = vld [vmem:[#allocation7 + $0x5f8] sm:$0xf0]  ;;  %v9783_v35 = vld [vmem:[#allocation7 + $0x50c] sm:$0xf] }
 0x221   :  { %v7842_v24 = vor.u32 %v9811_v32, %v7839_v53  ;;  %v7599_v47 = vld [vmem:[#allocation7 + $0x418] sm:$0xf0]  ;;  %v9779_v15 = vld [vmem:[#allocation7 + $0x4ec] sm:$0xf] }
 0x222   :  { %2499 = vmatpush.bf16.msrb.mxu1 %v7710_v55  ;;  %v7935_v55 = vld [vmem:[#allocation7 + $0x6b8] sm:$0xf0]  ;;  %v9739_v32 = vld [vmem:[#allocation7 + $0x3ac] sm:$0xf] }
 0x223   :  { %2359 = vmatmul.bf16.vlgmr.msra.gmra.mxu0 %v11287_v61  ;;  %2529 = vmatpush.bf16.msra.mxu2 %v7822_v22  ;;  %v7727_v8 = vld [vmem:[#allocation7 + $0x518] sm:$0xf0] }
 0x224   :  { %2471 = vmatpush.bf16.msrb.mxu0 %v7566_v60  ;;  %v7807_v63 = vld [vmem:[#allocation7 + $0x5b8] sm:$0xf0] }
 0x225   :  { %2388 = vmatmul.bf16.vlgmr.msra.gmra.mxu1 %v11289_v46  ;;  %v7567_v49 = vld [vmem:[#allocation7 + $0x3d8] sm:$0xf0] }
 0x226   :  { %2500 = vmatpush.bf16.msrb.mxu1 %v7694_v54  ;;  %v7695_v0 = vld [vmem:[#allocation7 + $0x4d8] sm:$0xf0] }
 0x227   :  { %2530 = vmatpush.bf16.msra.mxu2 %v7806_v58  ;;  %v7938_v58 = vor.u32 %v9835_v43, %v7935_v55  ;;  %v7583_v55 = vld [vmem:[#allocation7 + $0x3f8] sm:$0xf0] }
 0x228   :  { %2472 = vmatpush.bf16.msrb.mxu0 %v7550_v2  ;;  %v7551_v53 = vld [vmem:[#allocation7 + $0x3b8] sm:$0xf0] }
 0x229   :  { %2675 = vmatpush.bf16.msrb.mxu3 %v7938_v58  ;;  %v7711_v58 = vld [vmem:[#allocation7 + $0x4f8] sm:$0xf0] }
 0x22a   :  { %2422 = vmatmul.bf16.gmra.mxu2 %v11392_v30  ;;  %2501 = vmatpush.bf16.msrb.mxu1 %v7678_v1  ;;  %v7618_v1 = vor.u32 %v9755_v28, %v7615_v51 }
 0x22b   :  { %2531 = vmatpush.bf16.msra.mxu2 %v7790_v9  ;;  %v9819_v9 = vld [vmem:[#allocation7 + $0x62c] sm:$0xf] }
 0x22c   :  { %7944 = vmatmul.msk.bf16.gmra.mxu3 %vm2222_vm5, %v11417_v21  ;;  %2473 = vmatpush.bf16.msrb.mxu0 %v7534_v44  ;;  %v7874_v2 = vor.u32 %v9819_v9, %v7871_v12  ;;  %v9751_v44 = vld [vmem:[#allocation7 + $0x40c] sm:$0xf] }
 0x22e   :  { %2502 = vmatpush.bf16.msrb.mxu1 %v7662_v16 }
 0x22f   :  { %2532 = vmatpush.bf16.msra.mxu2 %v7774_v17  ;;  %v9787_v17 = vld [vmem:[#allocation7 + $0x52c] sm:$0xf] }
 0x230   :  { %2474 = vmatpush.bf16.msrb.mxu0 %v7518_v11  ;;  %v7746_v13 = vor.u32 %v9787_v17, %v7743_v45  ;;  %v7791_v17 = vld [vmem:[#allocation7 + $0x598] sm:$0xf0] }
 0x232   :  { %2503 = vmatpush.bf16.msrb.mxu1 %v7646_v3  ;;  %v7602_v3 = vor.u32 %v9751_v44, %v7599_v47  ;;  %v9771_v44 = vld [vmem:[#allocation7 + $0x4ac] sm:$0xf]  ;;  %v7679_v47 = vld [vmem:[#allocation7 + $0x4b8] sm:$0xf0] }
 0x233   :  { %2364 = vmatmul.bf16.gmra.mxu0 %v11455_v37  ;;  %2641 = vmatpush.bf16.msrb.mxu2 %v7890_v42  ;;  %v9747_v42 = vld [vmem:[#allocation7 + $0x3ec] sm:$0xf] }
 0x234   :  { %2583 = vmatpush.bf16.msra.mxu0 %v7634_v26  ;;  %v7586_v50 = vor.u32 %v9747_v42, %v7583_v55  ;;  %v9803_v26 = vld [vmem:[#allocation7 + $0x5ac] sm:$0xf]  ;;  %v7663_v42 = vld [vmem:[#allocation7 + $0x498] sm:$0xf0] }
 0x235   :  { %2393 = vmatmul.bf16.gmra.mxu1 %v11477_v18 }
 0x236   :  { %2612 = vmatpush.bf16.msra.mxu1 %v7762_v48  ;;  %v7714_v48 = vor.u32 %v9779_v15, %v7711_v58 }
 0x237   :  { %2642 = vmatpush.bf16.msrb.mxu2 %v7874_v2  ;;  %v9775_v2 = vld [vmem:[#allocation7 + $0x4cc] sm:$0xf] }
 0x238   :  { %2584 = vmatpush.bf16.msra.mxu0 %v7618_v1  ;;  %v7698_v51 = vor.u32 %v9775_v2, %v7695_v0  ;;  %v9799_v1 = vld [vmem:[#allocation7 + $0x58c] sm:$0xf] }
 0x23a   :  { %2427 = vmatmul.bf16.gmra.mxu2 %v11503_v10  ;;  %2613 = vmatpush.bf16.msra.mxu1 %v7746_v13 }
 0x23b   :  { %2643 = vmatpush.bf16.msrb.mxu2 %v7858_v4  ;;  %v7794_v4 = vor.u32 %v9799_v1, %v7791_v17 }
 0x23c   :  { %7945 = vmatmul.msk.bf16.gmra.mxu3 %vm2222_vm5, %v11514_v62  ;;  %2585 = vmatpush.bf16.msra.mxu0 %v7602_v3  ;;  %v7682_v3 = vor.u32 %v9771_v44, %v7679_v47 }
 0x23f   :  { %2644 = vmatpush.bf16.msrb.mxu2 %v7842_v24  ;;  %v7554_v24 = vor.u32 %v9739_v32, %v7551_v53 }
 0x240   :  { %2586 = vmatpush.bf16.msra.mxu0 %v7586_v50 }
 0x243   :  { %2369 = vmatmul.bf16.gmra.mxu0 %v11530_v34 }
 0x245   :  { %2398 = vmatmul.bf16.gmra.mxu1 %v11540_v36 }
 0x24a   :  { %2432 = vmatmul.bf16.gmra.mxu2 %v11549_v39 }
 0x24c   :  { %7946 = vmatmul.msk.bf16.gmra.mxu3 %vm2222_vm5, %v11551_v14 }
 0x252   :  { %v2302_v20 = vpop.f32.mrf.mxu2  ;;  %v2331_v7 = vpop.f32.mrf.mxu3 }
 0x253   :  { %2374 = vmatmul.bf16.gmra.mxu0 %v11556_v38 }
 0x254   :  { %v2244_v57 = vpop.f32.mrf.mxu0  ;;  %v2273_v6 = vpop.f32.mrf.mxu1 }
 0x255   :  { %2403 = vmatmul.bf16.gmra.mxu1 %v11558_v52  ;;  %v2274_v22 = vadd.f32 %v2273_v6, %v2244_v57  ;;  %v7730_v57 = vor.u32 %v9783_v35, %v7727_v8  ;;  %v9807_v6 = vld [vmem:[#allocation7 + $0x5cc] sm:$0xf]  ;;  %v7775_v8 = vld [vmem:[#allocation7 + $0x578] sm:$0xf0] }
 0x256   :  { %v9795_v35 = vld [vmem:[#allocation7 + $0x56c] sm:$0xf] }
 0x257   :  { %v2303_v5 = vadd.f32 %v2302_v20, %v2274_v22  ;;  %v7823_v22 = vld [vmem:[#allocation7 + $0x5d8] sm:$0xf0]  ;;  %2614 = vmatpush.bf16.msra.mxu1 %v7730_v57  ;;  %v7778_v57 = vor.u32 %v9795_v35, %v7775_v8 }
 0x259   :  { %v11587_v23 = vadd.f32 %v2331_v7, %v2303_v5  ;;  %v7826_v5 = vor.u32 %v9807_v6, %v7823_v22  ;;  %v9827_v6 = vld [vmem:[#allocation7 + $0x66c] sm:$0xf]  ;;  %v7903_v22 = vld [vmem:[#allocation7 + $0x678] sm:$0xf0] }
 0x25a   :  { %2533 = vmatmul.bf16.vlgmr.msra.gmra.mxu2 %v11237_v31  ;;  %v2304_v29 = vpop.f32.mrf.mxu2  ;;  %v2333_v27 = vpop.f32.mrf.mxu3 }
 0x25b   :  { %2645 = vmatpush.bf16.msrb.mxu2 %v7826_v5  ;;  %2615 = vmatpush.bf16.msra.mxu1 %v7714_v48  ;;  %v7519_v48 = vld [vmem:[#allocation7 + $0x378] sm:$0xf0] }
 0x25c   :  { %7947 = vmatmul.msk.bf16.vlgmr.msra.gmra.mxu3 %vm2222_vm5, %v11239_v19  ;;  %v2246_v60 = vpop.f32.mrf.mxu0  ;;  %v2275_v59 = vpop.f32.mrf.mxu1 }
 0x25d   :  { %v2276_v54 = vadd.f32 %v2275_v59, %v2246_v60  ;;  %v7810_v60 = vor.u32 %v9803_v26, %v7807_v63  ;;  %v9831_v59 = vld [vmem:[#allocation7 + $0x68c] sm:$0xf] }
 0x25f   :  { %v2305_v25 = vadd.f32 %v2304_v29, %v2276_v54  ;;  %v7919_v29 = vld [vmem:[#allocation7 + $0x698] sm:$0xf0]  ;;  %2646 = vmatpush.bf16.msrb.mxu2 %v7810_v60  ;;  %2616 = vmatpush.bf16.msra.mxu1 %v7698_v51  ;;  %v9763_v60 = vld [vmem:[#allocation7 + $0x46c] sm:$0xf] }
 0x260   :  { %v7922_v12 = vor.u32 %v9831_v59, %v7919_v29  ;;  %v7647_v29 = vld [vmem:[#allocation7 + $0x478] sm:$0xf0] }
 0x261   :  { %v11592_v16 = vadd.f32 %v2333_v27, %v2305_v25  ;;  %v9743_v27 = vld [vmem:[#allocation7 + $0x3cc] sm:$0xf] }
 0x262   :  { %v7570_v28 = vor.u32 %v9743_v27, %v7567_v49  ;;  %2676 = vmatpush.bf16.msrb.mxu3 %v7922_v12 }
 0x263   :  { %2475 = vmatmul.bf16.vlgmr.msrb.gmra.mxu0 %v11287_v61  ;;  %2647 = vmatpush.bf16.msrb.mxu2 %v7794_v4 }
 0x264   :  { %2587 = vmatpush.bf16.msra.mxu0 %v7570_v28  ;;  %2617 = vmatpush.bf16.msra.mxu1 %v7682_v3  ;;  %v9716_v3 = vld [vmem:[#allocation7 + $0x2ec] sm:$0xf0] }
 0x265   :  { %2504 = vmatmul.bf16.vlgmr.msrb.gmra.mxu1 %v11289_v46 }
 0x267   :  { %2648 = vmatpush.bf16.msrb.mxu2 %v7778_v57  ;;  %v8373_v57 = vld [vmem:[#allocation7 + $0x340] sm:$0xf] }
 0x268   :  { %2588 = vmatpush.bf16.msra.mxu0 %v7554_v24 }
 0x26a   :  { %2538 = vmatmul.bf16.gmra.mxu2 %v11392_v30 }
 0x26c   :  { %7948 = vmatmul.msk.bf16.gmra.mxu3 %vm2222_vm5, %v11417_v21  ;;  %v2307_v40 = vpop.f32.mrf.mxu2 }
 0x26e   :  { %v2336_v11 = vpop.f32.mrf.mxu3 }
 0x270   :  { %v2249_v20 = vpop.f32.mrf.mxu0 }
 0x272   :  { %v2278_v7 = vpop.f32.mrf.mxu1 }
 0x273   :  { %v2279_v56 = vadd.f32 %v2278_v7, %v2249_v20  ;;  %2480 = vmatmul.bf16.gmra.mxu0 %v11455_v37  ;;  %v9735_v20 = vld [vmem:[#allocation7 + $0x38c] sm:$0xf] }
 0x274   :  { %v2309_v43 = vpop.f32.mrf.mxu2 }
 0x275   :  { %v2308_v33 = vadd.f32 %v2307_v40, %v2279_v56  ;;  %2509 = vmatmul.bf16.gmra.mxu1 %v11477_v18  ;;  %v7906_v56 = vor.u32 %v9827_v6, %v7903_v22  ;;  %v9728_v22 = vld [vmem:[#allocation7 + $0x34c] sm:$0xf0] }
 0x276   :  { %v2338_v41 = vpop.f32.mrf.mxu3 }
 0x277   :  { %v11596_v54 = vadd.f32 %v2336_v11, %v2308_v33  ;;  %v7535_v33 = vld [vmem:[#allocation7 + $0x398] sm:$0xf0]  ;;  %2677 = vmatpush.bf16.msrb.mxu3 %v7906_v56 }
 0x278   :  { %v2251_v9 = vpop.f32.mrf.mxu0  ;;  %v7538_v55 = vor.u32 %v9735_v20, %v7535_v33  ;;  %v8069_v20 = vld [vmem:[#allocation7 + $0xe0] sm:$0xf]  ;;  %v8374_v33 = vor.u32 %v9728_v22, %v8373_v57 }
 0x279   :  { %v8165_v57 = vld [vmem:[#allocation7 + $0x1a0] sm:$0xf] }
 0x27a   :  { %v2280_v45 = vpop.f32.mrf.mxu1  ;;  %2543 = vmatmul.bf16.gmra.mxu2 %v11503_v10  ;;  %2589 = vmatpush.bf16.msra.mxu0 %v7538_v55  ;;  %v9684_v55 = vld [vmem:[#allocation7 + $0x1ec] sm:$0xf0] }
 0x27b   :  { %v2281_v13 = vadd.f32 %v2280_v45, %v2251_v9  ;;  %v7650_v9 = vor.u32 %v9763_v60, %v7647_v29  ;;  %3342 = vmatpush.bf16.msra.mxu3 %v8374_v33  ;;  %v8309_v60 = vld [vmem:[#allocation7 + $0x2c0] sm:$0xf]  ;;  %v9700_v33 = vld [vmem:[#allocation7 + $0x26c] sm:$0xf0] }
 0x27c   :  { %7949 = vmatmul.msk.bf16.gmra.mxu3 %vm2222_vm5, %v11514_v62  ;;  %v8293_v29 = vld [vmem:[#allocation7 + $0x2a0] sm:$0xf] }
 0x27d   :  { %v2310_v25 = vadd.f32 %v2309_v43, %v2281_v13  ;;  %v2312_v40 = vpop.f32.mrf.mxu2  ;;  %v9767_v43 = vld [vmem:[#allocation7 + $0x48c] sm:$0xf] }
 0x27e   :  { %v7666_v50 = vor.u32 %v9767_v43, %v7663_v42  ;;  %v8197_v42 = vld [vmem:[#allocation7 + $0x1e0] sm:$0xf] }
 0x27f   :  { %v2341_v11 = vpop.f32.mrf.mxu3  ;;  %v11601_v5 = vadd.f32 %v2338_v41, %v2310_v25  ;;  %v9731_v41 = vld [vmem:[#allocation7 + $0x36c] sm:$0xf] }
 0x280   :  { %v2254_v7 = vpop.f32.mrf.mxu0  ;;  %2618 = vmatpush.bf16.msra.mxu1 %v7666_v50  ;;  %v7522_v59 = vor.u32 %v9731_v41, %v7519_v48 }
 0x282   :  { %v2283_v15 = vpop.f32.mrf.mxu1  ;;  %2590 = vmatpush.bf16.msra.mxu0 %v7522_v59  ;;  %v9712_v59 = vld [vmem:[#allocation7 + $0x2cc] sm:$0xf0] }
 0x283   :  { %v2284_v58 = vadd.f32 %v2283_v15, %v2254_v7  ;;  %2485 = vmatmul.bf16.gmra.mxu0 %v11530_v34  ;;  %v9652_v7 = vld [vmem:[#allocation7 + $0xec] sm:$0xf0] }
 0x284   :  { %2619 = vmatpush.bf16.msra.mxu1 %v7650_v9  ;;  %v8070_v43 = vor.u32 %v9652_v7, %v8069_v20  ;;  %v9708_v9 = vld [vmem:[#allocation7 + $0x2ac] sm:$0xf0] }
 0x285   :  { %v2313_v26 = vadd.f32 %v2312_v40, %v2284_v58  ;;  %2514 = vmatmul.bf16.gmra.mxu1 %v11540_v36  ;;  %v2314_v63 = vpop.f32.mrf.mxu2  ;;  %v8198_v58 = vor.u32 %v9684_v55, %v8197_v42 }
 0x286   :  { %3250 = vmatpush.bf16.msrb.mxu0 %v8070_v43 }
 0x287   :  { %v2343_v27 = vpop.f32.mrf.mxu3  ;;  %v11605_v12 = vadd.f32 %v2341_v11, %v2313_v26  ;;  %v8325_v11 = vld [vmem:[#allocation7 + $0x2e0] sm:$0xf] }
 0x288   :  { %v2256_v49 = vpop.f32.mrf.mxu0  ;;  %v8326_v6 = vor.u32 %v9716_v3, %v8325_v11  ;;  %3279 = vmatpush.bf16.msrb.mxu1 %v8198_v58  ;;  %v9644_v3 = vld [vmem:[#allocation7 + $0xac] sm:$0xf0] }
 0x28a   :  { %v2285_v2 = vpop.f32.mrf.mxu1  ;;  %2548 = vmatmul.bf16.gmra.mxu2 %v11549_v39 }
 0x28b   :  { %v2286_v0 = vadd.f32 %v2285_v2, %v2256_v49  ;;  %3308 = vmatpush.bf16.msra.mxu2 %v8326_v6  ;;  %v8053_v49 = vld [vmem:[#allocation7 + $0xc0] sm:$0xf]  ;;  %v9648_v2 = vld [vmem:[#allocation7 + $0xcc] sm:$0xf0] }
 0x28c   :  { %7950 = vmatmul.msk.bf16.gmra.mxu3 %vm2222_vm5, %v11551_v14  ;;  %v9676_v6 = vld [vmem:[#allocation7 + $0x1ac] sm:$0xf0] }
 0x28d   :  { %v2315_v28 = vadd.f32 %v2314_v63, %v2286_v0  ;;  %v2317_v51 = vpop.f32.mrf.mxu2  ;;  %v8166_v7 = vor.u32 %v9676_v6, %v8165_v57 }
 0x28f   :  { %v2346_v1 = vpop.f32.mrf.mxu3  ;;  %v11610_v17 = vadd.f32 %v2343_v27, %v2315_v28  ;;  %v8310_v27 = vor.u32 %v9712_v59, %v8309_v60  ;;  %v8054_v28 = vor.u32 %v9648_v2, %v8053_v49  ;;  %v8149_v60 = vld [vmem:[#allocation7 + $0x180] sm:$0xf] }
 0x290   :  { %v2259_v45 = vpop.f32.mrf.mxu0 }
 0x291   :  { %3309 = vmatpush.bf16.msra.mxu2 %v8310_v27  ;;  %3251 = vmatpush.bf16.msrb.mxu0 %v8054_v28  ;;  %v8245_v27 = vld [vmem:[#allocation7 + $0x240] sm:$0xf] }
 0x292   :  { %v2288_v4 = vpop.f32.mrf.mxu1  ;;  %v8357_v28 = vld [vmem:[#allocation7 + $0x320] sm:$0xf] }
 0x293   :  { %v2289_v13 = vadd.f32 %v2288_v4, %v2259_v45  ;;  %2490 = vmatmul.bf16.gmra.mxu0 %v11556_v38 }
 0x295   :  { %v2318_v25 = vadd.f32 %v2317_v51, %v2289_v13  ;;  %2519 = vmatmul.bf16.gmra.mxu1 %v11558_v52  ;;  %v2319_v40 = vpop.f32.mrf.mxu2  ;;  %v8181_v51 = vld [vmem:[#allocation7 + $0x1c0] sm:$0xf]  ;;  %v8294_v13 = vor.u32 %v9708_v9, %v8293_v29  ;;  %v9672_v29 = vld [vmem:[#allocation7 + $0x18c] sm:$0xf0] }
 0x296   :  { %v9696_v9 = vld [vmem:[#allocation7 + $0x24c] sm:$0xf0]  ;;  %v8150_v2 = vor.u32 %v9672_v29, %v8149_v60 }
 0x297   :  { %v2348_v32 = vpop.f32.mrf.mxu3  ;;  %v11614_v53 = vadd.f32 %v2346_v1, %v2318_v25  ;;  %v9680_v1 = vld [vmem:[#allocation7 + $0x1cc] sm:$0xf0]  ;;  %3310 = vmatpush.bf16.msra.mxu2 %v8294_v13 }
 0x298   :  { %v2261_v44 = vpop.f32.mrf.mxu0  ;;  %v8182_v25 = vor.u32 %v9680_v1, %v8181_v51  ;;  %v9724_v51 = vld [vmem:[#allocation7 + $0x32c] sm:$0xf0]  ;;  %v8005_v1 = vld [vmem:[#allocation7 + $0x60] sm:$0xf] }
 0x299   :  { %v9720_v60 = vld [vmem:[#allocation7 + $0x30c] sm:$0xf0] }
 0x29a   :  { %v2290_v24 = vpop.f32.mrf.mxu1  ;;  %2649 = vmatmul.bf16.vlgmr.msrb.gmra.mxu2 %v11237_v31  ;;  %3280 = vmatpush.bf16.msrb.mxu1 %v8182_v25  ;;  %v8358_v25 = vor.u32 %v9724_v51, %v8357_v28 }
 0x29b   :  { %v2291_v47 = vadd.f32 %v2290_v24, %v2261_v44 }
 0x29c   :  { %7951 = vmatmul.msk.bf16.vlgmr.msrb.gmra.mxu3 %vm2222_vm5, %v11239_v19 }
 0x29d   :  { %v2320_v35 = vadd.f32 %v2319_v40, %v2291_v47  ;;  %v2418_v8 = vpop.f32.mrf.mxu2  ;;  %v8277_v47 = vld [vmem:[#allocation7 + $0x280] sm:$0xf]  ;;  %3343 = vmatpush.bf16.msra.mxu3 %v8358_v25 }
 0x29e   :  { %3281 = vmatpush.bf16.msrb.mxu1 %v8166_v7  ;;  %v9632_v7 = vld [vmem:[#allocation7 + $0x4c] sm:$0xf0] }
 0x29f   :  { %v2447_v56 = vpop.f32.mrf.mxu3  ;;  %v11619_v15 = vadd.f32 %v2348_v32, %v2320_v35  ;;  %v9704_v35 = vld [vmem:[#allocation7 + $0x28c] sm:$0xf0] }
 0x2a0   :  { %v2360_v50 = vpop.f32.mrf.mxu0  ;;  %v8278_v11 = vor.u32 %v9704_v35, %v8277_v47  ;;  %v8229_v35 = vld [vmem:[#allocation7 + $0x220] sm:$0xf] }
 0x2a2   :  { %v2389_v26 = vpop.f32.mrf.mxu1  ;;  %3311 = vmatpush.bf16.msra.mxu2 %v8278_v11  ;;  %3282 = vmatpush.bf16.msrb.mxu1 %v8150_v2  ;;  %v8101_v2 = vld [vmem:[#allocation7 + $0x120] sm:$0xf] }
 0x2a3   :  { %v2390_v63 = vadd.f32 %v2389_v26, %v2360_v50  ;;  %2591 = vmatmul.bf16.vlgmr.msra.gmra.mxu0 %v11287_v61 }
 0x2a5   :  { %v2419_v41 = vadd.f32 %v2418_v8, %v2390_v63  ;;  %2620 = vmatmul.bf16.vlgmr.msra.gmra.mxu1 %v11289_v46  ;;  %v2420_v48 = vpop.f32.mrf.mxu2  ;;  %v8037_v8 = vld [vmem:[#allocation7 + $0xa0] sm:$0xf] }
 0x2a6   :  { %v8038_v20 = vor.u32 %v9644_v3, %v8037_v8  ;;  %v9692_v8 = vld [vmem:[#allocation7 + $0x22c] sm:$0xf0] }
 0x2a7   :  { %v2449_v0 = vpop.f32.mrf.mxu3  ;;  %v11623_v45 = vadd.f32 %v2447_v56, %v2419_v41  ;;  %v8261_v56 = vld [vmem:[#allocation7 + $0x260] sm:$0xf]  ;;  %v8230_v3 = vor.u32 %v9692_v8, %v8229_v35 }
 0x2a8   :  { %v2362_v4 = vpop.f32.mrf.mxu0  ;;  %v8262_v55 = vor.u32 %v9700_v33, %v8261_v56  ;;  %3252 = vmatpush.bf16.msrb.mxu0 %v8038_v20  ;;  %v8021_v41 = vld [vmem:[#allocation7 + $0x80] sm:$0xf] }
 0x2a9   :  { %v7989_v20 = vld [vmem:[#allocation7 + $0x40] sm:$0xf] }
 0x2aa   :  { %v2391_v40 = vpop.f32.mrf.mxu1  ;;  %2654 = vmatmul.bf16.gmra.mxu2 %v11392_v30  ;;  %v8117_v56 = vld [vmem:[#allocation7 + $0x140] sm:$0xf]  ;;  %v7990_v33 = vor.u32 %v9632_v7, %v7989_v20 }
 0x2ab   :  { %v2392_v32 = vadd.f32 %v2391_v40, %v2362_v4  ;;  %3312 = vmatpush.bf16.msra.mxu2 %v8262_v55  ;;  %v9636_v40 = vld [vmem:[#allocation7 + $0x6c] sm:$0xf0]  ;;  %v8213_v55 = vld [vmem:[#allocation7 + $0x200] sm:$0xf] }
 0x2ac   :  { %7952 = vmatmul.msk.bf16.gmra.mxu3 %vm2222_vm5, %v11417_v21 }
 0x2ad   :  { %v2421_v44 = vadd.f32 %v2420_v48, %v2392_v32  ;;  %v2423_v24 = vpop.f32.mrf.mxu2  ;;  %v9640_v48 = vld [vmem:[#allocation7 + $0x8c] sm:$0xf0]  ;;  %v8133_v32 = vld [vmem:[#allocation7 + $0x160] sm:$0xf] }
 0x2ae   :  { %v8022_v59 = vor.u32 %v9640_v48, %v8021_v41  ;;  %v8341_v48 = vld [vmem:[#allocation7 + $0x300] sm:$0xf] }
 0x2af   :  { %v2452_v22 = vpop.f32.mrf.mxu3  ;;  %v11628_v43 = vadd.f32 %v2449_v0, %v2421_v44  ;;  %v8246_v0 = vor.u32 %v9696_v9, %v8245_v27  ;;  %v9668_v44 = vld [vmem:[#allocation7 + $0x16c] sm:$0xf0] }
 0x2b0   :  { %v2365_v42 = vpop.f32.mrf.mxu0  ;;  %3253 = vmatpush.bf16.msrb.mxu0 %v8022_v59  ;;  %v8134_v47 = vor.u32 %v9668_v44, %v8133_v32  ;;  %v7973_v59 = vld [vmem:[#allocation7 + $0x20] sm:$0xf]  ;;  %v9628_v9 = vld [vmem:[#allocation7 + $0x2c] sm:$0xf0] }
 0x2b1   :  { %3313 = vmatpush.bf16.msra.mxu2 %v8246_v0  ;;  %v9660_v0 = vld [vmem:[#allocation7 + $0x12c] sm:$0xf0]  ;;  %v7974_v28 = vor.u32 %v9628_v9, %v7973_v59  ;;  %v8085_v44 = vld [vmem:[#allocation7 + $0x100] sm:$0xf] }
 0x2b2   :  { %v2394_v50 = vpop.f32.mrf.mxu1  ;;  %3283 = vmatpush.bf16.msrb.mxu1 %v8134_v47  ;;  %v9624_v32 = vld [vmem:[#allocation7 + $0xc] sm:$0xf0] }
 0x2b3   :  { %v2395_v58 = vadd.f32 %v2394_v50, %v2365_v42  ;;  %2596 = vmatmul.bf16.gmra.mxu0 %v11455_v37  ;;  %v9664_v42 = vld [vmem:[#allocation7 + $0x14c] sm:$0xf0] }
 0x2b4   :  { %v9688_v50 = vld [vmem:[#allocation7 + $0x20c] sm:$0xf0] }
 0x2b5   :  { %v2424_v26 = vadd.f32 %v2423_v24, %v2395_v58  ;;  %2625 = vmatmul.bf16.gmra.mxu1 %v11477_v18  ;;  %v2425_v63 = vpop.f32.mrf.mxu2  ;;  %v8006_v24 = vor.u32 %v9636_v40, %v8005_v1  ;;  %3314 = vmatpush.bf16.msra.mxu2 %v8230_v3  ;;  %v8214_v41 = vor.u32 %v9688_v50, %v8213_v55  ;;  %v7957_v40 = vld [vmem:[#allocation7] sm:$0xf]  ;;  %v9656_v47 = vld [vmem:[#allocation7 + $0x10c] sm:$0xf0] }
 0x2b6   :  { %v8102_v1 = vor.u32 %v9660_v0, %v8101_v2  ;;  %v8086_v8 = vor.u32 %v9656_v47, %v8085_v44 }
 0x2b7   :  { %v2454_v49 = vpop.f32.mrf.mxu3  ;;  %v11632_v4 = vadd.f32 %v2452_v22, %v2424_v26  ;;  %3254 = vmatpush.bf16.msrb.mxu0 %v8006_v24  ;;  %v8118_v26 = vor.u32 %v9664_v42, %v8117_v56  ;;  %v7958_v24 = vor.u32 %v9624_v32, %v7957_v40  ;;  %v9650_v40 = vld [vmem:[#allocation7 + $0xe4] sm:$0xf]  ;;  %v8071_v32 = vld [vmem:[#allocation7 + $0xf0] sm:$0xf0] }
 0x2b8   :  { %v2367_v13 = vpop.f32.mrf.mxu0  ;;  %v8074_v47 = vor.u32 %v9650_v40, %v8071_v32  ;;  %v8183_v40 = vld [vmem:[#allocation7 + $0x1d0] sm:$0xf0] }
 0x2b9   :  { %3284 = vmatpush.bf16.msrb.mxu1 %v8118_v26  ;;  %3315 = vmatpush.bf16.msra.mxu2 %v8214_v41 }
 0x2ba   :  { %v2396_v11 = vpop.f32.mrf.mxu1  ;;  %2659 = vmatmul.bf16.gmra.mxu2 %v11503_v10 }
 0x2bb   :  { %v2397_v57 = vadd.f32 %v2396_v11, %v2367_v13  ;;  %3255 = vmatpush.bf16.msrb.mxu0 %v7990_v33 }
 0x2bc   :  { %7953 = vmatmul.msk.bf16.gmra.mxu3 %vm2222_vm5, %v11514_v62 }
 0x2bd   :  { %v2426_v6 = vadd.f32 %v2425_v63, %v2397_v57  ;;  %v2428_v22 = vpop.f32.mrf.mxu2  ;;  %v8342_v63 = vor.u32 %v9720_v60, %v8341_v48  ;;  %3285 = vmatpush.bf16.msrb.mxu1 %v8102_v1  ;;  %v1406_v48 = vrot.slane %v11239_v19, 7  ;;  %v8327_v1 = vld [vmem:[#allocation7 + $0x2f0] sm:$0xf0] }
 0x2be   :  { %v8103_v19 = vld [vmem:[#allocation7 + $0x130] sm:$0xf0] }
 0x2bf   :  { %v2457_v58 = vpop.f32.mrf.mxu3  ;;  %v11637_v29 = vadd.f32 %v2454_v49, %v2426_v6  ;;  %3344 = vmatpush.bf16.msra.mxu3 %v8342_v63  ;;  %3256 = vmatpush.bf16.msrb.mxu0 %v7974_v28  ;;  %v11665_v2 = vsel %vm1402_vm8, 0, %v1406_v48 }
 0x2c0   :  { %v2370_v27 = vpop.f32.mrf.mxu0 }
 0x2c1   :  { %3286 = vmatpush.bf16.msrb.mxu1 %v8086_v8  ;;  %v8199_v8 = vld [vmem:[#allocation7 + $0x1f0] sm:$0xf0] }
 0x2c2   :  { %v2399_v51 = vpop.f32.mrf.mxu1 }
 0x2c3   :  { %v2400_v13 = vadd.f32 %v2399_v51, %v2370_v27  ;;  %2601 = vmatmul.bf16.gmra.mxu0 %v11530_v34  ;;  %v11659_v27 = vrot.slane %v11237_v31, 7  ;;  %v9714_v51 = vld [vmem:[#allocation7 + $0x2e4] sm:$0xf] }
 0x2c4   :  { %3257 = vmatpush.bf16.msrb.mxu0 %v7958_v24 }
 0x2c5   :  { %v2429_v25 = vadd.f32 %v2428_v22, %v2400_v13  ;;  %2630 = vmatmul.bf16.gmra.mxu1 %v11540_v36  ;;  %v2430_v49 = vpop.f32.mrf.mxu2  ;;  %v9726_v13 = vld [vmem:[#allocation7 + $0x344] sm:$0xf] }
 0x2c7   :  { %v2459_v35 = vpop.f32.mrf.mxu3  ;;  %v11641_v11 = vadd.f32 %v2457_v58, %v2429_v25  ;;  %v8330_v25 = vor.u32 %v9714_v51, %v8327_v1  ;;  %v8055_v51 = vld [vmem:[#allocation7 + $0xd0] sm:$0xf0] }
 0x2c8   :  { %v2372_v3 = vpop.f32.mrf.mxu0  ;;  %3366 = vmatpush.bf16.msra.mxu0 %v8074_v47 }
 0x2c9   :  { %3424 = vmatpush.bf16.msrb.mxu2 %v8330_v25 }
 0x2ca   :  { %v2401_v57 = vpop.f32.mrf.mxu1  ;;  %2664 = vmatmul.bf16.gmra.mxu2 %v11549_v39 }
 0x2cb   :  { %v2402_v6 = vadd.f32 %v2401_v57, %v2372_v3 }
 0x2cc   :  { %7954 = vmatmul.msk.bf16.gmra.mxu3 %vm2222_vm5, %v11551_v14 }
 0x2cd   :  { %v2431_v22 = vadd.f32 %v2430_v49, %v2402_v6  ;;  %v2433_v20 = vpop.f32.mrf.mxu2  ;;  %v8375_v49 = vld [vmem:[#allocation7 + $0x350] sm:$0xf0] }
 0x2ce   :  { %v8378_v24 = vor.u32 %v9726_v13, %v8375_v49  ;;  %v12766_v13 = vrot.slane %v11417_v21, 7  ;;  %v9678_v49 = vld [vmem:[#allocation7 + $0x1c4] sm:$0xf] }
 0x2cf   :  { %v2462_v7 = vpop.f32.mrf.mxu3  ;;  %v11646_v56 = vadd.f32 %v2459_v35, %v2431_v22  ;;  %v9682_v35 = vld [vmem:[#allocation7 + $0x1e4] sm:$0xf]  ;;  %v11672_v22 = vrot.slane %v11287_v61, 7 }
 0x2d0   :  { %v2375_v33 = vpop.f32.mrf.mxu0  ;;  %v8202_v6 = vor.u32 %v9682_v35, %v8199_v8  ;;  %3458 = vmatpush.bf16.msrb.mxu3 %v8378_v24  ;;  %v8186_v24 = vor.u32 %v9678_v49, %v8183_v40 }
 0x2d2   :  { %v2404_v42 = vpop.f32.mrf.mxu1  ;;  %3395 = vmatpush.bf16.msra.mxu1 %v8202_v6  ;;  %v12765_v6 = vrot.slane %v11455_v37, 7 }
 0x2d3   :  { %v2405_v55 = vadd.f32 %v2404_v42, %v2375_v33  ;;  %2606 = vmatmul.bf16.gmra.mxu0 %v11556_v38  ;;  %v11678_v33 = vrot.slane %v11289_v46, 7  ;;  %v12767_v42 = vrot.slane %v11392_v30, 7  ;;  %v9666_v46 = vld [vmem:[#allocation7 + $0x164] sm:$0xf] }
 0x2d5   :  { %v2434_v50 = vadd.f32 %v2433_v20, %v2405_v55  ;;  %2635 = vmatmul.bf16.gmra.mxu1 %v11558_v52  ;;  %v2435_v58 = vpop.f32.mrf.mxu2  ;;  %v11689_v47 = vsel %vm1402_vm8, %v11659_v27, %v12767_v42  ;;  %v9722_v42 = vld [vmem:[#allocation7 + $0x324] sm:$0xf] }
 0x2d6   :  { %3396 = vmatpush.bf16.msra.mxu1 %v8186_v24  ;;  %v8263_v24 = vld [vmem:[#allocation7 + $0x270] sm:$0xf0] }
 0x2d7   :  { %v2464_v26 = vpop.f32.mrf.mxu3  ;;  %v11656_v60 = vadd.f32 %v2462_v7, %v2434_v50 }
 0x2d8   :  { %v2377_v59 = vpop.f32.mrf.mxu0 }
 0x2da   :  { %v2406_v63 = vpop.f32.mrf.mxu1  ;;  %8392 = vmatmul.msk.bf16.vlgmr.msra.gmra.mxu2 %vm11651_vm9, %v11659_v27 }
 0x2db   :  { %v2407_v9 = vadd.f32 %v2406_v63, %v2377_v59  ;;  %v9706_v59 = vld [vmem:[#allocation7 + $0x2a4] sm:$0xf] }
 0x2dc   :  { %8393 = vmatmul.msk.bf16.vlgmr.msra.gmra.mxu3 %vm2222_vm5, %v11665_v2 }
 0x2dd   :  { %v2436_v0 = vadd.f32 %v2435_v58, %v2407_v9  ;;  %v2534_v28 = vpop.f32.mrf.mxu2  ;;  %v9710_v58 = vld [vmem:[#allocation7 + $0x2c4] sm:$0xf]  ;;  %v8295_v9 = vld [vmem:[#allocation7 + $0x2b0] sm:$0xf0] }
 0x2df   :  { %v2563_v44 = vpop.f32.mrf.mxu3  ;;  %v11669_v3 = vadd.f32 %v2464_v26, %v2436_v0  ;;  %v8311_v26 = vld [vmem:[#allocation7 + $0x2d0] sm:$0xf0]  ;;  %v9646_v0 = vld [vmem:[#allocation7 + $0xc4] sm:$0xf] }
 0x2e0   :  { %v2476_v57 = vpop.f32.mrf.mxu0  ;;  %v8314_v63 = vor.u32 %v9710_v58, %v8311_v26  ;;  %v8058_v25 = vor.u32 %v9646_v0, %v8055_v51  ;;  %v9702_v58 = vld [vmem:[#allocation7 + $0x284] sm:$0xf]  ;;  %v8279_v26 = vld [vmem:[#allocation7 + $0x290] sm:$0xf0] }
 0x2e1   :  { %v8039_v0 = vld [vmem:[#allocation7 + $0xb0] sm:$0xf0]  ;;  %v9674_v51 = vld [vmem:[#allocation7 + $0x1a4] sm:$0xf] }
 0x2e2   :  { %v2505_v20 = vpop.f32.mrf.mxu1  ;;  %3425 = vmatpush.bf16.msrb.mxu2 %v8314_v63  ;;  %3367 = vmatpush.bf16.msra.mxu0 %v8058_v25  ;;  %v8167_v25 = vld [vmem:[#allocation7 + $0x1b0] sm:$0xf0] }
 0x2e3   :  { %v2506_v7 = vadd.f32 %v2505_v20, %v2476_v57  ;;  %8388 = vmatmul.msk.bf16.vlgmr.msrb.gmra.mxu0 %vm11651_vm9, %v11672_v22  ;;  %v11695_v57 = vsel %vm1402_vm8, %v1406_v48, %v12766_v13  ;;  %v8170_v40 = vor.u32 %v9674_v51, %v8167_v25  ;;  %v9638_v51 = vld [vmem:[#allocation7 + $0x84] sm:$0xf]  ;;  %v8023_v25 = vld [vmem:[#allocation7 + $0x90] sm:$0xf0] }
 0x2e5   :  { %v2535_v55 = vadd.f32 %v2534_v28, %v2506_v7  ;;  %8390 = vmatmul.msk.bf16.vlgmr.msrb.gmra.mxu1 %vm11651_vm9, %v11678_v33  ;;  %v2536_v50 = vpop.f32.mrf.mxu2  ;;  %v8298_v28 = vor.u32 %v9706_v59, %v8295_v9  ;;  %v9642_v59 = vld [vmem:[#allocation7 + $0xa4] sm:$0xf]  ;;  %v8282_v9 = vor.u32 %v9702_v58, %v8279_v26  ;;  %v8007_v26 = vld [vmem:[#allocation7 + $0x70] sm:$0xf0] }
 0x2e6   :  { %v8042_v48 = vor.u32 %v9642_v59, %v8039_v0  ;;  %3397 = vmatpush.bf16.msra.mxu1 %v8170_v40  ;;  %v8359_v59 = vld [vmem:[#allocation7 + $0x330] sm:$0xf0] }
 0x2e7   :  { %v2565_v1 = vpop.f32.mrf.mxu3  ;;  %3426 = vmatpush.bf16.msrb.mxu2 %v8298_v28  ;;  %v11700_v63 = vadd.f32 %v2563_v44, %v2535_v55  ;;  %v12764_v28 = vrot.slane %v11477_v18, 7  ;;  %v11709_v44 = vsel %vm1402_vm8, %v11672_v22, %v12765_v6 }
 0x2e8   :  { %v2478_v32 = vpop.f32.mrf.mxu0  ;;  %3368 = vmatpush.bf16.msra.mxu0 %v8042_v48  ;;  %v9670_v48 = vld [vmem:[#allocation7 + $0x184] sm:$0xf] }
 0x2e9   :  { %12866 = vst [vmem:[#allocation23_spill] sm:$0xff] %v11700_v63  ;;  %v11716_v58 = vsel %vm1402_vm8, %v11678_v33, %v12764_v28  ;;  %v8135_v63 = vld [vmem:[#allocation7 + $0x170] sm:$0xf0] }
 0x2ea   :  { %v2507_v35 = vpop.f32.mrf.mxu1  ;;  %3321 = vmatmul.bf16.gmra.mxu2 %v11689_v47 }
 0x2eb   :  { %v2508_v8 = vadd.f32 %v2507_v35, %v2478_v32  ;;  %v9698_v32 = vld [vmem:[#allocation7 + $0x264] sm:$0xf]  ;;  %3427 = vmatpush.bf16.msrb.mxu2 %v8282_v9 }
 0x2ec   :  { %8394 = vmatmul.msk.bf16.gmra.mxu3 %vm2222_vm5, %v11695_v57 }
 0x2ed   :  { %v2537_v20 = vadd.f32 %v2536_v50, %v2508_v8  ;;  %v2539_v7 = vpop.f32.mrf.mxu2  ;;  %v8266_v50 = vor.u32 %v9698_v32, %v8263_v24  ;;  %v8026_v32 = vor.u32 %v9638_v51, %v8023_v25  ;;  %v8151_v24 = vld [vmem:[#allocation7 + $0x190] sm:$0xf0] }
 0x2ee   :  { %v8154_v6 = vor.u32 %v9670_v48, %v8151_v24  ;;  %v8138_v48 = vor.u32 %v9666_v46, %v8135_v63  ;;  %v9690_v24 = vld [vmem:[#allocation7 + $0x224] sm:$0xf] }
 0x2ef   :  { %v11702_v49 = vpop.f32.mrf.mxu3  ;;  %3428 = vmatpush.bf16.msrb.mxu2 %v8266_v50  ;;  %v11721_v40 = vadd.f32 %v2565_v1, %v2537_v20  ;;  %v9634_v50 = vld [vmem:[#allocation7 + $0x64] sm:$0xf]  ;;  %3369 = vmatpush.bf16.msra.mxu0 %v8026_v32  ;;  %v12868_v1 = vrot.slane %v11503_v10, 7  ;;  %v12869_v20 = vrot.slane %v11392_v30, 7  ;;  %v12870_v32 = vrot.slane %v11514_v62, 7 }
 0x2f0   :  { %v2481_v35 = vpop.f32.mrf.mxu0  ;;  %3398 = vmatpush.bf16.msra.mxu1 %v8154_v6  ;;  %v8010_v25 = vor.u32 %v9634_v50, %v8007_v26  ;;  %v9630_v26 = vld [vmem:[#allocation7 + $0x44] sm:$0xf]  ;;  %v7991_v50 = vld [vmem:[#allocation7 + $0x50] sm:$0xf0] }
 0x2f1   :  { %12867 = vst [vmem:[#allocation31_spill] sm:$0xff] %v11721_v40  ;;  %v11730_v51 = vsel %vm1402_vm8, %v12869_v20, %v12868_v1  ;;  %v12871_v40 = vrot.slane %v11417_v21, 7  ;;  %v8119_v1 = vld [vmem:[#allocation7 + $0x150] sm:$0xf0]  ;;  %v9686_v20 = vld [vmem:[#allocation7 + $0x204] sm:$0xf] }
 0x2f2   :  { %v2510_v8 = vpop.f32.mrf.mxu1  ;;  %v9718_v46 = vld [vmem:[#allocation7 + $0x304] sm:$0xf] }
 0x2f3   :  { %v2511_v55 = vadd.f32 %v2510_v8, %v2481_v35  ;;  %3263 = vmatmul.bf16.gmra.mxu0 %v11709_v44  ;;  %v9694_v35 = vld [vmem:[#allocation7 + $0x244] sm:$0xf]  ;;  %v8247_v8 = vld [vmem:[#allocation7 + $0x250] sm:$0xf0]  ;;  %v11738_v61 = vsel %vm1402_vm8, %v12871_v40, %v12870_v32  ;;  %v7994_v40 = vor.u32 %v9630_v26, %v7991_v50  ;;  %v12873_v26 = vrot.slane %v11530_v34, 7 }
 0x2f4   :  { %v8250_v13 = vor.u32 %v9694_v35, %v8247_v8  ;;  %v8231_v35 = vld [vmem:[#allocation7 + $0x230] sm:$0xf0]  ;;  %3370 = vmatpush.bf16.msra.mxu0 %v8010_v25  ;;  %3399 = vmatpush.bf16.msra.mxu1 %v8138_v48  ;;  %v9626_v25 = vld [vmem:[#allocation7 + $0x24] sm:$0xf]  ;;  %v12874_v50 = vrot.slane %v11455_v37, 7 }
 0x2f5   :  { %v2540_v9 = vadd.f32 %v2539_v7, %v2511_v55  ;;  %3292 = vmatmul.bf16.gmra.mxu1 %v11716_v58  ;;  %v2541_v0 = vpop.f32.mrf.mxu2  ;;  %v8362_v55 = vor.u32 %v9722_v42, %v8359_v59  ;;  %v8234_v42 = vor.u32 %v9690_v24, %v8231_v35  ;;  %v8215_v24 = vld [vmem:[#allocation7 + $0x210] sm:$0xf0] }
 0x2f6   :  { %3429 = vmatpush.bf16.msrb.mxu2 %v8250_v13  ;;  %v8218_v32 = vor.u32 %v9686_v20, %v8215_v24  ;;  %v8343_v13 = vld [vmem:[#allocation7 + $0x310] sm:$0xf0] }
 0x2f7   :  { %v11723_v28 = vpop.f32.mrf.mxu3  ;;  %3459 = vmatpush.bf16.msrb.mxu3 %v8362_v55  ;;  %v11745_v55 = vadd.f32 %v11702_v49, %v2540_v9  ;;  %v8346_v48 = vor.u32 %v9718_v46, %v8343_v13  ;;  %v12875_v46 = vrot.slane %v11540_v36, 7  ;;  %v12876_v13 = vrot.slane %v11477_v18, 7 }
 0x2f8   :  { %v2483_v7 = vpop.f32.mrf.mxu0  ;;  %3371 = vmatpush.bf16.msra.mxu0 %v7994_v40 }
 0x2f9   :  { %12872 = vst [vmem:[#allocation24_spill] sm:$0xff] %v11745_v55  ;;  %v11760_v40 = vsel %vm1402_vm8, %v12876_v13, %v12875_v46  ;;  %v9685_v55 = vld [vmem:[#allocation7 + $0x1f4] sm:$0xf0] }
 0x2fa   :  { %v2512_v8 = vpop.f32.mrf.mxu1  ;;  %3326 = vmatmul.bf16.gmra.mxu2 %v11730_v51 }
 0x2fb   :  { %v2513_v59 = vadd.f32 %v2512_v8, %v2483_v7  ;;  %3430 = vmatpush.bf16.msrb.mxu2 %v8234_v42  ;;  %v9662_v7 = vld [vmem:[#allocation7 + $0x144] sm:$0xf]  ;;  %v7975_v42 = vld [vmem:[#allocation7 + $0x30] sm:$0xf0]  ;;  %3460 = vmatpush.bf16.msrb.mxu3 %v8346_v48 }
 0x2fc   :  { %8395 = vmatmul.msk.bf16.gmra.mxu3 %vm2222_vm5, %v11738_v61  ;;  %v8122_v8 = vor.u32 %v9662_v7, %v8119_v1  ;;  %v7978_v49 = vor.u32 %v9626_v25, %v7975_v42  ;;  %v11752_v7 = vsel %vm1402_vm8, %v12874_v50, %v12873_v26  ;;  %v7959_v25 = vld [vmem:[#allocation7 + $0x10] sm:$0xf0]  ;;  %v9654_v42 = vld [vmem:[#allocation7 + $0x104] sm:$0xf] }
 0x2fd   :  { %v2542_v6 = vadd.f32 %v2541_v0, %v2513_v59  ;;  %v2544_v63 = vpop.f32.mrf.mxu2  ;;  %v9658_v59 = vld [vmem:[#allocation7 + $0x124] sm:$0xf]  ;;  %v8087_v48 = vld [vmem:[#allocation7 + $0x110] sm:$0xf0] }
 0x2fe   :  { %3400 = vmatpush.bf16.msra.mxu1 %v8122_v8  ;;  %v8106_v1 = vor.u32 %v9658_v59, %v8103_v19  ;;  %3372 = vmatpush.bf16.msra.mxu0 %v7978_v49  ;;  %v8090_v26 = vor.u32 %v9654_v42, %v8087_v48  ;;  %v1423_v42 = vrot.slane %v11556_v38, 7 }
 0x2ff   :  { %v2573_v35 = vpop.f32.mrf.mxu3  ;;  %3431 = vmatpush.bf16.msrb.mxu2 %v8218_v32  ;;  %v9622_v32 = vld [vmem:[#allocation7 + $0x4] sm:$0xf]  ;;  %v11764_v19 = vadd.f32 %v11723_v28, %v2542_v6  ;;  %v12879_v6 = vrot.slane %v11514_v62, 7 }
 0x300   :  { %v2486_v0 = vpop.f32.mrf.mxu0 }
 0x301   :  { %12877 = vst [vmem:[#allocation25_spill] sm:$0xff] %v11764_v19 }
 0x302   :  { %v2515_v9 = vpop.f32.mrf.mxu1  ;;  %3401 = vmatpush.bf16.msra.mxu1 %v8106_v1 }
 0x303   :  { %v2516_v20 = vadd.f32 %v2515_v9, %v2486_v0  ;;  %3268 = vmatmul.bf16.gmra.mxu0 %v11752_v7  ;;  %v7962_v0 = vor.u32 %v9622_v32, %v7959_v25  ;;  %v1427_v9 = vrot.slane %v11549_v39, 7  ;;  %v8205_v39 = vld [vmem:[#allocation7 + $0x1e8] sm:$0xf] }
 0x305   :  { %v2545_v24 = vadd.f32 %v2544_v63, %v2516_v20  ;;  %3297 = vmatmul.bf16.gmra.mxu1 %v11760_v40  ;;  %v2546_v8 = vpop.f32.mrf.mxu2  ;;  %3373 = vmatpush.bf16.msra.mxu0 %v7962_v0  ;;  %v12878_v63 = vrot.slane %v11503_v10, 7  ;;  %v1429_v20 = vrot.slane %v11551_v14, 7 }
 0x306   :  { %3402 = vmatpush.bf16.msra.mxu1 %v8090_v26 }
 0x307   :  { %v2575_v59 = vpop.f32.mrf.mxu3  ;;  %v11770_v49 = vsel %vm1402_vm8, %v12878_v63, %v1427_v9  ;;  %v11777_v1 = vsel %vm1402_vm8, %v12879_v6, %v1429_v20  ;;  %v11781_v25 = vadd.f32 %v2573_v35, %v2545_v24  ;;  %v1425_v9 = vrot.slane %v11558_v52, 7 }
 0x308   :  { %v2488_v50 = vpop.f32.mrf.mxu0 }
 0x309   :  { %12880 = vst [vmem:[#allocation32_spill] sm:$0xff] %v11781_v25 }
 0x30a   :  { %v2517_v46 = vpop.f32.mrf.mxu1  ;;  %3331 = vmatmul.bf16.gmra.mxu2 %v11770_v49 }
 0x30b   :  { %v2518_v28 = vadd.f32 %v2517_v46, %v2488_v50  ;;  %v12881_v50 = vrot.slane %v11530_v34, 7  ;;  %v9669_v34 = vld [vmem:[#allocation7 + $0x174] sm:$0xf0] }
 0x30c   :  { %8396 = vmatmul.msk.bf16.gmra.mxu3 %vm2222_vm5, %v11777_v1 }
 0x30d   :  { %v2547_v13 = vadd.f32 %v2546_v8, %v2518_v28  ;;  %v2549_v32 = vpop.f32.mrf.mxu2  ;;  %v11788_v63 = vsel %vm1402_vm8, %v12881_v50, %v1423_v42  ;;  %v12882_v8 = vrot.slane %v11540_v36, 7  ;;  %v8381_v50 = vld [vmem:[#allocation7 + $0x348] sm:$0xf] }
 0x30f   :  { %v2578_v0 = vpop.f32.mrf.mxu3  ;;  %v11794_v35 = vsel %vm1402_vm8, %v12882_v8, %v1425_v9  ;;  %v11797_v28 = vadd.f32 %v2575_v59, %v2547_v13  ;;  %v9729_v13 = vld [vmem:[#allocation7 + $0x354] sm:$0xf0]  ;;  %v8077_v8 = vld [vmem:[#allocation7 + $0xe8] sm:$0xf] }
 0x310   :  { %v2491_v48 = vpop.f32.mrf.mxu0  ;;  %v8382_v19 = vor.u32 %v9729_v13, %v8381_v50 }
 0x311   :  { %12883 = vst [vmem:[#allocation33_spill] sm:$0xff] %v11797_v28  ;;  %v9653_v28 = vld [vmem:[#allocation7 + $0xf4] sm:$0xf0] }
 0x312   :  { %v2520_v26 = vpop.f32.mrf.mxu1  ;;  %v8078_v14 = vor.u32 %v9653_v28, %v8077_v8  ;;  %3574 = vmatpush.bf16.msra.mxu3 %v8382_v19  ;;  %v8317_v28 = vld [vmem:[#allocation7 + $0x2c8] sm:$0xf]  ;;  %v9649_v19 = vld [vmem:[#allocation7 + $0xd4] sm:$0xf0] }
 0x313   :  { %v2521_v20 = vadd.f32 %v2520_v26, %v2491_v48  ;;  %3273 = vmatmul.bf16.gmra.mxu0 %v11788_v63  ;;  %v8333_v26 = vld [vmem:[#allocation7 + $0x2e8] sm:$0xf] }
 0x314   :  { %3482 = vmatpush.bf16.msrb.mxu0 %v8078_v14  ;;  %v9709_v14 = vld [vmem:[#allocation7 + $0x2b4] sm:$0xf0]  ;;  %v8189_v8 = vld [vmem:[#allocation7 + $0x1c8] sm:$0xf] }
 0x315   :  { %v2550_v24 = vadd.f32 %v2549_v32, %v2521_v20  ;;  %3302 = vmatmul.bf16.gmra.mxu1 %v11794_v35  ;;  %v2551_v46 = vpop.f32.mrf.mxu2  ;;  %v9717_v32 = vld [vmem:[#allocation7 + $0x2f4] sm:$0xf0] }
 0x316   :  { %v8334_v59 = vor.u32 %v9717_v32, %v8333_v26  ;;  %v9713_v26 = vld [vmem:[#allocation7 + $0x2d4] sm:$0xf0]  ;;  %v8301_v32 = vld [vmem:[#allocation7 + $0x2a8] sm:$0xf] }
 0x317   :  { %v2580_v6 = vpop.f32.mrf.mxu3  ;;  %v11804_v20 = vadd.f32 %v2578_v0, %v2550_v24 }
 0x318   :  { %v2493_v25 = vpop.f32.mrf.mxu0  ;;  %3540 = vmatpush.bf16.msra.mxu2 %v8334_v59 }
 0x319   :  { %12884 = vst [vmem:[#allocation34_spill] sm:$0xff] %v11804_v20 }
 0x31a   :  { %v2522_v52 = vpop.f32.mrf.mxu1  ;;  %8402 = vmatmul.msk.bf16.vlgmr.msrb.gmra.mxu2 %vm11651_vm9, %v11659_v27 }
 0x31b   :  { %v2523_v42 = vadd.f32 %v2522_v52, %v2493_v25  ;;  %v8206_v25 = vor.u32 %v9685_v55, %v8205_v39  ;;  %v8318_v39 = vor.u32 %v9713_v26, %v8317_v28  ;;  %v8061_v55 = vld [vmem:[#allocation7 + $0xc8] sm:$0xf]  ;;  %v9705_v26 = vld [vmem:[#allocation7 + $0x294] sm:$0xf0] }
 0x31c   :  { %8403 = vmatmul.msk.bf16.vlgmr.msrb.gmra.mxu3 %vm2222_vm5, %v11665_v2  ;;  %v8062_v13 = vor.u32 %v9649_v19, %v8061_v55  ;;  %v8285_v28 = vld [vmem:[#allocation7 + $0x288] sm:$0xf] }
 0x31d   :  { %v2552_v48 = vadd.f32 %v2551_v46, %v2523_v42  ;;  %v2650_v9 = vpop.f32.mrf.mxu2  ;;  %3511 = vmatpush.bf16.msrb.mxu1 %v8206_v25  ;;  %3541 = vmatpush.bf16.msra.mxu2 %v8318_v39  ;;  %v8045_v55 = vld [vmem:[#allocation7 + $0xa8] sm:$0xf]  ;;  %v8286_v39 = vor.u32 %v9705_v26, %v8285_v28  ;;  %v9641_v28 = vld [vmem:[#allocation7 + $0x94] sm:$0xf0] }
 0x31e   :  { %3483 = vmatpush.bf16.msrb.mxu0 %v8062_v13  ;;  %v9677_v13 = vld [vmem:[#allocation7 + $0x1b4] sm:$0xf0]  ;;  %v8157_v26 = vld [vmem:[#allocation7 + $0x188] sm:$0xf] }
 0x31f   :  { %v2679_v38 = vpop.f32.mrf.mxu3  ;;  %v11812_v50 = vadd.f32 %v2580_v6, %v2552_v48 }
 0x320   :  { %v2592_v52 = vpop.f32.mrf.mxu0 }
 0x321   :  { %12885 = vst [vmem:[#allocation35_spill] sm:$0xff] %v11812_v50 }
 0x322   :  { %v2621_v46 = vpop.f32.mrf.mxu1 }
 0x323   :  { %v2622_v42 = vadd.f32 %v2621_v46, %v2592_v52  ;;  %8398 = vmatmul.msk.bf16.vlgmr.msra.gmra.mxu0 %vm11651_vm9, %v11672_v22  ;;  %v9681_v52 = vld [vmem:[#allocation7 + $0x1d4] sm:$0xf0] }
 0x324   :  { %v8190_v46 = vor.u32 %v9681_v52, %v8189_v8 }
 0x325   :  { %v2651_v0 = vadd.f32 %v2650_v9, %v2622_v42  ;;  %8400 = vmatmul.msk.bf16.vlgmr.msra.gmra.mxu1 %vm11651_vm9, %v11678_v33  ;;  %v2652_v24 = vpop.f32.mrf.mxu2  ;;  %v8302_v9 = vor.u32 %v9709_v14, %v8301_v32  ;;  %v9645_v32 = vld [vmem:[#allocation7 + $0xb4] sm:$0xf0]  ;;  %v8173_v14 = vld [vmem:[#allocation7 + $0x1a8] sm:$0xf] }
 0x326   :  { %3512 = vmatpush.bf16.msrb.mxu1 %v8190_v46  ;;  %v8046_v52 = vor.u32 %v9645_v32, %v8045_v55  ;;  %v8174_v50 = vor.u32 %v9677_v13, %v8173_v14  ;;  %v8269_v46 = vld [vmem:[#allocation7 + $0x268] sm:$0xf]  ;;  %v9673_v14 = vld [vmem:[#allocation7 + $0x194] sm:$0xf0] }
 0x327   :  { %v2681_v59 = vpop.f32.mrf.mxu3  ;;  %3542 = vmatpush.bf16.msra.mxu2 %v8302_v9  ;;  %v11817_v19 = vadd.f32 %v2679_v38, %v2651_v0  ;;  %v8029_v9 = vld [vmem:[#allocation7 + $0x88] sm:$0xf]  ;;  %v9697_v13 = vld [vmem:[#allocation7 + $0x254] sm:$0xf0] }
 0x328   :  { %v2594_v25 = vpop.f32.mrf.mxu0  ;;  %3484 = vmatpush.bf16.msrb.mxu0 %v8046_v52  ;;  %v8030_v32 = vor.u32 %v9641_v28, %v8029_v9  ;;  %v8237_v9 = vld [vmem:[#allocation7 + $0x228] sm:$0xf]  ;;  %v9693_v28 = vld [vmem:[#allocation7 + $0x234] sm:$0xf0] }
 0x329   :  { %12886 = vst [vmem:[#allocation36_spill] sm:$0xff] %v11817_v19  ;;  %v8141_v19 = vld [vmem:[#allocation7 + $0x168] sm:$0xf] }
 0x32a   :  { %v2623_v42 = vpop.f32.mrf.mxu1  ;;  %3437 = vmatmul.bf16.gmra.mxu2 %v11689_v47  ;;  %3513 = vmatpush.bf16.msrb.mxu1 %v8174_v50  ;;  %v8158_v50 = vor.u32 %v9673_v14, %v8157_v26  ;;  %v8238_v26 = vor.u32 %v9693_v28, %v8237_v9  ;;  %v9721_v9 = vld [vmem:[#allocation7 + $0x314] sm:$0xf0]  ;;  %v7981_v28 = vld [vmem:[#allocation7 + $0x28] sm:$0xf] }
 0x32b   :  { %v2624_v20 = vadd.f32 %v2623_v42, %v2594_v25  ;;  %v9701_v25 = vld [vmem:[#allocation7 + $0x274] sm:$0xf0]  ;;  %3543 = vmatpush.bf16.msra.mxu2 %v8286_v39  ;;  %v8253_v39 = vld [vmem:[#allocation7 + $0x248] sm:$0xf] }
 0x32c   :  { %8404 = vmatmul.msk.bf16.gmra.mxu3 %vm2222_vm5, %v11695_v57  ;;  %v8270_v36 = vor.u32 %v9701_v25, %v8269_v46  ;;  %v8254_v46 = vor.u32 %v9697_v13, %v8253_v39  ;;  %v8365_v25 = vld [vmem:[#allocation7 + $0x328] sm:$0xf]  ;;  %3485 = vmatpush.bf16.msrb.mxu0 %v8030_v32 }
 0x32d   :  { %v2653_v6 = vadd.f32 %v2652_v24, %v2624_v20  ;;  %v2655_v48 = vpop.f32.mrf.mxu2  ;;  %v7997_v13 = vld [vmem:[#allocation7 + $0x48] sm:$0xf] }
 0x32e   :  { %3514 = vmatpush.bf16.msrb.mxu1 %v8158_v50  ;;  %v9633_v50 = vld [vmem:[#allocation7 + $0x54] sm:$0xf0] }
 0x32f   :  { %v2684_v8 = vpop.f32.mrf.mxu3  ;;  %3544 = vmatpush.bf16.msra.mxu2 %v8270_v36  ;;  %v11821_v55 = vadd.f32 %v2681_v59, %v2653_v6  ;;  %v8142_v6 = vor.u32 %v9669_v34, %v8141_v19  ;;  %v7998_v19 = vor.u32 %v9633_v50, %v7997_v13 }
 0x330   :  { %v2597_v42 = vpop.f32.mrf.mxu0 }
 0x331   :  { %12887 = vst [vmem:[#allocation37_spill] sm:$0xff] %v11821_v55 }
 0x332   :  { %v2626_v20 = vpop.f32.mrf.mxu1  ;;  %3515 = vmatpush.bf16.msrb.mxu1 %v8142_v6  ;;  %v9629_v6 = vld [vmem:[#allocation7 + $0x34] sm:$0xf0] }
 0x333   :  { %v2627_v24 = vadd.f32 %v2626_v20, %v2597_v42  ;;  %3379 = vmatmul.bf16.gmra.mxu0 %v11709_v44  ;;  %v9725_v42 = vld [vmem:[#allocation7 + $0x334] sm:$0xf0]  ;;  %v8013_v20 = vld [vmem:[#allocation7 + $0x68] sm:$0xf]  ;;  %3545 = vmatpush.bf16.msra.mxu2 %v8254_v46 }
 0x334   :  { %v8125_v46 = vld [vmem:[#allocation7 + $0x148] sm:$0xf] }
 0x335   :  { %v2656_v38 = vadd.f32 %v2655_v48, %v2627_v24  ;;  %3408 = vmatmul.bf16.gmra.mxu1 %v11716_v58  ;;  %v2657_v0 = vpop.f32.mrf.mxu2  ;;  %v8366_v48 = vor.u32 %v9725_v42, %v8365_v25  ;;  %v9637_v24 = vld [vmem:[#allocation7 + $0x74] sm:$0xf0]  ;;  %v8221_v42 = vld [vmem:[#allocation7 + $0x208] sm:$0xf] }
 0x336   :  { %v8014_v59 = vor.u32 %v9637_v24, %v8013_v20  ;;  %v9665_v25 = vld [vmem:[#allocation7 + $0x154] sm:$0xf0] }
 0x337   :  { %v2686_v52 = vpop.f32.mrf.mxu3  ;;  %3575 = vmatpush.bf16.msra.mxu3 %v8366_v48  ;;  %3546 = vmatpush.bf16.msra.mxu2 %v8238_v26  ;;  %v11826_v34 = vadd.f32 %v2684_v8, %v2656_v38  ;;  %v9689_v20 = vld [vmem:[#allocation7 + $0x214] sm:$0xf0]  ;;  %v8126_v24 = vor.u32 %v9665_v25, %v8125_v46  ;;  %v8109_v26 = vld [vmem:[#allocation7 + $0x128] sm:$0xf]  ;;  %v7982_v8 = vor.u32 %v9629_v6, %v7981_v28 }
 0x338   :  { %v2599_v36 = vpop.f32.mrf.mxu0  ;;  %3486 = vmatpush.bf16.msrb.mxu0 %v8014_v59  ;;  %v9657_v28 = vld [vmem:[#allocation7 + $0x114] sm:$0xf0] }
 0x339   :  { %3516 = vmatpush.bf16.msrb.mxu1 %v8126_v24  ;;  %v8093_v24 = vld [vmem:[#allocation7 + $0x108] sm:$0xf] }
 0x33a   :  { %v2628_v55 = vpop.f32.mrf.mxu1  ;;  %3442 = vmatmul.bf16.gmra.mxu2 %v11730_v51 }
 0x33b   :  { %v2629_v14 = vadd.f32 %v2628_v55, %v2599_v36  ;;  %v8222_v55 = vor.u32 %v9689_v20, %v8221_v42  ;;  %v8349_v36 = vld [vmem:[#allocation7 + $0x308] sm:$0xf] }
 0x33c   :  { %8405 = vmatmul.msk.bf16.gmra.mxu3 %vm2222_vm5, %v11738_v61  ;;  %3487 = vmatpush.bf16.msrb.mxu0 %v7998_v19  ;;  %v7965_v20 = vld [vmem:[#allocation7 + $0x8] sm:$0xf] }
 0x33d   :  { %v2658_v32 = vadd.f32 %v2657_v0, %v2629_v14  ;;  %v2660_v39 = vpop.f32.mrf.mxu2  ;;  %v8350_v0 = vor.u32 %v9721_v9, %v8349_v36  ;;  %v9661_v14 = vld [vmem:[#allocation7 + $0x134] sm:$0xf0]  ;;  %3547 = vmatpush.bf16.msra.mxu2 %v8222_v55 }
 0x33e   :  { %v8110_v13 = vor.u32 %v9661_v14, %v8109_v26  ;;  %v9625_v36 = vld [vmem:[#allocation7 + $0x14] sm:$0xf0] }
 0x33f   :  { %v2689_v48 = vpop.f32.mrf.mxu3  ;;  %3576 = vmatpush.bf16.msra.mxu3 %v8350_v0  ;;  %v11830_v42 = vadd.f32 %v2686_v52, %v2658_v32  ;;  %v7966_v9 = vor.u32 %v9625_v36, %v7965_v20  ;;  %v8094_v0 = vor.u32 %v9657_v28, %v8093_v24 }
 0x340   :  { %v2602_v59 = vpop.f32.mrf.mxu0  ;;  %3488 = vmatpush.bf16.msrb.mxu0 %v7982_v8  ;;  %3517 = vmatpush.bf16.msrb.mxu1 %v8110_v13 }
 0x341   :  { %12888 = vst [vmem:[#allocation38_spill] sm:$0xff] %v11830_v42 }
 0x342   :  { %v2631_v38 = vpop.f32.mrf.mxu1 }
 0x343   :  { %v2632_v50 = vadd.f32 %v2631_v38, %v2602_v59  ;;  %3384 = vmatmul.bf16.gmra.mxu0 %v11752_v7 }
 0x344   :  { %3489 = vmatpush.bf16.msrb.mxu0 %v7966_v9  ;;  %3518 = vmatpush.bf16.msrb.mxu1 %v8094_v0  ;;  %v9715_v0 = vld [vmem:[#allocation7 + $0x2ec] sm:$0xf] }
 0x345   :  { %v2661_v46 = vadd.f32 %v2660_v39, %v2632_v50  ;;  %3413 = vmatmul.bf16.gmra.mxu1 %v11760_v40  ;;  %v2662_v25 = vpop.f32.mrf.mxu2 }
 0x347   :  { %v2691_v19 = vpop.f32.mrf.mxu3  ;;  %v11835_v39 = vadd.f32 %v2689_v48, %v2661_v46 }
 0x348   :  { %v2604_v55 = vpop.f32.mrf.mxu0 }
 0x349   :  { %12889 = vst [vmem:[#allocation39_spill] sm:$0xff] %v11835_v39  ;;  %v8207_v39 = vld [vmem:[#allocation7 + $0x1f8] sm:$0xf0] }
 0x34a   :  { %v2633_v6 = vpop.f32.mrf.mxu1  ;;  %3447 = vmatmul.bf16.gmra.mxu2 %v11770_v49 }
 0x34b   :  { %v2634_v59 = vadd.f32 %v2633_v6, %v2604_v55  ;;  %v8335_v6 = vld [vmem:[#allocation7 + $0x2f8] sm:$0xf0] }
 0x34c   :  { %8406 = vmatmul.msk.bf16.gmra.mxu3 %vm2222_vm5, %v11777_v1 }
 0x34d   :  { %v2663_v52 = vadd.f32 %v2662_v25, %v2634_v59  ;;  %v2665_v32 = vpop.f32.mrf.mxu2 }
 0x34f   :  { %v2694_v26 = vpop.f32.mrf.mxu3  ;;  %v11839_v20 = vadd.f32 %v2691_v19, %v2663_v52  ;;  %v9727_v19 = vld [vmem:[#allocation7 + $0x34c] sm:$0xf]  ;;  %v8338_v52 = vor.u32 %v9715_v0, %v8335_v6 }
 0x350   :  { %v2607_v14 = vpop.f32.mrf.mxu0 }
 0x351   :  { %12890 = vst [vmem:[#allocation40_spill] sm:$0xff] %v11839_v20  ;;  %3656 = vmatpush.bf16.msrb.mxu2 %v8338_v52 }
 0x352   :  { %v2636_v8 = vpop.f32.mrf.mxu1 }
 0x353   :  { %v2637_v38 = vadd.f32 %v2636_v8, %v2607_v14  ;;  %3389 = vmatmul.bf16.gmra.mxu0 %v11788_v63  ;;  %v9651_v14 = vld [vmem:[#allocation7 + $0xec] sm:$0xf]  ;;  %v8079_v8 = vld [vmem:[#allocation7 + $0xf8] sm:$0xf0] }
 0x355   :  { %v2666_v13 = vadd.f32 %v2665_v32, %v2637_v38  ;;  %3418 = vmatmul.bf16.gmra.mxu1 %v11794_v35  ;;  %v2667_v50 = vpop.f32.mrf.mxu2  ;;  %v8383_v32 = vld [vmem:[#allocation7 + $0x358] sm:$0xf0] }
 0x356   :  { %v8386_v20 = vor.u32 %v9727_v19, %v8383_v32  ;;  %v9707_v19 = vld [vmem:[#allocation7 + $0x2ac] sm:$0xf]  ;;  %v8303_v32 = vld [vmem:[#allocation7 + $0x2b8] sm:$0xf0] }
 0x357   :  { %v2696_v36 = vpop.f32.mrf.mxu3  ;;  %v11846_v9 = vadd.f32 %v2694_v26, %v2666_v13 }
 0x358   :  { %v2609_v24 = vpop.f32.mrf.mxu0  ;;  %3690 = vmatpush.bf16.msrb.mxu3 %v8386_v20  ;;  %v9647_v20 = vld [vmem:[#allocation7 + $0xcc] sm:$0xf] }
 0x35a   :  { %v2638_v55 = vpop.f32.mrf.mxu1  ;;  %8412 = vmatmul.msk.bf16.vlgmr.msra.gmra.mxu2 %vm11651_vm9, %v11659_v27 }
 0x35b   :  { %v2639_v48 = vadd.f32 %v2638_v55, %v2609_v24  ;;  %v8082_v24 = vor.u32 %v9651_v14, %v8079_v8  ;;  %v9683_v55 = vld [vmem:[#allocation7 + $0x1ec] sm:$0xf]  ;;  %v8063_v14 = vld [vmem:[#allocation7 + $0xd8] sm:$0xf0] }
 0x35c   :  { %8413 = vmatmul.msk.bf16.vlgmr.msra.gmra.mxu3 %vm2222_vm5, %v11665_v2  ;;  %v8066_v8 = vor.u32 %v9647_v20, %v8063_v14 }
 0x35d   :  { %v2668_v46 = vadd.f32 %v2667_v50, %v2639_v48  ;;  %v3317_v25 = vpop.f32.mrf.mxu2  ;;  %v8210_v50 = vor.u32 %v9683_v55, %v8207_v39  ;;  %3598 = vmatpush.bf16.msra.mxu0 %v8082_v24  ;;  %v9711_v39 = vld [vmem:[#allocation7 + $0x2cc] sm:$0xf]  ;;  %v8191_v24 = vld [vmem:[#allocation7 + $0x1d8] sm:$0xf0] }
 0x35f   :  { %v3346_v28 = vpop.f32.mrf.mxu3  ;;  %3627 = vmatpush.bf16.msra.mxu1 %v8210_v50  ;;  %v11855_v48 = vadd.f32 %v2696_v36, %v2668_v46 }
 0x360   :  { %v3259_v59 = vpop.f32.mrf.mxu0 }
 0x361   :  { %v3260_v38 = vadd.f32 %v3259_v59, %v11587_v23  ;;  %3599 = vmatpush.bf16.msra.mxu0 %v8066_v8 }
 0x362   :  { %v3288_v42 = vpop.f32.mrf.mxu1 }
 0x363   :  { %v3289_v26 = vadd.f32 %v3288_v42, %v3260_v38  ;;  %8408 = vmatmul.msk.bf16.vlgmr.msrb.gmra.mxu0 %vm11651_vm9, %v11672_v22  ;;  %v8319_v42 = vld [vmem:[#allocation7 + $0x2d8] sm:$0xf0]  ;;  %v9679_v38 = vld [vmem:[#allocation7 + $0x1cc] sm:$0xf] }
 0x364   :  { %v8322_v52 = vor.u32 %v9711_v39, %v8319_v42  ;;  %v8194_v36 = vor.u32 %v9679_v38, %v8191_v24  ;;  %v9703_v39 = vld [vmem:[#allocation7 + $0x28c] sm:$0xf]  ;;  %v8287_v42 = vld [vmem:[#allocation7 + $0x298] sm:$0xf0] }
 0x365   :  { %v3318_v13 = vadd.f32 %v3317_v25, %v3289_v26  ;;  %8410 = vmatmul.msk.bf16.vlgmr.msrb.gmra.mxu1 %vm11651_vm9, %v11678_v33  ;;  %v3319_v23 = vpop.f32.mrf.mxu2  ;;  %v8290_v14 = vor.u32 %v9703_v39, %v8287_v42  ;;  %v8047_v38 = vld [vmem:[#allocation7 + $0xb8] sm:$0xf0]  ;;  %v9699_v24 = vld [vmem:[#allocation7 + $0x26c] sm:$0xf] }
 0x366   :  { %3657 = vmatpush.bf16.msrb.mxu2 %v8322_v52  ;;  %3628 = vmatpush.bf16.msra.mxu1 %v8194_v36  ;;  %v8175_v52 = vld [vmem:[#allocation7 + $0x1b8] sm:$0xf0] }
 0x367   :  { %v11857_v0 = vadd.f32 %v3346_v28, %v3318_v13  ;;  %v3348_v6 = vpop.f32.mrf.mxu3  ;;  %v8306_v28 = vor.u32 %v9707_v19, %v8303_v32  ;;  %v8031_v42 = vld [vmem:[#allocation7 + $0x98] sm:$0xf0] }
 0x368   :  { %v3261_v59 = vpop.f32.mrf.mxu0 }
 0x369   :  { %v3262_v25 = vadd.f32 %v3261_v59, %v11592_v16  ;;  %v9643_v59 = vld [vmem:[#allocation7 + $0xac] sm:$0xf] }
 0x36a   :  { %v3290_v55 = vpop.f32.mrf.mxu1  ;;  %3553 = vmatmul.bf16.gmra.mxu2 %v11689_v47  ;;  %v8050_v32 = vor.u32 %v9643_v59, %v8047_v38  ;;  %v9671_v59 = vld [vmem:[#allocation7 + $0x18c] sm:$0xf] }
 0x36b   :  { %v3291_v46 = vadd.f32 %v3290_v55, %v3262_v25  ;;  %3658 = vmatpush.bf16.msrb.mxu2 %v8306_v28  ;;  %v9675_v25 = vld [vmem:[#allocation7 + $0x1ac] sm:$0xf]  ;;  %v8271_v55 = vld [vmem:[#allocation7 + $0x278] sm:$0xf0] }
 0x36c   :  { %8414 = vmatmul.msk.bf16.gmra.mxu3 %vm2222_vm5, %v11695_v57  ;;  %v8178_v8 = vor.u32 %v9675_v25, %v8175_v52  ;;  %3600 = vmatpush.bf16.msra.mxu0 %v8050_v32  ;;  %v8159_v25 = vld [vmem:[#allocation7 + $0x198] sm:$0xf0]  ;;  %v9695_v52 = vld [vmem:[#allocation7 + $0x24c] sm:$0xf] }
 0x36d   :  { %v3320_v50 = vadd.f32 %v3319_v23, %v3291_v46  ;;  %v3322_v26 = vpop.f32.mrf.mxu2  ;;  %v8162_v32 = vor.u32 %v9671_v59, %v8159_v25 }
 0x36e   :  { %3629 = vmatpush.bf16.msra.mxu1 %v8178_v8 }
 0x36f   :  { %v11863_v13 = vadd.f32 %v3348_v6, %v3320_v50  ;;  %v3351_v16 = vpop.f32.mrf.mxu3  ;;  %3659 = vmatpush.bf16.msrb.mxu2 %v8290_v14  ;;  %v8274_v6 = vor.u32 %v9699_v24, %v8271_v55  ;;  %v8367_v24 = vld [vmem:[#allocation7 + $0x338] sm:$0xf0]  ;;  %v9635_v55 = vld [vmem:[#allocation7 + $0x6c] sm:$0xf] }
 0x370   :  { %v3264_v20 = vpop.f32.mrf.mxu0 }
 0x371   :  { %12891 = vst [vmem:[#allocation41_spill] sm:$0xff] %v11863_v13  ;;  %v3265_v19 = vadd.f32 %v3264_v20, %v11596_v54  ;;  %v9639_v54 = vld [vmem:[#allocation7 + $0x8c] sm:$0xf] }
 0x372   :  { %v3293_v23 = vpop.f32.mrf.mxu1  ;;  %v8034_v38 = vor.u32 %v9639_v54, %v8031_v42  ;;  %3630 = vmatpush.bf16.msra.mxu1 %v8162_v32  ;;  %v9691_v13 = vld [vmem:[#allocation7 + $0x22c] sm:$0xf] }
 0x373   :  { %v3294_v36 = vadd.f32 %v3293_v23, %v3265_v19  ;;  %3495 = vmatmul.bf16.gmra.mxu0 %v11709_v44  ;;  %3660 = vmatpush.bf16.msrb.mxu2 %v8274_v6  ;;  %v8255_v19 = vld [vmem:[#allocation7 + $0x258] sm:$0xf0]  ;;  %v9667_v6 = vld [vmem:[#allocation7 + $0x16c] sm:$0xf] }
 0x374   :  { %v8258_v8 = vor.u32 %v9695_v52, %v8255_v19  ;;  %3601 = vmatpush.bf16.msra.mxu0 %v8034_v38  ;;  %v9631_v19 = vld [vmem:[#allocation7 + $0x4c] sm:$0xf] }
 0x375   :  { %v3323_v46 = vadd.f32 %v3322_v26, %v3294_v36  ;;  %3524 = vmatmul.bf16.gmra.mxu1 %v11716_v58  ;;  %v3324_v28 = vpop.f32.mrf.mxu2  ;;  %v9723_v26 = vld [vmem:[#allocation7 + $0x32c] sm:$0xf]  ;;  %v8015_v36 = vld [vmem:[#allocation7 + $0x78] sm:$0xf0] }
 0x376   :  { %v8018_v54 = vor.u32 %v9635_v55, %v8015_v36  ;;  %v9663_v32 = vld [vmem:[#allocation7 + $0x14c] sm:$0xf] }
 0x377   :  { %v11868_v50 = vadd.f32 %v3351_v16, %v3323_v46  ;;  %v3353_v39 = vpop.f32.mrf.mxu3  ;;  %v8370_v16 = vor.u32 %v9723_v26, %v8367_v24  ;;  %v8143_v46 = vld [vmem:[#allocation7 + $0x178] sm:$0xf0]  ;;  %3661 = vmatpush.bf16.msrb.mxu2 %v8258_v8  ;;  %v9687_v55 = vld [vmem:[#allocation7 + $0x20c] sm:$0xf] }
 0x378   :  { %v3266_v20 = vpop.f32.mrf.mxu0  ;;  %v8146_v42 = vor.u32 %v9667_v6, %v8143_v46  ;;  %3602 = vmatpush.bf16.msra.mxu0 %v8018_v54  ;;  %v8127_v24 = vld [vmem:[#allocation7 + $0x158] sm:$0xf0]  ;;  %v9627_v6 = vld [vmem:[#allocation7 + $0x2c] sm:$0xf] }
 0x379   :  { %12892 = vst [vmem:[#allocation42_spill] sm:$0xff] %v11868_v50  ;;  %v3267_v14 = vadd.f32 %v3266_v20, %v11601_v5  ;;  %v8239_v5 = vld [vmem:[#allocation7 + $0x238] sm:$0xf0]  ;;  %3691 = vmatpush.bf16.msrb.mxu3 %v8370_v16 }
 0x37a   :  { %v3295_v23 = vpop.f32.mrf.mxu1  ;;  %3558 = vmatmul.bf16.gmra.mxu2 %v11730_v51  ;;  %v8242_v59 = vor.u32 %v9691_v13, %v8239_v5  ;;  %3631 = vmatpush.bf16.msra.mxu1 %v8146_v42  ;;  %v8130_v13 = vor.u32 %v9663_v32, %v8127_v24  ;;  %v8351_v16 = vld [vmem:[#allocation7 + $0x318] sm:$0xf0]  ;;  %v9659_v42 = vld [vmem:[#allocation7 + $0x12c] sm:$0xf] }
 0x37b   :  { %v3296_v50 = vadd.f32 %v3295_v23, %v3267_v14  ;;  %v7999_v14 = vld [vmem:[#allocation7 + $0x58] sm:$0xf0] }
 0x37c   :  { %8415 = vmatmul.msk.bf16.gmra.mxu3 %vm2222_vm5, %v11738_v61  ;;  %3662 = vmatpush.bf16.msrb.mxu2 %v8242_v59  ;;  %v8002_v26 = vor.u32 %v9631_v19, %v7999_v14  ;;  %v8223_v23 = vld [vmem:[#allocation7 + $0x218] sm:$0xf0] }
 0x37d   :  { %v3325_v20 = vadd.f32 %v3324_v28, %v3296_v50  ;;  %v3327_v25 = vpop.f32.mrf.mxu2  ;;  %v8226_v28 = vor.u32 %v9687_v55, %v8223_v23  ;;  %v9719_v50 = vld [vmem:[#allocation7 + $0x30c] sm:$0xf]  ;;  %v7983_v54 = vld [vmem:[#allocation7 + $0x38] sm:$0xf0] }
 0x37e   :  { %3603 = vmatpush.bf16.msra.mxu0 %v8002_v26  ;;  %v8354_v46 = vor.u32 %v9719_v50, %v8351_v16  ;;  %v8111_v5 = vld [vmem:[#allocation7 + $0x138] sm:$0xf0]  ;;  %3632 = vmatpush.bf16.msra.mxu1 %v8130_v13  ;;  %v9623_v26 = vld [vmem:[#allocation7 + $0xc] sm:$0xf] }
 0x37f   :  { %v11874_v38 = vadd.f32 %v3353_v39, %v3325_v20  ;;  %v3356_v52 = vpop.f32.mrf.mxu3  ;;  %v7986_v20 = vor.u32 %v9627_v6, %v7983_v54  ;;  %v8114_v19 = vor.u32 %v9659_v42, %v8111_v5  ;;  %v7967_v24 = vld [vmem:[#allocation7 + $0x18] sm:$0xf0]  ;;  %v9655_v55 = vld [vmem:[#allocation7 + $0x10c] sm:$0xf] }
 0x380   :  { %v3269_v8 = vpop.f32.mrf.mxu0  ;;  %3663 = vmatpush.bf16.msrb.mxu2 %v8226_v28  ;;  %3692 = vmatpush.bf16.msrb.mxu3 %v8354_v46  ;;  %v8095_v50 = vld [vmem:[#allocation7 + $0x118] sm:$0xf0] }
 0x381   :  { %v3270_v36 = vadd.f32 %v3269_v8, %v11605_v12  ;;  %v8098_v16 = vor.u32 %v9655_v55, %v8095_v50  ;;  %v8797_v50 = vld [vmem:[#allocation7 + $0x9a0] sm:$0xf] }
 0x382   :  { %v3298_v39 = vpop.f32.mrf.mxu1  ;;  %3604 = vmatpush.bf16.msra.mxu0 %v7986_v20  ;;  %3633 = vmatpush.bf16.msra.mxu1 %v8114_v19 }
 0x383   :  { %v3299_v59 = vadd.f32 %v3298_v39, %v3270_v36  ;;  %3500 = vmatmul.bf16.gmra.mxu0 %v11752_v7  ;;  %v7970_v36 = vor.u32 %v9623_v26, %v7967_v24 }
 0x385   :  { %v3328_v12 = vadd.f32 %v3327_v25, %v3299_v59  ;;  %3529 = vmatmul.bf16.gmra.mxu1 %v11760_v40  ;;  %v3329_v14 = vpop.f32.mrf.mxu2 }
 0x386   :  { %3605 = vmatpush.bf16.msra.mxu0 %v7970_v36  ;;  %3634 = vmatpush.bf16.msra.mxu1 %v8098_v16  ;;  %v8845_v16 = vld [vmem:[#allocation7 + $0xa00] sm:$0xf] }
 0x387   :  { %v11879_v32 = vadd.f32 %v3356_v52, %v3328_v12  ;;  %v3358_v8 = vpop.f32.mrf.mxu3 }
 0x388   :  { %v3271_v23 = vpop.f32.mrf.mxu0 }
 0x389   :  { %v3272_v13 = vadd.f32 %v3271_v23, %v11610_v17 }
 0x38a   :  { %v3300_v28 = vpop.f32.mrf.mxu1  ;;  %3563 = vmatmul.bf16.gmra.mxu2 %v11770_v49 }
 0x38b   :  { %v3301_v25 = vadd.f32 %v3300_v28, %v3272_v13  ;;  %v9932_v13 = vld [vmem:[#allocation7 + $0x9ac] sm:$0xf0] }
 0x38c   :  { %8416 = vmatmul.msk.bf16.gmra.mxu3 %vm2222_vm5, %v11777_v1 }
 0x38d   :  { %v3330_v52 = vadd.f32 %v3329_v14, %v3301_v25  ;;  %v3332_v6 = vpop.f32.mrf.mxu2  ;;  %v8798_v25 = vor.u32 %v9932_v13, %v8797_v50  ;;  %v9924_v13 = vld [vmem:[#allocation7 + $0x96c] sm:$0xf0] }
 0x38f   :  { %v11885_v39 = vadd.f32 %v3358_v8, %v3330_v52  ;;  %v3361_v46 = vpop.f32.mrf.mxu3  ;;  %v8541_v52 = vld [vmem:[#allocation7 + $0x7a0] sm:$0xf]  ;;  %4481 = vmatpush.bf16.msra.mxu2 %v8798_v25 }
 0x390   :  { %v3274_v54 = vpop.f32.mrf.mxu0 }
 0x391   :  { %v3275_v42 = vadd.f32 %v3274_v54, %v11614_v53 }
 0x392   :  { %v3303_v5 = vpop.f32.mrf.mxu1 }
 0x393   :  { %v3304_v17 = vadd.f32 %v3303_v5, %v3275_v42  ;;  %3505 = vmatmul.bf16.gmra.mxu0 %v11788_v63  ;;  %v8669_v42 = vld [vmem:[#allocation7 + $0x8a0] sm:$0xf]  ;;  %v9900_v5 = vld [vmem:[#allocation7 + $0x8ac] sm:$0xf0] }
 0x395   :  { %v3333_v59 = vadd.f32 %v3332_v6, %v3304_v17  ;;  %3534 = vmatmul.bf16.gmra.mxu1 %v11794_v35  ;;  %v3334_v20 = vpop.f32.mrf.mxu2  ;;  %v9868_v6 = vld [vmem:[#allocation7 + $0x7ac] sm:$0xf0]  ;;  %v8670_v17 = vor.u32 %v9900_v5, %v8669_v42  ;;  %v8509_v5 = vld [vmem:[#allocation7 + $0x760] sm:$0xf] }
 0x396   :  { %v8542_v54 = vor.u32 %v9868_v6, %v8541_v52  ;;  %v9920_v42 = vld [vmem:[#allocation7 + $0x94c] sm:$0xf0] }
 0x397   :  { %v11890_v19 = vadd.f32 %v3361_v46, %v3333_v59  ;;  %v3363_v12 = vpop.f32.mrf.mxu3  ;;  %4452 = vmatpush.bf16.msrb.mxu1 %v8670_v17  ;;  %v9860_v17 = vld [vmem:[#allocation7 + $0x76c] sm:$0xf0] }
 0x398   :  { %v3276_v26 = vpop.f32.mrf.mxu0  ;;  %4423 = vmatpush.bf16.msrb.mxu0 %v8542_v54  ;;  %v8749_v54 = vld [vmem:[#allocation7 + $0x940] sm:$0xf] }
 0x399   :  { %v3277_v14 = vadd.f32 %v3276_v26, %v11619_v15  ;;  %v9944_v15 = vld [vmem:[#allocation7 + $0xa0c] sm:$0xf0] }
 0x39a   :  { %v3305_v8 = vpop.f32.mrf.mxu1  ;;  %8422 = vmatmul.msk.bf16.vlgmr.msrb.gmra.mxu2 %vm11651_vm9, %v11659_v27  ;;  %v8846_v27 = vor.u32 %v9944_v15, %v8845_v16  ;;  %v8525_v16 = vld [vmem:[#allocation7 + $0x780] sm:$0xf]  ;;  %v9896_v15 = vld [vmem:[#allocation7 + $0x88c] sm:$0xf0] }
 0x39b   :  { %v3306_v53 = vadd.f32 %v3305_v8, %v3277_v14  ;;  %v8781_v14 = vld [vmem:[#allocation7 + $0x980] sm:$0xf]  ;;  %v9928_v8 = vld [vmem:[#allocation7 + $0x98c] sm:$0xf0] }
 0x39c   :  { %8423 = vmatmul.msk.bf16.vlgmr.msrb.gmra.mxu3 %vm2222_vm5, %v11665_v2  ;;  %v8782_v50 = vor.u32 %v9928_v8, %v8781_v14  ;;  %v8510_v8 = vor.u32 %v9860_v17, %v8509_v5  ;;  %v9884_v17 = vld [vmem:[#allocation7 + $0x82c] sm:$0xf0] }
 0x39d   :  { %v3335_v24 = vadd.f32 %v3334_v20, %v3306_v53  ;;  %v3433_v55 = vpop.f32.mrf.mxu2  ;;  %4515 = vmatpush.bf16.msra.mxu3 %v8846_v27  ;;  %v8765_v53 = vld [vmem:[#allocation7 + $0x960] sm:$0xf] }
 0x39e   :  { %4482 = vmatpush.bf16.msra.mxu2 %v8782_v50 }
 0x39f   :  { %v11898_v23 = vadd.f32 %v3363_v12, %v3335_v24  ;;  %v3462_v36 = vpop.f32.mrf.mxu3 }
 0x3a0   :  { %v3375_v28 = vpop.f32.mrf.mxu0 }
 0x3a1   :  { %v3376_v46 = vadd.f32 %v3375_v28, %v11623_v45 }
 0x3a2   :  { %v3404_v2 = vpop.f32.mrf.mxu1 }
 0x3a3   :  { %v3405_v59 = vadd.f32 %v3404_v2, %v3376_v46  ;;  %8418 = vmatmul.msk.bf16.vlgmr.msra.gmra.mxu0 %vm11651_vm9, %v11672_v22  ;;  %v9864_v22 = vld [vmem:[#allocation7 + $0x78c] sm:$0xf0] }
 0x3a4   :  { %v8526_v25 = vor.u32 %v9864_v22, %v8525_v16 }
 0x3a5   :  { %v3434_v20 = vadd.f32 %v3433_v55, %v3405_v59  ;;  %8420 = vmatmul.msk.bf16.vlgmr.msra.gmra.mxu1 %vm11651_vm9, %v11678_v33  ;;  %v3435_v45 = vpop.f32.mrf.mxu2  ;;  %v8653_v55 = vld [vmem:[#allocation7 + $0x880] sm:$0xf] }
 0x3a6   :  { %v8654_v41 = vor.u32 %v9896_v15, %v8653_v55  ;;  %4424 = vmatpush.bf16.msrb.mxu0 %v8526_v25  ;;  %v8637_v59 = vld [vmem:[#allocation7 + $0x860] sm:$0xf]  ;;  %v9856_v25 = vld [vmem:[#allocation7 + $0x74c] sm:$0xf0] }
 0x3a7   :  { %v11907_v12 = vadd.f32 %v3462_v36, %v3434_v20  ;;  %v3464_v26 = vpop.f32.mrf.mxu3  ;;  %v8766_v36 = vor.u32 %v9924_v13, %v8765_v53  ;;  %v9892_v20 = vld [vmem:[#allocation7 + $0x86c] sm:$0xf0]  ;;  %v8621_v55 = vld [vmem:[#allocation7 + $0x840] sm:$0xf] }
 0x3a8   :  { %v3377_v24 = vpop.f32.mrf.mxu0  ;;  %4453 = vmatpush.bf16.msrb.mxu1 %v8654_v41  ;;  %v8638_v53 = vor.u32 %v9892_v20, %v8637_v59  ;;  %v9888_v41 = vld [vmem:[#allocation7 + $0x84c] sm:$0xf0] }
 0x3a9   :  { %v3378_v28 = vadd.f32 %v3377_v24, %v11628_v43  ;;  %4483 = vmatpush.bf16.msra.mxu2 %v8766_v36  ;;  %v9916_v24 = vld [vmem:[#allocation7 + $0x92c] sm:$0xf0] }
 0x3aa   :  { %v3406_v52 = vpop.f32.mrf.mxu1  ;;  %3669 = vmatmul.bf16.gmra.mxu2 %v11689_v47  ;;  %v8750_v47 = vor.u32 %v9920_v42, %v8749_v54  ;;  %4425 = vmatpush.bf16.msrb.mxu0 %v8510_v8  ;;  %v9940_v42 = vld [vmem:[#allocation7 + $0x9ec] sm:$0xf0]  ;;  %v8701_v8 = vld [vmem:[#allocation7 + $0x8e0] sm:$0xf] }
 0x3ab   :  { %v3407_v33 = vadd.f32 %v3406_v52, %v3378_v28 }
 0x3ac   :  { %8424 = vmatmul.msk.bf16.gmra.mxu3 %vm2222_vm5, %v11695_v57  ;;  %v8733_v57 = vld [vmem:[#allocation7 + $0x920] sm:$0xf]  ;;  %4454 = vmatpush.bf16.msrb.mxu1 %v8638_v53 }
 0x3ad   :  { %v3436_v6 = vadd.f32 %v3435_v45, %v3407_v33  ;;  %v3438_v46 = vpop.f32.mrf.mxu2  ;;  %4484 = vmatpush.bf16.msra.mxu2 %v8750_v47  ;;  %v8717_v33 = vld [vmem:[#allocation7 + $0x900] sm:$0xf] }
 0x3ae   :  { %v8605_v47 = vld [vmem:[#allocation7 + $0x820] sm:$0xf] }
 0x3af   :  { %v11913_v27 = vadd.f32 %v3464_v26, %v3436_v6  ;;  %v3467_v43 = vpop.f32.mrf.mxu3  ;;  %v8734_v26 = vor.u32 %v9916_v24, %v8733_v57  ;;  %v8622_v6 = vor.u32 %v9888_v41, %v8621_v55  ;;  %v9880_v55 = vld [vmem:[#allocation7 + $0x80c] sm:$0xf0] }
 0x3b0   :  { %v3380_v2 = vpop.f32.mrf.mxu0 }
 0x3b1   :  { %v3381_v14 = vadd.f32 %v3380_v2, %v11632_v4  ;;  %4485 = vmatpush.bf16.msra.mxu2 %v8734_v26  ;;  %v8493_v4 = vld [vmem:[#allocation7 + $0x740] sm:$0xf]  ;;  %v9852_v2 = vld [vmem:[#allocation7 + $0x72c] sm:$0xf0]  ;;  %4455 = vmatpush.bf16.msrb.mxu1 %v8622_v6 }
 0x3b2   :  { %v3409_v45 = vpop.f32.mrf.mxu1  ;;  %v8494_v52 = vor.u32 %v9856_v25, %v8493_v4  ;;  %v9848_v26 = vld [vmem:[#allocation7 + $0x70c] sm:$0xf0] }
 0x3b3   :  { %v3410_v50 = vadd.f32 %v3409_v45, %v3381_v14  ;;  %3611 = vmatmul.bf16.gmra.mxu0 %v11709_v44  ;;  %v9912_v44 = vld [vmem:[#allocation7 + $0x90c] sm:$0xf0]  ;;  %v8606_v14 = vor.u32 %v9884_v17, %v8605_v47 }
 0x3b4   :  { %v8718_v54 = vor.u32 %v9912_v44, %v8717_v33  ;;  %4426 = vmatpush.bf16.msrb.mxu0 %v8494_v52  ;;  %v9904_v52 = vld [vmem:[#allocation7 + $0x8cc] sm:$0xf0]  ;;  %v8813_v33 = vld [vmem:[#allocation7 + $0x9c0] sm:$0xf] }
 0x3b5   :  { %v3439_v13 = vadd.f32 %v3438_v46, %v3410_v50  ;;  %3640 = vmatmul.bf16.gmra.mxu1 %v11716_v58  ;;  %v3440_v16 = vpop.f32.mrf.mxu2  ;;  %v8829_v46 = vld [vmem:[#allocation7 + $0x9e0] sm:$0xf]  ;;  %v9936_v44 = vld [vmem:[#allocation7 + $0x9cc] sm:$0xf0] }
 0x3b6   :  { %v8477_v58 = vld [vmem:[#allocation7 + $0x720] sm:$0xf]  ;;  %4486 = vmatpush.bf16.msra.mxu2 %v8718_v54  ;;  %4456 = vmatpush.bf16.msrb.mxu1 %v8606_v14  ;;  %v8814_v6 = vor.u32 %v9936_v44, %v8813_v33  ;;  %v9844_v54 = vld [vmem:[#allocation7 + $0x6ec] sm:$0xf0] }
 0x3b7   :  { %v11918_v22 = vadd.f32 %v3467_v43, %v3439_v13  ;;  %v3469_v28 = vpop.f32.mrf.mxu3  ;;  %v8830_v43 = vor.u32 %v9940_v42, %v8829_v46  ;;  %v8478_v20 = vor.u32 %v9852_v2, %v8477_v58  ;;  %v8461_v50 = vld [vmem:[#allocation7 + $0x700] sm:$0xf]  ;;  %v9876_v42 = vld [vmem:[#allocation7 + $0x7ec] sm:$0xf0] }
 0x3b8   :  { %v3382_v15 = vpop.f32.mrf.mxu0  ;;  %v8589_v13 = vld [vmem:[#allocation7 + $0x800] sm:$0xf]  ;;  %v8462_v25 = vor.u32 %v9848_v26, %v8461_v50 }
 0x3b9   :  { %v3383_v36 = vadd.f32 %v3382_v15, %v11637_v29  ;;  %v9908_v29 = vld [vmem:[#allocation7 + $0x8ec] sm:$0xf0]  ;;  %4516 = vmatpush.bf16.msra.mxu3 %v8830_v43  ;;  %4427 = vmatpush.bf16.msrb.mxu0 %v8478_v20  ;;  %v8685_v15 = vld [vmem:[#allocation7 + $0x8c0] sm:$0xf]  ;;  %v8590_v41 = vor.u32 %v9880_v55, %v8589_v13 }
 0x3ba   :  { %v3411_v5 = vpop.f32.mrf.mxu1  ;;  %3674 = vmatmul.bf16.gmra.mxu2 %v11730_v51  ;;  %v8702_v53 = vor.u32 %v9908_v29, %v8701_v8  ;;  %v8573_v46 = vld [vmem:[#allocation7 + $0x7e0] sm:$0xf]  ;;  %v9840_v20 = vld [vmem:[#allocation7 + $0x6cc] sm:$0xf0] }
 0x3bb   :  { %v3412_v59 = vadd.f32 %v3411_v5, %v3383_v36  ;;  %v8445_v36 = vld [vmem:[#allocation7 + $0x6e0] sm:$0xf]  ;;  %4457 = vmatpush.bf16.msrb.mxu1 %v8590_v41  ;;  %v8574_v43 = vor.u32 %v9876_v42, %v8573_v46  ;;  %v3721_v41 = vrot.slane %v11237_v31, 1  ;;  %v3716_v46 = vrot.slane %v11455_v37, 1 }
 0x3bc   :  { %8425 = vmatmul.msk.bf16.gmra.mxu3 %vm2222_vm5, %v11738_v61  ;;  %4487 = vmatpush.bf16.msra.mxu2 %v8702_v53  ;;  %v8446_v5 = vor.u32 %v9844_v54, %v8445_v36  ;;  %v8557_v14 = vld [vmem:[#allocation7 + $0x7c0] sm:$0xf]  ;;  %v3719_v42 = vrot.slane %v11477_v18, 1  ;;  %v8495_v18 = vld [vmem:[#allocation7 + $0x750] sm:$0xf0] }
 0x3bd   :  { %v3441_v57 = vadd.f32 %v3440_v16, %v3412_v59  ;;  %v3443_v24 = vpop.f32.mrf.mxu2  ;;  %v8686_v16 = vor.u32 %v9904_v52, %v8685_v15  ;;  %4428 = vmatpush.bf16.msrb.mxu0 %v8462_v25  ;;  %4517 = vmatpush.bf16.msra.mxu3 %v8814_v6  ;;  %v8429_v59 = vld [vmem:[#allocation7 + $0x6c0] sm:$0xf]  ;;  %v3722_v52 = vrot.slane %v11392_v30, 1 }
 0x3be   :  { %v8430_v29 = vor.u32 %v9840_v20, %v8429_v59  ;;  %v8847_v20 = vld [vmem:[#allocation7 + $0xa10] sm:$0xf0] }
 0x3bf   :  { %v11924_v51 = vadd.f32 %v3469_v28, %v3441_v57  ;;  %v3472_v45 = vpop.f32.mrf.mxu3  ;;  %4458 = vmatpush.bf16.msrb.mxu1 %v8574_v43  ;;  %v11947_v44 = vsel %vm148_vm1, %v3721_v41, %v3722_v52  ;;  %v9930_v43 = vld [vmem:[#allocation7 + $0x9a4] sm:$0xf]  ;;  %v3733_v41 = vrot.slane %v11514_v62, 1 }
 0x3c0   :  { %v3385_v4 = vpop.f32.mrf.mxu0  ;;  %4488 = vmatpush.bf16.msra.mxu2 %v8686_v16  ;;  %v3725_v16 = vrot.slane %v11417_v21, 1  ;;  %v9918_v21 = vld [vmem:[#allocation7 + $0x944] sm:$0xf] }
 0x3c1   :  { %v3386_v61 = vadd.f32 %v3385_v4, %v11641_v11  ;;  %4429 = vmatpush.bf16.msrb.mxu0 %v8446_v5 }
 0x3c2   :  { %v3414_v28 = vpop.f32.mrf.mxu1 }
 0x3c3   :  { %v3415_v58 = vadd.f32 %v3414_v28, %v3386_v61  ;;  %3616 = vmatmul.bf16.gmra.mxu0 %v11752_v7  ;;  %v9872_v7 = vld [vmem:[#allocation7 + $0x7cc] sm:$0xf0] }
 0x3c4   :  { %v8558_v57 = vor.u32 %v9872_v7, %v8557_v14  ;;  %v9866_v14 = vld [vmem:[#allocation7 + $0x7a4] sm:$0xf] }
 0x3c5   :  { %v3444_v11 = vadd.f32 %v3443_v24, %v3415_v58  ;;  %3645 = vmatmul.bf16.gmra.mxu1 %v11760_v40  ;;  %v3445_v2 = vpop.f32.mrf.mxu2  ;;  %4430 = vmatpush.bf16.msrb.mxu0 %v8430_v29  ;;  %v12895_v29 = vld [vmem:[#allocation23_spill] sm:$0xff] }
 0x3c6   :  { %4459 = vmatpush.bf16.msrb.mxu1 %v8558_v57 }
 0x3c7   :  { %v11929_v47 = vadd.f32 %v3472_v45, %v3444_v11  ;;  %v3474_v17 = vpop.f32.mrf.mxu3  ;;  %v8799_v11 = vld [vmem:[#allocation7 + $0x9b0] sm:$0xf0] }
 0x3c8   :  { %v3387_v8 = vpop.f32.mrf.mxu0  ;;  %v8802_v59 = vor.u32 %v9930_v43, %v8799_v11  ;;  %v8527_v43 = vld [vmem:[#allocation7 + $0x790] sm:$0xf0]  ;;  %v12897_v11 = vld [vmem:[#allocation31_spill] sm:$0xff] }
 0x3c9   :  { %v3388_v53 = vadd.f32 %v3387_v8, %v11646_v56  ;;  %v8543_v8 = vld [vmem:[#allocation7 + $0x7b0] sm:$0xf0] }
 0x3ca   :  { %v3416_v50 = vpop.f32.mrf.mxu1  ;;  %3679 = vmatmul.bf16.gmra.mxu2 %v11770_v49  ;;  %v8546_v57 = vor.u32 %v9866_v14, %v8543_v8 }
 0x3cb   :  { %v3417_v40 = vadd.f32 %v3416_v50, %v3388_v53  ;;  %v9898_v50 = vld [vmem:[#allocation7 + $0x8a4] sm:$0xf]  ;;  %4597 = vmatpush.bf16.msrb.mxu2 %v8802_v59 }
 0x3cc   :  { %8426 = vmatmul.msk.bf16.gmra.mxu3 %vm2222_vm5, %v11777_v1  ;;  %4539 = vmatpush.bf16.msra.mxu0 %v8546_v57  ;;  %v9894_v59 = vld [vmem:[#allocation7 + $0x884] sm:$0xf]  ;;  %v12898_v57 = vld [vmem:[#allocation19_spill] sm:$0xff] }
 0x3cd   :  { %v3446_v24 = vadd.f32 %v3445_v2, %v3417_v40  ;;  %v3448_v45 = vpop.f32.mrf.mxu2  ;;  %v9942_v2 = vld [vmem:[#allocation7 + $0xa04] sm:$0xf]  ;;  %v8671_v40 = vld [vmem:[#allocation7 + $0x8b0] sm:$0xf0] }
 0x3ce   :  { %v8850_v53 = vor.u32 %v9942_v2, %v8847_v20 }
 0x3cf   :  { %v11935_v26 = vadd.f32 %v3474_v17, %v3446_v24  ;;  %v3477_v13 = vpop.f32.mrf.mxu3 }
 0x3d0   :  { %v3390_v4 = vpop.f32.mrf.mxu0  ;;  %4631 = vmatpush.bf16.msrb.mxu3 %v8850_v53 }
 0x3d1   :  { %v3391_v25 = vadd.f32 %v3390_v4, %v11656_v60 }
 0x3d2   :  { %v3419_v55 = vpop.f32.mrf.mxu1 }
 0x3d3   :  { %v3420_v56 = vadd.f32 %v3419_v55, %v3391_v25  ;;  %3621 = vmatmul.bf16.gmra.mxu0 %v11788_v63  ;;  %v12893_v63 = vld [vmem:[#allocation28_spill] sm:$0xff]  ;;  %v8674_v25 = vor.u32 %v9898_v50, %v8671_v40  ;;  %v3727_v50 = vrot.slane %v12898_v57, 1  ;;  %v12899_v40 = vld [vmem:[#allocation26_spill] sm:$0xff] }
 0x3d4   :  { %v3724_v36 = vrot.slane %v12893_v63, 1  ;;  %v9926_v63 = vld [vmem:[#allocation7 + $0x984] sm:$0xf] }
 0x3d5   :  { %v3449_v15 = vadd.f32 %v3448_v45, %v3420_v56  ;;  %3650 = vmatmul.bf16.gmra.mxu1 %v11794_v35  ;;  %v3450_v49 = vpop.f32.mrf.mxu2 }
 0x3d6   :  { %v11954_v30 = vsel %vm148_vm1, %v3724_v36, %v3725_v16  ;;  %4568 = vmatpush.bf16.msra.mxu1 %v8674_v25  ;;  %v8783_v36 = vld [vmem:[#allocation7 + $0x990] sm:$0xf0]  ;;  %v9858_v25 = vld [vmem:[#allocation7 + $0x764] sm:$0xf] }
 0x3d7   :  { %v11941_v61 = vadd.f32 %v3477_v13, %v3449_v15  ;;  %v3479_v1 = vpop.f32.mrf.mxu3  ;;  %v12896_v13 = vld [vmem:[#allocation29_spill] sm:$0xff] }
 0x3d8   :  { %v3392_v33 = vpop.f32.mrf.mxu0  ;;  %v3718_v4 = vrot.slane %v12896_v13, 1 }
 0x3d9   :  { %v3393_v60 = vadd.f32 %v3392_v33, %v11669_v3  ;;  %v12894_v3 = vld [vmem:[#allocation21_spill] sm:$0xff] }
 0x3da   :  { %v3421_v28 = vpop.f32.mrf.mxu1  ;;  %4489 = vmatmul.bf16.vlgmr.msra.gmra.mxu2 %v11947_v44  ;;  %v3715_v54 = vrot.slane %v12894_v3, 1  ;;  %v11974_v56 = vsel %vm148_vm1, %v3718_v4, %v3719_v42  ;;  %v8767_v3 = vld [vmem:[#allocation7 + $0x970] sm:$0xf0] }
 0x3db   :  { %v3422_v35 = vadd.f32 %v3421_v28, %v3393_v60  ;;  %v9922_v28 = vld [vmem:[#allocation7 + $0x964] sm:$0xf] }
 0x3dc   :  { %8862 = vmatmul.msk.bf16.vlgmr.msra.gmra.mxu3 %vm2222_vm5, %v11954_v30  ;;  %v11967_v45 = vsel %vm148_vm1, %v3715_v54, %v3716_v46  ;;  %v9862_v54 = vld [vmem:[#allocation7 + $0x784] sm:$0xf] }
 0x3dd   :  { %v3451_v31 = vadd.f32 %v3450_v49, %v3422_v35  ;;  %v3549_v6 = vpop.f32.mrf.mxu2 }
 0x3df   :  { %v11961_v58 = vadd.f32 %v3479_v1, %v3451_v31  ;;  %v3578_v5 = vpop.f32.mrf.mxu3  ;;  %v3731_v1 = vrot.slane %v11503_v10, 1  ;;  %v8786_v31 = vor.u32 %v9926_v63, %v8783_v36  ;;  %v8511_v63 = vld [vmem:[#allocation7 + $0x770] sm:$0xf0]  ;;  %v9890_v36 = vld [vmem:[#allocation7 + $0x864] sm:$0xf] }
 0x3e0   :  { %v3491_v17 = vpop.f32.mrf.mxu0 }
 0x3e1   :  { %v3492_v7 = vadd.f32 %v3491_v17, %v12895_v29  ;;  %v11985_v2 = vsel %vm148_vm1, %v3722_v52, %v3731_v1  ;;  %v8530_v17 = vor.u32 %v9862_v54, %v8527_v43  ;;  %v11993_v29 = vsel %vm148_vm1, %v3725_v16, %v3733_v41  ;;  %4598 = vmatpush.bf16.msrb.mxu2 %v8786_v31  ;;  %v8751_v16 = vld [vmem:[#allocation7 + $0x950] sm:$0xf0]  ;;  %v9914_v54 = vld [vmem:[#allocation7 + $0x924] sm:$0xf] }
 0x3e2   :  { %v3520_v24 = vpop.f32.mrf.mxu1  ;;  %v8735_v43 = vld [vmem:[#allocation7 + $0x930] sm:$0xf0] }
 0x3e3   :  { %v3521_v55 = vadd.f32 %v3520_v24, %v3492_v7  ;;  %4431 = vmatmul.bf16.vlgmr.msrb.gmra.mxu0 %v11967_v45  ;;  %v8770_v7 = vor.u32 %v9922_v28, %v8767_v3  ;;  %v3729_v24 = vrot.slane %v12899_v40, 1  ;;  %v8639_v28 = vld [vmem:[#allocation7 + $0x870] sm:$0xf0] }
 0x3e4   :  { %4540 = vmatpush.bf16.msra.mxu0 %v8530_v17  ;;  %v8642_v3 = vor.u32 %v9890_v36, %v8639_v28  ;;  %v8738_v17 = vor.u32 %v9914_v54, %v8735_v43  ;;  %v8559_v40 = vld [vmem:[#allocation7 + $0x7d0] sm:$0xf0] }
 0x3e5   :  { %v3550_v15 = vadd.f32 %v3549_v6, %v3521_v55  ;;  %4460 = vmatmul.bf16.vlgmr.msrb.gmra.mxu1 %v11974_v56  ;;  %v3551_v49 = vpop.f32.mrf.mxu2  ;;  %4599 = vmatpush.bf16.msrb.mxu2 %v8770_v7 }
 0x3e7   :  { %v11979_v33 = vadd.f32 %v3578_v5, %v3550_v15  ;;  %v3580_v60 = vpop.f32.mrf.mxu3  ;;  %v8655_v5 = vld [vmem:[#allocation7 + $0x890] sm:$0xf0]  ;;  %v8754_v15 = vor.u32 %v9918_v21, %v8751_v16  ;;  %v9854_v21 = vld [vmem:[#allocation7 + $0x744] sm:$0xf] }
 0x3e8   :  { %v3493_v35 = vpop.f32.mrf.mxu0  ;;  %v8658_v14 = vor.u32 %v9894_v59, %v8655_v5  ;;  %v12015_v59 = vsel %vm148_vm1, %v3719_v42, %v3729_v24  ;;  %v9886_v16 = vld [vmem:[#allocation7 + $0x844] sm:$0xf] }
 0x3e9   :  { %v3494_v6 = vadd.f32 %v3493_v35, %v12897_v11  ;;  %v12900_v35 = vld [vmem:[#allocation24_spill] sm:$0xff]  ;;  %4600 = vmatpush.bf16.msrb.mxu2 %v8754_v15 }
 0x3ea   :  { %v3522_v20 = vpop.f32.mrf.mxu1  ;;  %4494 = vmatmul.bf16.gmra.mxu2 %v11985_v2  ;;  %4569 = vmatpush.bf16.msra.mxu1 %v8658_v14  ;;  %v12902_v14 = vld [vmem:[#allocation27_spill] sm:$0xff]  ;;  %v9910_v15 = vld [vmem:[#allocation7 + $0x904] sm:$0xf] }
 0x3eb   :  { %v3523_v8 = vadd.f32 %v3522_v20, %v3494_v6 }
 0x3ec   :  { %8863 = vmatmul.msk.bf16.gmra.mxu3 %vm2222_vm5, %v11993_v29 }
 0x3ed   :  { %v3552_v52 = vadd.f32 %v3551_v49, %v3523_v8  ;;  %v3554_v53 = vpop.f32.mrf.mxu2  ;;  %v8514_v49 = vor.u32 %v9858_v25, %v8511_v63  ;;  %v3741_v8 = vrot.slane %v12902_v14, 1  ;;  %4601 = vmatpush.bf16.msrb.mxu2 %v8738_v17  ;;  %v8498_v25 = vor.u32 %v9854_v21, %v8495_v18  ;;  %v12903_v63 = vld [vmem:[#allocation25_spill] sm:$0xff]  ;;  %v9906_v21 = vld [vmem:[#allocation7 + $0x8e4] sm:$0xf]  ;;  %v8703_v18 = vld [vmem:[#allocation7 + $0x8f0] sm:$0xf0] }
 0x3ee   :  { %4570 = vmatpush.bf16.msra.mxu1 %v8642_v3  ;;  %v9850_v3 = vld [vmem:[#allocation7 + $0x724] sm:$0xf] }
 0x3ef   :  { %v11999_v13 = vadd.f32 %v3580_v60, %v3552_v52  ;;  %v3583_v4 = vpop.f32.mrf.mxu3  ;;  %v12007_v60 = vsel %vm148_vm1, %v3716_v46, %v3727_v50  ;;  %4541 = vmatpush.bf16.msra.mxu0 %v8514_v49  ;;  %v12901_v46 = vld [vmem:[#allocation20_spill] sm:$0xff]  ;;  %v8831_v49 = vld [vmem:[#allocation7 + $0x9f0] sm:$0xf0]  ;;  %v12037_v43 = vsel %vm148_vm1, %v3733_v41, %v3741_v8 }
 0x3f0   :  { %v3496_v55 = vpop.f32.mrf.mxu0  ;;  %v12019_v20 = vrot.slane %v12901_v46, 1  ;;  %v12904_v41 = vld [vmem:[#allocation22_spill] sm:$0xff] }
 0x3f1   :  { %v3497_v31 = vadd.f32 %v3496_v55, %v12900_v35  ;;  %v8623_v55 = vld [vmem:[#allocation7 + $0x850] sm:$0xf0] }
 0x3f2   :  { %v3525_v11 = vpop.f32.mrf.mxu1  ;;  %v12029_v28 = vsel %vm148_vm1, %v3731_v1, %v12019_v20  ;;  %v9882_v1 = vld [vmem:[#allocation7 + $0x824] sm:$0xf] }
 0x3f3   :  { %v3526_v6 = vadd.f32 %v3525_v11, %v3497_v31  ;;  %4436 = vmatmul.bf16.gmra.mxu0 %v12007_v60  ;;  %v9938_v31 = vld [vmem:[#allocation7 + $0x9e4] sm:$0xf]  ;;  %v8479_v11 = vld [vmem:[#allocation7 + $0x730] sm:$0xf0] }
 0x3f4   :  { %4542 = vmatpush.bf16.msra.mxu0 %v8498_v25  ;;  %v8834_v10 = vor.u32 %v9938_v31, %v8831_v49  ;;  %v12042_v25 = vrot.slane %v12904_v41, 1  ;;  %v8575_v41 = vld [vmem:[#allocation7 + $0x7f0] sm:$0xf0] }
 0x3f5   :  { %v3555_v5 = vadd.f32 %v3554_v53, %v3526_v6  ;;  %4465 = vmatmul.bf16.gmra.mxu1 %v12015_v59  ;;  %v3556_v37 = vpop.f32.mrf.mxu2  ;;  %v8719_v53 = vld [vmem:[#allocation7 + $0x910] sm:$0xf0] }
 0x3f6   :  { %v8722_v35 = vor.u32 %v9910_v15, %v8719_v53  ;;  %v8607_v6 = vld [vmem:[#allocation7 + $0x830] sm:$0xf0]  ;;  %4632 = vmatpush.bf16.msrb.mxu3 %v8834_v10  ;;  %v12906_v10 = vld [vmem:[#allocation32_spill] sm:$0xff] }
 0x3f7   :  { %v12022_v7 = vadd.f32 %v3583_v4, %v3555_v5  ;;  %v3585_v52 = vpop.f32.mrf.mxu3  ;;  %v8626_v4 = vor.u32 %v9886_v16, %v8623_v55  ;;  %v8482_v5 = vor.u32 %v9850_v3, %v8479_v11  ;;  %v8610_v46 = vor.u32 %v9882_v1, %v8607_v6  ;;  %v12905_v55 = vld [vmem:[#allocation30_spill] sm:$0xff]  ;;  %v9902_v3 = vld [vmem:[#allocation7 + $0x8c4] sm:$0xf] }
 0x3f8   :  { %v3498_v42 = vpop.f32.mrf.mxu0  ;;  %4602 = vmatpush.bf16.msrb.mxu2 %v8722_v35  ;;  %v8706_v16 = vor.u32 %v9906_v21, %v8703_v18  ;;  %v12045_v15 = vrot.slane %v12905_v55, 1  ;;  %v9878_v35 = vld [vmem:[#allocation7 + $0x804] sm:$0xf]  ;;  %v8815_v21 = vld [vmem:[#allocation7 + $0x9d0] sm:$0xf0] }
 0x3f9   :  { %v3499_v36 = vadd.f32 %v3498_v42, %v12903_v63  ;;  %4571 = vmatpush.bf16.msra.mxu1 %v8626_v4  ;;  %4543 = vmatpush.bf16.msra.mxu0 %v8482_v5  ;;  %v8463_v4 = vld [vmem:[#allocation7 + $0x710] sm:$0xf0]  ;;  %v9842_v5 = vld [vmem:[#allocation7 + $0x6e4] sm:$0xf] }
 0x3fa   :  { %v3527_v54 = vpop.f32.mrf.mxu1  ;;  %4499 = vmatmul.bf16.gmra.mxu2 %v12029_v28 }
 0x3fb   :  { %v3528_v17 = vadd.f32 %v3527_v54, %v3499_v36  ;;  %v9846_v36 = vld [vmem:[#allocation7 + $0x704] sm:$0xf]  ;;  %v8687_v54 = vld [vmem:[#allocation7 + $0x8d0] sm:$0xf0] }
 0x3fc   :  { %8864 = vmatmul.msk.bf16.gmra.mxu3 %vm2222_vm5, %v12037_v43  ;;  %4603 = vmatpush.bf16.msrb.mxu2 %v8706_v16  ;;  %v8466_v49 = vor.u32 %v9846_v36, %v8463_v4  ;;  %v8690_v6 = vor.u32 %v9902_v3, %v8687_v54  ;;  %v8447_v16 = vld [vmem:[#allocation7 + $0x6f0] sm:$0xf0]  ;;  %v9870_v54 = vld [vmem:[#allocation7 + $0x7c4] sm:$0xf] }
 0x3fd   :  { %v3557_v62 = vadd.f32 %v3556_v37, %v3528_v17  ;;  %v3559_v42 = vpop.f32.mrf.mxu2  ;;  %4572 = vmatpush.bf16.msra.mxu1 %v8610_v46  ;;  %v8591_v37 = vld [vmem:[#allocation7 + $0x810] sm:$0xf0]  ;;  %v9934_v17 = vld [vmem:[#allocation7 + $0x9c4] sm:$0xf]  ;;  %v12054_v46 = vsel %vm148_vm1, %v3727_v50, %v12042_v25  ;;  %v8450_v36 = vor.u32 %v9842_v5, %v8447_v16 }
 0x3fe   :  { %v8594_v1 = vor.u32 %v9878_v35, %v8591_v37  ;;  %4544 = vmatpush.bf16.msra.mxu0 %v8466_v49  ;;  %v8818_v18 = vor.u32 %v9934_v17, %v8815_v21  ;;  %v12061_v35 = vsel %vm148_vm1, %v3729_v24, %v12045_v15  ;;  %v9838_v37 = vld [vmem:[#allocation7 + $0x6c4] sm:$0xf]  ;;  %v8431_v3 = vld [vmem:[#allocation7 + $0x6d0] sm:$0xf0]  ;;  %v8562_v17 = vor.u32 %v9870_v54, %v8559_v40 }
 0x3ff   :  { %v12047_v53 = vadd.f32 %v3585_v52, %v3557_v62  ;;  %v3588_v63 = vpop.f32.mrf.mxu3  ;;  %v9874_v62 = vld [vmem:[#allocation7 + $0x7e4] sm:$0xf] }
 0x400   :  { %v3501_v31 = vpop.f32.mrf.mxu0  ;;  %v8578_v4 = vor.u32 %v9874_v62, %v8575_v41  ;;  %4604 = vmatpush.bf16.msrb.mxu2 %v8690_v6  ;;  %4633 = vmatpush.bf16.msrb.mxu3 %v8818_v18  ;;  %v12908_v62 = vld [vmem:[#allocation34_spill] sm:$0xff] }
 0x401   :  { %v3502_v11 = vadd.f32 %v3501_v31, %v12906_v10  ;;  %4573 = vmatpush.bf16.msra.mxu1 %v8594_v1  ;;  %v12907_v1 = vld [vmem:[#allocation33_spill] sm:$0xff] }
 0x402   :  { %v3530_v52 = vpop.f32.mrf.mxu1  ;;  %4545 = vmatpush.bf16.msra.mxu0 %v8450_v36 }
 0x403   :  { %v3531_v55 = vadd.f32 %v3530_v52, %v3502_v11  ;;  %4441 = vmatmul.bf16.gmra.mxu0 %v12054_v46  ;;  %v8434_v11 = vor.u32 %v9838_v37, %v8431_v3 }
 0x405   :  { %v3560_v57 = vadd.f32 %v3559_v42, %v3531_v55  ;;  %4470 = vmatmul.bf16.gmra.mxu1 %v12061_v35  ;;  %v3561_v50 = vpop.f32.mrf.mxu2 }
 0x406   :  { %4574 = vmatpush.bf16.msra.mxu1 %v8578_v4  ;;  %4546 = vmatpush.bf16.msra.mxu0 %v8434_v11 }
 0x407   :  { %v12064_v31 = vadd.f32 %v3588_v63, %v3560_v57  ;;  %v3590_v49 = vpop.f32.mrf.mxu3  ;;  %v12072_v63 = vsel %vm148_vm1, %v3741_v8, 0 }
 0x408   :  { %v3503_v10 = vpop.f32.mrf.mxu0 }
 0x409   :  { %v3504_v24 = vadd.f32 %v3503_v10, %v12907_v1 }
 0x40a   :  { %v3532_v6 = vpop.f32.mrf.mxu1  ;;  %8861 = vmatmul.msk.bf16.gmra.mxu2 %vm148_vm1, %v12019_v20  ;;  %4575 = vmatpush.bf16.msra.mxu1 %v8562_v17  ;;  %v9933_v17 = vld [vmem:[#allocation7 + $0x9b4] sm:$0xf0] }
 0x40b   :  { %v3533_v42 = vadd.f32 %v3532_v6, %v3504_v24  ;;  %v8805_v24 = vld [vmem:[#allocation7 + $0x9a8] sm:$0xf] }
 0x40c   :  { %8865 = vmatmul.msk.bf16.gmra.mxu3 %vm2222_vm5, %v12072_v63  ;;  %v8853_v6 = vld [vmem:[#allocation7 + $0xa08] sm:$0xf] }
 0x40d   :  { %v3562_v21 = vadd.f32 %v3561_v50, %v3533_v42  ;;  %v3564_v5 = vpop.f32.mrf.mxu2 }
 0x40f   :  { %v12076_v52 = vadd.f32 %v3590_v49, %v3562_v21  ;;  %v3593_v18 = vpop.f32.mrf.mxu3  ;;  %v12909_v49 = vld [vmem:[#allocation35_spill] sm:$0xff]  ;;  %v8806_v21 = vor.u32 %v9933_v17, %v8805_v24  ;;  %v8789_v24 = vld [vmem:[#allocation7 + $0x988] sm:$0xf] }
 0x410   :  { %v3506_v16 = vpop.f32.mrf.mxu0  ;;  %v9929_v17 = vld [vmem:[#allocation7 + $0x994] sm:$0xf0] }
 0x411   :  { %v3507_v41 = vadd.f32 %v3506_v16, %v12908_v62  ;;  %v9869_v16 = vld [vmem:[#allocation7 + $0x7b4] sm:$0xf0]  ;;  %v12910_v62 = vld [vmem:[#allocation36_spill] sm:$0xff]  ;;  %4713 = vmatpush.bf16.msra.mxu2 %v8806_v21 }
 0x412   :  { %v3535_v55 = vpop.f32.mrf.mxu1  ;;  %v9925_v21 = vld [vmem:[#allocation7 + $0x974] sm:$0xf0] }
 0x413   :  { %v3536_v36 = vadd.f32 %v3535_v55, %v3507_v41  ;;  %8859 = vmatmul.msk.bf16.gmra.mxu0 %vm148_vm1, %v12042_v25 }
 0x415   :  { %v3565_v14 = vadd.f32 %v3564_v5, %v3536_v36  ;;  %8860 = vmatmul.msk.bf16.gmra.mxu1 %vm148_vm1, %v12045_v15  ;;  %v3566_v8 = vpop.f32.mrf.mxu2  ;;  %v9945_v5 = vld [vmem:[#allocation7 + $0xa14] sm:$0xf0] }
 0x416   :  { %v8854_v55 = vor.u32 %v9945_v5, %v8853_v6  ;;  %v8773_v6 = vld [vmem:[#allocation7 + $0x968] sm:$0xf]  ;;  %v8790_v5 = vor.u32 %v9929_v17, %v8789_v24 }
 0x417   :  { %v12083_v4 = vadd.f32 %v3593_v18, %v3565_v14  ;;  %v3595_v57 = vpop.f32.mrf.mxu3  ;;  %v8549_v18 = vld [vmem:[#allocation7 + $0x7a8] sm:$0xf] }
 0x418   :  { %v3508_v50 = vpop.f32.mrf.mxu0  ;;  %v8550_v36 = vor.u32 %v9869_v16, %v8549_v18  ;;  %v8677_v14 = vld [vmem:[#allocation7 + $0x8a8] sm:$0xf]  ;;  %4747 = vmatpush.bf16.msra.mxu3 %v8854_v55  ;;  %v9865_v16 = vld [vmem:[#allocation7 + $0x794] sm:$0xf0]  ;;  %4714 = vmatpush.bf16.msra.mxu2 %v8790_v5 }
 0x419   :  { %v3509_v37 = vadd.f32 %v3508_v50, %v12909_v49  ;;  %v9901_v50 = vld [vmem:[#allocation7 + $0x8b4] sm:$0xf0]  ;;  %v8533_v18 = vld [vmem:[#allocation7 + $0x788] sm:$0xf] }
 0x41a   :  { %v3537_v3 = vpop.f32.mrf.mxu1  ;;  %4605 = vmatmul.bf16.vlgmr.msrb.gmra.mxu2 %v11947_v44  ;;  %4655 = vmatpush.bf16.msrb.mxu0 %v8550_v36  ;;  %v8534_v55 = vor.u32 %v9865_v16, %v8533_v18  ;;  %v8661_v36 = vld [vmem:[#allocation7 + $0x888] sm:$0xf]  ;;  %v9893_v5 = vld [vmem:[#allocation7 + $0x874] sm:$0xf0] }
 0x41b   :  { %v3538_v54 = vadd.f32 %v3537_v3, %v3509_v37  ;;  %v8757_v17 = vld [vmem:[#allocation7 + $0x948] sm:$0xf] }
 0x41c   :  { %8869 = vmatmul.msk.bf16.vlgmr.msrb.gmra.mxu3 %vm2222_vm5, %v11954_v30  ;;  %v8517_v18 = vld [vmem:[#allocation7 + $0x768] sm:$0xf] }
 0x41d   :  { %v3567_v10 = vadd.f32 %v3566_v8, %v3538_v54  ;;  %v3665_v11 = vpop.f32.mrf.mxu2  ;;  %v8678_v8 = vor.u32 %v9901_v50, %v8677_v14  ;;  %v9897_v14 = vld [vmem:[#allocation7 + $0x894] sm:$0xf0] }
 0x41e   :  { %v8662_v50 = vor.u32 %v9897_v14, %v8661_v36  ;;  %4656 = vmatpush.bf16.msrb.mxu0 %v8534_v55  ;;  %v9861_v36 = vld [vmem:[#allocation7 + $0x774] sm:$0xf0]  ;;  %v8741_v14 = vld [vmem:[#allocation7 + $0x928] sm:$0xf] }
 0x41f   :  { %v12089_v40 = vadd.f32 %v3595_v57, %v3567_v10  ;;  %v3694_v1 = vpop.f32.mrf.mxu3  ;;  %4684 = vmatpush.bf16.msrb.mxu1 %v8678_v8 }
 0x420   :  { %v3607_v42 = vpop.f32.mrf.mxu0 }
 0x421   :  { %v3608_v41 = vadd.f32 %v3607_v42, %v12910_v62  ;;  %v12912_v62 = vld [vmem:[#allocation37_spill] sm:$0xff] }
 0x422   :  { %v3636_v49 = vpop.f32.mrf.mxu1 }
 0x423   :  { %v3637_v57 = vadd.f32 %v3636_v49, %v3608_v41  ;;  %4547 = vmatmul.bf16.vlgmr.msra.gmra.mxu0 %v11967_v45  ;;  %v8774_v49 = vor.u32 %v9925_v21, %v8773_v6  ;;  %4685 = vmatpush.bf16.msrb.mxu1 %v8662_v50  ;;  %v8518_v21 = vor.u32 %v9861_v36, %v8517_v18  ;;  %v8629_v18 = vld [vmem:[#allocation7 + $0x848] sm:$0xf] }
 0x425   :  { %v3666_v37 = vadd.f32 %v3665_v11, %v3637_v57  ;;  %4576 = vmatmul.bf16.vlgmr.msra.gmra.mxu1 %v11974_v56  ;;  %v3667_v3 = vpop.f32.mrf.mxu2  ;;  %4715 = vmatpush.bf16.msra.mxu2 %v8774_v49 }
 0x426   :  { %4657 = vmatpush.bf16.msrb.mxu0 %v8518_v21 }
 0x427   :  { %v12094_v54 = vadd.f32 %v3694_v1, %v3666_v37  ;;  %v3696_v10 = vpop.f32.mrf.mxu3 }
 0x428   :  { %v3609_v42 = vpop.f32.mrf.mxu0 }
 0x429   :  { %12911 = vst [vmem:[#allocation28_spill] sm:$0xff] %v12094_v54  ;;  %v3610_v41 = vadd.f32 %v3609_v42, %v12912_v62  ;;  %v9921_v42 = vld [vmem:[#allocation7 + $0x954] sm:$0xf0] }
 0x42a   :  { %v3638_v11 = vpop.f32.mrf.mxu1  ;;  %4610 = vmatmul.bf16.gmra.mxu2 %v11985_v2  ;;  %v8758_v62 = vor.u32 %v9921_v42, %v8757_v17  ;;  %v9857_v42 = vld [vmem:[#allocation7 + $0x754] sm:$0xf0] }
 0x42b   :  { %v3639_v1 = vadd.f32 %v3638_v11, %v3610_v41  ;;  %v8645_v41 = vld [vmem:[#allocation7 + $0x868] sm:$0xf]  ;;  %v9917_v11 = vld [vmem:[#allocation7 + $0x934] sm:$0xf0] }
 0x42c   :  { %8870 = vmatmul.msk.bf16.gmra.mxu3 %vm2222_vm5, %v11993_v29  ;;  %v8646_v55 = vor.u32 %v9893_v5, %v8645_v41  ;;  %4716 = vmatpush.bf16.msra.mxu2 %v8758_v62  ;;  %v9889_v41 = vld [vmem:[#allocation7 + $0x854] sm:$0xf0]  ;;  %v8725_v5 = vld [vmem:[#allocation7 + $0x908] sm:$0xf]  ;;  %v12915_v62 = vld [vmem:[#allocation38_spill] sm:$0xff] }
 0x42d   :  { %v3668_v8 = vadd.f32 %v3667_v3, %v3639_v1  ;;  %v3670_v57 = vpop.f32.mrf.mxu2  ;;  %v8630_v21 = vor.u32 %v9889_v41, %v8629_v18 }
 0x42e   :  { %4686 = vmatpush.bf16.msrb.mxu1 %v8646_v55 }
 0x42f   :  { %v12100_v37 = vadd.f32 %v3696_v10, %v3668_v8  ;;  %v3699_v24 = vpop.f32.mrf.mxu3  ;;  %v8742_v10 = vor.u32 %v9917_v11, %v8741_v14  ;;  %v9941_v11 = vld [vmem:[#allocation7 + $0x9f4] sm:$0xf0] }
 0x430   :  { %v3612_v16 = vpop.f32.mrf.mxu0 }
 0x431   :  { %12913 = vst [vmem:[#allocation21_spill] sm:$0xff] %v12100_v37  ;;  %v3613_v6 = vadd.f32 %v3612_v16, %v11826_v34  ;;  %4717 = vmatpush.bf16.msra.mxu2 %v8742_v10  ;;  %v8501_v34 = vld [vmem:[#allocation7 + $0x748] sm:$0xf]  ;;  %v9853_v10 = vld [vmem:[#allocation7 + $0x734] sm:$0xf0] }
 0x432   :  { %v3641_v3 = vpop.f32.mrf.mxu1  ;;  %v8502_v36 = vor.u32 %v9857_v42, %v8501_v34  ;;  %4687 = vmatpush.bf16.msrb.mxu1 %v8630_v21  ;;  %v8709_v37 = vld [vmem:[#allocation7 + $0x8e8] sm:$0xf] }
 0x433   :  { %v3642_v50 = vadd.f32 %v3641_v3, %v3613_v6  ;;  %4552 = vmatmul.bf16.gmra.mxu0 %v12007_v60  ;;  %v9913_v6 = vld [vmem:[#allocation7 + $0x914] sm:$0xf0]  ;;  %v8485_v3 = vld [vmem:[#allocation7 + $0x728] sm:$0xf] }
 0x434   :  { %v8726_v55 = vor.u32 %v9913_v6, %v8725_v5  ;;  %4658 = vmatpush.bf16.msrb.mxu0 %v8502_v36  ;;  %v8486_v34 = vor.u32 %v9853_v10, %v8485_v3  ;;  %v8597_v21 = vld [vmem:[#allocation7 + $0x808] sm:$0xf]  ;;  %v9905_v3 = vld [vmem:[#allocation7 + $0x8d4] sm:$0xf0] }
 0x435   :  { %v3671_v1 = vadd.f32 %v3670_v57, %v3642_v50  ;;  %4581 = vmatmul.bf16.gmra.mxu1 %v12015_v59  ;;  %v3672_v49 = vpop.f32.mrf.mxu2  ;;  %v8837_v57 = vld [vmem:[#allocation7 + $0x9e8] sm:$0xf] }
 0x436   :  { %4718 = vmatpush.bf16.msra.mxu2 %v8726_v55 }
 0x437   :  { %v12105_v8 = vadd.f32 %v3699_v24, %v3671_v1  ;;  %v3701_v17 = vpop.f32.mrf.mxu3  ;;  %v8838_v24 = vor.u32 %v9941_v11, %v8837_v57  ;;  %v8613_v1 = vld [vmem:[#allocation7 + $0x828] sm:$0xf]  ;;  %v9881_v57 = vld [vmem:[#allocation7 + $0x814] sm:$0xf0] }
 0x438   :  { %v3614_v16 = vpop.f32.mrf.mxu0  ;;  %4659 = vmatpush.bf16.msrb.mxu0 %v8486_v34  ;;  %v8693_v11 = vld [vmem:[#allocation7 + $0x8c8] sm:$0xf] }
 0x439   :  { %12914 = vst [vmem:[#allocation23_spill] sm:$0xff] %v12105_v8  ;;  %v3615_v14 = vadd.f32 %v3614_v16, %v12915_v62  ;;  %v9885_v8 = vld [vmem:[#allocation7 + $0x834] sm:$0xf0]  ;;  %4748 = vmatpush.bf16.msra.mxu3 %v8838_v24  ;;  %v8469_v62 = vld [vmem:[#allocation7 + $0x708] sm:$0xf] }
 0x43a   :  { %v3643_v50 = vpop.f32.mrf.mxu1  ;;  %4615 = vmatmul.bf16.gmra.mxu2 %v12029_v28  ;;  %v8614_v42 = vor.u32 %v9885_v8, %v8613_v1  ;;  %v9909_v16 = vld [vmem:[#allocation7 + $0x8f4] sm:$0xf0]  ;;  %v8453_v1 = vld [vmem:[#allocation7 + $0x6e8] sm:$0xf] }
 0x43b   :  { %v3644_v54 = vadd.f32 %v3643_v50, %v3615_v14  ;;  %v8710_v18 = vor.u32 %v9909_v16, %v8709_v37  ;;  %v9849_v14 = vld [vmem:[#allocation7 + $0x714] sm:$0xf0]  ;;  %v8598_v37 = vor.u32 %v9881_v57, %v8597_v21  ;;  %v8581_v16 = vld [vmem:[#allocation7 + $0x7e8] sm:$0xf] }
 0x43c   :  { %8871 = vmatmul.msk.bf16.gmra.mxu3 %vm2222_vm5, %v12037_v43  ;;  %4688 = vmatpush.bf16.msrb.mxu1 %v8614_v42  ;;  %v8470_v8 = vor.u32 %v9849_v14, %v8469_v62  ;;  %v12917_v50 = vld [vmem:[#allocation39_spill] sm:$0xff] }
 0x43d   :  { %v3673_v41 = vadd.f32 %v3672_v49, %v3644_v54  ;;  %v3675_v5 = vpop.f32.mrf.mxu2  ;;  %4719 = vmatpush.bf16.msra.mxu2 %v8710_v18  ;;  %v8694_v54 = vor.u32 %v9905_v3, %v8693_v11  ;;  %v8821_v49 = vld [vmem:[#allocation7 + $0x9c8] sm:$0xf]  ;;  %v9937_v24 = vld [vmem:[#allocation7 + $0x9d4] sm:$0xf0]  ;;  %v12919_v3 = vld [vmem:[#allocation40_spill] sm:$0xff] }
 0x43e   :  { %4660 = vmatpush.bf16.msrb.mxu0 %v8470_v8  ;;  %v8822_v34 = vor.u32 %v9937_v24, %v8821_v49  ;;  %v9845_v42 = vld [vmem:[#allocation7 + $0x6f4] sm:$0xf0]  ;;  %v8565_v24 = vld [vmem:[#allocation7 + $0x7c8] sm:$0xf] }
 0x43f   :  { %v12111_v36 = vadd.f32 %v3701_v17, %v3673_v41  ;;  %v3704_v6 = vpop.f32.mrf.mxu3  ;;  %v9877_v18 = vld [vmem:[#allocation7 + $0x7f4] sm:$0xf0]  ;;  %v8454_v62 = vor.u32 %v9845_v42, %v8453_v1 }
 0x440   :  { %v3617_v55 = vpop.f32.mrf.mxu0  ;;  %4689 = vmatpush.bf16.msrb.mxu1 %v8598_v37  ;;  %v8582_v14 = vor.u32 %v9877_v18, %v8581_v16  ;;  %4749 = vmatpush.bf16.msra.mxu3 %v8822_v34  ;;  %v9841_v49 = vld [vmem:[#allocation7 + $0x6d4] sm:$0xf0] }
 0x441   :  { %12916 = vst [vmem:[#allocation29_spill] sm:$0xff] %v12111_v36  ;;  %v3618_v10 = vadd.f32 %v3617_v55, %v12917_v50  ;;  %4720 = vmatpush.bf16.msra.mxu2 %v8694_v54 }
 0x442   :  { %v3646_v17 = vpop.f32.mrf.mxu1  ;;  %4661 = vmatpush.bf16.msrb.mxu0 %v8454_v62 }
 0x443   :  { %v3647_v41 = vadd.f32 %v3646_v17, %v3618_v10  ;;  %4557 = vmatmul.bf16.gmra.mxu0 %v12054_v46  ;;  %v8437_v10 = vld [vmem:[#allocation7 + $0x6c8] sm:$0xf] }
 0x444   :  { %4690 = vmatpush.bf16.msrb.mxu1 %v8582_v14  ;;  %v8438_v54 = vor.u32 %v9841_v49, %v8437_v10 }
 0x445   :  { %v3676_v55 = vadd.f32 %v3675_v5, %v3647_v41  ;;  %4586 = vmatmul.bf16.gmra.mxu1 %v12061_v35  ;;  %v3677_v21 = vpop.f32.mrf.mxu2  ;;  %v9873_v5 = vld [vmem:[#allocation7 + $0x7d4] sm:$0xf0] }
 0x446   :  { %v8566_v17 = vor.u32 %v9873_v5, %v8565_v24  ;;  %4662 = vmatpush.bf16.msrb.mxu0 %v8438_v54 }
 0x447   :  { %v12116_v57 = vadd.f32 %v3704_v6, %v3676_v55  ;;  %v3706_v8 = vpop.f32.mrf.mxu3 }
 0x448   :  { %v3619_v11 = vpop.f32.mrf.mxu0  ;;  %4691 = vmatpush.bf16.msrb.mxu1 %v8566_v17  ;;  %v8807_v17 = vld [vmem:[#allocation7 + $0x9b8] sm:$0xf0] }
 0x449   :  { %12918 = vst [vmem:[#allocation31_spill] sm:$0xff] %v12116_v57  ;;  %v3620_v50 = vadd.f32 %v3619_v11, %v12919_v3 }
 0x44a   :  { %v3648_v37 = vpop.f32.mrf.mxu1  ;;  %8868 = vmatmul.msk.bf16.gmra.mxu2 %vm148_vm1, %v12019_v20 }
 0x44b   :  { %v3649_v1 = vadd.f32 %v3648_v37, %v3620_v50 }
 0x44c   :  { %8872 = vmatmul.msk.bf16.gmra.mxu3 %vm2222_vm5, %v12072_v63 }
 0x44d   :  { %v3678_v6 = vadd.f32 %v3677_v21, %v3649_v1  ;;  %v3680_v34 = vpop.f32.mrf.mxu2  ;;  %v9931_v1 = vld [vmem:[#allocation7 + $0x9ac] sm:$0xf] }
 0x44f   :  { %v12123_v42 = vadd.f32 %v3706_v8, %v3678_v6  ;;  %v3709_v16 = vpop.f32.mrf.mxu3  ;;  %v9943_v6 = vld [vmem:[#allocation7 + $0xa0c] sm:$0xf] }
 0x450   :  { %v3622_v18 = vpop.f32.mrf.mxu0 }
 0x451   :  { %12920 = vst [vmem:[#allocation19_spill] sm:$0xff] %v12123_v42  ;;  %v3623_v41 = vadd.f32 %v3622_v18, %v11846_v9  ;;  %v8855_v18 = vld [vmem:[#allocation7 + $0xa18] sm:$0xf0] }
 0x452   :  { %v3651_v62 = vpop.f32.mrf.mxu1  ;;  %v8519_v42 = vld [vmem:[#allocation7 + $0x778] sm:$0xf0] }
 0x453   :  { %v3652_v14 = vadd.f32 %v3651_v62, %v3623_v41  ;;  %8866 = vmatmul.msk.bf16.gmra.mxu0 %vm148_vm1, %v12042_v25  ;;  %v8551_v41 = vld [vmem:[#allocation7 + $0x7b8] sm:$0xf0] }
 0x455   :  { %v3681_v55 = vadd.f32 %v3680_v34, %v3652_v14  ;;  %8867 = vmatmul.msk.bf16.gmra.mxu1 %vm148_vm1, %v12045_v15  ;;  %v3682_v11 = vpop.f32.mrf.mxu2  ;;  %v8858_v14 = vor.u32 %v9943_v6, %v8855_v18  ;;  %v8791_v6 = vld [vmem:[#allocation7 + $0x998] sm:$0xf0] }
 0x457   :  { %v12130_v3 = vadd.f32 %v3709_v16, %v3681_v55  ;;  %v3711_v21 = vpop.f32.mrf.mxu3  ;;  %v8810_v16 = vor.u32 %v9931_v1, %v8807_v17  ;;  %4863 = vmatpush.bf16.msrb.mxu3 %v8858_v14  ;;  %v9927_v17 = vld [vmem:[#allocation7 + $0x98c] sm:$0xf] }
 0x458   :  { %v3624_v50 = vpop.f32.mrf.mxu0 }
 0x459   :  { %12921 = vst [vmem:[#allocation26_spill] sm:$0xff] %v12130_v3  ;;  %v3625_v8 = vadd.f32 %v3624_v50, %v11855_v48  ;;  %v9867_v48 = vld [vmem:[#allocation7 + $0x7ac] sm:$0xf]  ;;  %4829 = vmatpush.bf16.msrb.mxu2 %v8810_v16  ;;  %v8794_v16 = vor.u32 %v9927_v17, %v8791_v6 }
 0x45a   :  { %v3653_v10 = vpop.f32.mrf.mxu1  ;;  %4721 = vmatmul.bf16.vlgmr.msra.gmra.mxu2 %v11947_v44  ;;  %v8554_v55 = vor.u32 %v9867_v48, %v8551_v41  ;;  %v9899_v50 = vld [vmem:[#allocation7 + $0x8ac] sm:$0xf]  ;;  %v8535_v41 = vld [vmem:[#allocation7 + $0x798] sm:$0xf0] }
 0x45b   :  { %v3654_v9 = vadd.f32 %v3653_v10, %v3625_v8  ;;  %v9863_v48 = vld [vmem:[#allocation7 + $0x78c] sm:$0xf] }
 0x45c   :  { %8876 = vmatmul.msk.bf16.vlgmr.msra.gmra.mxu3 %vm2222_vm5, %v11954_v30  ;;  %4771 = vmatpush.bf16.msra.mxu0 %v8554_v55  ;;  %v8538_v14 = vor.u32 %v9863_v48, %v8535_v41  ;;  %v9895_v55 = vld [vmem:[#allocation7 + $0x88c] sm:$0xf] }
 0x45d   :  { %v3683_v49 = vadd.f32 %v3682_v11, %v3654_v9  ;;  %v4490_v24 = vpop.f32.mrf.mxu2  ;;  %v8679_v11 = vld [vmem:[#allocation7 + $0x8b8] sm:$0xf0]  ;;  %4830 = vmatpush.bf16.msrb.mxu2 %v8794_v16  ;;  %v12923_v6 = vld [vmem:[#allocation41_spill] sm:$0xff] }
 0x45e   :  { %v9859_v48 = vld [vmem:[#allocation7 + $0x76c] sm:$0xf] }
 0x45f   :  { %v12136_v37 = vadd.f32 %v3711_v21, %v3683_v49  ;;  %v4519_v54 = vpop.f32.mrf.mxu3  ;;  %v8682_v21 = vor.u32 %v9899_v50, %v8679_v11  ;;  %v8663_v50 = vld [vmem:[#allocation7 + $0x898] sm:$0xf0]  ;;  %v9891_v16 = vld [vmem:[#allocation7 + $0x86c] sm:$0xf] }
 0x460   :  { %v4432_v5 = vpop.f32.mrf.mxu0  ;;  %4772 = vmatpush.bf16.msra.mxu0 %v8538_v14  ;;  %v8743_v14 = vld [vmem:[#allocation7 + $0x938] sm:$0xf0] }
 0x461   :  { %12922 = vst [vmem:[#allocation24_spill] sm:$0xff] %v12136_v37  ;;  %4800 = vmatpush.bf16.msra.mxu1 %v8682_v21 }
 0x462   :  { %v4461_v34 = vpop.f32.mrf.mxu1 }
 0x463   :  { %v4462_v62 = vadd.f32 %v4461_v34, %v4432_v5  ;;  %4663 = vmatmul.bf16.vlgmr.msrb.gmra.mxu0 %v11967_v45  ;;  %v9923_v34 = vld [vmem:[#allocation7 + $0x96c] sm:$0xf] }
 0x465   :  { %v4491_v8 = vadd.f32 %v4490_v24, %v4462_v62  ;;  %4692 = vmatmul.bf16.vlgmr.msrb.gmra.mxu1 %v11974_v56  ;;  %v4492_v10 = vpop.f32.mrf.mxu2  ;;  %v8775_v24 = vld [vmem:[#allocation7 + $0x978] sm:$0xf0] }
 0x467   :  { %v4520_v9 = vadd.f32 %v4519_v54, %v4491_v8  ;;  %v4521_v49 = vpop.f32.mrf.mxu3  ;;  %v8666_v54 = vor.u32 %v9895_v55, %v8663_v50 }
 0x468   :  { %v4434_v1 = vpop.f32.mrf.mxu0 }
 0x469   :  { %v12141_v5 = vadd.f32 %v4520_v9, %v11857_v0  ;;  %v8778_v0 = vor.u32 %v9923_v34, %v8775_v24  ;;  %4801 = vmatpush.bf16.msra.mxu1 %v8666_v54  ;;  %v8647_v34 = vld [vmem:[#allocation7 + $0x878] sm:$0xf0] }
 0x46a   :  { %v4463_v18 = vpop.f32.mrf.mxu1  ;;  %4726 = vmatmul.bf16.gmra.mxu2 %v11985_v2 }
 0x46b   :  { %v4464_v62 = vadd.f32 %v4463_v18, %v4434_v1  ;;  %4831 = vmatpush.bf16.msrb.mxu2 %v8778_v0  ;;  %v9919_v1 = vld [vmem:[#allocation7 + $0x94c] sm:$0xf]  ;;  %v8759_v18 = vld [vmem:[#allocation7 + $0x958] sm:$0xf0] }
 0x46c   :  { %8877 = vmatmul.msk.bf16.gmra.mxu3 %vm2222_vm5, %v11993_v29  ;;  %v8762_v3 = vor.u32 %v9919_v1, %v8759_v18  ;;  %v9855_v1 = vld [vmem:[#allocation7 + $0x74c] sm:$0xf]  ;;  %v8503_v18 = vld [vmem:[#allocation7 + $0x758] sm:$0xf0] }
 0x46d   :  { %v4493_v11 = vadd.f32 %v4492_v10, %v4464_v62  ;;  %v4495_v21 = vpop.f32.mrf.mxu2  ;;  %v8522_v10 = vor.u32 %v9859_v48, %v8519_v42  ;;  %v8650_v62 = vor.u32 %v9891_v16, %v8647_v34  ;;  %v9887_v42 = vld [vmem:[#allocation7 + $0x84c] sm:$0xf]  ;;  %v8727_v16 = vld [vmem:[#allocation7 + $0x918] sm:$0xf0]  ;;  %v12153_v34 = vld [vmem:[#allocation8] sm:$0xf] }
 0x46f   :  { %v4522_v8 = vadd.f32 %v4521_v49, %v4493_v11  ;;  %v4524_v9 = vpop.f32.mrf.mxu3  ;;  %v9915_v49 = vld [vmem:[#allocation7 + $0x92c] sm:$0xf]  ;;  %4832 = vmatpush.bf16.msrb.mxu2 %v8762_v3  ;;  %4773 = vmatpush.bf16.msra.mxu0 %v8522_v10  ;;  %v8506_v3 = vor.u32 %v9855_v1, %v8503_v18 }
 0x470   :  { %v4437_v17 = vpop.f32.mrf.mxu0  ;;  %v8746_v55 = vor.u32 %v9915_v49, %v8743_v14  ;;  %4802 = vmatpush.bf16.msra.mxu1 %v8650_v62  ;;  %v9939_v62 = vld [vmem:[#allocation7 + $0x9ec] sm:$0xf]  ;;  %v8839_v49 = vld [vmem:[#allocation7 + $0x9f8] sm:$0xf0] }
 0x471   :  { %v12147_v37 = vadd.f32 %v4522_v8, %v12923_v6  ;;  %v12924_v6 = vld [vmem:[#allocation42_spill] sm:$0xff]  ;;  %v9851_v14 = vld [vmem:[#allocation7 + $0x72c] sm:$0xf] }
 0x472   :  { %v4466_v41 = vpop.f32.mrf.mxu1 }
 0x473   :  { %v4467_v24 = vadd.f32 %v4466_v41, %v4437_v17  ;;  %4668 = vmatmul.bf16.gmra.mxu0 %v12007_v60  ;;  %4833 = vmatpush.bf16.msrb.mxu2 %v8746_v55  ;;  %v8631_v41 = vld [vmem:[#allocation7 + $0x858] sm:$0xf0]  ;;  %v8842_v55 = vor.u32 %v9939_v62, %v8839_v49 }
 0x474   :  { %v8634_v10 = vor.u32 %v9887_v42, %v8631_v41  ;;  %4774 = vmatpush.bf16.msra.mxu0 %v8506_v3  ;;  %v8711_v42 = vld [vmem:[#allocation7 + $0x8f8] sm:$0xf0] }
 0x475   :  { %v4496_v50 = vadd.f32 %v4495_v21, %v4467_v24  ;;  %4697 = vmatmul.bf16.gmra.mxu1 %v12015_v59  ;;  %v4497_v0 = vpop.f32.mrf.mxu2  ;;  %v9911_v21 = vld [vmem:[#allocation7 + $0x90c] sm:$0xf]  ;;  %4864 = vmatpush.bf16.msrb.mxu3 %v8842_v55  ;;  %v8599_v55 = vld [vmem:[#allocation7 + $0x818] sm:$0xf0] }
 0x476   :  { %4803 = vmatpush.bf16.msra.mxu1 %v8634_v10  ;;  %v9879_v10 = vld [vmem:[#allocation7 + $0x80c] sm:$0xf] }
 0x477   :  { %v4525_v54 = vadd.f32 %v4524_v9, %v4496_v50  ;;  %v4526_v11 = vpop.f32.mrf.mxu3  ;;  %v8730_v9 = vor.u32 %v9911_v21, %v8727_v16  ;;  %v8487_v50 = vld [vmem:[#allocation7 + $0x738] sm:$0xf0]  ;;  %v12158_v16 = vperm.slane %v12153_v34, 0 }
 0x478   :  { %v4439_v8 = vpop.f32.mrf.mxu0  ;;  %v8490_v57 = vor.u32 %v9851_v14, %v8487_v50  ;;  %v8695_v50 = vld [vmem:[#allocation7 + $0x8d8] sm:$0xf0] }
 0x479   :  { %v4895_v17 = vadd.f32 %v4525_v54, %v12924_v6  ;;  %v9883_v54 = vld [vmem:[#allocation7 + $0x82c] sm:$0xf]  ;;  %v8615_v6 = vld [vmem:[#allocation7 + $0x838] sm:$0xf0]  ;;  %4834 = vmatpush.bf16.msrb.mxu2 %v8730_v9 }
 0x47a   :  { %v4468_v48 = vpop.f32.mrf.mxu1  ;;  %4731 = vmatmul.bf16.gmra.mxu2 %v12029_v28  ;;  %v8618_v36 = vor.u32 %v9883_v54, %v8615_v6  ;;  %4775 = vmatpush.bf16.msra.mxu0 %v8490_v57  ;;  %v8602_v6 = vor.u32 %v9879_v10, %v8599_v55 }
 0x47b   :  { %v4469_v24 = vadd.f32 %v4468_v48, %v4439_v8  ;;  %v9907_v8 = vld [vmem:[#allocation7 + $0x8ec] sm:$0xf]  ;;  %v12162_v9 = vadd.f32 %v12158_v16, %v4895_v17 }
 0x47c   :  { %8878 = vmatmul.msk.bf16.gmra.mxu3 %vm2222_vm5, %v12037_v43  ;;  %v8714_v48 = vor.u32 %v9907_v8, %v8711_v42  ;;  %4804 = vmatpush.bf16.msra.mxu1 %v8618_v36  ;;  %v9843_v36 = vld [vmem:[#allocation7 + $0x6ec] sm:$0xf]  ;;  %v8455_v42 = vld [vmem:[#allocation7 + $0x6f8] sm:$0xf0] }
 0x47d   :  { %v4498_v1 = vadd.f32 %v4497_v0, %v4469_v24  ;;  %v4500_v18 = vpop.f32.mrf.mxu2  ;;  %v9847_v0 = vld [vmem:[#allocation7 + $0x70c] sm:$0xf]  ;;  %v8471_v24 = vld [vmem:[#allocation7 + $0x718] sm:$0xf0] }
 0x47e   :  { %4835 = vmatpush.bf16.msrb.mxu2 %v8714_v48  ;;  %v8474_v14 = vor.u32 %v9847_v0, %v8471_v24  ;;  %v9875_v48 = vld [vmem:[#allocation7 + $0x7ec] sm:$0xf]  ;;  %v8458_v24 = vor.u32 %v9843_v36, %v8455_v42 }
 0x47f   :  { %v4527_v41 = vadd.f32 %v4526_v11, %v4498_v1  ;;  %v4529_v21 = vpop.f32.mrf.mxu3  ;;  %v9903_v11 = vld [vmem:[#allocation7 + $0x8cc] sm:$0xf] }
 0x480   :  { %v4442_v3 = vpop.f32.mrf.mxu0  ;;  %v8698_v57 = vor.u32 %v9903_v11, %v8695_v50  ;;  %v9935_v1 = vld [vmem:[#allocation7 + $0x9cc] sm:$0xf]  ;;  %4776 = vmatpush.bf16.msra.mxu0 %v8474_v14  ;;  %4805 = vmatpush.bf16.msra.mxu1 %v8602_v6  ;;  %v8439_v50 = vld [vmem:[#allocation7 + $0x6d8] sm:$0xf0] }
 0x481   :  { %v4899_v62 = vadd.f32 %v4527_v41, %v11874_v38  ;;  %v8823_v38 = vld [vmem:[#allocation7 + $0x9d8] sm:$0xf0]  ;;  %v9839_v14 = vld [vmem:[#allocation7 + $0x6cc] sm:$0xf] }
 0x482   :  { %v4471_v49 = vpop.f32.mrf.mxu1  ;;  %v8826_v8 = vor.u32 %v9935_v1, %v8823_v38  ;;  %v8583_v41 = vld [vmem:[#allocation7 + $0x7f8] sm:$0xf0]  ;;  %4836 = vmatpush.bf16.msrb.mxu2 %v8698_v57  ;;  %v9871_v1 = vld [vmem:[#allocation7 + $0x7cc] sm:$0xf] }
 0x483   :  { %v4472_v54 = vadd.f32 %v4471_v49, %v4442_v3  ;;  %4673 = vmatmul.bf16.gmra.mxu0 %v12054_v46  ;;  %v8586_v3 = vor.u32 %v9875_v48, %v8583_v41  ;;  %v12168_v38 = vadd.f32 %v12158_v16, %v4899_v62  ;;  %v8567_v6 = vld [vmem:[#allocation7 + $0x7d8] sm:$0xf0] }
 0x484   :  { %4865 = vmatpush.bf16.msrb.mxu3 %v8826_v8  ;;  %4777 = vmatpush.bf16.msra.mxu0 %v8458_v24 }
 0x485   :  { %v4501_v17 = vadd.f32 %v4500_v18, %v4472_v54  ;;  %4702 = vmatmul.bf16.gmra.mxu1 %v12061_v35  ;;  %v4502_v0 = vpop.f32.mrf.mxu2  ;;  %v8442_v54 = vor.u32 %v9839_v14, %v8439_v50 }
 0x486   :  { %4806 = vmatpush.bf16.msra.mxu1 %v8586_v3 }
 0x487   :  { %v4530_v49 = vadd.f32 %v4529_v21, %v4501_v17  ;;  %v4531_v10 = vpop.f32.mrf.mxu3  ;;  %v8570_v21 = vor.u32 %v9871_v1, %v8567_v6 }
 0x488   :  { %v4444_v55 = vpop.f32.mrf.mxu0  ;;  %4778 = vmatpush.bf16.msra.mxu0 %v8442_v54 }
 0x489   :  { %v4903_v11 = vadd.f32 %v4530_v49, %v11879_v32 }
 0x48a   :  { %v4473_v18 = vpop.f32.mrf.mxu1  ;;  %8875 = vmatmul.msk.bf16.gmra.mxu2 %vm148_vm1, %v12019_v20  ;;  %4807 = vmatpush.bf16.msra.mxu1 %v8570_v21 }
 0x48b   :  { %v4474_v57 = vadd.f32 %v4473_v18, %v4444_v55  ;;  %v12176_v41 = vadd.f32 %v12158_v16, %v4903_v11 }
 0x48c   :  { %8879 = vmatmul.msk.bf16.gmra.mxu3 %vm2222_vm5, %v12072_v63 }
 0x48d   :  { %v4503_v32 = vadd.f32 %v4502_v0, %v4474_v57  ;;  %v4505_v36 = vpop.f32.mrf.mxu2 }
 0x48f   :  { %v4532_v8 = vadd.f32 %v4531_v10, %v4503_v32  ;;  %v4534_v42 = vpop.f32.mrf.mxu3 }
 0x490   :  { %v4447_v62 = vpop.f32.mrf.mxu0 }
 0x491   :  { %v4907_v48 = vadd.f32 %v4532_v8, %v11885_v39 }
 0x492   :  { %v4476_v17 = vpop.f32.mrf.mxu1 }
 0x493   :  { %v4477_v24 = vadd.f32 %v4476_v17, %v4447_v62  ;;  %8873 = vmatmul.msk.bf16.gmra.mxu0 %vm148_vm1, %v12042_v25  ;;  %v12184_v39 = vadd.f32 %v12158_v16, %v4907_v48  ;;  %v12196_v62 = vperm.slane %v12153_v34, 1 }
 0x495   :  { %v4506_v3 = vadd.f32 %v4505_v36, %v4477_v24  ;;  %8874 = vmatmul.msk.bf16.gmra.mxu1 %vm148_vm1, %v12045_v15  ;;  %v4507_v0 = vpop.f32.mrf.mxu2 }
 0x497   :  { %v4535_v49 = vadd.f32 %v4534_v42, %v4506_v3  ;;  %v4536_v55 = vpop.f32.mrf.mxu3 }
 0x498   :  { %v4449_v10 = vpop.f32.mrf.mxu0 }
 0x499   :  { %v4911_v14 = vadd.f32 %v4535_v49, %v11890_v19 }
 0x49a   :  { %v4478_v11 = vpop.f32.mrf.mxu1  ;;  %4837 = vmatmul.bf16.vlgmr.msrb.gmra.mxu2 %v11947_v44 }
 0x49b   :  { %v4479_v50 = vadd.f32 %v4478_v11, %v4449_v10  ;;  %v12191_v32 = vadd.f32 %v12158_v16, %v4911_v14 }
 0x49c   :  { %8883 = vmatmul.msk.bf16.vlgmr.msrb.gmra.mxu3 %vm2222_vm5, %v11954_v30 }
 0x49d   :  { %v4508_v1 = vadd.f32 %v4507_v0, %v4479_v50  ;;  %v4606_v18 = vpop.f32.mrf.mxu2 }
 0x49f   :  { %v4537_v54 = vadd.f32 %v4536_v55, %v4508_v1  ;;  %v4635_v6 = vpop.f32.mrf.mxu3 }
 0x4a0   :  { %v4548_v57 = vpop.f32.mrf.mxu0 }
 0x4a1   :  { %v4915_v21 = vadd.f32 %v4537_v54, %v11898_v23  ;;  %v12201_v23 = vadd.f32 %v12158_v16, %v12141_v5 }
 0x4a2   :  { %v4577_v19 = vpop.f32.mrf.mxu1 }
 0x4a3   :  { %v4578_v36 = vadd.f32 %v4577_v19, %v4548_v57  ;;  %4779 = vmatmul.bf16.vlgmr.msra.gmra.mxu0 %v11967_v45  ;;  %v12204_v24 = vadd.f32 %v12158_v16, %v4915_v21 }
 0x4a5   :  { %v4607_v8 = vadd.f32 %v4606_v18, %v4578_v36  ;;  %4808 = vmatmul.bf16.vlgmr.msra.gmra.mxu1 %v11974_v56  ;;  %v4608_v44 = vpop.f32.mrf.mxu2 }
 0x4a7   :  { %v4636_v42 = vadd.f32 %v4635_v6, %v4607_v8  ;;  %v4637_v30 = vpop.f32.mrf.mxu3 }
 0x4a8   :  { %v4550_v48 = vpop.f32.mrf.mxu0 }
 0x4a9   :  { %v4888_v17 = vadd.f32 %v4636_v42, %v11907_v12  ;;  %v4961_v12 = vmax.f32 %v12201_v23, 0.0 }
 0x4aa   :  { %v4579_v45 = vpop.f32.mrf.mxu1  ;;  %4842 = vmatmul.bf16.gmra.mxu2 %v11985_v2 }
 0x4ab   :  { %v4580_v56 = vadd.f32 %v4579_v45, %v4550_v48  ;;  %v12208_v3 = vadd.f32 %v12196_v62, %v4888_v17 }
 0x4ac   :  { %8884 = vmatmul.msk.bf16.gmra.mxu3 %vm2222_vm5, %v11993_v29  ;;  %v12222_v29 = vadd.f32 %v12158_v16, %v12147_v37 }
 0x4ad   :  { %v4609_v0 = vadd.f32 %v4608_v44, %v4580_v56  ;;  %v4611_v49 = vpop.f32.mrf.mxu2  ;;  %v4962_v5 = vmax.f32 %v12208_v3, 0.0 }
 0x4af   :  { %v4638_v55 = vadd.f32 %v4637_v30, %v4609_v0  ;;  %v4640_v10 = vpop.f32.mrf.mxu3  ;;  %v10236_v2 = vpack.i.bf16 %v4962_v5, %v4961_v12 }
 0x4b0   :  { %v4553_v14 = vpop.f32.mrf.mxu0 }
 0x4b1   :  { %v4892_v11 = vadd.f32 %v4638_v55, %v11913_v27  ;;  %10237 = vrot.lane.b32.xlu0 %v10236_v2, %s10503_s22  ;;  %v4965_v27 = vmax.f32 %v12222_v29, 0.0 }
 0x4b2   :  { %v4582_v50 = vpop.f32.mrf.mxu1 }
 0x4b3   :  { %v4583_v1 = vadd.f32 %v4582_v50, %v4553_v14  ;;  %4784 = vmatmul.bf16.gmra.mxu0 %v12007_v60  ;;  %v12226_v18 = vadd.f32 %v12196_v62, %v4892_v11 }
 0x4b5   :  { %v4612_v54 = vadd.f32 %v4611_v49, %v4583_v1  ;;  %4813 = vmatmul.bf16.gmra.mxu1 %v12015_v59  ;;  %v4613_v6 = vpop.f32.mrf.mxu2  ;;  %v12797_v57 = vmax.f32 %v12226_v18, 0.0 }
 0x4b7   :  { %v4641_v21 = vadd.f32 %v4640_v10, %v4612_v54  ;;  %v4642_v19 = vpop.f32.mrf.mxu3  ;;  %v10256_v37 = vpack.i.bf16 %v12797_v57, %v4965_v27  ;;  %v9948_v57 = vld [vmem:[#allocation10 + $0x10] sm:$0xff] }
 0x4b8   :  { %v4555_v16 = vpop.f32.mrf.mxu0 }
 0x4b9   :  { %v4896_v60 = vadd.f32 %v4641_v21, %v11918_v22  ;;  %10257 = vrot.lane.b32.xlu0 %v10256_v37, %s10503_s22 }
 0x4ba   :  { %v4584_v36 = vpop.f32.mrf.mxu1  ;;  %4847 = vmatmul.bf16.gmra.mxu2 %v12029_v28 }
 0x4bb   :  { %v4585_v59 = vadd.f32 %v4584_v36, %v4555_v16  ;;  %v12241_v17 = vadd.f32 %v12196_v62, %v4896_v60 }
 0x4bc   :  { %8885 = vmatmul.msk.bf16.gmra.mxu3 %vm2222_vm5, %v12037_v43 }
 0x4bd   :  { %v4614_v8 = vadd.f32 %v4613_v6, %v4585_v59  ;;  %v4616_v44 = vpop.f32.mrf.mxu2 }
 0x4bf   :  { %v4645_v42 = vpop.f32.mrf.mxu3  ;;  %v4643_v48 = vadd.f32 %v4642_v19, %v4614_v8 }
 0x4c0   :  { %v4558_v30 = vpop.f32.mrf.mxu0 }
 0x4c1   :  { %v4900_v22 = vadd.f32 %v4643_v48, %v11924_v51 }
 0x4c2   :  { %v4587_v45 = vpop.f32.mrf.mxu1 }
 0x4c3   :  { %v4588_v56 = vadd.f32 %v4587_v45, %v4558_v30  ;;  %4789 = vmatmul.bf16.gmra.mxu0 %v12054_v46  ;;  %v12248_v2 = vadd.f32 %v12196_v62, %v4900_v22 }
 0x4c5   :  { %v4617_v0 = vadd.f32 %v4616_v44, %v4588_v56  ;;  %4818 = vmatmul.bf16.gmra.mxu1 %v12061_v35  ;;  %v4618_v28 = vpop.f32.mrf.mxu2 }
 0x4c7   :  { %v4646_v49 = vadd.f32 %v4645_v42, %v4617_v0  ;;  %v4647_v43 = vpop.f32.mrf.mxu3 }
 0x4c8   :  { %v4560_v55 = vpop.f32.mrf.mxu0 }
 0x4c9   :  { %v4904_v10 = vadd.f32 %v4646_v49, %v11929_v47 }
 0x4ca   :  { %v4589_v14 = vpop.f32.mrf.mxu1  ;;  %8882 = vmatmul.msk.bf16.gmra.mxu2 %vm148_vm1, %v12019_v20 }
 0x4cb   :  { %v4590_v11 = vadd.f32 %v4589_v14, %v4560_v55  ;;  %v12255_v54 = vadd.f32 %v12196_v62, %v4904_v10 }
 0x4cc   :  { %8886 = vmatmul.msk.bf16.gmra.mxu3 %vm2222_vm5, %v12072_v63 }
 0x4cd   :  { %v4619_v51 = vadd.f32 %v4618_v28, %v4590_v11  ;;  %v4621_v46 = vpop.f32.mrf.mxu2 }
 0x4cf   :  { %v4650_v35 = vpop.f32.mrf.mxu3  ;;  %v4648_v1 = vadd.f32 %v4647_v43, %v4619_v51 }
 0x4d0   :  { %v4563_v50 = vpop.f32.mrf.mxu0 }
 0x4d1   :  { %v4908_v21 = vadd.f32 %v4648_v1, %v11935_v26 }
 0x4d2   :  { %v4592_v47 = vpop.f32.mrf.mxu1 }
 0x4d3   :  { %v4593_v6 = vadd.f32 %v4592_v47, %v4563_v50  ;;  %8880 = vmatmul.msk.bf16.gmra.mxu0 %vm148_vm1, %v12042_v25  ;;  %v12264_v36 = vadd.f32 %v12196_v62, %v4908_v21 }
 0x4d5   :  { %v4622_v20 = vadd.f32 %v4621_v46, %v4593_v6  ;;  %8881 = vmatmul.msk.bf16.gmra.mxu1 %vm148_vm1, %v12045_v15  ;;  %v4623_v63 = vpop.f32.mrf.mxu2 }
 0x4d7   :  { %v4651_v19 = vadd.f32 %v4650_v35, %v4622_v20  ;;  %v4652_v37 = vpop.f32.mrf.mxu3 }
 0x4d8   :  { %v4565_v16 = vpop.f32.mrf.mxu0 }
 0x4d9   :  { %v4912_v60 = vadd.f32 %v4651_v19, %v11941_v61  ;;  %v12283_v19 = vperm.slane %v12153_v34, 2 }
 0x4da   :  { %v4594_v59 = vpop.f32.mrf.mxu1 }
 0x4db   :  { %v4595_v8 = vadd.f32 %v4594_v59, %v4565_v16  ;;  %v12267_v48 = vadd.f32 %v12196_v62, %v4912_v60 }
 0x4dd   :  { %v4624_v44 = vadd.f32 %v4623_v63, %v4595_v8  ;;  %v4722_v42 = vpop.f32.mrf.mxu2 }
 0x4df   :  { %v4751_v25 = vpop.f32.mrf.mxu3  ;;  %v4653_v26 = vadd.f32 %v4652_v37, %v4624_v44 }
 0x4e0   :  { %v4664_v30 = vpop.f32.mrf.mxu0 }
 0x4e1   :  { %v4916_v45 = vadd.f32 %v4653_v26, %v11961_v58 }
 0x4e2   :  { %v4693_v15 = vpop.f32.mrf.mxu1 }
 0x4e3   :  { %v12277_v0 = vadd.f32 %v12196_v62, %v4916_v45  ;;  %v4694_v50 = vadd.f32 %v4693_v15, %v4664_v30 }
 0x4e5   :  { %v12270_v56 = vpop.f32.mrf.mxu2  ;;  %v4723_v21 = vadd.f32 %v4722_v42, %v4694_v50 }
 0x4e7   :  { %v12272_v22 = vpop.f32.mrf.mxu3  ;;  %v4752_v16 = vadd.f32 %v4751_v25, %v4723_v21 }
 0x4e8   :  { %v12274_v61 = vpop.f32.mrf.mxu0 }
 0x4e9   :  { %v4889_v30 = vadd.f32 %v4752_v16, %v11979_v33 }
 0x4ea   :  { %v12279_v28 = vpop.f32.mrf.mxu1 }
 0x4ed   :  { %v4727_v49 = vpop.f32.mrf.mxu2 }
 0x4ef   :  { %v4756_v43 = vpop.f32.mrf.mxu3 }
 0x4f0   :  { %v4669_v55 = vpop.f32.mrf.mxu0 }
 0x4f2   :  { %v4698_v10 = vpop.f32.mrf.mxu1 }
 0x4f3   :  { %v4699_v14 = vadd.f32 %v4698_v10, %v4669_v55  ;;  %v12292_v55 = vadd.f32 %v12283_v19, %v4889_v30 }
 0x4f5   :  { %v4728_v11 = vadd.f32 %v4727_v49, %v4699_v14  ;;  %v4729_v51 = vpop.f32.mrf.mxu2 }
 0x4f7   :  { %v4757_v46 = vadd.f32 %v4756_v43, %v4728_v11  ;;  %v4758_v58 = vpop.f32.mrf.mxu3 }
 0x4f8   :  { %v4671_v35 = vpop.f32.mrf.mxu0 }
 0x4f9   :  { %v4897_v1 = vadd.f32 %v4757_v46, %v12022_v7 }
 0x4fa   :  { %v4700_v47 = vpop.f32.mrf.mxu1 }
 0x4fb   :  { %v4701_v6 = vadd.f32 %v4700_v47, %v4671_v35  ;;  %v12286_v59 = vadd.f32 %v12283_v19, %v4897_v1 }
 0x4fd   :  { %v4730_v62 = vadd.f32 %v4729_v51, %v4701_v6  ;;  %v4732_v20 = vpop.f32.mrf.mxu2  ;;  %v4963_v51 = vmax.f32 %v12292_v55, 0.0  ;;  %v12799_v6 = vmax.f32 %v12264_v36, 0.0  ;;  %v9964_v55 = vld [vmem:[#allocation10 + $0x90] sm:$0xff] }
 0x4ff   :  { %v4761_v63 = vpop.f32.mrf.mxu3  ;;  %v4759_v60 = vadd.f32 %v4758_v58, %v4730_v62 }
 0x500   :  { %v4674_v37 = vpop.f32.mrf.mxu0 }
 0x501   :  { %v4901_v7 = vadd.f32 %v4759_v60, %v12047_v53 }
 0x502   :  { %v4703_v8 = vpop.f32.mrf.mxu1 }
 0x503   :  { %v4704_v44 = vadd.f32 %v4703_v8, %v4674_v37  ;;  %v12295_v25 = vadd.f32 %v12283_v19, %v4901_v7 }
 0x505   :  { %v4733_v26 = vadd.f32 %v4732_v20, %v4704_v44  ;;  %v4734_v42 = vpop.f32.mrf.mxu2 }
 0x507   :  { %v4762_v15 = vadd.f32 %v4761_v63, %v4733_v26  ;;  %v4763_v45 = vpop.f32.mrf.mxu3  ;;  %v4981_v63 = vmax.f32 %v12184_v39, 0.0 }
 0x508   :  { %v4676_v49 = vpop.f32.mrf.mxu0 }
 0x509   :  { %v4905_v43 = vadd.f32 %v4762_v15, %v12064_v31  ;;  %v10251_v60 = vpack.i.bf16 %v12799_v6, %v4981_v63  ;;  %v9956_v6 = vld [vmem:[#allocation10 + $0x50] sm:$0xff] }
 0x50a   :  { %v4705_v10 = vpop.f32.mrf.mxu1 }
 0x50b   :  { %v4706_v14 = vadd.f32 %v4705_v10, %v4676_v49  ;;  %v12298_v11 = vadd.f32 %v12283_v19, %v4905_v43  ;;  %v4696_v43 = vadd.f32 %v12279_v28, %v12274_v61 }
 0x50d   :  { %v4735_v33 = vadd.f32 %v4734_v42, %v4706_v14  ;;  %v4737_v53 = vpop.f32.mrf.mxu2  ;;  %v4979_v46 = vmax.f32 %v12298_v11, 0.0 }
 0x50f   :  { %v4766_v58 = vpop.f32.mrf.mxu3  ;;  %v10231_v31 = vpack.i.bf16 %v4979_v46, %v4963_v51  ;;  %v4764_v50 = vadd.f32 %v4763_v45, %v4735_v33  ;;  %v4725_v33 = vadd.f32 %v12270_v56, %v4696_v43 }
 0x510   :  { %v4679_v35 = vpop.f32.mrf.mxu0 }
 0x511   :  { %10232 = vrot.lane.b32.xlu2 %v10231_v31, %s10503_s22  ;;  %v4909_v21 = vadd.f32 %v4764_v50, %v12076_v52 }
 0x512   :  { %v4708_v1 = vpop.f32.mrf.mxu1 }
 0x513   :  { %v4709_v47 = vadd.f32 %v4708_v1, %v4679_v35  ;;  %v12317_v30 = vadd.f32 %v12283_v19, %v4909_v21  ;;  %v4754_v35 = vadd.f32 %v12272_v22, %v4725_v33 }
 0x515   :  { %v4738_v62 = vadd.f32 %v4737_v53, %v4709_v47  ;;  %v4739_v20 = vpop.f32.mrf.mxu2  ;;  %v4893_v61 = vadd.f32 %v4754_v35, %v11999_v13 }
 0x517   :  { %v4767_v37 = vadd.f32 %v4766_v58, %v4738_v62  ;;  %v4768_v16 = vpop.f32.mrf.mxu3  ;;  %v12338_v22 = vadd.f32 %v12283_v19, %v4893_v61 }
 0x518   :  { %v4681_v8 = vpop.f32.mrf.mxu0 }
 0x519   :  { %v4913_v44 = vadd.f32 %v4767_v37, %v12083_v4  ;;  %10252 = vrot.lane.b32.xlu2 %v10251_v60, %s10503_s22  ;;  %v12925_v37 = vld [vmem:[#allocation21_spill] sm:$0xff]  ;;  %v12796_v13 = vmax.f32 %v12338_v22, 0.0 }
 0x51a   :  { %v4710_v52 = vpop.f32.mrf.mxu1 }
 0x51b   :  { %v4711_v7 = vadd.f32 %v4710_v52, %v4681_v8  ;;  %v12323_v14 = vadd.f32 %v12283_v19, %v4913_v44 }
 0x51d   :  { %v4740_v26 = vadd.f32 %v4739_v20, %v4711_v7  ;;  %v4838_v42 = vpop.f32.mrf.mxu2 }
 0x51f   :  { %v4769_v15 = vadd.f32 %v4768_v16, %v4740_v26  ;;  %v4867_v45 = vpop.f32.mrf.mxu3  ;;  %v12335_v16 = vperm.slane %v12153_v34, 3 }
 0x520   :  { %v4780_v49 = vpop.f32.mrf.mxu0 }
 0x521   :  { %v4917_v10 = vadd.f32 %v4769_v15, %v12089_v40 }
 0x522   :  { %v4809_v4 = vpop.f32.mrf.mxu1 }
 0x523   :  { %v12328_v50 = vadd.f32 %v12283_v19, %v4917_v10  ;;  %v4810_v15 = vadd.f32 %v4809_v4, %v4780_v49  ;;  %v12794_v10 = vmax.f32 %v12267_v48, 0.0 }
 0x525   :  { %v4840_v53 = vpop.f32.mrf.mxu2  ;;  %v4839_v33 = vadd.f32 %v4838_v42, %v4810_v15  ;;  %v12926_v42 = vld [vmem:[#allocation28_spill] sm:$0xff] }
 0x527   :  { %v4869_v58 = vpop.f32.mrf.mxu3  ;;  %v4868_v61 = vadd.f32 %v4867_v45, %v4839_v33 }
 0x528   :  { %v4782_v31 = vpop.f32.mrf.mxu0 }
 0x52a   :  { %v4811_v1 = vpop.f32.mrf.mxu1 }
 0x52b   :  { %v4812_v47 = vadd.f32 %v4811_v1, %v4782_v31 }
 0x52d   :  { %v4841_v28 = vadd.f32 %v4840_v53, %v4812_v47  ;;  %v4843_v40 = vpop.f32.mrf.mxu2 }
 0x52f   :  { %v4870_v21 = vadd.f32 %v4869_v58, %v4841_v28  ;;  %v12331_v62 = vpop.f32.mrf.mxu3  ;;  %v12793_v58 = vmax.f32 %v12241_v17, 0.0 }
 0x530   :  { %v4785_v20 = vpop.f32.mrf.mxu0 }
 0x531   :  { %v4894_v56 = vadd.f32 %v4870_v21, %v12925_v37  ;;  %v10276_v35 = vpack.i.bf16 %v12793_v58, %v12794_v10  ;;  %v12780_v21 = vmax.f32 %v12248_v2, 0.0  ;;  %v4890_v37 = vadd.f32 %v4868_v61, %v12926_v42  ;;  %v9988_v58 = vld [vmem:[#allocation10 + $0x150] sm:$0xff] }
 0x532   :  { %v4814_v60 = vpop.f32.mrf.mxu1 }
 0x533   :  { %v12341_v8 = vadd.f32 %v12335_v16, %v4894_v56  ;;  %v12927_v56 = vld [vmem:[#allocation29_spill] sm:$0xff]  ;;  %v4815_v42 = vadd.f32 %v4814_v60, %v4785_v20  ;;  %v4977_v20 = vmax.f32 %v12176_v41, 0.0 }
 0x535   :  { %v4845_v44 = vpop.f32.mrf.mxu2  ;;  %v12800_v52 = vmax.f32 %v12341_v8, 0.0 }
 0x537   :  { %v4874_v7 = vpop.f32.mrf.mxu3  ;;  %v10266_v26 = vpack.i.bf16 %v12796_v13, %v12800_v52  ;;  %v9970_v13 = vld [vmem:[#allocation10 + $0xc0] sm:$0xff]  ;;  %v9955_v52 = vld [vmem:[#allocation10 + $0x48] sm:$0xff] }
 0x538   :  { %v4787_v34 = vpop.f32.mrf.mxu0 }
 0x539   :  { %10267 = vrot.lane.b32.xlu2 %v10266_v26, %s10503_s22 }
 0x53a   :  { %v4816_v19 = vpop.f32.mrf.mxu1 }
 0x53b   :  { %v4817_v43 = vadd.f32 %v4816_v19, %v4787_v34  ;;  %v12781_v34 = vmax.f32 %v12168_v38, 0.0 }
 0x53d   :  { %v4846_v53 = vadd.f32 %v4845_v44, %v4817_v43  ;;  %v4848_v31 = vpop.f32.mrf.mxu2  ;;  %v10296_v45 = vpack.i.bf16 %v12780_v21, %v12781_v34  ;;  %v12928_v43 = vld [vmem:[#allocation31_spill] sm:$0xff]  ;;  %v12798_v21 = vmax.f32 %v12317_v30, 0.0  ;;  %v12786_v34 = vmax.f32 %v12328_v50, 0.0 }
 0x53f   :  { %v4877_v1 = vpop.f32.mrf.mxu3  ;;  %v4875_v49 = vadd.f32 %v4874_v7, %v4846_v53  ;;  %v12368_v53 = vadd.f32 %v12335_v16, %v4890_v37 }
 0x540   :  { %v4790_v47 = vpop.f32.mrf.mxu0 }
 0x541   :  { %10277 = vrot.lane.b32.xlu2 %v10276_v35, %s10503_s22  ;;  %v4902_v44 = vadd.f32 %v4875_v49, %v12927_v56 }
 0x542   :  { %v4819_v4 = vpop.f32.mrf.mxu1 }
 0x543   :  { %v4820_v28 = vadd.f32 %v4819_v4, %v4790_v47  ;;  %v12371_v35 = vadd.f32 %v12335_v16, %v4902_v44  ;;  %v4964_v4 = vmax.f32 %v12368_v53, 0.0 }
 0x545   :  { %v4849_v26 = vadd.f32 %v4848_v31, %v4820_v28  ;;  %v4850_v7 = vpop.f32.mrf.mxu2 }
 0x547   :  { %v4878_v15 = vadd.f32 %v4877_v1, %v4849_v26  ;;  %v4879_v31 = vpop.f32.mrf.mxu3 }
 0x548   :  { %v4792_v19 = vpop.f32.mrf.mxu0 }
 0x549   :  { %v4906_v33 = vadd.f32 %v4878_v15, %v12928_v43  ;;  %10297 = vrot.lane.b32.xlu2 %v10296_v45, %s10503_s22  ;;  %v4844_v45 = vadd.f32 %v4843_v40, %v4815_v42  ;;  %v12930_v42 = vld [vmem:[#allocation26_spill] sm:$0xff] }
 0x54a   :  { %v4821_v47 = vpop.f32.mrf.mxu1 }
 0x54b   :  { %v4822_v1 = vadd.f32 %v4821_v47, %v4792_v19  ;;  %v12374_v61 = vadd.f32 %v12335_v16, %v4906_v33  ;;  %v12929_v19 = vld [vmem:[#allocation19_spill] sm:$0xff]  ;;  %v4978_v33 = vmax.f32 %v12255_v54, 0.0  ;;  %v4873_v60 = vadd.f32 %v12331_v62, %v4844_v45 }
 0x54c   :  { %v10004_v54 = vld [vmem:[#allocation10 + $0x1d0] sm:$0xff] }
 0x54d   :  { %v4851_v49 = vadd.f32 %v4850_v7, %v4822_v1  ;;  %v4980_v28 = vmax.f32 %v12374_v61, 0.0  ;;  %v4853_v26 = vpop.f32.mrf.mxu2 }
 0x54f   :  { %v4880_v56 = vadd.f32 %v4879_v31, %v4851_v49  ;;  %v10241_v37 = vpack.i.bf16 %v4980_v28, %v4964_v4  ;;  %v4882_v47 = vpop.f32.mrf.mxu3  ;;  %v10246_v49 = vpack.i.bf16 %v4978_v33, %v4977_v20 }
 0x550   :  { %v4795_v44 = vpop.f32.mrf.mxu0 }
 0x551   :  { %10242 = vrot.lane.b32.xlu1 %v10241_v37, %s10503_s22  ;;  %v4910_v43 = vadd.f32 %v4880_v56, %v12929_v19 }
 0x552   :  { %v4824_v15 = vpop.f32.mrf.mxu1 }
 0x553   :  { %v4825_v7 = vadd.f32 %v4824_v15, %v4795_v44  ;;  %v12392_v37 = vadd.f32 %v12335_v16, %v4910_v43 }
 0x555   :  { %v4854_v1 = vadd.f32 %v4853_v26, %v4825_v7  ;;  %v12931_v26 = vld [vmem:[#allocation23_spill] sm:$0xff]  ;;  %v12801_v45 = vmax.f32 %v12392_v37, 0.0  ;;  %v4855_v7 = vpop.f32.mrf.mxu2 }
 0x556   :  { %v4898_v15 = vadd.f32 %v4873_v60, %v12931_v26 }
 0x557   :  { %v4883_v31 = vadd.f32 %v4882_v47, %v4854_v1  ;;  %v12790_v1 = vmax.f32 %v12323_v14, 0.0 }
 0x558   :  { %v4797_v40 = vpop.f32.mrf.mxu0 }
 0x559   :  { %v4914_v56 = vadd.f32 %v4883_v31, %v12930_v42  ;;  %10247 = vrot.lane.b32.xlu1 %v10246_v49, %s10503_s22  ;;  %v4884_v31 = vpop.f32.mrf.mxu3  ;;  %v10261_v49 = vpack.i.bf16 %v12798_v21, %v12801_v45 }
 0x55a   :  { %v4826_v44 = vpop.f32.mrf.mxu1 }
 0x55b   :  { %v4827_v19 = vadd.f32 %v4826_v44, %v4797_v40  ;;  %v12398_v62 = vadd.f32 %v12335_v16, %v4914_v56  ;;  %v12413_v40 = vadd.f32 %v12335_v16, %v4898_v15  ;;  %v12932_v56 = vld [vmem:[#allocation24_spill] sm:$0xff] }
 0x55d   :  { %v4856_v47 = vadd.f32 %v4855_v7, %v4827_v19  ;;  %v12785_v43 = vmax.f32 %v12398_v62, 0.0  ;;  %v12782_v26 = vmax.f32 %v12413_v40, 0.0  ;;  %v12795_v19 = vmax.f32 %v12191_v32, 0.0 }
 0x55e   :  { %v12788_v7 = vmax.f32 %v12286_v59, 0.0 }
 0x55f   :  { %v4885_v42 = vadd.f32 %v4884_v31, %v4856_v47  ;;  %v10281_v60 = vpack.i.bf16 %v12785_v43, %v12790_v1  ;;  %v12789_v47 = vmax.f32 %v12162_v9, 0.0  ;;  %v9995_v43 = vld [vmem:[#allocation10 + $0x188] sm:$0xff]  ;;  %v9993_v1 = vld [vmem:[#allocation10 + $0x178] sm:$0xff] }
 0x560   :  { %v10271_v15 = vpack.i.bf16 %v12782_v26, %v12788_v7  ;;  %5545 = vmatpush.bf16.msra.mxu2 %v9995_v43  ;;  %v9977_v7 = vld [vmem:[#allocation10 + $0xf8] sm:$0xff]  ;;  %v9991_v43 = vld [vmem:[#allocation10 + $0x168] sm:$0xff] }
 0x561   :  { %10282 = vrot.lane.b32.xlu0 %v10281_v60, %s10503_s22  ;;  %10262 = vrot.lane.b32.xlu1 %v10261_v49, %s10503_s22  ;;  %v4918_v44 = vadd.f32 %v4885_v42, %v12932_v56  ;;  %v10286_v31 = vpack.i.bf16 %v12789_v47, %v12795_v19  ;;  %v12783_v60 = vmax.f32 %v12277_v0, 0.0  ;;  %v12784_v56 = vmax.f32 %v12204_v24, 0.0  ;;  %v9985_v47 = vld [vmem:[#allocation10 + $0x138] sm:$0xff] }
 0x563   :  { %v12431_v42 = vadd.f32 %v12335_v16, %v4918_v44  ;;  %v10291_v26 = vpack.i.bf16 %v12783_v60, %v12784_v56  ;;  %v12792_v44 = vmax.f32 %v12371_v35, 0.0  ;;  %v9979_v60 = vld [vmem:[#allocation10 + $0x108] sm:$0xff] }
 0x564   :  { %v9987_v56 = vld [vmem:[#allocation10 + $0x148] sm:$0xff]  ;;  %5519 = vmatpush.bf16.msrb.mxu0 %v9979_v60 }
 0x565   :  { %v12787_v49 = vmax.f32 %v12431_v42, 0.0  ;;  %5532 = vmatpush.bf16.msrb.mxu1 %v9987_v56  ;;  %v9975_v60 = vld [vmem:[#allocation10 + $0xe8] sm:$0xff] }
 0x566   :  { %v9983_v56 = vld [vmem:[#allocation10 + $0x128] sm:$0xff] }
 0x567   :  { %v10301_v16 = vpack.i.bf16 %v12786_v34, %v12787_v49  ;;  %v9978_v34 = vld [vmem:[#allocation10 + $0x100] sm:$0xff]  ;;  %v9997_v49 = vld [vmem:[#allocation10 + $0x198] sm:$0xff] }
 0x568   :  { %5520 = vmatpush.bf16.msrb.mxu0 %v9978_v34  ;;  %5564 = vmatpush.bf16.msra.mxu3 %v9997_v49  ;;  %v9974_v34 = vld [vmem:[#allocation10 + $0xe0] sm:$0xff]  ;;  %v9989_v49 = vld [vmem:[#allocation10 + $0x158] sm:$0xff] }
 0x569   :  { %10272 = vrot.lane.b32.xlu1 %v10271_v15, %s10503_s22  ;;  %10287 = vrot.lane.b32.xlu0 %v10286_v31, %s10503_s22  ;;  %v12791_v15 = vmax.f32 %v12295_v25, 0.0 }
 0x56b   :  { %v10306_v31 = vpack.i.bf16 %v12791_v15, %v12792_v44  ;;  %v9984_v15 = vld [vmem:[#allocation10 + $0x130] sm:$0xff] }
 0x56c   :  { %5521 = vmatpush.bf16.msrb.mxu0 %v9977_v7  ;;  %v9992_v44 = vld [vmem:[#allocation10 + $0x170] sm:$0xff]  ;;  %v9973_v7 = vld [vmem:[#allocation10 + $0xd8] sm:$0xff] }
 0x571   :  { %10292 = vrot.lane.b32.xlu1 %v10291_v26, %s10503_s22  ;;  %10302 = vrot.lane.b32.xlu0 %v10301_v16, %s10503_s22  ;;  %v9986_v26 = vld [vmem:[#allocation10 + $0x140] sm:$0xff] }
 0x572   :  { %v9994_v16 = vld [vmem:[#allocation10 + $0x180] sm:$0xff]  ;;  %5533 = vmatpush.bf16.msrb.mxu1 %v9986_v26 }
 0x573   :  { %5546 = vmatpush.bf16.msra.mxu2 %v9994_v16  ;;  %v9982_v26 = vld [vmem:[#allocation10 + $0x120] sm:$0xff] }
 0x574   :  { %v9990_v16 = vld [vmem:[#allocation10 + $0x160] sm:$0xff] }
 0x576   :  { %5534 = vmatpush.bf16.msrb.mxu1 %v9985_v47  ;;  %v9981_v47 = vld [vmem:[#allocation10 + $0x118] sm:$0xff] }
 0x577   :  { %5547 = vmatpush.bf16.msra.mxu2 %v9993_v1  ;;  %v9972_v1 = vld [vmem:[#allocation10 + $0xd0] sm:$0xff] }
 0x579   :  { %10307 = vrot.lane.b32.xlu1 %v10306_v31, %s10503_s22  ;;  %v9976_v31 = vld [vmem:[#allocation10 + $0xf0] sm:$0xff] }
 0x57a   :  { %5522 = vmatpush.bf16.msrb.mxu0 %v9976_v31  ;;  %5535 = vmatpush.bf16.msrb.mxu1 %v9984_v15  ;;  %v9980_v15 = vld [vmem:[#allocation10 + $0x110] sm:$0xff]  ;;  %v9953_v31 = vld [vmem:[#allocation10 + $0x38] sm:$0xff] }
 0x57b   :  { %5548 = vmatpush.bf16.msra.mxu2 %v9992_v44  ;;  %v9961_v44 = vld [vmem:[#allocation10 + $0x78] sm:$0xff] }
 0x57e   :  { %5523 = vmatpush.bf16.msrb.mxu0 %v9975_v60  ;;  %5536 = vmatpush.bf16.msrb.mxu1 %v9983_v56  ;;  %v9969_v60 = vld [vmem:[#allocation10 + $0xb8] sm:$0xff]  ;;  %v9952_v56 = vld [vmem:[#allocation10 + $0x30] sm:$0xff] }
 0x57f   :  { %5549 = vmatpush.bf16.msra.mxu2 %v9991_v43  ;;  %v9960_v43 = vld [vmem:[#allocation10 + $0x70] sm:$0xff] }
 0x582   :  { %5524 = vmatpush.bf16.msrb.mxu0 %v9974_v34  ;;  %5537 = vmatpush.bf16.msrb.mxu1 %v9982_v26  ;;  %v9968_v34 = vld [vmem:[#allocation10 + $0xb0] sm:$0xff]  ;;  %v9951_v26 = vld [vmem:[#allocation10 + $0x28] sm:$0xff] }
 0x583   :  { %5550 = vmatpush.bf16.msra.mxu2 %v9990_v16  ;;  %v9959_v16 = vld [vmem:[#allocation10 + $0x68] sm:$0xff] }
 0x586   :  { %5525 = vmatpush.bf16.msrb.mxu0 %v9973_v7  ;;  %5538 = vmatpush.bf16.msrb.mxu1 %v9981_v47  ;;  %v9967_v7 = vld [vmem:[#allocation10 + $0xa8] sm:$0xff]  ;;  %v9950_v47 = vld [vmem:[#allocation10 + $0x20] sm:$0xff] }
 0x587   :  { %5551 = vmatpush.bf16.msra.mxu2 %v9989_v49  ;;  %v9958_v49 = vld [vmem:[#allocation10 + $0x60] sm:$0xff] }
 0x58a   :  { %5526 = vmatpush.bf16.msrb.mxu0 %v9972_v1  ;;  %5539 = vmatpush.bf16.msrb.mxu1 %v9980_v15  ;;  %v9996_v1 = vld [vmem:[#allocation10 + $0x190] sm:$0xff]  ;;  %v9971_v15 = vld [vmem:[#allocation10 + $0xc8] sm:$0xff] }
 0x58b   :  { %5552 = vmatpush.bf16.msra.mxu2 %v9988_v58  ;;  %v9966_v58 = vld [vmem:[#allocation10 + $0xa0] sm:$0xff]  ;;  %5565 = vmatpush.bf16.msra.mxu3 %v9996_v1 }
 0x58e   :  { %5745 = vmatpush.bf16.msra.mxu0 %v9953_v31  ;;  %5758 = vmatpush.bf16.msra.mxu1 %v9961_v44  ;;  %v9949_v31 = vld [vmem:[#allocation10 + $0x18] sm:$0xff] }
 0x58f   :  { %5771 = vmatpush.bf16.msrb.mxu2 %v9969_v60  ;;  %v9957_v44 = vld [vmem:[#allocation10 + $0x58] sm:$0xff]  ;;  %5790 = vmatpush.bf16.msrb.mxu3 %v9971_v15  ;;  %v12456_v60 = vpop.permute.xlu2 %10232 }
 0x592   :  { %5746 = vmatpush.bf16.msra.mxu0 %v9952_v56  ;;  %5759 = vmatpush.bf16.msra.mxu1 %v9960_v43  ;;  %v10238_v43 = vpop.permute.xlu0 %10237 }
 0x593   :  { %5772 = vmatpush.bf16.msrb.mxu2 %v9968_v34  ;;  %v10235_v34 = vunpack.i.h.bf16 %v12456_v60  ;;  %5791 = vmatpush.bf16.msrb.mxu3 %v9970_v13 }
 0x596   :  { %5747 = vmatpush.bf16.msra.mxu0 %v9951_v26  ;;  %5760 = vmatpush.bf16.msra.mxu1 %v9959_v16  ;;  %v10234_v26 = vunpack.i.l.bf16 %v12456_v60 }
 0x597   :  { %5773 = vmatpush.bf16.msrb.mxu2 %v9967_v7  ;;  %v12471_v45 = vpop.permute.xlu2 %10252 }
 0x598   :  { %v10254_v23 = vunpack.i.l.bf16 %v12471_v45 }
 0x59a   :  { %5748 = vmatpush.bf16.msra.mxu0 %v9950_v47  ;;  %5761 = vmatpush.bf16.msra.mxu1 %v9958_v49 }
 0x59b   :  { %5774 = vmatpush.bf16.msrb.mxu2 %v9966_v58  ;;  %v10240_v58 = vunpack.i.h.bf16 %v10238_v43 }
 0x59d   :  { %v5091_v41 = vsel %vm5089_vm10, %v10240_v58, %v10234_v26 }
 0x59e   :  { %5749 = vmatpush.bf16.msra.mxu0 %v9949_v31  ;;  %5762 = vmatpush.bf16.msra.mxu1 %v9957_v44  ;;  %v10239_v31 = vunpack.i.l.bf16 %v10238_v43 }
 0x5a0   :  { %v5090_v53 = vsel %vm5089_vm10, %v10239_v31, %v10240_v58 }
 0x5a1   :  { %v5146_v13 = vmax.f32 %v4961_v12, %v5090_v53  ;;  %v10005_v53 = vld [vmem:[#allocation10 + $0x1d8] sm:$0xff] }
 0x5a2   :  { %5750 = vmatpush.bf16.msra.mxu0 %v9948_v57  ;;  %5763 = vmatpush.bf16.msra.mxu1 %v9956_v6  ;;  %v10255_v6 = vunpack.i.h.bf16 %v12471_v45  ;;  %v12935_v45 = vmax.f32 %v12264_v36, 0.0 }
 0x5a6   :  { %5764 = vmatpush.bf16.msra.mxu1 %v9955_v52 }
 0x5c3   :  { %v10243_v56 = vpop.permute.xlu1 %10242 }
 0x5c4   :  { %v10245_v16 = vunpack.i.h.bf16 %v10243_v56  ;;  %v10244_v7 = vunpack.i.l.bf16 %v10243_v56 }
 0x5c6   :  { %v5165_v47 = vmax.f32 %v4980_v28, %v10245_v16  ;;  %v5092_v49 = vsel %vm5089_vm10, %v10234_v26, %v10244_v7  ;;  %v5104_v1 = vsel %vm5089_vm10, %v10235_v34, %v10245_v16  ;;  %v5149_v15 = vmax.f32 %v4964_v4, %v10244_v7  ;;  %v9965_v28 = vld [vmem:[#allocation10 + $0x98] sm:$0xff] }
 0x5c7   :  { %v5148_v44 = vmax.f32 %v4963_v51, %v5092_v49  ;;  %v5164_v60 = vmax.f32 %v4979_v46, %v5104_v1  ;;  %5775 = vmatpush.bf16.msrb.mxu2 %v9965_v28  ;;  %v9947_v1 = vld [vmem:[#allocation10 + $0x8] sm:$0xff]  ;;  %v5105_v26 = vsel %vm5089_vm10, %v10254_v23, %v10255_v6 }
 0x5c8   :  { %v5193_v56 = vrot.slane %v5165_v47, 2  ;;  %v5189_v10 = vrot.slane %v5149_v15, 2  ;;  %5751 = vmatpush.bf16.msra.mxu0 %v9947_v1 }
 0x5c9   :  { %v5188_v19 = vrot.slane %v5148_v44, 2  ;;  %v5192_v61 = vrot.slane %v5164_v60, 2 }
 0x5ca   :  { %v5209_v21 = vmax.f32 %v5165_v47, %v5193_v56  ;;  %v5205_v16 = vmax.f32 %v5149_v15, %v5189_v10 }
 0x5cb   :  { %v5204_v4 = vmax.f32 %v5148_v44, %v5188_v19  ;;  %v5208_v43 = vmax.f32 %v5164_v60, %v5192_v61  ;;  %v10248_v7 = vpop.permute.xlu1 %10247  ;;  %5776 = vmatpush.bf16.msrb.mxu2 %v9964_v55  ;;  %v5147_v55 = vmax.f32 %v4962_v5, %v5091_v41  ;;  %v5166_v5 = vmax.f32 %v4981_v63, %v5105_v26  ;;  %v10022_v41 = vld [vmem:[#allocation10 + $0x260] sm:$0xff] }
 0x5cc   :  { %v5217_v11 = vpack.c.bf16 %v5209_v21, %v5209_v21  ;;  %v5213_v51 = vpack.c.bf16 %v5205_v16, %v5205_v16  ;;  %v10250_v46 = vunpack.i.h.bf16 %v10248_v7  ;;  %v10249_v49 = vunpack.i.l.bf16 %v10248_v7  ;;  %v12498_v7 = vpop.permute.xlu0 %10257 }
 0x5cd   :  { %v5212_v10 = vpack.c.bf16 %v5204_v4, %v5204_v4  ;;  %v5216_v47 = vpack.c.bf16 %v5208_v43, %v5208_v43  ;;  %v5186_v4 = vrot.slane %v5146_v13, 2  ;;  %v10260_v1 = vunpack.i.h.bf16 %v12498_v7 }
 0x5ce   :  { %v12473_v15 = vunpack.c.l.b16 %v5217_v11  ;;  %v12475_v19 = vunpack.c.l.b16 %v5213_v51  ;;  %v5102_v31 = vsel %vm5089_vm10, %v10249_v49, %v10250_v46  ;;  %v5103_v61 = vsel %vm5089_vm10, %v10250_v46, %v10235_v34  ;;  %v9963_v51 = vld [vmem:[#allocation10 + $0x88] sm:$0xff]  ;;  %v9946_v46 = vld [vmem:[#allocation10] sm:$0xff] }
 0x5cf   :  { %v12480_v21 = vunpack.c.l.b16 %v5212_v10  ;;  %v12482_v44 = vunpack.c.l.b16 %v5216_v47  ;;  %v5162_v57 = vmax.f32 %v4977_v20, %v5102_v31  ;;  %v5163_v34 = vmax.f32 %v4978_v33, %v5103_v61  ;;  %v9954_v49 = vld [vmem:[#allocation10 + $0x40] sm:$0xff]  ;;  %5752 = vmatpush.bf16.msra.mxu0 %v9946_v46  ;;  %5777 = vmatpush.bf16.msrb.mxu2 %v9963_v51 }
 0x5d0   :  { %v5350_v60 = vrot.slane %v12473_v15, 3  ;;  %v5349_v56 = vrot.slane %v12475_v19, 4  ;;  %v5202_v33 = vmax.f32 %v5146_v13, %v5186_v4  ;;  %v10259_v10 = vunpack.i.l.bf16 %v12498_v7  ;;  %5765 = vmatpush.bf16.msra.mxu1 %v9954_v49  ;;  %v9962_v47 = vld [vmem:[#allocation10 + $0x80] sm:$0xff] }
 0x5d1   :  { %v5346_v12 = vrot.slane %v12480_v21, 4  ;;  %v5347_v28 = vrot.slane %v12482_v44, 3  ;;  %v5190_v16 = vrot.slane %v5162_v57, 2  ;;  %v5191_v3 = vrot.slane %v5163_v34, 2 }
 0x5d2   :  { %v5351_v20 = vsel %vm5341_vm11, %v5350_v60, %v5349_v56  ;;  %v5187_v31 = vrot.slane %v5147_v55, 2  ;;  %v10023_v60 = vld [vmem:[#allocation10 + $0x268] sm:$0xff]  ;;  %v5210_v61 = vpack.c.bf16 %v5202_v33, %v5202_v33  ;;  %v5093_v13 = vsel %vm5089_vm10, %v10259_v10, %v10260_v1  ;;  %v10000_v33 = vld [vmem:[#allocation10 + $0x1b0] sm:$0xff]  ;;  %v10268_v10 = vpop.permute.xlu2 %10267 }
 0x5d3   :  { %v5355_v43 = vpack.c.b16 %v5351_v20, %v5351_v20  ;;  %v5348_v52 = vsel %vm5341_vm11, %v5347_v28, %v5346_v12  ;;  %v5206_v58 = vmax.f32 %v5162_v57, %v5190_v16  ;;  %v10003_v56 = vld [vmem:[#allocation10 + $0x1c8] sm:$0xff]  ;;  %v5207_v23 = vmax.f32 %v5163_v34, %v5191_v3  ;;  %5778 = vmatpush.bf16.msrb.mxu2 %v9962_v47  ;;  %v10002_v16 = vld [vmem:[#allocation10 + $0x1c0] sm:$0xff]  ;;  %v10013_v47 = vld [vmem:[#allocation10 + $0x218] sm:$0xff] }
 0x5d4   :  { %v5354_v11 = vpack.c.b16 %v5348_v52, %v5348_v52  ;;  %v5809_v12 = vrot.slane %v5166_v5, 2  ;;  %v5577_v28 = vrot.slane %v12473_v15, 7  ;;  %v5203_v39 = vmax.f32 %v5147_v55, %v5187_v31  ;;  %v10263_v55 = vpop.permute.xlu1 %10262 }
 0x5d5   :  { %8991 = vmatmul.msk.bf16.vlgmr.msra.gmra.mxu3 %vm5515_vm12, %v5355_v43  ;;  %v5214_v57 = vpack.c.bf16 %v5206_v58, %v5206_v58  ;;  %v5150_v20 = vmax.f32 %v4965_v27, %v5093_v13  ;;  %v5215_v4 = vpack.c.bf16 %v5207_v23, %v5207_v23  ;;  %v10001_v58 = vld [vmem:[#allocation10 + $0x1b8] sm:$0xff]  ;;  %v10264_v46 = vunpack.i.l.bf16 %v10263_v55 }
 0x5d6   :  { %6080 = vmatpush.bf16.msra.mxu3 %v10005_v53  ;;  %5553 = vmatmul.bf16.vlgmr.msra.gmra.mxu2 %v5354_v11  ;;  %v12518_v53 = vunpack.c.l.b16 %v5210_v61  ;;  %v5825_v43 = vmax.f32 %v5166_v5, %v5809_v12  ;;  %v5578_v34 = vsel %vm5341_vm11, %v5577_v28, %v12475_v19  ;;  %v5211_v52 = vpack.c.bf16 %v5203_v39, %v5203_v39  ;;  %v9999_v12 = vld [vmem:[#allocation10 + $0x1a8] sm:$0xff] }
 0x5d7   :  { %v12514_v63 = vunpack.c.l.b16 %v5214_v57  ;;  %6125 = vmatpush.bf16.msra.mxu2 %v10023_v60  ;;  %v5805_v26 = vrot.slane %v5150_v20, 2  ;;  %v5582_v27 = vpack.c.b16 %v5578_v34, %v5578_v34  ;;  %v12524_v11 = vunpack.c.l.b16 %v5215_v4 }
 0x5d8   :  { %v5339_v29 = vrot.slane %v12518_v53, 4  ;;  %v5833_v51 = vpack.c.bf16 %v5825_v43, %v5825_v43  ;;  %v12526_v49 = vunpack.c.l.b16 %v5211_v52  ;;  %v10265_v5 = vunpack.i.h.bf16 %v10263_v55 }
 0x5d9   :  { %v5340_v15 = vrot.slane %v12514_v63, 3  ;;  %v5821_v19 = vmax.f32 %v5150_v20, %v5805_v26  ;;  %v5344_v3 = vrot.slane %v12524_v11, 3  ;;  %v12933_v57 = vmax.f32 %v12392_v37, 0.0  ;;  %v9998_v26 = vld [vmem:[#allocation10 + $0x1a0] sm:$0xff] }
 0x5da   :  { %6081 = vmatpush.bf16.msra.mxu3 %v10004_v54  ;;  %v12531_v31 = vunpack.c.l.b16 %v5833_v51  ;;  %v5343_v61 = vrot.slane %v12526_v49, 4  ;;  %v10269_v23 = vunpack.i.l.bf16 %v10268_v10  ;;  %v5106_v28 = vsel %vm5089_vm10, %v10255_v6, %v10265_v5 }
 0x5db   :  { %6126 = vmatpush.bf16.msra.mxu2 %v10022_v41  ;;  %v5342_v54 = vsel %vm5341_vm11, %v5340_v15, %v5339_v29  ;;  %v5169_v60 = vmax.f32 %v12933_v57, %v10264_v46  ;;  %v5829_v13 = vpack.c.bf16 %v5821_v19, %v5821_v19  ;;  %v10012_v41 = vld [vmem:[#allocation10 + $0x210] sm:$0xff]  ;;  %v10270_v4 = vunpack.i.h.bf16 %v10268_v10  ;;  %v10011_v29 = vld [vmem:[#allocation10 + $0x208] sm:$0xff]  ;;  %v10010_v57 = vld [vmem:[#allocation10 + $0x200] sm:$0xff] }
 0x5dc   :  { %v5345_v39 = vsel %vm5341_vm11, %v5344_v3, %v5343_v61  ;;  %v5906_v20 = vrot.slane %v12531_v31, 7  ;;  %v5575_v43 = vrot.slane %v12482_v44, 7  ;;  %v12934_v15 = vmax.f32 %v12341_v8, 0.0  ;;  %v10020_v44 = vld [vmem:[#allocation10 + $0x250] sm:$0xff]  ;;  %v10031_v3 = vld [vmem:[#allocation10 + $0x2a8] sm:$0xff]  ;;  %v10038_v61 = vld [vmem:[#allocation10 + $0x2e0] sm:$0xff] }
 0x5dd   :  { %v5812_v37 = vrot.slane %v5169_v60, 2  ;;  %v5353_v34 = vpack.c.b16 %v5345_v39, %v5345_v39  ;;  %v12542_v52 = vunpack.c.l.b16 %v5829_v13  ;;  %v5167_v6 = vmax.f32 %v12935_v45, %v5106_v28 }
 0x5de   :  { %6082 = vmatpush.bf16.msra.mxu3 %v10003_v56  ;;  %v5352_v56 = vpack.c.b16 %v5342_v54, %v5342_v54  ;;  %v5153_v55 = vmax.f32 %v12934_v15, %v10269_v23  ;;  %v5094_v8 = vsel %vm5089_vm10, %v10260_v1, %v10270_v4  ;;  %v5576_v36 = vsel %vm5341_vm11, %v5575_v43, %v12480_v21  ;;  %v10019_v21 = vld [vmem:[#allocation10 + $0x248] sm:$0xff] }
 0x5df   :  { %5540 = vmatmul.bf16.vlgmr.msrb.gmra.mxu1 %v5353_v34  ;;  %v5828_v51 = vmax.f32 %v5169_v60, %v5812_v37  ;;  %v5907_v54 = vsel %vm5341_vm11, %v5906_v20, %v12542_v52  ;;  %v12937_v7 = vmax.f32 %v12226_v18, 0.0  ;;  %v5095_v13 = vsel %vm5089_vm10, %v10270_v4, %v10269_v23  ;;  %v10018_v23 = vld [vmem:[#allocation10 + $0x240] sm:$0xff]  ;;  %v10009_v4 = vld [vmem:[#allocation10 + $0x1f8] sm:$0xff] }
 0x5e0   :  { %5527 = vmatmul.bf16.vlgmr.msrb.gmra.mxu0 %v5352_v56  ;;  %v5808_v19 = vrot.slane %v5153_v55, 2  ;;  %v5914_v60 = vpack.c.b16 %v5907_v54, %v5907_v54  ;;  %v5573_v39 = vrot.slane %v12524_v11, 7  ;;  %v12938_v20 = vmax.f32 %v12338_v22, 0.0  ;;  %v10037_v34 = vld [vmem:[#allocation10 + $0x2d8] sm:$0xff] }
 0x5e1   :  { %6093 = vmatpush.bf16.msrb.mxu0 %v10013_v47  ;;  %v5581_v47 = vpack.c.b16 %v5576_v36, %v5576_v36  ;;  %v5151_v1 = vmax.f32 %v12937_v7, %v5094_v8  ;;  %v5836_v56 = vpack.c.bf16 %v5828_v51, %v5828_v51  ;;  %v10029_v11 = vld [vmem:[#allocation10 + $0x298] sm:$0xff]  ;;  %v10036_v51 = vld [vmem:[#allocation10 + $0x2d0] sm:$0xff] }
 0x5e2   :  { %6083 = vmatpush.bf16.msra.mxu3 %v10002_v16  ;;  %v10021_v16 = vld [vmem:[#allocation10 + $0x258] sm:$0xff]  ;;  %v5152_v37 = vmax.f32 %v12938_v20, %v5095_v13  ;;  %v10028_v36 = vld [vmem:[#allocation10 + $0x290] sm:$0xff]  ;;  %v10047_v13 = vld [vmem:[#allocation10 + $0x328] sm:$0xff] }
 0x5e3   :  { %6106 = vmatpush.bf16.msrb.mxu1 %v10021_v16  ;;  %v12567_v16 = vunpack.c.l.b16 %v5836_v56 }
 0x5e4   :  { %v5807_v22 = vrot.slane %v5152_v37, 2 }
 0x5e5   :  { %9096 = vmatmul.msk.bf16.vlgmr.msrb.gmra.mxu3 %vm5515_vm12, %v5582_v27  ;;  %6094 = vmatpush.bf16.msrb.mxu0 %v10012_v41  ;;  %v10039_v27 = vld [vmem:[#allocation10 + $0x2e8] sm:$0xff]  ;;  %v5806_v41 = vrot.slane %v5151_v1, 2 }
 0x5e6   :  { %6084 = vmatpush.bf16.msra.mxu3 %v10001_v58  ;;  %v5107_v58 = vsel %vm5089_vm10, %v10265_v5, %v10264_v46  ;;  %v12936_v46 = vmax.f32 %v12317_v30, 0.0  ;;  %v5571_v5 = vrot.slane %v12514_v63, 7  ;;  %5779 = vmatmul.bf16.vlgmr.msrb.gmra.mxu2 %v5581_v47  ;;  %v5824_v30 = vmax.f32 %v5153_v55, %v5808_v19  ;;  %v10030_v63 = vld [vmem:[#allocation10 + $0x2a0] sm:$0xff] }
 0x5e7   :  { %6107 = vmatpush.bf16.msrb.mxu1 %v10020_v44  ;;  %6364 = vmatpush.bf16.msrb.mxu2 %v10031_v3  ;;  %v5823_v19 = vmax.f32 %v5152_v37, %v5807_v22  ;;  %v10007_v3 = vld [vmem:[#allocation10 + $0x1e8] sm:$0xff]  ;;  %v10046_v37 = vld [vmem:[#allocation10 + $0x320] sm:$0xff]  ;;  %v10045_v22 = vld [vmem:[#allocation10 + $0x318] sm:$0xff] }
 0x5e8   :  { %v5168_v10 = vmax.f32 %v12936_v46, %v5107_v58  ;;  %v5572_v18 = vsel %vm5341_vm11, %v5571_v5, %v12518_v53  ;;  %v5832_v15 = vpack.c.bf16 %v5824_v30, %v5824_v30  ;;  %v5574_v53 = vsel %vm5341_vm11, %v5573_v39, %v12526_v49  ;;  %v10017_v58 = vld [vmem:[#allocation10 + $0x238] sm:$0xff]  ;;  %v10035_v5 = vld [vmem:[#allocation10 + $0x2c8] sm:$0xff]  ;;  %v10034_v30 = vld [vmem:[#allocation10 + $0x2c0] sm:$0xff] }
 0x5e9   :  { %6095 = vmatpush.bf16.msrb.mxu0 %v10011_v29  ;;  %v5579_v43 = vpack.c.b16 %v5572_v18, %v5572_v18  ;;  %v10008_v29 = vld [vmem:[#allocation10 + $0x1f0] sm:$0xff]  ;;  %v5831_v56 = vpack.c.bf16 %v5823_v19, %v5823_v19  ;;  %v10014_v18 = vld [vmem:[#allocation10 + $0x220] sm:$0xff]  ;;  %v10073_v19 = vld [vmem:[#allocation10 + $0x3f8] sm:$0xff] }
 0x5ea   :  { %6085 = vmatpush.bf16.msra.mxu3 %v10000_v33  ;;  %v5810_v33 = vrot.slane %v5167_v6, 2  ;;  %v5811_v28 = vrot.slane %v5168_v10, 2  ;;  %v12572_v44 = vunpack.c.l.b16 %v5832_v15  ;;  %v6187_v15 = vrot.slane %v12531_v31, 3  ;;  %v12596_v31 = vpop.permute.xlu1 %10272 }
 0x5eb   :  { %6108 = vmatpush.bf16.msrb.mxu1 %v10019_v21  ;;  %6365 = vmatpush.bf16.msrb.mxu2 %v10030_v63  ;;  %v10015_v21 = vld [vmem:[#allocation10 + $0x228] sm:$0xff]  ;;  %v12586_v39 = vunpack.c.l.b16 %v5831_v56 }
 0x5ec   :  { %v5827_v45 = vmax.f32 %v5168_v10, %v5811_v28  ;;  %v10016_v10 = vld [vmem:[#allocation10 + $0x230] sm:$0xff]  ;;  %v10026_v28 = vld [vmem:[#allocation10 + $0x280] sm:$0xff] }
 0x5ed   :  { %6096 = vmatpush.bf16.msrb.mxu0 %v10010_v57 }
 0x5ee   :  { %6086 = vmatpush.bf16.msra.mxu3 %v9999_v12  ;;  %v5826_v12 = vmax.f32 %v5167_v6, %v5810_v33  ;;  %v5822_v6 = vmax.f32 %v5151_v1, %v5806_v41  ;;  %v5835_v8 = vpack.c.bf16 %v5827_v45, %v5827_v45  ;;  %v12576_v33 = vpop.permute.xlu0 %10282  ;;  %v10049_v41 = vld [vmem:[#allocation10 + $0x338] sm:$0xff] }
 0x5ef   :  { %6109 = vmatpush.bf16.msrb.mxu1 %v10018_v23  ;;  %6366 = vmatpush.bf16.msrb.mxu2 %v10029_v11 }
 0x5f0   :  { %v5834_v55 = vpack.c.bf16 %v5826_v12, %v5826_v12  ;;  %5753 = vmatmul.bf16.vlgmr.msra.gmra.mxu0 %v5579_v43  ;;  %v5830_v49 = vpack.c.bf16 %v5822_v6, %v5822_v6  ;;  %v12581_v57 = vunpack.c.l.b16 %v5835_v8  ;;  %v10025_v43 = vld [vmem:[#allocation10 + $0x278] sm:$0xff]  ;;  %v10048_v6 = vld [vmem:[#allocation10 + $0x330] sm:$0xff] }
 0x5f1   :  { %6097 = vmatpush.bf16.msrb.mxu0 %v10009_v4  ;;  %v10065_v8 = vld [vmem:[#allocation10 + $0x3b8] sm:$0xff] }
 0x5f2   :  { %6087 = vmatpush.bf16.msra.mxu3 %v9998_v26  ;;  %v5912_v26 = vrot.slane %v12567_v16, 7  ;;  %v12574_v54 = vunpack.c.l.b16 %v5834_v55  ;;  %v5899_v1 = vunpack.c.l.b16 %v5830_v49  ;;  %v5910_v12 = vrot.slane %v12581_v57, 7  ;;  %v10278_v55 = vpop.permute.xlu2 %10277 }
 0x5f3   :  { %6110 = vmatpush.bf16.msrb.mxu1 %v10017_v58  ;;  %6367 = vmatpush.bf16.msrb.mxu2 %v10028_v36  ;;  %v10057_v58 = vld [vmem:[#allocation10 + $0x378] sm:$0xff]  ;;  %v10284_v36 = vunpack.i.l.bf16 %v12576_v33  ;;  %v10280_v56 = vunpack.i.h.bf16 %v10278_v55 }
 0x5f4   :  { %v5913_v46 = vsel %vm5341_vm11, %v5912_v26, %v12572_v44  ;;  %v5908_v47 = vrot.slane %v12574_v54, 7  ;;  %v5911_v4 = vsel %vm5341_vm11, %v5910_v12, %v12586_v39  ;;  %v6190_v45 = vrot.slane %v12574_v54, 3  ;;  %v10032_v54 = vld [vmem:[#allocation10 + $0x2b0] sm:$0xff] }
 0x5f5   :  { %6088 = vmatmul.bf16.vlgmr.msra.gmra.mxu3 %v5914_v60  ;;  %6098 = vmatpush.bf16.msrb.mxu0 %v10008_v29  ;;  %v10027_v60 = vld [vmem:[#allocation10 + $0x288] sm:$0xff]  ;;  %v5917_v7 = vpack.c.b16 %v5913_v46, %v5913_v46  ;;  %v6186_v26 = vrot.slane %v12542_v52, 4  ;;  %v10024_v29 = vld [vmem:[#allocation10 + $0x270] sm:$0xff] }
 0x5f6   :  { %6377 = vmatpush.bf16.msrb.mxu3 %v10039_v27  ;;  %v5580_v27 = vpack.c.b16 %v5574_v53, %v5574_v53  ;;  %v5909_v63 = vsel %vm5341_vm11, %v5908_v47, %v5899_v1  ;;  %v12588_v23 = vpop.permute.xlu0 %10287  ;;  %v5916_v53 = vpack.c.b16 %v5911_v4, %v5911_v4  ;;  %v10044_v52 = vld [vmem:[#allocation10 + $0x310] sm:$0xff]  ;;  %v10285_v47 = vunpack.i.h.bf16 %v12576_v33  ;;  %v10043_v33 = vld [vmem:[#allocation10 + $0x308] sm:$0xff] }
 0x5f7   :  { %6111 = vmatpush.bf16.msrb.mxu1 %v10016_v10  ;;  %9201 = vmatmul.msk.bf16.vlgmr.msra.gmra.mxu2 %vm5515_vm12, %v5917_v7  ;;  %v5915_v20 = vpack.c.b16 %v5909_v63, %v5909_v63  ;;  %v10289_v11 = vunpack.i.l.bf16 %v12588_v23  ;;  %v6188_v49 = vsel %vm5341_vm11, %v6187_v15, %v6186_v26  ;;  %v10072_v12 = vld [vmem:[#allocation10 + $0x3f0] sm:$0xff]  ;;  %v6196_v63 = vrot.slane %v12567_v16, 3  ;;  %v10063_v4 = vld [vmem:[#allocation10 + $0x3a8] sm:$0xff] }
 0x5f8   :  { %5766 = vmatmul.bf16.vlgmr.msra.gmra.mxu1 %v5580_v27  ;;  %6368 = vmatpush.bf16.msrb.mxu2 %v10027_v60  ;;  %v6189_v27 = vrot.slane %v5899_v1, 4  ;;  %v10290_v60 = vunpack.i.h.bf16 %v12588_v23  ;;  %v6198_v7 = vpack.c.b16 %v6188_v49, %v6188_v49  ;;  %v10064_v1 = vld [vmem:[#allocation10 + $0x3b0] sm:$0xff]  ;;  %v10071_v15 = vld [vmem:[#allocation10 + $0x3e8] sm:$0xff]  ;;  %v10041_v49 = vld [vmem:[#allocation10 + $0x2f8] sm:$0xff] }
 0x5f9   :  { %6099 = vmatpush.bf16.msrb.mxu0 %v10007_v3  ;;  %v10274_v3 = vunpack.i.l.bf16 %v12596_v31 }
 0x5fa   :  { %6378 = vmatpush.bf16.msrb.mxu3 %v10038_v61  ;;  %v10006_v61 = vld [vmem:[#allocation10 + $0x1e0] sm:$0xff]  ;;  %v6191_v10 = vsel %vm5341_vm11, %v6190_v45, %v6189_v27  ;;  %v5096_v23 = vsel %vm5089_vm10, %v10290_v60, %v10280_v56  ;;  %v12944_v27 = vmax.f32 %v12286_v59, 0.0  ;;  %v10061_v59 = vld [vmem:[#allocation10 + $0x398] sm:$0xff] }
 0x5fb   :  { %6112 = vmatpush.bf16.msrb.mxu1 %v10015_v21  ;;  %v10069_v60 = vld [vmem:[#allocation10 + $0x3d8] sm:$0xff] }
 0x5fc   :  { %6369 = vmatpush.bf16.msrb.mxu2 %v10026_v28  ;;  %v10275_v28 = vunpack.i.h.bf16 %v12596_v31  ;;  %v10070_v31 = vld [vmem:[#allocation10 + $0x3e0] sm:$0xff] }
 0x5fd   :  { %6100 = vmatpush.bf16.msrb.mxu0 %v10006_v61  ;;  %v12939_v61 = vmax.f32 %v12191_v32, 0.0  ;;  %v12940_v32 = vmax.f32 %v12267_v48, 0.0 }
 0x5fe   :  { %6379 = vmatpush.bf16.msrb.mxu3 %v10037_v34  ;;  %v10033_v34 = vld [vmem:[#allocation10 + $0x2b8] sm:$0xff]  ;;  %v5098_v16 = vsel %vm5089_vm10, %v10274_v3, %v10275_v28 }
 0x5ff   :  { %6113 = vmatpush.bf16.msrb.mxu1 %v10014_v18  ;;  %v5097_v18 = vsel %vm5089_vm10, %v10280_v56, %v10274_v3  ;;  %v12946_v3 = vmax.f32 %v12413_v40, 0.0 }
 0x600   :  { %6101 = vmatmul.bf16.vlgmr.msrb.gmra.mxu0 %v5915_v20  ;;  %6370 = vmatpush.bf16.msrb.mxu2 %v10025_v43  ;;  %v5110_v20 = vsel %vm5089_vm10, %v10284_v36, %v10285_v47  ;;  %v6195_v43 = vrot.slane %v12572_v44, 4  ;;  %v10054_v44 = vld [vmem:[#allocation10 + $0x360] sm:$0xff] }
 0x601   :  { %6390 = vmatpush.bf16.msra.mxu0 %v10047_v13 }
 0x602   :  { %6380 = vmatpush.bf16.msrb.mxu3 %v10036_v51  ;;  %v10279_v51 = vunpack.i.l.bf16 %v10278_v55  ;;  %v12941_v55 = vmax.f32 %v12241_v17, 0.0 }
 0x603   :  { %6409 = vmatpush.bf16.msra.mxu1 %v10049_v41  ;;  %v10055_v41 = vld [vmem:[#allocation10 + $0x368] sm:$0xff] }
 0x604   :  { %v5108_v46 = vsel %vm5089_vm10, %v10289_v11, %v10279_v51  ;;  %6371 = vmatpush.bf16.msrb.mxu2 %v10024_v29  ;;  %v5109_v21 = vsel %vm5089_vm10, %v10279_v51, %v10284_v36  ;;  %v5155_v45 = vmax.f32 %v12941_v55, %v5097_v18  ;;  %v10042_v11 = vld [vmem:[#allocation10 + $0x300] sm:$0xff]  ;;  %v5156_v51 = vmax.f32 %v12944_v27, %v5098_v16  ;;  %v10083_v16 = vld [vmem:[#allocation10 + $0x448] sm:$0xff] }
 0x605   :  { %6391 = vmatpush.bf16.msra.mxu0 %v10046_v37  ;;  %v5170_v13 = vmax.f32 %v12939_v61, %v5108_v46  ;;  %v5171_v37 = vmax.f32 %v12940_v32, %v5109_v21  ;;  %v10062_v29 = vld [vmem:[#allocation10 + $0x3a0] sm:$0xff]  ;;  %v10053_v46 = vld [vmem:[#allocation10 + $0x358] sm:$0xff]  ;;  %v10040_v21 = vld [vmem:[#allocation10 + $0x2f0] sm:$0xff] }
 0x606   :  { %6381 = vmatpush.bf16.msrb.mxu3 %v10035_v5  ;;  %v10056_v5 = vld [vmem:[#allocation10 + $0x370] sm:$0xff]  ;;  %v6426_v36 = vrot.slane %v5155_v45, 2  ;;  %v10058_v27 = vld [vmem:[#allocation10 + $0x380] sm:$0xff] }
 0x607   :  { %6410 = vmatpush.bf16.msra.mxu1 %v10048_v6  ;;  %6372 = vmatmul.bf16.vlgmr.msrb.gmra.mxu2 %v6198_v7  ;;  %v6197_v6 = vsel %vm5341_vm11, %v6196_v63, %v6195_v43  ;;  %v6192_v7 = vrot.slane %v12586_v39, 4  ;;  %v10068_v39 = vld [vmem:[#allocation10 + $0x3d0] sm:$0xff]  ;;  %v10074_v43 = vld [vmem:[#allocation10 + $0x400] sm:$0xff] }
 0x608   :  { %6114 = vmatmul.bf16.vlgmr.msrb.gmra.mxu1 %v5916_v53  ;;  %6713 = vmatpush.bf16.msra.mxu2 %v10065_v8  ;;  %v12942_v53 = vmax.f32 %v12323_v14, 0.0  ;;  %v12945_v8 = vmax.f32 %v12398_v62, 0.0  ;;  %v6427_v62 = vrot.slane %v5156_v51, 2  ;;  %v6442_v56 = vmax.f32 %v5155_v45, %v6426_v36  ;;  %v10066_v36 = vld [vmem:[#allocation10 + $0x3c0] sm:$0xff] }
 0x609   :  { %6392 = vmatpush.bf16.msra.mxu0 %v10045_v22  ;;  %v12943_v22 = vmax.f32 %v12162_v9, 0.0 }
 0x60a   :  { %6382 = vmatpush.bf16.msrb.mxu3 %v10034_v30  ;;  %v6199_v30 = vpack.c.b16 %v6191_v10, %v6191_v10  ;;  %v5172_v48 = vmax.f32 %v12942_v53, %v5110_v20  ;;  %v5173_v14 = vmax.f32 %v12945_v8, %v10285_v47  ;;  %v6193_v10 = vrot.slane %v12581_v57, 3  ;;  %v10052_v57 = vld [vmem:[#allocation10 + $0x350] sm:$0xff]  ;;  %v10067_v53 = vld [vmem:[#allocation10 + $0x3c8] sm:$0xff] }
 0x60b   :  { %6700 = vmatpush.bf16.msrb.mxu1 %v10057_v58  ;;  %v5154_v26 = vmax.f32 %v12943_v22, %v5096_v23  ;;  %v6430_v58 = vrot.slane %v5171_v37, 2  ;;  %v6443_v63 = vmax.f32 %v5156_v51, %v6427_v62  ;;  %v6450_v20 = vpack.c.bf16 %v6442_v56, %v6442_v56  ;;  %v10051_v23 = vld [vmem:[#allocation10 + $0x348] sm:$0xff] }
 0x60c   :  { %6714 = vmatpush.bf16.msra.mxu2 %v10064_v1  ;;  %v6431_v9 = vrot.slane %v5172_v48, 2  ;;  %v6432_v1 = vrot.slane %v5173_v14, 2  ;;  %v6194_v40 = vsel %vm5341_vm11, %v6193_v10, %v6192_v7  ;;  %v10099_v8 = vld [vmem:[#allocation10 + $0x4c8] sm:$0xff]  ;;  %v10100_v7 = vld [vmem:[#allocation10 + $0x4d0] sm:$0xff] }
 0x60d   :  { %6393 = vmatpush.bf16.msra.mxu0 %v10044_v52  ;;  %v6446_v52 = vmax.f32 %v5171_v37, %v6430_v58  ;;  %v6451_v45 = vpack.c.bf16 %v6443_v63, %v6443_v63  ;;  %v10108_v63 = vld [vmem:[#allocation10 + $0x510] sm:$0xff] }
 0x60e   :  { %6383 = vmatpush.bf16.msrb.mxu3 %v10033_v34  ;;  %v6429_v34 = vrot.slane %v5170_v13, 2  ;;  %v6447_v61 = vmax.f32 %v5172_v48, %v6431_v9  ;;  %v12639_v48 = vunpack.c.l.b16 %v6450_v20 }
 0x60f   :  { %6701 = vmatpush.bf16.msrb.mxu1 %v10056_v5  ;;  %v5157_v5 = vmax.f32 %v12946_v3, %v10275_v28  ;;  %v10098_v3 = vld [vmem:[#allocation10 + $0x4c0] sm:$0xff] }
 0x610   :  { %6715 = vmatpush.bf16.msra.mxu2 %v10063_v4  ;;  %v6445_v17 = vmax.f32 %v5170_v13, %v6429_v34  ;;  %v6455_v32 = vpack.c.bf16 %v6447_v61, %v6447_v61  ;;  %v6200_v4 = vpack.c.b16 %v6194_v40, %v6194_v40 }
 0x611   :  { %6394 = vmatpush.bf16.msra.mxu0 %v10043_v33  ;;  %v10060_v33 = vld [vmem:[#allocation10 + $0x390] sm:$0xff]  ;;  %v6428_v28 = vrot.slane %v5157_v5, 2 }
 0x612   :  { %6384 = vmatpush.bf16.msrb.mxu3 %v10032_v54  ;;  %v6201_v54 = vpack.c.b16 %v6197_v6, %v6197_v6  ;;  %v6453_v47 = vpack.c.bf16 %v6445_v17, %v6445_v17  ;;  %v12641_v22 = vunpack.c.l.b16 %v6455_v32  ;;  %v12646_v17 = vunpack.c.l.b16 %v6451_v45  ;;  %v10096_v32 = vld [vmem:[#allocation10 + $0x4b0] sm:$0xff]  ;;  %v10095_v45 = vld [vmem:[#allocation10 + $0x4a8] sm:$0xff] }
 0x613   :  { %6702 = vmatpush.bf16.msrb.mxu1 %v10055_v41  ;;  %v6448_v41 = vmax.f32 %v5173_v14, %v6432_v1  ;;  %v6444_v55 = vmax.f32 %v5157_v5, %v6428_v28  ;;  %v10082_v14 = vld [vmem:[#allocation10 + $0x440] sm:$0xff]  ;;  %v10081_v5 = vld [vmem:[#allocation10 + $0x438] sm:$0xff]  ;;  %v10088_v28 = vld [vmem:[#allocation10 + $0x470] sm:$0xff] }
 0x614   :  { %6716 = vmatpush.bf16.msra.mxu2 %v10062_v29  ;;  %v12634_v18 = vunpack.c.l.b16 %v6453_v47  ;;  %v10091_v29 = vld [vmem:[#allocation10 + $0x488] sm:$0xff]  ;;  %v6530_v9 = vrot.slane %v12641_v22, 7  ;;  %v12659_v47 = vpop.permute.xlu1 %10292  ;;  %v10089_v1 = vld [vmem:[#allocation10 + $0x478] sm:$0xff] }
 0x615   :  { %6385 = vmatmul.bf16.vlgmr.msrb.gmra.mxu3 %v6199_v30  ;;  %6395 = vmatpush.bf16.msra.mxu0 %v10042_v11  ;;  %v10075_v30 = vld [vmem:[#allocation10 + $0x408] sm:$0xff]  ;;  %v6456_v6 = vpack.c.bf16 %v6448_v41, %v6448_v41  ;;  %v6452_v51 = vpack.c.bf16 %v6444_v55, %v6444_v55 }
 0x616   :  { %6726 = vmatpush.bf16.msra.mxu3 %v10073_v19  ;;  %v6425_v19 = vrot.slane %v5154_v26, 2  ;;  %v6526_v11 = vrot.slane %v12634_v18, 7  ;;  %v6531_v62 = vsel %vm5341_vm11, %v6530_v9, %v12646_v17 }
 0x617   :  { %6703 = vmatpush.bf16.msrb.mxu1 %v10054_v44  ;;  %v10050_v44 = vld [vmem:[#allocation10 + $0x340] sm:$0xff]  ;;  %v12655_v10 = vunpack.c.l.b16 %v6452_v51  ;;  %v6536_v56 = vpack.c.b16 %v6531_v62, %v6531_v62  ;;  %v10076_v62 = vld [vmem:[#allocation10 + $0x410] sm:$0xff] }
 0x618   :  { %9306 = vmatmul.msk.bf16.vlgmr.msra.gmra.mxu1 %vm5515_vm12, %v6201_v54  ;;  %v6441_v13 = vmax.f32 %v5154_v26, %v6425_v19  ;;  %6717 = vmatpush.bf16.msra.mxu2 %v10061_v59  ;;  %v10101_v19 = vld [vmem:[#allocation10 + $0x4d8] sm:$0xff]  ;;  %v10106_v51 = vld [vmem:[#allocation10 + $0x500] sm:$0xff] }
 0x619   :  { %6396 = vmatpush.bf16.msra.mxu0 %v10041_v49  ;;  %v12652_v49 = vunpack.c.l.b16 %v6456_v6  ;;  %v6815_v55 = vrot.slane %v12655_v10, 4 }
 0x61a   :  { %6727 = vmatpush.bf16.msra.mxu3 %v10072_v12  ;;  %v6454_v12 = vpack.c.bf16 %v6446_v52, %v6446_v52  ;;  %v6449_v37 = vpack.c.bf16 %v6441_v13, %v6441_v13  ;;  %v10090_v52 = vld [vmem:[#allocation10 + $0x480] sm:$0xff]  ;;  %v10295_v13 = vunpack.i.h.bf16 %v12659_v47 }
 0x61b   :  { %6704 = vmatpush.bf16.msrb.mxu1 %v10053_v46  ;;  %v6816_v6 = vrot.slane %v12652_v49, 3 }
 0x61c   :  { %v12636_v34 = vunpack.c.l.b16 %v6454_v12  ;;  %6718 = vmatpush.bf16.msra.mxu2 %v10060_v33  ;;  %v12643_v26 = vunpack.c.l.b16 %v6449_v37  ;;  %v10080_v12 = vld [vmem:[#allocation10 + $0x430] sm:$0xff]  ;;  %v12666_v33 = vpop.permute.xlu2 %10297  ;;  %v10079_v37 = vld [vmem:[#allocation10 + $0x428] sm:$0xff] }
 0x61d   :  { %6397 = vmatpush.bf16.msra.mxu0 %v10040_v21  ;;  %v10109_v21 = vld [vmem:[#allocation10 + $0x518] sm:$0xff]  ;;  %v10299_v41 = vunpack.i.l.bf16 %v12666_v33 }
 0x61e   :  { %6728 = vmatpush.bf16.msra.mxu3 %v10071_v15  ;;  %v10059_v15 = vld [vmem:[#allocation10 + $0x388] sm:$0xff]  ;;  %v6528_v58 = vrot.slane %v12636_v34, 7 }
 0x61f   :  { %6705 = vmatpush.bf16.msrb.mxu1 %v10052_v57  ;;  %v10294_v57 = vunpack.i.l.bf16 %v12659_v47  ;;  %v12951_v47 = vmax.f32 %v12277_v0, 0.0 }
 0x620   :  { %6398 = vmatmul.bf16.vlgmr.msra.gmra.mxu0 %v6200_v4  ;;  %6719 = vmatpush.bf16.msra.mxu2 %v10059_v15  ;;  %v6529_v54 = vsel %vm5341_vm11, %v6528_v58, %v12639_v48  ;;  %v10107_v15 = vld [vmem:[#allocation10 + $0x508] sm:$0xff] }
 0x621   :  { %6745 = vmatpush.bf16.msrb.mxu0 %v10075_v30  ;;  %v6535_v59 = vpack.c.b16 %v6529_v54, %v6529_v54  ;;  %v10097_v30 = vld [vmem:[#allocation10 + $0x4b8] sm:$0xff]  ;;  %v5111_v20 = vsel %vm5089_vm10, %v10294_v57, %v10295_v13 }
 0x622   :  { %6729 = vmatpush.bf16.msra.mxu3 %v10070_v31  ;;  %v6527_v31 = vsel %vm5341_vm11, %v6526_v11, %v12643_v26  ;;  %v10078_v11 = vld [vmem:[#allocation10 + $0x420] sm:$0xff]  ;;  %v10077_v54 = vld [vmem:[#allocation10 + $0x418] sm:$0xff] }
 0x623   :  { %6706 = vmatpush.bf16.msrb.mxu1 %v10051_v23  ;;  %v6534_v46 = vpack.c.b16 %v6527_v31, %v6527_v31  ;;  %v12947_v23 = vmax.f32 %v12204_v24, 0.0  ;;  %v12948_v24 = vmax.f32 %v12168_v38, 0.0  ;;  %v6817_v31 = vsel %vm5341_vm11, %v6816_v6, %v6815_v55  ;;  %v10124_v55 = vld [vmem:[#allocation10 + $0x590] sm:$0xff]  ;;  %v10103_v6 = vld [vmem:[#allocation10 + $0x4e8] sm:$0xff] }
 0x624   :  { %6720 = vmatpush.bf16.msra.mxu2 %v10058_v27  ;;  %v10086_v27 = vld [vmem:[#allocation10 + $0x460] sm:$0xff]  ;;  %v6807_v38 = vrot.slane %v12634_v18, 3  ;;  %v6812_v18 = vrot.slane %v12646_v17, 4 }
 0x625   :  { %6746 = vmatpush.bf16.msrb.mxu0 %v10074_v43  ;;  %v5174_v4 = vmax.f32 %v12947_v23, %v5111_v20  ;;  %v10087_v43 = vld [vmem:[#allocation10 + $0x468] sm:$0xff]  ;;  %v10104_v20 = vld [vmem:[#allocation10 + $0x4f0] sm:$0xff] }
 0x626   :  { %6730 = vmatpush.bf16.msra.mxu3 %v10069_v60  ;;  %v6532_v60 = vrot.slane %v12652_v49, 7 }
 0x627   :  { %6707 = vmatpush.bf16.msrb.mxu1 %v10050_v44  ;;  %6721 = vmatmul.bf16.vlgmr.msra.gmra.mxu2 %v6535_v59  ;;  %v7049_v58 = vrot.slane %v5174_v4, 2  ;;  %v12949_v59 = vmax.f32 %v12431_v42, 0.0 }
 0x628   :  { %7010 = vmatpush.bf16.msrb.mxu2 %v10099_v8  ;;  %v6533_v61 = vsel %vm5341_vm11, %v6532_v60, %v12655_v10  ;;  %v10105_v10 = vld [vmem:[#allocation10 + $0x4f8] sm:$0xff] }
 0x629   :  { %6984 = vmatpush.bf16.msra.mxu0 %v10083_v16  ;;  %v6537_v40 = vpack.c.b16 %v6533_v61, %v6533_v61  ;;  %v10117_v60 = vld [vmem:[#allocation10 + $0x558] sm:$0xff]  ;;  %v6810_v61 = vrot.slane %v12636_v34, 3 }
 0x62a   :  { %6731 = vmatpush.bf16.msra.mxu3 %v10068_v39  ;;  %6708 = vmatmul.bf16.vlgmr.msrb.gmra.mxu1 %v6534_v46  ;;  %v10300_v39 = vunpack.i.h.bf16 %v12666_v33  ;;  %v7065_v46 = vmax.f32 %v5174_v4, %v7049_v58  ;;  %v10126_v33 = vld [vmem:[#allocation10 + $0x5a0] sm:$0xff]  ;;  %v12952_v58 = vmax.f32 %v12248_v2, 0.0 }
 0x62b   :  { %6997 = vmatpush.bf16.msra.mxu1 %v10091_v29  ;;  %v12685_v29 = vpop.permute.xlu1 %10307 }
 0x62c   :  { %7011 = vmatpush.bf16.msrb.mxu2 %v10098_v3  ;;  %v5099_v16 = vsel %vm5089_vm10, %v10299_v41, %v10300_v39  ;;  %v10309_v49 = vunpack.i.l.bf16 %v12685_v29  ;;  %v7073_v57 = vpack.c.bf16 %v7065_v46, %v7065_v46  ;;  %v10310_v17 = vunpack.i.h.bf16 %v12685_v29  ;;  %v10116_v41 = vld [vmem:[#allocation10 + $0x550] sm:$0xff] }
 0x62d   :  { %6985 = vmatpush.bf16.msra.mxu0 %v10082_v14  ;;  %v5158_v44 = vmax.f32 %v12948_v24, %v5099_v16  ;;  %v10094_v14 = vld [vmem:[#allocation10 + $0x4a0] sm:$0xff]  ;;  %v12954_v29 = vmax.f32 %v12295_v25, 0.0 }
 0x62e   :  { %6732 = vmatpush.bf16.msra.mxu3 %v10067_v53  ;;  %v12680_v53 = vpop.permute.xlu0 %10302  ;;  %v7142_v4 = vunpack.c.l.b16 %v7073_v57 }
 0x62f   :  { %6998 = vmatpush.bf16.msra.mxu1 %v10090_v52  ;;  %v10304_v8 = vunpack.i.l.bf16 %v12680_v53  ;;  %v7045_v9 = vrot.slane %v5158_v44, 2  ;;  %v10085_v52 = vld [vmem:[#allocation10 + $0x458] sm:$0xff] }
 0x630   :  { %7012 = vmatpush.bf16.msrb.mxu2 %v10097_v30  ;;  %9411 = vmatmul.msk.bf16.vlgmr.msrb.gmra.mxu0 %vm5515_vm12, %v6537_v40  ;;  %v6813_v30 = vrot.slane %v12641_v22, 3  ;;  %v10125_v40 = vld [vmem:[#allocation10 + $0x598] sm:$0xff] }
 0x631   :  { %6986 = vmatpush.bf16.msra.mxu0 %v10081_v5  ;;  %v5177_v3 = vmax.f32 %v12949_v59, %v10304_v8  ;;  %v10093_v5 = vld [vmem:[#allocation10 + $0x498] sm:$0xff] }
 0x632   :  { %6733 = vmatpush.bf16.msra.mxu3 %v10066_v36  ;;  %v6806_v36 = vrot.slane %v12643_v26, 4  ;;  %v6809_v26 = vrot.slane %v12639_v48, 4  ;;  %v10084_v48 = vld [vmem:[#allocation10 + $0x450] sm:$0xff]  ;;  %v6814_v22 = vsel %vm5341_vm11, %v6813_v30, %v6812_v18  ;;  %v10113_v59 = vld [vmem:[#allocation10 + $0x538] sm:$0xff] }
 0x633   :  { %6999 = vmatpush.bf16.msra.mxu1 %v10089_v1  ;;  %v12950_v1 = vmax.f32 %v12371_v35, 0.0  ;;  %v10121_v18 = vld [vmem:[#allocation10 + $0x578] sm:$0xff]  ;;  %v10120_v30 = vld [vmem:[#allocation10 + $0x570] sm:$0xff] }
 0x634   :  { %7013 = vmatpush.bf16.msrb.mxu2 %v10096_v32  ;;  %v6808_v42 = vsel %vm5341_vm11, %v6807_v38, %v6806_v36  ;;  %v10114_v36 = vld [vmem:[#allocation10 + $0x540] sm:$0xff] }
 0x635   :  { %6734 = vmatmul.bf16.vlgmr.msra.gmra.mxu3 %v6536_v56  ;;  %6987 = vmatpush.bf16.msra.mxu0 %v10080_v12  ;;  %v5161_v56 = vmax.f32 %v12950_v1, %v10309_v49  ;;  %v7052_v12 = vrot.slane %v5177_v3, 2  ;;  %v6818_v35 = vpack.c.b16 %v6808_v42, %v6808_v42  ;;  %v10102_v38 = vld [vmem:[#allocation10 + $0x4e0] sm:$0xff] }
 0x636   :  { %7029 = vmatpush.bf16.msrb.mxu3 %v10101_v19  ;;  %v6821_v19 = vpack.c.b16 %v6817_v31, %v6817_v31 }
 0x637   :  { %7000 = vmatpush.bf16.msra.mxu1 %v10088_v28  ;;  %v10092_v28 = vld [vmem:[#allocation10 + $0x490] sm:$0xff]  ;;  %v7048_v32 = vrot.slane %v5161_v56, 2 }
 0x638   :  { %7014 = vmatpush.bf16.msrb.mxu2 %v10095_v45 }
 0x639   :  { %6988 = vmatpush.bf16.msra.mxu0 %v10079_v37  ;;  %v10127_v37 = vld [vmem:[#allocation10 + $0x5a8] sm:$0xff]  ;;  %v7064_v24 = vmax.f32 %v5161_v56, %v7048_v32  ;;  %v10112_v56 = vld [vmem:[#allocation10 + $0x530] sm:$0xff]  ;;  %v10110_v32 = vld [vmem:[#allocation10 + $0x520] sm:$0xff] }
 0x63a   :  { %7030 = vmatpush.bf16.msrb.mxu3 %v10100_v7  ;;  %v10305_v7 = vunpack.i.h.bf16 %v12680_v53  ;;  %v10115_v53 = vld [vmem:[#allocation10 + $0x548] sm:$0xff] }
 0x63b   :  { %7001 = vmatpush.bf16.msra.mxu1 %v10087_v43  ;;  %v7068_v43 = vmax.f32 %v5177_v3, %v7052_v12 }
 0x63c   :  { %7015 = vmatpush.bf16.msrb.mxu2 %v10094_v14  ;;  %v5112_v34 = vsel %vm5089_vm10, %v10295_v13, %v10305_v7  ;;  %v5113_v45 = vsel %vm5089_vm10, %v10305_v7, %v10304_v8  ;;  %v10123_v8 = vld [vmem:[#allocation10 + $0x588] sm:$0xff] }
 0x63d   :  { %6989 = vmatpush.bf16.msra.mxu0 %v10078_v11  ;;  %v5175_v13 = vmax.f32 %v12951_v47, %v5112_v34  ;;  %v6820_v11 = vpack.c.b16 %v6814_v22, %v6814_v22  ;;  %v7076_v31 = vpack.c.bf16 %v7068_v43, %v7068_v43  ;;  %v10118_v43 = vld [vmem:[#allocation10 + $0x560] sm:$0xff] }
 0x63e   :  { %7320 = vmatpush.bf16.msra.mxu3 %v10109_v21  ;;  %v7061_v21 = vmax.f32 %v5158_v44, %v7045_v9  ;;  %v7146_v44 = vrot.slane %v7142_v4, 7 }
 0x63f   :  { %7002 = vmatpush.bf16.msra.mxu1 %v10086_v27  ;;  %v12953_v27 = vmax.f32 %v12328_v50, 0.0  ;;  %v7145_v50 = vunpack.c.l.b16 %v7076_v31 }
 0x640   :  { %7016 = vmatpush.bf16.msrb.mxu2 %v10093_v5  ;;  %v7069_v23 = vpack.c.bf16 %v7061_v21, %v7061_v21 }
 0x641   :  { %6990 = vmatpush.bf16.msra.mxu0 %v10077_v54  ;;  %v7050_v54 = vrot.slane %v5175_v13, 2  ;;  %v7152_v25 = vrot.slane %v7145_v50, 7 }
 0x642   :  { %7321 = vmatpush.bf16.msra.mxu3 %v10108_v63  ;;  %v6811_v63 = vsel %vm5341_vm11, %v6810_v61, %v6809_v26  ;;  %v7138_v14 = vunpack.c.l.b16 %v7069_v23 }
 0x643   :  { %7003 = vmatpush.bf16.msra.mxu1 %v10085_v52  ;;  %v6819_v16 = vpack.c.b16 %v6811_v63, %v6811_v63  ;;  %v10122_v52 = vld [vmem:[#allocation10 + $0x580] sm:$0xff] }
 0x644   :  { %7017 = vmatpush.bf16.msrb.mxu2 %v10092_v28 }
 0x645   :  { %9516 = vmatmul.msk.bf16.vlgmr.msrb.gmra.mxu3 %vm5515_vm12, %v6821_v19  ;;  %6991 = vmatpush.bf16.msra.mxu0 %v10076_v62  ;;  %v7147_v19 = vsel %vm5341_vm11, %v7146_v44, %v7138_v14 }
 0x646   :  { %7322 = vmatpush.bf16.msra.mxu3 %v10107_v15  ;;  %v5100_v15 = vsel %vm5089_vm10, %v10300_v39, %v10310_v17  ;;  %v5101_v39 = vsel %vm5089_vm10, %v10310_v17, %v10309_v49  ;;  %v7072_v49 = vpack.c.bf16 %v7064_v24, %v7064_v24  ;;  %v7154_v62 = vpack.c.b16 %v7147_v19, %v7147_v19 }
 0x647   :  { %7004 = vmatpush.bf16.msra.mxu1 %v10084_v48  ;;  %v5159_v0 = vmax.f32 %v12952_v58, %v5100_v15  ;;  %7018 = vmatmul.bf16.vlgmr.msrb.gmra.mxu2 %v6820_v11  ;;  %v5160_v9 = vmax.f32 %v12954_v29, %v5101_v39 }
 0x648   :  { %6992 = vmatmul.bf16.vlgmr.msra.gmra.mxu0 %v6818_v35  ;;  %7365 = vmatpush.bf16.msra.mxu2 %v10127_v37  ;;  %v7141_v5 = vunpack.c.l.b16 %v7072_v49 }
 0x649   :  { %7333 = vmatpush.bf16.msrb.mxu0 %v10117_v60  ;;  %v7046_v2 = vrot.slane %v5159_v0, 2  ;;  %v7047_v3 = vrot.slane %v5160_v9, 2 }
 0x64a   :  { %7323 = vmatpush.bf16.msra.mxu3 %v10106_v51  ;;  %7005 = vmatmul.bf16.vlgmr.msra.gmra.mxu1 %v6819_v16  ;;  %v5176_v51 = vmax.f32 %v12953_v27, %v5113_v45  ;;  %v7153_v21 = vsel %vm5341_vm11, %v7152_v25, %v7141_v5 }
 0x64b   :  { %7346 = vmatpush.bf16.msrb.mxu1 %v10125_v40  ;;  %v7062_v26 = vmax.f32 %v5159_v0, %v7046_v2  ;;  %v7063_v42 = vmax.f32 %v5160_v9, %v7047_v3  ;;  %v7157_v17 = vpack.c.b16 %v7153_v21, %v7153_v21  ;;  %v10111_v40 = vld [vmem:[#allocation10 + $0x528] sm:$0xff] }
 0x64c   :  { %7366 = vmatpush.bf16.msra.mxu2 %v10126_v33  ;;  %v7051_v46 = vrot.slane %v5176_v51, 2 }
 0x64d   :  { %7334 = vmatpush.bf16.msrb.mxu0 %v10116_v41  ;;  %v7070_v57 = vpack.c.bf16 %v7062_v26, %v7062_v26  ;;  %v7071_v28 = vpack.c.bf16 %v7063_v42, %v7063_v42  ;;  %v10119_v41 = vld [vmem:[#allocation10 + $0x568] sm:$0xff] }
 0x64e   :  { %7324 = vmatpush.bf16.msra.mxu3 %v10105_v10  ;;  %v7066_v10 = vmax.f32 %v5175_v13, %v7050_v54  ;;  %v7067_v60 = vmax.f32 %v5176_v51, %v7051_v46 }
 0x64f   :  { %7347 = vmatpush.bf16.msrb.mxu1 %v10124_v55  ;;  %v7139_v35 = vunpack.c.l.b16 %v7070_v57  ;;  %v7140_v22 = vunpack.c.l.b16 %v7071_v28 }
 0x650   :  { %v7074_v1 = vpack.c.bf16 %v7066_v10, %v7066_v10  ;;  %v7075_v48 = vpack.c.bf16 %v7067_v60, %v7067_v60 }
 0x651   :  { %7335 = vmatpush.bf16.msrb.mxu0 %v10115_v53 }
 0x652   :  { %7325 = vmatpush.bf16.msra.mxu3 %v10104_v20  ;;  %v7143_v12 = vunpack.c.l.b16 %v7074_v1  ;;  %v7144_v63 = vunpack.c.l.b16 %v7075_v48 }
 0x653   :  { %7348 = vmatpush.bf16.msrb.mxu1 %v10123_v8 }
 0x654   :  { %v7148_v34 = vrot.slane %v7143_v12, 7  ;;  %v7150_v4 = vrot.slane %v7144_v63, 7 }
 0x655   :  { %7336 = vmatpush.bf16.msrb.mxu0 %v10114_v36 }
 0x656   :  { %7326 = vmatpush.bf16.msra.mxu3 %v10103_v6  ;;  %v7149_v23 = vsel %vm5341_vm11, %v7148_v34, %v7139_v35  ;;  %v7151_v16 = vsel %vm5341_vm11, %v7150_v4, %v7140_v22 }
 0x657   :  { %7349 = vmatpush.bf16.msrb.mxu1 %v10122_v52  ;;  %9621 = vmatmul.msk.bf16.vlgmr.msra.gmra.mxu2 %vm5515_vm12, %v7157_v17  ;;  %v7155_v15 = vpack.c.b16 %v7149_v23, %v7149_v23  ;;  %v7156_v13 = vpack.c.b16 %v7151_v16, %v7151_v16 }
 0x658   :  { %v5567_v7 = vpop.f32.mrf.mxu3 }
 0x659   :  { %7337 = vmatpush.bf16.msrb.mxu0 %v10113_v59  ;;  %v5554_v61 = vpop.f32.mrf.mxu2 }
 0x65a   :  { %7327 = vmatpush.bf16.msra.mxu3 %v10102_v38 }
 0x65b   :  { %7350 = vmatpush.bf16.msrb.mxu1 %v10121_v18 }
 0x65c   :  { %v5541_v45 = vpop.f32.mrf.mxu1 }
 0x65d   :  { %7328 = vmatmul.bf16.vlgmr.msra.gmra.mxu3 %v7154_v62  ;;  %7338 = vmatpush.bf16.msrb.mxu0 %v10112_v56  ;;  %v5528_v55 = vpop.f32.mrf.mxu0 }
 0x65e   :  { %v5542_v11 = vadd.f32 %v5541_v45, %v5528_v55 }
 0x65f   :  { %7351 = vmatpush.bf16.msrb.mxu1 %v10120_v30 }
 0x660   :  { %v5569_v20 = vpop.f32.mrf.mxu3  ;;  %v5555_v53 = vadd.f32 %v5554_v61, %v5542_v11 }
 0x661   :  { %7339 = vmatpush.bf16.msrb.mxu0 %v10111_v40  ;;  %v5556_v37 = vpop.f32.mrf.mxu2 }
 0x662   :  { %v5568_v33 = vadd.f32 %v5567_v7, %v5555_v53 }
 0x663   :  { %7352 = vmatpush.bf16.msrb.mxu1 %v10119_v41 }
 0x664   :  { %v5543_v44 = vpop.f32.mrf.mxu1 }
 0x665   :  { %7340 = vmatpush.bf16.msrb.mxu0 %v10110_v32  ;;  %v5530_v6 = vpop.f32.mrf.mxu0 }
 0x667   :  { %7353 = vmatpush.bf16.msrb.mxu1 %v10118_v43 }
 0x668   :  { %7341 = vmatmul.bf16.vlgmr.msrb.gmra.mxu0 %v7155_v15  ;;  %v5793_v47 = vpop.f32.mrf.mxu3 }
 0x669   :  { %v5780_v39 = vpop.f32.mrf.mxu2 }
 0x66a   :  { %7354 = vmatmul.bf16.vlgmr.msrb.gmra.mxu1 %v7156_v13 }
 0x66d   :  { %v5754_v58 = vpop.f32.mrf.mxu0 }
 0x66e   :  { %v5755_v0 = vadd.f32 %v5754_v58, %v5568_v33 }
 0x670   :  { %v5795_v24 = vpop.f32.mrf.mxu3 }
 0x671   :  { %v5782_v14 = vpop.f32.mrf.mxu2 }
 0x675   :  { %v5767_v51 = vpop.f32.mrf.mxu1  ;;  %v5756_v54 = vpop.f32.mrf.mxu0 }
 0x676   :  { %v5768_v31 = vadd.f32 %v5767_v51, %v5755_v0 }
 0x678   :  { %v6089_v27 = vpop.f32.mrf.mxu3  ;;  %v5781_v8 = vadd.f32 %v5780_v39, %v5768_v31 }
 0x67a   :  { %v5794_v36 = vadd.f32 %v5793_v47, %v5781_v8  ;;  %v6128_v9 = vpop.f32.mrf.mxu2 }
 0x67d   :  { %v5769_v29 = vpop.f32.mrf.mxu1  ;;  %v6102_v49 = vpop.f32.mrf.mxu0 }
 0x67e   :  { %v6103_v2 = vadd.f32 %v6102_v49, %v6089_v27  ;;  %v10311_v27 = vld [vmem:[#allocation11] ss:$0 sm:$0xff] }
 0x680   :  { %v6091_v38 = vpop.f32.mrf.mxu3 }
 0x682   :  { %v6130_v52 = vpop.f32.mrf.mxu2 }
 0x685   :  { %v6115_v19 = vpop.f32.mrf.mxu1  ;;  %v6104_v10 = vpop.f32.mrf.mxu0 }
 0x686   :  { %v6116_v46 = vadd.f32 %v6115_v19, %v6103_v2 }
 0x688   :  { %v6129_v50 = vadd.f32 %v6128_v9, %v6116_v46 }
 0x68a   :  { %v6132_v59 = vadd.f32 %v6129_v50, %v5794_v36  ;;  %v6373_v5 = vpop.f32.mrf.mxu2 }
 0x68d   :  { %v6117_v3 = vpop.f32.mrf.mxu1 }
 0x692   :  { %v6375_v25 = vpop.f32.mrf.mxu2 }
 0x695   :  { %v6412_v60 = vpop.f32.mrf.mxu1 }
 0x698   :  { %v6386_v62 = vpop.f32.mrf.mxu3 }
 0x699   :  { %v6387_v26 = vadd.f32 %v6386_v62, %v6373_v5 }
 0x69d   :  { %v6414_v7 = vpop.f32.mrf.mxu1  ;;  %v6399_v1 = vpop.f32.mrf.mxu0 }
 0x69e   :  { %v6400_v56 = vadd.f32 %v6399_v1, %v6387_v26 }
 0x6a0   :  { %v6388_v18 = vpop.f32.mrf.mxu3  ;;  %v6413_v42 = vadd.f32 %v6412_v60, %v6400_v56 }
 0x6a2   :  { %v6416_v21 = vadd.f32 %v6413_v42, %v6132_v59 }
 0x6a5   :  { %v6401_v61 = vpop.f32.mrf.mxu0 }
 0x6a7   :  { %v6709_v57 = vpop.f32.mrf.mxu1 }
 0x6aa   :  { %v6722_v48 = vpop.f32.mrf.mxu2 }
 0x6ab   :  { %v6723_v43 = vadd.f32 %v6722_v48, %v6709_v57 }
 0x6ad   :  { %v6748_v12 = vpop.f32.mrf.mxu0 }
 0x6af   :  { %v6711_v30 = vpop.f32.mrf.mxu1 }
 0x6b2   :  { %v6724_v40 = vpop.f32.mrf.mxu2 }
 0x6b5   :  { %v6750_v28 = vpop.f32.mrf.mxu0 }
 0x6b8   :  { %v6735_v17 = vpop.f32.mrf.mxu3 }
 0x6b9   :  { %v6736_v15 = vadd.f32 %v6735_v17, %v6723_v43 }
 0x6bb   :  { %v6749_v45 = vadd.f32 %v6748_v12, %v6736_v15 }
 0x6bd   :  { %v6752_v33 = vadd.f32 %v6749_v45, %v6416_v21 }
 0x6c0   :  { %v6737_v35 = vpop.f32.mrf.mxu3 }
 0x6c5   :  { %v6993_v63 = vpop.f32.mrf.mxu0 }
 0x6c7   :  { %v7006_v20 = vpop.f32.mrf.mxu1 }
 0x6c8   :  { %v7032_v41 = vpop.f32.mrf.mxu3  ;;  %v7007_v16 = vadd.f32 %v7006_v20, %v6993_v63 }
 0x6ca   :  { %v7019_v22 = vpop.f32.mrf.mxu2 }
 0x6cb   :  { %v7020_v47 = vadd.f32 %v7019_v22, %v7007_v16 }
 0x6cd   :  { %v6995_v34 = vpop.f32.mrf.mxu0  ;;  %v7033_v6 = vadd.f32 %v7032_v41, %v7020_v47 }
 0x6cf   :  { %v7008_v37 = vpop.f32.mrf.mxu1  ;;  %v7036_v58 = vadd.f32 %v7033_v6, %v6752_v33 }
 0x6d0   :  { %v7034_v32 = vpop.f32.mrf.mxu3 }
 0x6d2   :  { %v7021_v23 = vpop.f32.mrf.mxu2 }
 0x6da   :  { %v7368_v55 = vpop.f32.mrf.mxu2 }
 0x6e0   :  { %v7329_v4 = vpop.f32.mrf.mxu3 }
 0x6e2   :  { %v7370_v39 = vpop.f32.mrf.mxu2 }
 0x6e5   :  { %v7342_v11 = vpop.f32.mrf.mxu0 }
 0x6e6   :  { %v7343_v53 = vadd.f32 %v7342_v11, %v7329_v4 }
 0x6e7   :  { %v7355_v24 = vpop.f32.mrf.mxu1 }
 0x6e8   :  { %v7331_v13 = vpop.f32.mrf.mxu3  ;;  %v7356_v44 = vadd.f32 %v7355_v24, %v7343_v53 }
 0x6ea   :  { %v7369_v0 = vadd.f32 %v7368_v55, %v7356_v44 }
 0x6ec   :  { %v7372_v51 = vadd.f32 %v7369_v0, %v7036_v58 }
 0x6ed   :  { %v7344_v31 = vpop.f32.mrf.mxu0 }
 0x6ee   :  { %v7377_v8 = vadd.f32 %v10311_v27, %v7372_v51 }
 0x6ef   :  { %v7357_v14 = vpop.f32.mrf.mxu1 }
 0x6f0   :  { %7378 = vst [vmem:[#allocation13] sm:$0x3] %v7377_v8 }
 0x6f1   :  { %7389 = dma.vmem_to_hbm [thread:$0]  %s7385_s23, 32, %s7387_s26, [#allocation4]  }
 0x6f2   :  { %10488 = dma.done.wait [#allocation4], 32  }
 0x6f3   :  { %10489 = vsyncadd [#allocation4], 4294967264 }
 0x6f4   :  { %7394 = vsyncpa [#allocation3], 1 }
 0x6f5   :  { %7395 = vsyncpa [#allocation6], 1 }
 0x6f6   :  { %7396 = vsyncpa [#allocation9], 1 }
 0x6f7   :  { %7397 = vsyncpa [#allocation12], 1 }
 0x6f8   :  { %7398 = vsyncpa [#allocation4], 1 }

</bundles_post_ra>
